<compile_context>
chip_gen: v7x
topology: tpu7x:2x2x1
jax: 0.10.0
libtpu: 0.0.40
codegen_flags: <defaults>
</compile_context>

<pallas_src>
import functools

import jax
import jax.numpy as jnp
from jax import lax
from jax.experimental import pallas as pl
from jax.experimental.pallas import tpu as pltpu


# ---------------------------------------------------------------------------
# Fused forward kernel: conv+ReLU+global-avg-pool -> Attr MLP -> concat/head.
# All intermediates live in VMEM/vregs; only the padded logits hit HBM.
# ---------------------------------------------------------------------------
def _net_two_kernel(xp_ref, x2_ref,
                    conv_A_ref, conv_b_ref, pool_r_ref, pool_c_ref,
                    a0_w_ref, a0_b_ref, a1_w_ref, a1_b_ref,
                    lin_w_img_ref, lin_w_attr_ref, lin_b_ref,
                    fc1_w_ref, fc1_b_ref, fc2_w_ref, fc2_b_ref,
                    out_ref):
    f32, bf16 = jnp.float32, jnp.bfloat16
    r2 = pool_r_ref.shape[1]          # bm*(H+2) - 2 rows carrying every conv window

    # ---- image branch: 3x3 conv (stride 1, pad 1) as 3 row-tap matmuls ----------
    # xp_ref rows are (sample, padded_row); cols are (padded_col, channel) flattened.
    # conv_A[di] is structured so contracting the flattened column axis performs the
    # (dj, c) part of the 3x3 kernel; the di part is the 3 row-shifted ref slices.
    conv = None
    for di in range(3):
        y = xp_ref[di:di + r2, :].astype(bf16)                    # (r2, (W+2)*C)
        t = jnp.dot(y, conv_A_ref[di], preferred_element_type=f32)
        conv = t if conv is None else conv + t
    conv = jnp.maximum(conv + conv_b_ref[...], 0.0)               # (r2, W*c_feat)

    # ---- AdaptiveAvgPool2d(1) as two pooling matmuls on the MXU -----------------
    # pool_r picks/averages each sample's H valid rows (junk window rows get 0),
    # pool_c averages over the W column positions and collapses to c_feat features.
    x1 = jnp.dot(pool_r_ref[...], conv, preferred_element_type=f32)   # (bm, W*c_feat)
    x1 = jnp.dot(x1, pool_c_ref[...], preferred_element_type=f32)     # (bm, c_feat)

    # ---- attribute branch: Linear -> (Dropout = identity in eval) -> ReLU, twice --
    a = jnp.dot(x2_ref[...].astype(bf16), a0_w_ref[...],
                preferred_element_type=f32) + a0_b_ref[...]
    a = jnp.maximum(a, 0.0)
    a = jnp.dot(a.astype(bf16), a1_w_ref[...],
                preferred_element_type=f32) + a1_b_ref[...]
    a = jnp.maximum(a, 0.0)                                           # (bm, 512)

    # ---- head: cat([x1, a], 1) @ W  ==  x1 @ W[:c_feat] + a @ W[c_feat:] ---------
    z = (jnp.dot(x1.astype(bf16), lin_w_img_ref[...], preferred_element_type=f32)
         + jnp.dot(a.astype(bf16), lin_w_attr_ref[...], preferred_element_type=f32)
         + lin_b_ref[...])
    z = jnp.maximum(z, 0.0)                                           # (bm, 2048)
    z = jnp.dot(z.astype(bf16), fc1_w_ref[...],
                preferred_element_type=f32) + fc1_b_ref[...]
    z = jnp.maximum(z, 0.0)                                           # (bm, 1024)
    logits = jnp.dot(z.astype(bf16), fc2_w_ref[...],
                     preferred_element_type=f32) + fc2_b_ref[...]     # (bm, 128)
    out_ref[...] = logits.astype(out_ref.dtype)


# ---------------------------------------------------------------------------
# Parameter initialization (PyTorch-Linear-style uniform; weights in bf16)
# ---------------------------------------------------------------------------
def _init_linear(key, fan_in, fan_out):
    kw, kb = jax.random.split(key)
    bound = 1.0 / float(fan_in) ** 0.5
    w = jax.random.uniform(kw, (fan_in, fan_out), jnp.float32, -bound, bound)
    b = jax.random.uniform(kb, (1, fan_out), jnp.float32, -bound, bound)
    return w.astype(jnp.bfloat16), b       # bf16 weights, f32 biases


def make_params(key, c_in=4, c_feat=32, spatial=(16, 16),
                attr_filters=(40, 128, 512), num_classes=5):
    H, W = spatial
    keys = jax.random.split(key, 6)
    p = {}

    # Stand-in for model._features (external pretrained ResNeXt): 3x3 conv + ReLU.
    # TODO(synk): full pretrained ResNeXt backbone not reproduced (external model).
    kw, kb = jax.random.split(keys[0])
    bound = 1.0 / float(9 * c_in) ** 0.5
    w4 = jax.random.uniform(kw, (3, 3, c_in, c_feat), jnp.float32, -bound, bound)
    conv_b = jax.random.uniform(kb, (1, c_feat), jnp.float32, -bound, bound)
    p["conv_w4"] = w4          # f32, kept only for the pure-JAX reference check
    p["conv_b"] = conv_b
    # Structured tap matrices: A[di, (j+dj)*C + c, j*c_feat + f] = w4[di, dj, c, f]
    dj = jnp.arange(3)[:, None, None]
    jj = jnp.arange(W)[None, :, None]
    kk = jnp.arange(W + 2)[None, None, :]
    S = (kk == jj + dj).astype(jnp.float32)                        # (3, W, W+2)
    A = jnp.einsum("djk,Ddcf->Dkcjf", S, w4)                       # (3, W+2, C, W, F)
    p["conv_A"] = A.reshape(3, (W + 2) * c_in, W * c_feat).astype(jnp.bfloat16)
    p["conv_b_tiled"] = jnp.tile(conv_b, (1, W))                   # (1, W*c_feat)

    # Attr_Net: Linear(40,128) -> Dropout -> ReLU -> Linear(128,512) -> Dropout -> ReLU
    p["attr_w0"], p["attr_b0"] = _init_linear(keys[1], attr_filters[0], attr_filters[1])
    p["attr_w1"], p["attr_b1"] = _init_linear(keys[2], attr_filters[1], attr_filters[2])

    # linear_layer: Linear(c_feat + 512, 2048); rows pre-split so the kernel replaces
    # the concat with two matmuls.
    in_features = c_feat + attr_filters[-1]
    lin_w, p["lin_b"] = _init_linear(keys[3], in_features, 2048)
    p["lin_w_img"] = lin_w[:c_feat]
    p["lin_w_attr"] = lin_w[c_feat:]
    p["fc1_w"], p["fc1_b"] = _init_linear(keys[4], 2048, 1024)
    # fc2: pad output features to a lane-dense multiple of 128; wrapper slices back.
    fc2_w, fc2_b = _init_linear(keys[5], 1024, num_classes)
    n_out_pad = 128 * pl.cdiv(num_classes, 128)
    p["fc2_w"] = jnp.pad(fc2_w, ((0, 0), (0, n_out_pad - num_classes)))
    p["fc2_b"] = jnp.pad(fc2_b, ((0, 0), (0, n_out_pad - num_classes)))
    return p


# ---------------------------------------------------------------------------
# Forward pass (mirrors Net_Two.forward)
# ---------------------------------------------------------------------------
def net_two_forward(params, x1, x2, *, num_classes, bm=16):
    N, C, H, W = x1.shape
    n_pad = bm * pl.cdiv(N, bm)
    n_out_pad = params["fc2_w"].shape[1]
    c_feat = params["conv_A"].shape[2] // W

    # Layout prep: NCHW -> NHWC, zero pad batch + 1-pixel spatial ring, flatten to 2D
    # rows=(sample, padded_row), cols=(padded_col, channel).  One tiny XLA fusion
    # (~tens of KB) instead of the previous 9x im2col materialization.
    x_nhwc = jnp.transpose(x1, (0, 2, 3, 1))
    xp = jnp.pad(x_nhwc, ((0, n_pad - N), (1, 1), (1, 1), (0, 0)))
    xp2 = xp.reshape(n_pad * (H + 2), (W + 2) * C)
    x2p = jnp.pad(x2, ((0, n_pad - N), (0, 0)))

    # Pooling matrices (structural constants; the averaging runs on the MXU).
    r2 = bm * (H + 2) - 2
    rel = jnp.arange(r2)[None, :] - (H + 2) * jnp.arange(bm)[:, None]
    pool_r = jnp.where((rel >= 0) & (rel < H), 1.0 / H, 0.0).astype(jnp.float32)
    ks = jnp.arange(W * c_feat)[:, None]
    pool_c = jnp.where(ks % c_feat == jnp.arange(c_feat)[None, :],
                       1.0 / W, 0.0).astype(jnp.float32)

    args = (xp2, x2p,
            params["conv_A"], params["conv_b_tiled"], pool_r, pool_c,
            params["attr_w0"], params["attr_b0"],
            params["attr_w1"], params["attr_b1"],
            params["lin_w_img"], params["lin_w_attr"], params["lin_b"],
            params["fc1_w"], params["fc1_b"],
            params["fc2_w"], params["fc2_b"])

    def resident(a):
        nd = a.ndim
        # Constant block index across the batch grid -> weight stays resident in VMEM.
        return pl.BlockSpec(a.shape, lambda b: (0,) * nd)

    in_specs = [
        pl.BlockSpec((bm * (H + 2), (W + 2) * C), lambda b: (b, 0)),   # streamed image
        pl.BlockSpec((bm, x2p.shape[1]), lambda b: (b, 0)),            # streamed attrs
    ] + [resident(a) for a in args[2:]]

    steps = n_pad // bm

    # Advisory cost estimate (matmul flops + HBM bytes) for XLA scheduling.
    def mm(m, k, n):
        return 2 * m * k * n
    flops = steps * (
        3 * mm(r2, (W + 2) * C, W * c_feat)
        + mm(bm, r2, W * c_feat) + mm(bm, W * c_feat, c_feat)
        + mm(bm, *params["attr_w0"].shape) + mm(bm, *params["attr_w1"].shape)
        + mm(bm, *params["lin_w_img"].shape) + mm(bm, *params["lin_w_attr"].shape)
        + mm(bm, *params["fc1_w"].shape) + mm(bm, *params["fc2_w"].shape))
    bytes_accessed = (sum(int(a.size) * a.dtype.itemsize for a in args)
                      + n_pad * n_out_pad * 4)

    out = pl.pallas_call(
        _net_two_kernel,
        out_shape=jax.ShapeDtypeStruct((n_pad, n_out_pad), jnp.float32),
        grid=(steps,),
        in_specs=in_specs,
        out_specs=pl.BlockSpec((bm, n_out_pad), lambda b: (b, 0)),
        compiler_params=pltpu.CompilerParams(
            # Real batch-parallel axis: sharded across v7x's 2 TensorCores.
            dimension_semantics=("parallel",),
            # Measured footprint ~18 MiB (resident bf16 weights + streamed blocks);
            # 32 MiB leaves clear headroom even on v7x's 64 MiB physical VMEM.
            vmem_limit_bytes=32 * 1024 * 1024,
        ),
        cost_estimate=pl.CostEstimate(flops=int(flops), transcendentals=0,
                                      bytes_accessed=int(bytes_accessed)),
    )(*args)

    return out[:N, :num_classes]


# ---------------------------------------------------------------------------
# Pure-JAX f32 reference (same bf16-rounded weights) for a tolerance check
# ---------------------------------------------------------------------------
def net_two_reference(params, x1, x2, *, num_classes):
    f32 = jnp.float32
    up = lambda w: w.astype(f32)
    w4 = params["conv_w4"].astype(jnp.bfloat16).astype(f32)   # match kernel's bf16 taps
    xh = jnp.transpose(x1, (0, 2, 3, 1))
    conv = lax.conv_general_dilated(xh, w4, window_strides=(1, 1), padding="SAME",
                                    dimension_numbers=("NHWC", "HWIO", "NHWC"))
    conv = jnp.maximum(conv + params["conv_b"], 0.0)
    x1f = jnp.mean(conv, axis=(1, 2))                          # global average pool

    a = jnp.maximum(x2 @ up(params["attr_w0"]) + params["attr_b0"], 0.0)
    a = jnp.maximum(a @ up(params["attr_w1"]) + params["attr_b1"], 0.0)

    z = jnp.maximum(x1f @ up(params["lin_w_img"]) + a @ up(params["lin_w_attr"])
                    + params["lin_b"], 0.0)
    z = jnp.maximum(z @ up(params["fc1_w"]) + params["fc1_b"], 0.0)
    logits = z @ up(params["fc2_w"]) + params["fc2_b"]
    return logits[:, :num_classes]


# ---------------------------------------------------------------------------
# Main
# ---------------------------------------------------------------------------
if __name__ == "__main__":
    key = jax.random.PRNGKey(0)
    k_params, k_x1, k_x2 = jax.random.split(key, 3)

    batch, c_in, spatial = 2, 4, 16
    attr_filters = (40, 128, 512)
    num_classes = 5
    c_feat = 32  # stand-in for the backbone's classifier.in_features (2048 in the real net)

    params = make_params(k_params, c_in=c_in, c_feat=c_feat,
                         spatial=(spatial, spatial),
                         attr_filters=attr_filters, num_classes=num_classes)

    x1 = jax.random.normal(k_x1, (batch, c_in, spatial, spatial), jnp.float32)
    x2 = jax.random.normal(k_x2, (batch, attr_filters[0]), jnp.float32)

    fwd = jax.jit(functools.partial(net_two_forward, num_classes=num_classes))
    out = jax.block_until_ready(fwd(params, x1, x2))
    assert out.shape == (batch, num_classes), out.shape
    assert bool(jnp.all(jnp.isfinite(out))), "non-finite output"

    ref = net_two_reference(params, x1, x2, num_classes=num_classes)
    max_err = float(jnp.max(jnp.abs(out - ref)))
    assert bool(jnp.allclose(out, ref, rtol=5e-2, atol=5e-2)), (
        "kernel/reference mismatch: max abs err = %g" % max_err)
    print("KERNEL_OK")
</pallas_src>

<mosaic_0001>
module attributes {stable_mosaic.version = 11 : i64} {
  func.func @_net_two_kernel(%arg0: i32, %arg1: memref<288x72xf32, #tpu.memory_space<vmem>>, %arg2: memref<16x40xf32, #tpu.memory_space<vmem>>, %arg3: memref<3x72x512xbf16, #tpu.memory_space<vmem>>, %arg4: memref<1x512xf32, #tpu.memory_space<vmem>>, %arg5: memref<16x286xf32, #tpu.memory_space<vmem>>, %arg6: memref<512x32xf32, #tpu.memory_space<vmem>>, %arg7: memref<40x128xbf16, #tpu.memory_space<vmem>>, %arg8: memref<1x128xf32, #tpu.memory_space<vmem>>, %arg9: memref<128x512xbf16, #tpu.memory_space<vmem>>, %arg10: memref<1x512xf32, #tpu.memory_space<vmem>>, %arg11: memref<32x2048xbf16, #tpu.memory_space<vmem>>, %arg12: memref<512x2048xbf16, #tpu.memory_space<vmem>>, %arg13: memref<1x2048xf32, #tpu.memory_space<vmem>>, %arg14: memref<2048x1024xbf16, #tpu.memory_space<vmem>>, %arg15: memref<1x1024xf32, #tpu.memory_space<vmem>>, %arg16: memref<1024x128xbf16, #tpu.memory_space<vmem>>, %arg17: memref<1x128xf32, #tpu.memory_space<vmem>>, %arg18: memref<16x128xf32, #tpu.memory_space<vmem>>) attributes {dimension_semantics = [#tpu.dimension_semantics<parallel>], iteration_bounds = array<i64: 1>, scalar_prefetch = 0 : i64, scratch_operands = 0 : i64, tpu.core_type = #tpu.core_type<tc>, window_params = [{transform_indices = @transform_0, window_bounds = array<i64: 288, 72>}, {transform_indices = @transform_1, window_bounds = array<i64: 16, 40>}, {pipeline_mode = #tpu.pipeline_mode<synchronous>, transform_indices = @transform_2, window_bounds = array<i64: 3, 72, 512>}, {pipeline_mode = #tpu.pipeline_mode<synchronous>, transform_indices = @transform_3, window_bounds = array<i64: 1, 512>}, {pipeline_mode = #tpu.pipeline_mode<synchronous>, transform_indices = @transform_4, window_bounds = array<i64: 16, 286>}, {pipeline_mode = #tpu.pipeline_mode<synchronous>, transform_indices = @transform_5, window_bounds = array<i64: 512, 32>}, {pipeline_mode = #tpu.pipeline_mode<synchronous>, transform_indices = @transform_6, window_bounds = array<i64: 40, 128>}, {pipeline_mode = #tpu.pipeline_mode<synchronous>, transform_indices = @transform_7, window_bounds = array<i64: 1, 128>}, {pipeline_mode = #tpu.pipeline_mode<synchronous>, transform_indices = @transform_8, window_bounds = array<i64: 128, 512>}, {pipeline_mode = #tpu.pipeline_mode<synchronous>, transform_indices = @transform_9, window_bounds = array<i64: 1, 512>}, {pipeline_mode = #tpu.pipeline_mode<synchronous>, transform_indices = @transform_10, window_bounds = array<i64: 32, 2048>}, {pipeline_mode = #tpu.pipeline_mode<synchronous>, transform_indices = @transform_11, window_bounds = array<i64: 512, 2048>}, {pipeline_mode = #tpu.pipeline_mode<synchronous>, transform_indices = @transform_12, window_bounds = array<i64: 1, 2048>}, {pipeline_mode = #tpu.pipeline_mode<synchronous>, transform_indices = @transform_13, window_bounds = array<i64: 2048, 1024>}, {pipeline_mode = #tpu.pipeline_mode<synchronous>, transform_indices = @transform_14, window_bounds = array<i64: 1, 1024>}, {pipeline_mode = #tpu.pipeline_mode<synchronous>, transform_indices = @transform_15, window_bounds = array<i64: 1024, 128>}, {pipeline_mode = #tpu.pipeline_mode<synchronous>, transform_indices = @transform_16, window_bounds = array<i64: 1, 128>}, {transform_indices = @transform_17, window_bounds = array<i64: 16, 128>}]} {
    %c0 = arith.constant 0 : index
    %c0_0 = arith.constant 0 : index
    %0 = vector.load %arg1[%c0, %c0_0] : memref<288x72xf32, #tpu.memory_space<vmem>>, vector<286x72xf32>
    %1 = arith.truncf %0 : vector<286x72xf32> to vector<286x72xbf16>
    %c0_1 = arith.constant 0 : index
    %c0_2 = arith.constant 0 : index
    %c0_3 = arith.constant 0 : index
    %2 = vector.load %arg3[%c0_1, %c0_2, %c0_3] : memref<3x72x512xbf16, #tpu.memory_space<vmem>>, vector<1x72x512xbf16>
    %3 = vector.shape_cast %2 : vector<1x72x512xbf16> to vector<72x512xbf16>
    %cst = arith.constant dense<0.000000e+00> : vector<286x512xf32>
    %4 = tpu.matmul %1, %3, %cst {dimension_numbers = #tpu.dot_dimension_numbers<[1], [0], [0], [1], [0, 0, 1, 1], [], []>} : vector<286x72xbf16>, vector<72x512xbf16>, vector<286x512xf32> -> vector<286x512xf32>
    %c1 = arith.constant 1 : index
    %c0_4 = arith.constant 0 : index
    %5 = vector.load %arg1[%c1, %c0_4] : memref<288x72xf32, #tpu.memory_space<vmem>>, vector<286x72xf32>
    %6 = arith.truncf %5 : vector<286x72xf32> to vector<286x72xbf16>
    %c1_5 = arith.constant 1 : index
    %c0_6 = arith.constant 0 : index
    %c0_7 = arith.constant 0 : index
    %7 = vector.load %arg3[%c1_5, %c0_6, %c0_7] : memref<3x72x512xbf16, #tpu.memory_space<vmem>>, vector<1x72x512xbf16>
    %8 = vector.shape_cast %7 : vector<1x72x512xbf16> to vector<72x512xbf16>
    %cst_8 = arith.constant dense<0.000000e+00> : vector<286x512xf32>
    %9 = tpu.matmul %6, %8, %cst_8 {dimension_numbers = #tpu.dot_dimension_numbers<[1], [0], [0], [1], [0, 0, 1, 1], [], []>} : vector<286x72xbf16>, vector<72x512xbf16>, vector<286x512xf32> -> vector<286x512xf32>
    %10 = arith.addf %4, %9 : vector<286x512xf32>
    %c2 = arith.constant 2 : index
    %c0_9 = arith.constant 0 : index
    %11 = vector.load %arg1[%c2, %c0_9] : memref<288x72xf32, #tpu.memory_space<vmem>>, vector<286x72xf32>
    %12 = arith.truncf %11 : vector<286x72xf32> to vector<286x72xbf16>
    %c2_10 = arith.constant 2 : index
    %c0_11 = arith.constant 0 : index
    %c0_12 = arith.constant 0 : index
    %13 = vector.load %arg3[%c2_10, %c0_11, %c0_12] : memref<3x72x512xbf16, #tpu.memory_space<vmem>>, vector<1x72x512xbf16>
    %14 = vector.shape_cast %13 : vector<1x72x512xbf16> to vector<72x512xbf16>
    %cst_13 = arith.constant dense<0.000000e+00> : vector<286x512xf32>
    %15 = tpu.matmul %12, %14, %cst_13 {dimension_numbers = #tpu.dot_dimension_numbers<[1], [0], [0], [1], [0, 0, 1, 1], [], []>} : vector<286x72xbf16>, vector<72x512xbf16>, vector<286x512xf32> -> vector<286x512xf32>
    %16 = arith.addf %10, %15 : vector<286x512xf32>
    %c0_14 = arith.constant 0 : index
    %c0_15 = arith.constant 0 : index
    %17 = vector.load %arg4[%c0_14, %c0_15] : memref<1x512xf32, #tpu.memory_space<vmem>>, vector<1x512xf32>
    %18 = vector.broadcast %17 : vector<1x512xf32> to vector<286x512xf32>
    %19 = arith.addf %16, %18 : vector<286x512xf32>
    %cst_16 = arith.constant 0.000000e+00 : f32
    %20 = vector.broadcast %cst_16 : f32 to vector<286x512xf32>
    %21 = arith.maximumf %19, %20 : vector<286x512xf32>
    %c0_17 = arith.constant 0 : index
    %c0_18 = arith.constant 0 : index
    %22 = vector.load %arg5[%c0_17, %c0_18] : memref<16x286xf32, #tpu.memory_space<vmem>>, vector<16x286xf32>
    %cst_19 = arith.constant dense<0.000000e+00> : vector<16x512xf32>
    %23 = tpu.matmul %22, %21, %cst_19 {dimension_numbers = #tpu.dot_dimension_numbers<[1], [0], [0], [1], [0, 0, 1, 1], [], []>} : vector<16x286xf32>, vector<286x512xf32>, vector<16x512xf32> -> vector<16x512xf32>
    %c0_20 = arith.constant 0 : index
    %c0_21 = arith.constant 0 : index
    %24 = vector.load %arg6[%c0_20, %c0_21] : memref<512x32xf32, #tpu.memory_space<vmem>>, vector<512x32xf32>
    %cst_22 = arith.constant dense<0.000000e+00> : vector<16x32xf32>
    %25 = tpu.matmul %23, %24, %cst_22 {dimension_numbers = #tpu.dot_dimension_numbers<[1], [0], [0], [1], [0, 0, 1, 1], [], []>} : vector<16x512xf32>, vector<512x32xf32>, vector<16x32xf32> -> vector<16x32xf32>
    %c0_23 = arith.constant 0 : index
    %c0_24 = arith.constant 0 : index
    %26 = vector.load %arg2[%c0_23, %c0_24] : memref<16x40xf32, #tpu.memory_space<vmem>>, vector<16x40xf32>
    %27 = arith.truncf %26 : vector<16x40xf32> to vector<16x40xbf16>
    %c0_25 = arith.constant 0 : index
    %c0_26 = arith.constant 0 : index
    %28 = vector.load %arg7[%c0_25, %c0_26] : memref<40x128xbf16, #tpu.memory_space<vmem>>, vector<40x128xbf16>
    %cst_27 = arith.constant dense<0.000000e+00> : vector<16x128xf32>
    %29 = tpu.matmul %27, %28, %cst_27 {dimension_numbers = #tpu.dot_dimension_numbers<[1], [0], [0], [1], [0, 0, 1, 1], [], []>} : vector<16x40xbf16>, vector<40x128xbf16>, vector<16x128xf32> -> vector<16x128xf32>
    %c0_28 = arith.constant 0 : index
    %c0_29 = arith.constant 0 : index
    %30 = vector.load %arg8[%c0_28, %c0_29] : memref<1x128xf32, #tpu.memory_space<vmem>>, vector<1x128xf32>
    %31 = vector.broadcast %30 : vector<1x128xf32> to vector<16x128xf32>
    %32 = arith.addf %29, %31 : vector<16x128xf32>
    %cst_30 = arith.constant 0.000000e+00 : f32
    %33 = vector.broadcast %cst_30 : f32 to vector<16x128xf32>
    %34 = arith.maximumf %32, %33 : vector<16x128xf32>
    %35 = arith.truncf %34 : vector<16x128xf32> to vector<16x128xbf16>
    %c0_31 = arith.constant 0 : index
    %c0_32 = arith.constant 0 : index
    %36 = vector.load %arg9[%c0_31, %c0_32] : memref<128x512xbf16, #tpu.memory_space<vmem>>, vector<128x512xbf16>
    %cst_33 = arith.constant dense<0.000000e+00> : vector<16x512xf32>
    %37 = tpu.matmul %35, %36, %cst_33 {dimension_numbers = #tpu.dot_dimension_numbers<[1], [0], [0], [1], [0, 0, 1, 1], [], []>} : vector<16x128xbf16>, vector<128x512xbf16>, vector<16x512xf32> -> vector<16x512xf32>
    %c0_34 = arith.constant 0 : index
    %c0_35 = arith.constant 0 : index
    %38 = vector.load %arg10[%c0_34, %c0_35] : memref<1x512xf32, #tpu.memory_space<vmem>>, vector<1x512xf32>
    %39 = vector.broadcast %38 : vector<1x512xf32> to vector<16x512xf32>
    %40 = arith.addf %37, %39 : vector<16x512xf32>
    %cst_36 = arith.constant 0.000000e+00 : f32
    %41 = vector.broadcast %cst_36 : f32 to vector<16x512xf32>
    %42 = arith.maximumf %40, %41 : vector<16x512xf32>
    %43 = arith.truncf %25 : vector<16x32xf32> to vector<16x32xbf16>
    %c0_37 = arith.constant 0 : index
    %c0_38 = arith.constant 0 : index
    %44 = vector.load %arg11[%c0_37, %c0_38] : memref<32x2048xbf16, #tpu.memory_space<vmem>>, vector<32x2048xbf16>
    %cst_39 = arith.constant dense<0.000000e+00> : vector<16x2048xf32>
    %45 = tpu.matmul %43, %44, %cst_39 {dimension_numbers = #tpu.dot_dimension_numbers<[1], [0], [0], [1], [0, 0, 1, 1], [], []>} : vector<16x32xbf16>, vector<32x2048xbf16>, vector<16x2048xf32> -> vector<16x2048xf32>
    %46 = arith.truncf %42 : vector<16x512xf32> to vector<16x512xbf16>
    %c0_40 = arith.constant 0 : index
    %c0_41 = arith.constant 0 : index
    %47 = vector.load %arg12[%c0_40, %c0_41] : memref<512x2048xbf16, #tpu.memory_space<vmem>>, vector<512x2048xbf16>
    %cst_42 = arith.constant dense<0.000000e+00> : vector<16x2048xf32>
    %48 = tpu.matmul %46, %47, %cst_42 {dimension_numbers = #tpu.dot_dimension_numbers<[1], [0], [0], [1], [0, 0, 1, 1], [], []>} : vector<16x512xbf16>, vector<512x2048xbf16>, vector<16x2048xf32> -> vector<16x2048xf32>
    %49 = arith.addf %45, %48 : vector<16x2048xf32>
    %c0_43 = arith.constant 0 : index
    %c0_44 = arith.constant 0 : index
    %50 = vector.load %arg13[%c0_43, %c0_44] : memref<1x2048xf32, #tpu.memory_space<vmem>>, vector<1x2048xf32>
    %51 = vector.broadcast %50 : vector<1x2048xf32> to vector<16x2048xf32>
    %52 = arith.addf %49, %51 : vector<16x2048xf32>
    %cst_45 = arith.constant 0.000000e+00 : f32
    %53 = vector.broadcast %cst_45 : f32 to vector<16x2048xf32>
    %54 = arith.maximumf %52, %53 : vector<16x2048xf32>
    %55 = arith.truncf %54 : vector<16x2048xf32> to vector<16x2048xbf16>
    %c0_46 = arith.constant 0 : index
    %c0_47 = arith.constant 0 : index
    %56 = vector.load %arg14[%c0_46, %c0_47] : memref<2048x1024xbf16, #tpu.memory_space<vmem>>, vector<2048x1024xbf16>
    %cst_48 = arith.constant dense<0.000000e+00> : vector<16x1024xf32>
    %57 = tpu.matmul %55, %56, %cst_48 {dimension_numbers = #tpu.dot_dimension_numbers<[1], [0], [0], [1], [0, 0, 1, 1], [], []>} : vector<16x2048xbf16>, vector<2048x1024xbf16>, vector<16x1024xf32> -> vector<16x1024xf32>
    %c0_49 = arith.constant 0 : index
    %c0_50 = arith.constant 0 : index
    %58 = vector.load %arg15[%c0_49, %c0_50] : memref<1x1024xf32, #tpu.memory_space<vmem>>, vector<1x1024xf32>
    %59 = vector.broadcast %58 : vector<1x1024xf32> to vector<16x1024xf32>
    %60 = arith.addf %57, %59 : vector<16x1024xf32>
    %cst_51 = arith.constant 0.000000e+00 : f32
    %61 = vector.broadcast %cst_51 : f32 to vector<16x1024xf32>
    %62 = arith.maximumf %60, %61 : vector<16x1024xf32>
    %63 = arith.truncf %62 : vector<16x1024xf32> to vector<16x1024xbf16>
    %c0_52 = arith.constant 0 : index
    %c0_53 = arith.constant 0 : index
    %64 = vector.load %arg16[%c0_52, %c0_53] : memref<1024x128xbf16, #tpu.memory_space<vmem>>, vector<1024x128xbf16>
    %cst_54 = arith.constant dense<0.000000e+00> : vector<16x128xf32>
    %65 = tpu.matmul %63, %64, %cst_54 {dimension_numbers = #tpu.dot_dimension_numbers<[1], [0], [0], [1], [0, 0, 1, 1], [], []>} : vector<16x1024xbf16>, vector<1024x128xbf16>, vector<16x128xf32> -> vector<16x128xf32>
    %c0_55 = arith.constant 0 : index
    %c0_56 = arith.constant 0 : index
    %66 = vector.load %arg17[%c0_55, %c0_56] : memref<1x128xf32, #tpu.memory_space<vmem>>, vector<1x128xf32>
    %67 = vector.broadcast %66 : vector<1x128xf32> to vector<16x128xf32>
    %68 = arith.addf %65, %67 : vector<16x128xf32>
    %c0_57 = arith.constant 0 : index
    %c0_58 = arith.constant 0 : index
    %69 = vector.load %arg18[%c0_57, %c0_58] : memref<16x128xf32, #tpu.memory_space<vmem>>, vector<16x128xf32>
    tpu.vector_store %arg18[%c0_57, %c0_58], %68 {strides = array<i32>} : memref<16x128xf32, #tpu.memory_space<vmem>>, vector<16x128xf32>,
    return
  }
  func.func @transform_0(%arg0: i32) -> (i32, i32) {
    %c0_i32 = arith.constant 0 : i32
    %c0_i32_0 = arith.constant 0 : i32
    return %arg0, %c0_i32 : i32, i32
  }
  func.func @transform_1(%arg0: i32) -> (i32, i32) {
    %c0_i32 = arith.constant 0 : i32
    %c0_i32_0 = arith.constant 0 : i32
    return %arg0, %c0_i32 : i32, i32
  }
  func.func @transform_2(%arg0: i32) -> (i32, i32, i32) {
    %c0_i32 = arith.constant 0 : i32
    %c0_i32_0 = arith.constant 0 : i32
    %c0_i32_1 = arith.constant 0 : i32
    %c0_i32_2 = arith.constant 0 : i32
    return %c0_i32, %c0_i32_0, %c0_i32_1 : i32, i32, i32
  }
  func.func @transform_3(%arg0: i32) -> (i32, i32) {
    %c0_i32 = arith.constant 0 : i32
    %c0_i32_0 = arith.constant 0 : i32
    %c0_i32_1 = arith.constant 0 : i32
    return %c0_i32, %c0_i32_0 : i32, i32
  }
  func.func @transform_4(%arg0: i32) -> (i32, i32) {
    %c0_i32 = arith.constant 0 : i32
    %c0_i32_0 = arith.constant 0 : i32
    %c0_i32_1 = arith.constant 0 : i32
    return %c0_i32, %c0_i32_0 : i32, i32
  }
  func.func @transform_5(%arg0: i32) -> (i32, i32) {
    %c0_i32 = arith.constant 0 : i32
    %c0_i32_0 = arith.constant 0 : i32
    %c0_i32_1 = arith.constant 0 : i32
    return %c0_i32, %c0_i32_0 : i32, i32
  }
  func.func @transform_6(%arg0: i32) -> (i32, i32) {
    %c0_i32 = arith.constant 0 : i32
    %c0_i32_0 = arith.constant 0 : i32
    %c0_i32_1 = arith.constant 0 : i32
    return %c0_i32, %c0_i32_0 : i32, i32
  }
  func.func @transform_7(%arg0: i32) -> (i32, i32) {
    %c0_i32 = arith.constant 0 : i32
    %c0_i32_0 = arith.constant 0 : i32
    %c0_i32_1 = arith.constant 0 : i32
    return %c0_i32, %c0_i32_0 : i32, i32
  }
  func.func @transform_8(%arg0: i32) -> (i32, i32) {
    %c0_i32 = arith.constant 0 : i32
    %c0_i32_0 = arith.constant 0 : i32
    %c0_i32_1 = arith.constant 0 : i32
    return %c0_i32, %c0_i32_0 : i32, i32
  }
  func.func @transform_9(%arg0: i32) -> (i32, i32) {
    %c0_i32 = arith.constant 0 : i32
    %c0_i32_0 = arith.constant 0 : i32
    %c0_i32_1 = arith.constant 0 : i32
    return %c0_i32, %c0_i32_0 : i32, i32
  }
  func.func @transform_10(%arg0: i32) -> (i32, i32) {
    %c0_i32 = arith.constant 0 : i32
    %c0_i32_0 = arith.constant 0 : i32
    %c0_i32_1 = arith.constant 0 : i32
    return %c0_i32, %c0_i32_0 : i32, i32
  }
  func.func @transform_11(%arg0: i32) -> (i32, i32) {
    %c0_i32 = arith.constant 0 : i32
    %c0_i32_0 = arith.constant 0 : i32
    %c0_i32_1 = arith.constant 0 : i32
    return %c0_i32, %c0_i32_0 : i32, i32
  }
  func.func @transform_12(%arg0: i32) -> (i32, i32) {
    %c0_i32 = arith.constant 0 : i32
    %c0_i32_0 = arith.constant 0 : i32
    %c0_i32_1 = arith.constant 0 : i32
    return %c0_i32, %c0_i32_0 : i32, i32
  }
  func.func @transform_13(%arg0: i32) -> (i32, i32) {
    %c0_i32 = arith.constant 0 : i32
    %c0_i32_0 = arith.constant 0 : i32
    %c0_i32_1 = arith.constant 0 : i32
    return %c0_i32, %c0_i32_0 : i32, i32
  }
  func.func @transform_14(%arg0: i32) -> (i32, i32) {
    %c0_i32 = arith.constant 0 : i32
    %c0_i32_0 = arith.constant 0 : i32
    %c0_i32_1 = arith.constant 0 : i32
    return %c0_i32, %c0_i32_0 : i32, i32
  }
  func.func @transform_15(%arg0: i32) -> (i32, i32) {
    %c0_i32 = arith.constant 0 : i32
    %c0_i32_0 = arith.constant 0 : i32
    %c0_i32_1 = arith.constant 0 : i32
    return %c0_i32, %c0_i32_0 : i32, i32
  }
  func.func @transform_16(%arg0: i32) -> (i32, i32) {
    %c0_i32 = arith.constant 0 : i32
    %c0_i32_0 = arith.constant 0 : i32
    %c0_i32_1 = arith.constant 0 : i32
    return %c0_i32, %c0_i32_0 : i32, i32
  }
  func.func @transform_17(%arg0: i32) -> (i32, i32) {
    %c0_i32 = arith.constant 0 : i32
    %c0_i32_0 = arith.constant 0 : i32
    return %arg0, %c0_i32 : i32, i32
  }
}

</mosaic_0001>

<bundles_post_ra>
// kernel: net_two_forward.1
= control target key start
LH: loop header
LB: loop body
LE: loop exit
PB: predicated region body
PF: predicated region fallthrough
CT: control target
= control target key end

     0   :  { %s21235_s0 = inlined_call_operand.vmem [shape: f32[288,72], index: 0, kind: input, shape index: {}]   ;;  %s21236_s1 = inlined_call_operand.vmem [shape: f32[16,40], index: 1, kind: input, shape index: {}]   ;;  %s21237_s2 = inlined_call_operand.hbm [shape: bf16[3,72,512], index: 2, kind: input, shape index: {}]   ;;  %s21238_s3 = inlined_call_operand.hbm [shape: f32[1,512], index: 3, kind: input, shape index: {}]   ;;  %s21239_s4 = inlined_call_operand.vmem [shape: f32[16,286], index: 4, kind: input, shape index: {}]   ;;  %s21240_s5 = inlined_call_operand.vmem [shape: f32[512,32], index: 5, kind: input, shape index: {}]   ;;  %s21241_s6 = inlined_call_operand.hbm [shape: bf16[40,128], index: 6, kind: input, shape index: {}]   ;;  %s21242_s7 = inlined_call_operand.hbm [shape: f32[1,128], index: 7, kind: input, shape index: {}]   ;;  %s21243_s8 = inlined_call_operand.hbm [shape: bf16[128,512], index: 8, kind: input, shape index: {}]   ;;  %s21244_s9 = inlined_call_operand.hbm [shape: f32[1,512], index: 9, kind: input, shape index: {}]   ;;  %s21245_s10 = inlined_call_operand.hbm [shape: bf16[32,2048], index: 10, kind: input, shape index: {}]   ;;  %s21246_s11 = inlined_call_operand.hbm [shape: bf16[512,2048], index: 11, kind: input, shape index: {}]   ;;  %s21247_s12 = inlined_call_operand.hbm [shape: f32[1,2048], index: 12, kind: input, shape index: {}]   ;;  %s21248_s13 = inlined_call_operand.hbm [shape: bf16[2048,1024], index: 13, kind: input, shape index: {}]   ;;  %s21249_s14 = inlined_call_operand.hbm [shape: f32[1,1024], index: 14, kind: input, shape index: {}]   ;;  %s21250_s15 = inlined_call_operand.hbm [shape: bf16[1024,128], index: 15, kind: input, shape index: {}]   ;;  %s21251_s16 = inlined_call_operand.hbm [shape: f32[1,128], index: 16, kind: input, shape index: {}]   ;;  %s21252_s17 = inlined_call_operand.vmem [shape: f32[16,128], index: 17, kind: output, shape index: {}]  }
   0x1   :  { %21255 = sst [smem:[#allocation29_spill]] %s21235_s0 }
   0x2   :  { %21256 = sst [smem:[#allocation30_spill]] %s21236_s1 }
   0x3   :  { %22 = vsyncpa [#allocation3], 0 }
   0x4   :  { %23 = vsyncpa [#allocation5], 0 }
   0x5   :  { %24 = vsyncpa [#allocation8], 0 }
   0x6   :  { %25 = vsyncpa [#allocation11], 0 }
   0x7   :  { %26 = vsyncpa [#allocation14], 0 }
   0x8   :  { %27 = vsyncpa [#allocation17], 0 }
   0x9   :  { %28 = vsyncpa [#allocation20], 0  ;;  %s19591_s24 = smov [#allocation4]   ;;  %s19592_s26 = smov [#allocation7]  }
   0xa   :  { %s51_s25 = sshll.u32 %s19591_s24, 4  ;;  %s77_s27 = sshll.u32 %s19592_s26, 4  ;;  %s52_s25 = int_to_ptr.vmem [resolvable:$true] %s51_s25  ;;  %s78_s27 = int_to_ptr.vmem [resolvable:$true] %s77_s27 }
   0xb   :  { %s19291_s0 = scalar_lea.hbm %s21238_s3, 64 }
   0xc   :  { %p19292_p0 = scmp.ne.s32.totalorder %s21238_s3, %s19291_s0  ;;  %p19295_p1 = scmp.lt.u32.totalorder %s19291_s0, %s21238_s3 }
   0xe   :  { %p19297_p2 = pnand %p19295_p1, %p19292_p0 }
  0x10   :  { %19300 = shalt.err (!%p19297_p2)
}
  0x11   :  { %s19301_s20 = scalar_lea.vmem %s52_s25, 64  ;;  %p19306_p4 = scmp.lt.s32.totalorder %s52_s25, %s52_s25 }
  0x12   :  { %p19302_p3 = scmp.ne.s32.totalorder %s52_s25, %s19301_s20  ;;  %p19307_p5 = scmp.lt.s32.totalorder %s19301_s20, %s19301_s20 }
  0x14   :  { %p19308_p6 = por %p19307_p5, %p19306_p4 }
  0x16   :  { %p19309_p7 = pnand %p19308_p6, %p19302_p3 }
  0x18   :  { %19312 = shalt.err (!%p19309_p7)
}
  0x19   :  { %54 = dma.hbm_to_vmem [thread:$0]  %s21238_s3, 64, %s52_s25, [#allocation5]  }
  0x1a   :  { %s19313_s26 = scalar_lea.hbm %s21242_s7, 16 }
  0x1b   :  { %p19314_p8 = scmp.ne.s32.totalorder %s21242_s7, %s19313_s26  ;;  %p19317_p9 = scmp.lt.u32.totalorder %s19313_s26, %s21242_s7 }
  0x1d   :  { %p19319_p10 = pnand %p19317_p9, %p19314_p8 }
  0x1f   :  { %19322 = shalt.err (!%p19319_p10)
}
  0x20   :  { %s19323_s18 = scalar_lea.vmem %s78_s27, 16  ;;  %s19327_s19 = scalar_lea.vmem %s78_s27, 32 }
  0x21   :  { %p19324_p11 = scmp.ne.s32.totalorder %s78_s27, %s19323_s18  ;;  %p19328_p12 = scmp.lt.s32.totalorder %s78_s27, %s78_s27 }
  0x22   :  { %p19329_p13 = scmp.lt.s32.totalorder %s19327_s19, %s19323_s18 }
  0x24   :  { %p19330_p0 = por %p19329_p13, %p19328_p12 }
  0x26   :  { %p19331_p1 = pnand %p19330_p0, %p19324_p11 }
  0x28   :  { %19334 = shalt.err (!%p19331_p1)
}
  0x29   :  { %80 = dma.hbm_to_vmem [thread:$0]  %s21242_s7, 16, %s78_s27, [#allocation8]  }
  0x2a   :  { %s19593_s1 = smov [#allocation10]   ;;  %s19335_s23 = scalar_lea.hbm %s21244_s9, 64 }
  0x2b   :  { %s99_s20 = sshll.u32 %s19593_s1, 4  ;;  %p19336_p2 = scmp.ne.s32.totalorder %s21244_s9, %s19335_s23  ;;  %s100_s20 = int_to_ptr.vmem [resolvable:$true] %s99_s20 }
  0x2c   :  { %p19339_p3 = scmp.lt.u32.totalorder %s19335_s23, %s21244_s9 }
  0x2e   :  { %p19341_p4 = pnand %p19339_p3, %p19336_p2 }
  0x30   :  { %19344 = shalt.err (!%p19341_p4)
}
  0x31   :  { %s19345_s0 = scalar_lea.vmem %s100_s20, 64  ;;  %p19350_p6 = scmp.lt.s32.totalorder %s100_s20, %s100_s20 }
  0x32   :  { %p19346_p5 = scmp.ne.s32.totalorder %s100_s20, %s19345_s0  ;;  %p19351_p7 = scmp.lt.s32.totalorder %s19345_s0, %s19345_s0 }
  0x34   :  { %p19352_p8 = por %p19351_p7, %p19350_p6 }
  0x36   :  { %p19353_p9 = pnand %p19352_p8, %p19346_p5 }
  0x38   :  { %19356 = shalt.err (!%p19353_p9)
}
  0x39   :  { %102 = dma.hbm_to_vmem [thread:$0]  %s21244_s9, 64, %s100_s20, [#allocation11]  }
  0x3a   :  { %s19594_s30 = smov [#allocation13]   ;;  %s19595_s19 = smov [#allocation16]  }
  0x3b   :  { %s120_s18 = sshll.u32 %s19594_s30, 4  ;;  %s142_s3 = sshll.u32 %s19595_s19, 4  ;;  %s121_s18 = int_to_ptr.vmem [resolvable:$true] %s120_s18  ;;  %s143_s3 = int_to_ptr.vmem [resolvable:$true] %s142_s3 }
  0x3c   :  { %s19357_s21 = scalar_lea.hbm %s21246_s11, 65536 }
  0x3d   :  { %p19358_p10 = scmp.ne.s32.totalorder %s21246_s11, %s19357_s21  ;;  %p19361_p11 = scmp.lt.u32.totalorder %s19357_s21, %s21246_s11 }
  0x3f   :  { %p19363_p12 = pnand %p19361_p11, %p19358_p10 }
  0x41   :  { %19366 = shalt.err (!%p19363_p12)
}
  0x42   :  { %s19367_s9 = scalar_lea.vmem %s121_s18, 65536  ;;  %p19372_p0 = scmp.lt.s32.totalorder %s121_s18, %s121_s18 }
  0x43   :  { %p19368_p13 = scmp.ne.s32.totalorder %s121_s18, %s19367_s9  ;;  %p19373_p1 = scmp.lt.s32.totalorder %s19367_s9, %s19367_s9 }
  0x45   :  { %p19374_p2 = por %p19373_p1, %p19372_p0 }
  0x47   :  { %p19375_p3 = pnand %p19374_p2, %p19368_p13 }
  0x49   :  { %19378 = shalt.err (!%p19375_p3)
}
  0x4a   :  { %s19596_s20 = smov 1024   ;;  %s19597_s28 = smov 64  }
  0x4b   :  { %126 = dma.hbm_to_vmem [thread:$0]  %s21246_s11, 65536, %s121_s18, [#allocation14], %s19596_s20, %s19596_s20, %s19597_s28  }
  0x4c   :  { %s19379_s30 = scalar_lea.hbm %s21248_s13, 131072 }
  0x4d   :  { %p19380_p4 = scmp.ne.s32.totalorder %s21248_s13, %s19379_s30  ;;  %p19383_p5 = scmp.lt.u32.totalorder %s19379_s30, %s21248_s13 }
  0x4f   :  { %p19385_p6 = pnand %p19383_p5, %p19380_p4 }
  0x51   :  { %19388 = shalt.err (!%p19385_p6)
}
  0x52   :  { %s19389_s22 = scalar_lea.vmem %s143_s3, 131072  ;;  %p19394_p8 = scmp.lt.s32.totalorder %s143_s3, %s143_s3 }
  0x53   :  { %p19390_p7 = scmp.ne.s32.totalorder %s143_s3, %s19389_s22  ;;  %p19395_p9 = scmp.lt.s32.totalorder %s19389_s22, %s19389_s22 }
  0x55   :  { %p19396_p10 = por %p19395_p9, %p19394_p8 }
  0x57   :  { %p19397_p11 = pnand %p19396_p10, %p19390_p7 }
  0x59   :  { %19400 = shalt.err (!%p19397_p11)
}
  0x5a   :  { %s19598_s11 = smov 512   ;;  %s19599_s18 = smov 32  }
  0x5b   :  { %148 = dma.hbm_to_vmem [thread:$0]  %s21248_s13, 131072, %s143_s3, [#allocation17], %s19598_s11, %s19598_s11, %s19599_s18  }
  0x5c   :  { %s19600_s26 = smov [#allocation19]   ;;  %s19601_s29 = smov [#allocation2]  }
  0x5d   :  { %s164_s9 = sshll.u32 %s19600_s26, 4  ;;  %s38_s0 = sshll.u32 %s19601_s29, 4  ;;  %s165_s9 = int_to_ptr.vmem [resolvable:$true] %s164_s9  ;;  %s19768_s0 = int_to_ptr.vmem [resolvable:$true] %s38_s0 }
  0x5e   :  { %s19401_s30 = scalar_lea.hbm %s21250_s15, 8192 }
  0x5f   :  { %p19402_p12 = scmp.ne.s32.totalorder %s21250_s15, %s19401_s30  ;;  %p19405_p13 = scmp.lt.u32.totalorder %s19401_s30, %s21250_s15 }
  0x61   :  { %p19407_p0 = pnand %p19405_p13, %p19402_p12 }
  0x63   :  { %19410 = shalt.err (!%p19407_p0)
}
  0x64   :  { %s19411_s13 = scalar_lea.vmem %s165_s9, 8192  ;;  %p19416_p2 = scmp.lt.s32.totalorder %s165_s9, %s165_s9 }
  0x65   :  { %p19412_p1 = scmp.ne.s32.totalorder %s165_s9, %s19411_s13  ;;  %p19417_p3 = scmp.lt.s32.totalorder %s19411_s13, %s19411_s13 }
  0x67   :  { %p19418_p4 = por %p19417_p3, %p19416_p2 }
  0x69   :  { %p19419_p5 = pnand %p19418_p4, %p19412_p1 }
  0x6b   :  { %19422 = shalt.err (!%p19419_p5)
}
  0x6c   :  { %s19602_s3 = smov 4   ;;  %s19423_s24 = scalar_lea.hbm %s21237_s2, 6912 }
  0x6d   :  { %170 = dma.hbm_to_vmem [thread:$0]  %s21250_s15, 8192, %s165_s9, [#allocation20], %s19597_s28, %s19597_s28, %s19602_s3  }
  0x6e   :  { %p19424_p6 = scmp.ne.s32.totalorder %s21237_s2, %s19423_s24  ;;  %p19427_p7 = scmp.lt.u32.totalorder %s19423_s24, %s21237_s2 }
  0x70   :  { %p19429_p8 = pnand %p19427_p7, %p19424_p6 }
  0x72   :  { %19432 = shalt.err (!%p19429_p8)
}
  0x73   :  { %s19433_s30 = scalar_lea.vmem %s19768_s0, 6912  ;;  %p19438_p10 = scmp.lt.s32.totalorder %s19768_s0, %s19768_s0 }
  0x74   :  { %p19434_p9 = scmp.ne.s32.totalorder %s19768_s0, %s19433_s30  ;;  %p19439_p11 = scmp.lt.s32.totalorder %s19433_s30, %s19433_s30 }
  0x76   :  { %p19440_p12 = por %p19439_p11, %p19438_p10 }
  0x78   :  { %p19441_p13 = pnand %p19440_p12, %p19434_p9 }
  0x7a   :  { %19444 = shalt.err (!%p19441_p13)
}
  0x7b   :  { %s19603_s15 = smov 256   ;;  %s19604_s9 = smov 16  }
  0x7c   :  { %44 = dma.hbm_to_vmem [thread:$0]  %s21237_s2, 6912, %s19768_s0, [#allocation3], %s19603_s15, %s19603_s15, %s19604_s9  }
  0x7d   :  { %s19605_s1 = smov [#allocation6]   ;;  %s19606_s13 = smov [#allocation9]  }
  0x7e   :  { %s64_s21 = sshll.u32 %s19605_s1, 4  ;;  %s86_s22 = sshll.u32 %s19606_s13, 4  ;;  %s65_s21 = int_to_ptr.vmem [resolvable:$true] %s64_s21  ;;  %s19805_s22 = int_to_ptr.vmem [resolvable:$true] %s86_s22 }
  0x7f   :  { %s19445_s23 = scalar_lea.hbm %s21241_s6, 320 }
  0x80   :  { %p19446_p0 = scmp.ne.s32.totalorder %s21241_s6, %s19445_s23  ;;  %p19449_p1 = scmp.lt.u32.totalorder %s19445_s23, %s21241_s6 }
  0x82   :  { %p19451_p2 = pnand %p19449_p1, %p19446_p0 }
  0x84   :  { %19454 = shalt.err (!%p19451_p2)
}
  0x85   :  { %s19455_s2 = scalar_lea.vmem %s65_s21, 320  ;;  %p19460_p4 = scmp.lt.s32.totalorder %s65_s21, %s65_s21 }
  0x86   :  { %p19456_p3 = scmp.ne.s32.totalorder %s65_s21, %s19455_s2  ;;  %p19461_p5 = scmp.lt.s32.totalorder %s19455_s2, %s19455_s2 }
  0x88   :  { %p19462_p6 = por %p19461_p5, %p19460_p4 }
  0x8a   :  { %p19463_p7 = pnand %p19462_p6, %p19456_p3 }
  0x8c   :  { %19466 = shalt.err (!%p19463_p7)
}
  0x8d   :  { %70 = dma.hbm_to_vmem [thread:$0]  %s21241_s6, 320, %s65_s21, [#allocation5], %s19597_s28, %s19597_s28, %s19602_s3  }
  0x8e   :  { %s19467_s25 = scalar_lea.hbm %s21243_s8, 4096 }
  0x8f   :  { %p19468_p8 = scmp.ne.s32.totalorder %s21243_s8, %s19467_s25  ;;  %p19471_p9 = scmp.lt.u32.totalorder %s19467_s25, %s21243_s8 }
  0x91   :  { %p19473_p10 = pnand %p19471_p9, %p19468_p8 }
  0x93   :  { %19476 = shalt.err (!%p19473_p10)
}
  0x94   :  { %s19477_s23 = scalar_lea.vmem %s19805_s22, 4096  ;;  %p19482_p12 = scmp.lt.s32.totalorder %s19805_s22, %s19805_s22 }
  0x95   :  { %p19478_p11 = scmp.ne.s32.totalorder %s19805_s22, %s19477_s23  ;;  %p19483_p13 = scmp.lt.s32.totalorder %s19477_s23, %s19477_s23 }
  0x97   :  { %p19484_p0 = por %p19483_p13, %p19482_p12 }
  0x99   :  { %p19485_p1 = pnand %p19484_p0, %p19478_p11 }
  0x9b   :  { %19488 = shalt.err (!%p19485_p1)
}
  0x9c   :  { %92 = dma.hbm_to_vmem [thread:$0]  %s21243_s8, 4096, %s19805_s22, [#allocation8], %s19603_s15, %s19603_s15, %s19604_s9  }
  0x9d   :  { %s19607_s21 = smov [#allocation12]   ;;  %s19608_s26 = smov [#allocation15]  }
  0x9e   :  { %s108_s24 = sshll.u32 %s19607_s21, 4  ;;  %s133_s29 = sshll.u32 %s19608_s26, 4  ;;  %s109_s24 = int_to_ptr.vmem [resolvable:$true] %s108_s24  ;;  %s134_s29 = int_to_ptr.vmem [resolvable:$true] %s133_s29 }
  0x9f   :  { %s19489_s0 = scalar_lea.hbm %s21245_s10, 4096 }
  0xa0   :  { %p19490_p2 = scmp.ne.s32.totalorder %s21245_s10, %s19489_s0  ;;  %p19493_p3 = scmp.lt.u32.totalorder %s19489_s0, %s21245_s10 }
  0xa2   :  { %p19495_p4 = pnand %p19493_p3, %p19490_p2 }
  0xa4   :  { %19498 = shalt.err (!%p19495_p4)
}
  0xa5   :  { %s19499_s8 = scalar_lea.vmem %s109_s24, 4096  ;;  %p19504_p6 = scmp.lt.s32.totalorder %s109_s24, %s109_s24 }
  0xa6   :  { %p19500_p5 = scmp.ne.s32.totalorder %s109_s24, %s19499_s8  ;;  %p19505_p7 = scmp.lt.s32.totalorder %s19499_s8, %s19499_s8 }
  0xa8   :  { %p19506_p8 = por %p19505_p7, %p19504_p6 }
  0xaa   :  { %p19507_p9 = pnand %p19506_p8, %p19500_p5 }
  0xac   :  { %19510 = shalt.err (!%p19507_p9)
}
  0xad   :  { %114 = dma.hbm_to_vmem [thread:$0]  %s21245_s10, 4096, %s109_s24, [#allocation11], %s19596_s20, %s19596_s20, %s19597_s28  }
  0xae   :  { %s19511_s13 = scalar_lea.hbm %s21247_s12, 256 }
  0xaf   :  { %p19512_p10 = scmp.ne.s32.totalorder %s21247_s12, %s19511_s13  ;;  %p19515_p11 = scmp.lt.u32.totalorder %s19511_s13, %s21247_s12 }
  0xb1   :  { %p19517_p12 = pnand %p19515_p11, %p19512_p10 }
  0xb3   :  { %19520 = shalt.err (!%p19517_p12)
}
  0xb4   :  { %s19521_s3 = scalar_lea.vmem %s134_s29, 256  ;;  %p19526_p0 = scmp.lt.s32.totalorder %s134_s29, %s134_s29 }
  0xb5   :  { %p19522_p13 = scmp.ne.s32.totalorder %s134_s29, %s19521_s3  ;;  %p19527_p1 = scmp.lt.s32.totalorder %s19521_s3, %s19521_s3 }
  0xb7   :  { %p19528_p2 = por %p19527_p1, %p19526_p0 }
  0xb9   :  { %p19529_p3 = pnand %p19528_p2, %p19522_p13 }
  0xbb   :  { %19532 = shalt.err (!%p19529_p3)
}
  0xbc   :  { %136 = dma.hbm_to_vmem [thread:$0]  %s21247_s12, 256, %s134_s29, [#allocation14]  }
  0xbd   :  { %s19609_s28 = smov [#allocation18]   ;;  %s19610_s24 = smov [#allocation21]  }
  0xbe   :  { %s155_s21 = sshll.u32 %s19609_s28, 4  ;;  %s177_s26 = sshll.u32 %s19610_s24, 4  ;;  %s156_s21 = int_to_ptr.vmem [resolvable:$true] %s155_s21  ;;  %s178_s26 = int_to_ptr.vmem [resolvable:$true] %s177_s26 }
  0xbf   :  { %s19533_s0 = scalar_lea.hbm %s21249_s14, 128 }
  0xc0   :  { %p19534_p4 = scmp.ne.s32.totalorder %s21249_s14, %s19533_s0  ;;  %p19537_p5 = scmp.lt.u32.totalorder %s19533_s0, %s21249_s14 }
  0xc2   :  { %p19539_p6 = pnand %p19537_p5, %p19534_p4 }
  0xc4   :  { %19542 = shalt.err (!%p19539_p6)
}
  0xc5   :  { %s19543_s12 = scalar_lea.vmem %s156_s21, 128  ;;  %p19548_p8 = scmp.lt.s32.totalorder %s156_s21, %s156_s21 }
  0xc6   :  { %p19544_p7 = scmp.ne.s32.totalorder %s156_s21, %s19543_s12  ;;  %p19549_p9 = scmp.lt.s32.totalorder %s19543_s12, %s19543_s12 }
  0xc8   :  { %p19550_p10 = por %p19549_p9, %p19548_p8 }
  0xca   :  { %p19551_p11 = pnand %p19550_p10, %p19544_p7 }
  0xcc   :  { %19554 = shalt.err (!%p19551_p11)
}
  0xcd   :  { %158 = dma.hbm_to_vmem [thread:$0]  %s21249_s14, 128, %s156_s21, [#allocation17]  }
  0xce   :  { %s19555_s22 = scalar_lea.hbm %s21251_s16, 16 }
  0xcf   :  { %p19556_p12 = scmp.ne.s32.totalorder %s21251_s16, %s19555_s22  ;;  %p19559_p13 = scmp.lt.u32.totalorder %s19555_s22, %s21251_s16 }
  0xd1   :  { %p19561_p0 = pnand %p19559_p13, %p19556_p12 }
  0xd3   :  { %19564 = shalt.err (!%p19561_p0)
}
  0xd4   :  { %s19565_s23 = scalar_lea.vmem %s178_s26, 16  ;;  %s19569_s6 = scalar_lea.vmem %s178_s26, 32 }
  0xd5   :  { %p19566_p1 = scmp.ne.s32.totalorder %s178_s26, %s19565_s23  ;;  %p19570_p2 = scmp.lt.s32.totalorder %s178_s26, %s178_s26 }
  0xd6   :  { %p19571_p3 = scmp.lt.s32.totalorder %s19569_s6, %s19565_s23 }
  0xd8   :  { %p19572_p4 = por %p19571_p3, %p19570_p2 }
  0xda   :  { %p19573_p5 = pnand %p19572_p4, %p19566_p1 }
  0xdc   :  { %19576 = shalt.err (!%p19573_p5)
}
  0xdd   :  { %180 = dma.hbm_to_vmem [thread:$0]  %s21251_s16, 16, %s178_s26, [#allocation20]  }
  0xde   :  { %19577 = dma.done.wait [#allocation3], 6912  }
  0xdf   :  { %19578 = vsyncadd [#allocation3], 4294960384 }
  0xe0   :  { %19579 = dma.done.wait [#allocation5], 384  }
  0xe1   :  { %19580 = vsyncadd [#allocation5], 4294966912 }
  0xe2   :  { %19581 = dma.done.wait [#allocation8], 4112  }
  0xe3   :  { %19582 = vsyncadd [#allocation8], 4294963184 }
  0xe4   :  { %19583 = dma.done.wait [#allocation11], 4160  }
  0xe5   :  { %19584 = vsyncadd [#allocation11], 4294963136 }
  0xe6   :  { %19585 = dma.done.wait [#allocation14], 65792  }
  0xe7   :  { %19586 = vsyncadd [#allocation14], 4294901504 }
  0xe8   :  { %19587 = dma.done.wait [#allocation17], 131200  }
  0xe9   :  { %19588 = vsyncadd [#allocation17], 4294836096 }
  0xea   :  { %19589 = dma.done.wait [#allocation20], 8208  }
  0xeb   :  { %19590 = vsyncadd [#allocation20], 4294959088  ;;  %v19611_v0 = vmov 0   ;;  %v19091_v1 = vld [vmem:[#allocation2 + $0x94] ss:$16 sps:$4 sm:$0xff]   ;;  %v365_v16 = vld [vmem:[#allocation2 + $0x118] sm:$0xff] }
  0xec   :  { %556 = vmatprep.mubr.bf16.mxu0 %v19611_v0  ;;  %769 = vmatprep.mubr.bf16.mxu1 %v19611_v0  ;;  %v19093_v2 = vld [vmem:[#allocation2 + $0x9c] ss:$16 sps:$4 sm:$0xff]   ;;  %v19095_v3 = vld [vmem:[#allocation2 + $0x90] ss:$16 sps:$4 sm:$0xff]   ;;  %v19096_v4 = vld [vmem:[#allocation2 + $0x98] ss:$16 sps:$4 sm:$0xff]   ;;  %v16348_v20 = vcombine.high %v365_v16, %v365_v16  ;;  %v16347_v22 = vcombine.low %v365_v16, %v365_v16 }
  0xed   :  { %524 = vmatprep.subr.bf16.mxu0 %v19091_v1  ;;  %737 = vmatprep.subr.bf16.mxu1 %v19093_v2  ;;  %v19097_v5 = vld [vmem:[#allocation2 + $0xb4] ss:$16 sps:$4 sm:$0xff]   ;;  %v19099_v6 = vld [vmem:[#allocation2 + $0xbc] ss:$16 sps:$4 sm:$0xff]   ;;  %v19101_v7 = vld [vmem:[#allocation2 + $0xb0] ss:$16 sps:$4 sm:$0xff]  }
  0xee   :  { %525 = vmatpush1.bf16.msra.mxu0 %v19095_v3  ;;  %738 = vmatpush1.bf16.msra.mxu1 %v19096_v4  ;;  %v19102_v8 = vld [vmem:[#allocation2 + $0xb8] ss:$16 sps:$4 sm:$0xff]   ;;  %v19103_v9 = vld [vmem:[#allocation2 + $0xd4] ss:$16 sps:$4 sm:$0xff]   ;;  %v19105_v10 = vld [vmem:[#allocation2 + $0xdc] ss:$16 sps:$4 sm:$0xff]  }
  0xef   :  { %526 = vmatprep.subr.bf16.mxu0 %v19097_v5  ;;  %739 = vmatprep.subr.bf16.mxu1 %v19099_v6  ;;  %v19107_v11 = vld [vmem:[#allocation2 + $0xd0] ss:$16 sps:$4 sm:$0xff]   ;;  %v19108_v12 = vld [vmem:[#allocation2 + $0xd8] ss:$16 sps:$4 sm:$0xff]   ;;  %v19109_v13 = vld [vmem:[#allocation2 + $0xf4] ss:$16 sps:$4 sm:$0xff]  }
  0xf0   :  { %v19111_v14 = vld [vmem:[#allocation2 + $0xfc] ss:$16 sps:$4 sm:$0xff]   ;;  %v364_v15 = vld [vmem:[#allocation2 + $0x110] sm:$0xff]  ;;  %v19114_v18 = vld [vmem:[#allocation2 + $0xf8] ss:$16 sps:$4 sm:$0xff]   ;;  %vm511_vm0 = vcmask 1043456  }
  0xf1   :  { %v19113_v17 = vld [vmem:[#allocation2 + $0xf0] ss:$16 sps:$4 sm:$0xff]   ;;  %v16346_v19 = vcombine.high %v364_v15, %v364_v15  ;;  %v16345_v21 = vcombine.low %v364_v15, %v364_v15  ;;  %s21257_s20 = sld [smem:[#allocation29_spill]]  ;;  %v519_v26 = vsel %vm511_vm0, %v16347_v22, 0  ;;  %v19121_v27 = vld [vmem:[#allocation2 + $0x4] ss:$16 sps:$4 sm:$0xff]  }
  0xf2   :  { %527 = vmatpush1.bf16.msra.mxu0 %v19101_v7  ;;  %740 = vmatpush1.bf16.msra.mxu1 %v19102_v8  ;;  %vm456_vm1 = vcmask 588800   ;;  %v19119_v29 = vld [vmem:[#allocation2] ss:$16 sps:$4 sm:$0xff]   ;;  %v19124_v30 = vld [vmem:[#allocation2 + $0x24] ss:$16 sps:$4 sm:$0xff]   ;;  %v292_v52 = vld [vmem:[#allocation2 + $0x88] sm:$0xff] }
  0xf3   :  { %528 = vmatprep.subr.bf16.mxu0 %v19103_v9  ;;  %741 = vmatprep.subr.bf16.mxu1 %v19105_v10  ;;  %v513_v25 = vsel %vm511_vm0, %v16345_v21, 0  ;;  %v19122_v33 = vld [vmem:[#allocation2 + $0x20] ss:$16 sps:$4 sm:$0xff]   ;;  %v19127_v34 = vld [vmem:[#allocation2 + $0x44] ss:$16 sps:$4 sm:$0xff]   ;;  %v16406_v57 = vcombine.high %v292_v52, %v292_v52  ;;  %v16405_v58 = vcombine.low %v292_v52, %v292_v52  ;;  %vm2654_vm2 = vcmask 1045504  }
  0xf4   :  { %v19133_v36 = vld [vmem:[#allocation2 + $0xc] ss:$16 sps:$4 sm:$0xff]   ;;  %v19125_v37 = vld [vmem:[#allocation2 + $0x40] ss:$16 sps:$4 sm:$0xff]   ;;  %v19131_v38 = vld [vmem:[#allocation2 + $0x8] ss:$16 sps:$4 sm:$0xff]  }
  0xf5   :  { %v19130_v39 = vld [vmem:[#allocation2 + $0x64] ss:$16 sps:$4 sm:$0xff]   ;;  %v19137_v40 = vld [vmem:[#allocation2 + $0x2c] ss:$16 sps:$4 sm:$0xff]   ;;  %v19128_v44 = vld [vmem:[#allocation2 + $0x60] ss:$16 sps:$4 sm:$0xff]  }
  0xf6   :  { %529 = vmatpush1.bf16.msra.mxu0 %v19107_v11  ;;  %742 = vmatpush1.bf16.msra.mxu1 %v19108_v12  ;;  %v291_v41 = vld [vmem:[#allocation2 + $0x80] sm:$0xff]  ;;  %v19135_v45 = vld [vmem:[#allocation2 + $0x28] ss:$16 sps:$4 sm:$0xff]   ;;  %v19141_v48 = vld [vmem:[#allocation2 + $0x4c] ss:$16 sps:$4 sm:$0xff]   ;;  %v1101_v60 = vsel %vm511_vm0, %v16405_v58, 0 }
  0xf7   :  { %530 = vmatprep.subr.bf16.mxu0 %v19109_v13  ;;  %743 = vmatprep.subr.bf16.mxu1 %v19111_v14  ;;  %v293_v23 = vld [vmem:[%s21257_s20 + $0x1] sm:$0xff]  ;;  %v294_v24 = vld [vmem:[%s21257_s20 + $0x9] sm:$0xff]  ;;  %v295_v31 = vld [vmem:[%s21257_s20 + $0x11] sm:$0xff]  ;;  %v16404_v46 = vcombine.high %v291_v41, %v291_v41  ;;  %v16403_v47 = vcombine.low %v291_v41, %v291_v41  ;;  %vm19613_vm3 = vmmov 1   ;;  %vm2647_vm5 = vcmask 244736   ;;  %s21260_s14 = sld [smem:[#allocation30_spill]] }
  0xf8   :  { %v329_v28 = vpack.c.bf16 %v294_v24, %v293_v23  ;;  %v296_v32 = vld [vmem:[%s21257_s20 + $0x19] sm:$0xff]  ;;  %v297_v42 = vld [vmem:[%s21257_s20 + $0x21] sm:$0xff]  ;;  %v298_v43 = vld [vmem:[%s21257_s20 + $0x29] sm:$0xff]  ;;  %vm19614_vm6 = vmmov 0   ;;  %vm3219_vm7 = vcmask 326656   ;;  %vm7535_vm8 = vcmask 261120  }
  0xf9   :  { %v330_v35 = vpack.c.bf16 %v296_v32, %v295_v31  ;;  %v331_v49 = vpack.c.bf16 %v298_v43, %v297_v42  ;;  %v19139_v50 = vld [vmem:[#allocation2 + $0x48] ss:$16 sps:$4 sm:$0xff]   ;;  %v19144_v51 = vld [vmem:[#allocation2 + $0x6c] ss:$16 sps:$4 sm:$0xff]   ;;  %v1095_v54 = vsel %vm511_vm0, %v16403_v47, 0  ;;  %v221_v42 = vld [vmem:[%s21257_s20] sm:$0xff] }
  0xfa   :  { %531 = vmatpush1.bf16.msra.mxu0 %v19113_v17  ;;  %744 = vmatpush1.bf16.msra.mxu1 %v19114_v18  ;;  %v299_v53 = vld [vmem:[%s21257_s20 + $0x31] sm:$0xff]  ;;  %v300_v55 = vld [vmem:[%s21257_s20 + $0x39] sm:$0xff]  ;;  %v301_v62 = vld [vmem:[%s21257_s20 + $0x41] sm:$0xff] }
  0xfb   :  { %16349 = vmatprep.subr.msk.bf16.mxu0 %vm511_vm0, %v16346_v19  ;;  %16368 = vmatprep.subr.msk.bf16.mxu1 %vm511_vm0, %v16348_v20  ;;  %v19142_v56 = vld [vmem:[#allocation2 + $0x68] ss:$16 sps:$4 sm:$0xff]   ;;  %v332_v59 = vpack.c.bf16 %v300_v55, %v299_v53  ;;  %v19149_v61 = vld [vmem:[#allocation2 + $0x124] ss:$16 sps:$4 sm:$0xff]   ;;  %v19161_v41 = vld [vmem:[#allocation2 + $0x12c] ss:$16 sps:$4 sm:$0xff]  }
  0xfc   :  { %v302_v63 = vld [vmem:[%s21257_s20 + $0x49] sm:$0xff]  ;;  %v303_v2 = vld [vmem:[%s21257_s20 + $0x51] sm:$0xff]  ;;  %v304_v3 = vld [vmem:[%s21257_s20 + $0x59] sm:$0xff] }
  0xfd   :  { %v333_v1 = vpack.c.bf16 %v302_v63, %v301_v62  ;;  %v334_v4 = vpack.c.bf16 %v304_v3, %v303_v2  ;;  %v305_v5 = vld [vmem:[%s21257_s20 + $0x61] sm:$0xff]  ;;  %v306_v6 = vld [vmem:[%s21257_s20 + $0x69] sm:$0xff]  ;;  %v307_v8 = vld [vmem:[%s21257_s20 + $0x71] sm:$0xff] }
  0xfe   :  { %533 = vmatpush1.bf16.msra.mxu0 %v513_v25  ;;  %746 = vmatpush1.bf16.msra.mxu1 %v519_v26  ;;  %v335_v7 = vpack.c.bf16 %v306_v6, %v305_v5  ;;  %v308_v9 = vld [vmem:[%s21257_s20 + $0x79] sm:$0xff]  ;;  %v309_v11 = vld [vmem:[%s21257_s20 + $0x81] sm:$0xff]  ;;  %v310_v12 = vld [vmem:[%s21257_s20 + $0x89] sm:$0xff] }
  0xff   :  { %1106 = vmatprep.subr.bf16.mxu0 %v19121_v27  ;;  %1319 = vmatprep.subr.bf16.mxu1 %v19133_v36  ;;  %v336_v10 = vpack.c.bf16 %v308_v9, %v307_v8  ;;  %v337_v13 = vpack.c.bf16 %v310_v12, %v309_v11  ;;  %v311_v14 = vld [vmem:[%s21257_s20 + $0x91] sm:$0xff]  ;;  %v312_v15 = vld [vmem:[%s21257_s20 + $0x99] sm:$0xff]  ;;  %v313_v17 = vld [vmem:[%s21257_s20 + $0xa1] sm:$0xff] }
 0x100   :  { %v338_v16 = vpack.c.bf16 %v312_v15, %v311_v14  ;;  %v314_v18 = vld [vmem:[%s21257_s20 + $0xa9] sm:$0xff]  ;;  %v315_v20 = vld [vmem:[%s21257_s20 + $0xb1] sm:$0xff]  ;;  %v316_v21 = vld [vmem:[%s21257_s20 + $0xb9] sm:$0xff] }
 0x101   :  { %16350 = vmatmul.mubr.msk.bf16.vlgmr.msra.gmra.mrb[0].mxu0 %vm456_vm1, %v329_v28  ;;  %16369 = vmatmul.mubr.msk.bf16.vlgmr.msra.gmra.mrb[0].mxu1 %vm456_vm1, %v329_v28  ;;  %v339_v19 = vpack.c.bf16 %v314_v18, %v313_v17  ;;  %v340_v22 = vpack.c.bf16 %v316_v21, %v315_v20  ;;  %v317_v23 = vld [vmem:[%s21257_s20 + $0xc1] sm:$0xff]  ;;  %v318_v24 = vld [vmem:[%s21257_s20 + $0xc9] sm:$0xff]  ;;  %v319_v26 = vld [vmem:[%s21257_s20 + $0xd1] sm:$0xff] }
 0x102   :  { %566 = vmatprep.mubr.bf16.mxu0 %v19611_v0  ;;  %779 = vmatprep.mubr.bf16.mxu1 %v19611_v0  ;;  %v341_v25 = vpack.c.bf16 %v318_v24, %v317_v23  ;;  %v320_v27 = vld [vmem:[%s21257_s20 + $0xd9] sm:$0xff]  ;;  %v323_v32 = vld [vmem:[%s21257_s20 + $0xf1] sm:$0xff]  ;;  %v326_v36 = vld [vmem:[%s21257_s20 + $0x109] sm:$0xff] }
 0x103   :  { %1107 = vmatpush1.bf16.msra.mxu0 %v19119_v29  ;;  %1320 = vmatpush1.bf16.msra.mxu1 %v19131_v38  ;;  %v342_v28 = vpack.c.bf16 %v320_v27, %v319_v26  ;;  %v321_v29 = vld [vmem:[%s21257_s20 + $0xe1] sm:$0xff]  ;;  %v327_v38 = vld [vmem:[%s21257_s20 + $0x111] sm:$0xff]  ;;  %vm20642_vm4 = vmpackc.low %vm2654_vm2, %vm19613_vm3 }
 0x104   :  { %1108 = vmatprep.subr.bf16.mxu0 %v19124_v30  ;;  %1321 = vmatprep.subr.bf16.mxu1 %v19137_v40  ;;  %v322_v30 = vld [vmem:[%s21257_s20 + $0xe9] sm:$0xff]  ;;  %v19152_v47 = vld [vmem:[#allocation2 + $0x144] ss:$16 sps:$4 sm:$0xff]   ;;  %v228_v11 = vld [vmem:[%s21257_s20 + $0x38] sm:$0xff] }
 0x105   :  { %v343_v31 = vpack.c.bf16 %v322_v30, %v321_v29  ;;  %v222_v43 = vld [vmem:[%s21257_s20 + $0x8] sm:$0xff]  ;;  %v19155_v53 = vld [vmem:[#allocation2 + $0x164] ss:$16 sps:$4 sm:$0xff]   ;;  %v232_v17 = vld [vmem:[%s21257_s20 + $0x58] sm:$0xff] }
 0x106   :  { %v19163_v52 = vld [vmem:[#allocation2 + $0x148] ss:$16 sps:$4 sm:$0xff]   ;;  %v19158_v58 = vld [vmem:[#allocation2 + $0x184] ss:$16 sps:$4 sm:$0xff]  }
 0x107   :  { %1109 = vmatpush1.bf16.msra.mxu0 %v19122_v33  ;;  %1322 = vmatpush1.bf16.msra.mxu1 %v19135_v45  ;;  %v324_v33 = vld [vmem:[%s21257_s20 + $0xf9] sm:$0xff]  ;;  %v226_v63 = vld [vmem:[%s21257_s20 + $0x28] sm:$0xff] }
 0x108   :  { %1110 = vmatprep.subr.bf16.mxu0 %v19127_v34  ;;  %1323 = vmatprep.subr.bf16.mxu1 %v19141_v48  ;;  %v344_v34 = vpack.c.bf16 %v324_v33, %v323_v32  ;;  %v19147_v45 = vld [vmem:[#allocation2 + $0x120] ss:$16 sps:$4 sm:$0xff]   ;;  %v19165_v48 = vld [vmem:[#allocation2 + $0x14c] ss:$16 sps:$4 sm:$0xff]   ;;  %v19170_v3 = vld [vmem:[#allocation2 + $0x188] ss:$16 sps:$4 sm:$0xff]  }
 0x109   :  { %16351 = vmatmul.mubr.msk.bf16.gmra.mrb[4].mxu0 %vm456_vm1, %v330_v35  ;;  %16370 = vmatmul.mubr.msk.bf16.gmra.mrb[4].mxu1 %vm456_vm1, %v330_v35  ;;  %v325_v35 = vld [vmem:[%s21257_s20 + $0x101] sm:$0xff]  ;;  %v236_v23 = vld [vmem:[%s21257_s20 + $0x78] sm:$0xff] }
 0x10a   :  { %576 = vmatprep.mubr.bf16.mxu0 %v19611_v0  ;;  %789 = vmatprep.mubr.bf16.mxu1 %v19611_v0  ;;  %v225_v62 = vld [vmem:[%s21257_s20 + $0x20] sm:$0xff]  ;;  %v230_v14 = vld [vmem:[%s21257_s20 + $0x48] sm:$0xff]  ;;  %v240_v29 = vld [vmem:[%s21257_s20 + $0x98] sm:$0xff] }
 0x10b   :  { %1111 = vmatpush1.bf16.msra.mxu0 %v19125_v37  ;;  %1324 = vmatpush1.bf16.msra.mxu1 %v19139_v50  ;;  %v345_v37 = vpack.c.bf16 %v326_v36, %v325_v35  ;;  %v224_v50 = vld [vmem:[%s21257_s20 + $0x18] sm:$0xff]  ;;  %v234_v20 = vld [vmem:[%s21257_s20 + $0x68] sm:$0xff] }
 0x10c   :  { %1112 = vmatprep.subr.bf16.mxu0 %v19130_v39  ;;  %1325 = vmatprep.subr.bf16.mxu1 %v19144_v51  ;;  %v328_v39 = vld [vmem:[%s21257_s20 + $0x119] sm:$0x3f]  ;;  %v19150_v51 = vld [vmem:[#allocation2 + $0x140] ss:$16 sps:$4 sm:$0xff]   ;;  %v238_v26 = vld [vmem:[%s21257_s20 + $0x88] sm:$0xff] }
 0x10d   :  { %v346_v40 = vpack.c.bf16 %v328_v39, %v327_v38  ;;  %v242_v32 = vld [vmem:[%s21257_s20 + $0xa8] sm:$0xff]  ;;  %v244_v35 = vld [vmem:[%s21257_s20 + $0xb8] sm:$0xff] }
 0x10e   :  { %v246_v38 = vld [vmem:[%s21257_s20 + $0xc8] sm:$0xff] }
 0x10f   :  { %1113 = vmatpush1.bf16.msra.mxu0 %v19128_v44  ;;  %1326 = vmatpush1.bf16.msra.mxu1 %v19142_v56  ;;  %v257_v44 = vpack.c.bf16 %v222_v43, %v221_v42  ;;  %v19153_v56 = vld [vmem:[#allocation2 + $0x160] ss:$16 sps:$4 sm:$0xff]  }
 0x110   :  { %16407 = vmatprep.subr.msk.bf16.mxu0 %vm511_vm0, %v16404_v46  ;;  %16426 = vmatprep.subr.msk.bf16.mxu1 %vm511_vm0, %v16406_v57  ;;  %v19159_v46 = vld [vmem:[#allocation2 + $0x128] ss:$16 sps:$4 sm:$0xff]   ;;  %v249_v43 = vld [vmem:[%s21257_s20 + $0xe0] sm:$0xff] }
 0x111   :  { %16352 = vmatmul.mubr.msk.bf16.gmra.mrb[8].mxu0 %vm456_vm1, %v331_v49  ;;  %16371 = vmatmul.mubr.msk.bf16.gmra.mrb[8].mxu1 %vm456_vm1, %v331_v49  ;;  %v223_v49 = vld [vmem:[%s21257_s20 + $0x10] sm:$0xff]  ;;  %v19167_v57 = vld [vmem:[#allocation2 + $0x168] ss:$16 sps:$4 sm:$0xff]  }
 0x112   :  { %586 = vmatprep.mubr.bf16.mxu0 %v19611_v0  ;;  %799 = vmatprep.mubr.bf16.mxu1 %v19611_v0  ;;  %v258_v55 = vpack.c.bf16 %v224_v50, %v223_v49  ;;  %v253_v49 = vld [vmem:[%s21257_s20 + $0x100] sm:$0xff]  ;;  %v254_v50 = vld [vmem:[%s21257_s20 + $0x108] sm:$0xff] }
 0x113   :  { %1115 = vmatpush1.bf16.msra.mxu0 %v1095_v54  ;;  %1328 = vmatpush1.bf16.msra.mxu1 %v1101_v60  ;;  %v19169_v54 = vld [vmem:[#allocation2 + $0x16c] ss:$16 sps:$4 sm:$0xff]  }
 0x114   :  { %1761 = vmatprep.subr.bf16.mxu0 %v19149_v61  ;;  %1974 = vmatprep.subr.bf16.mxu1 %v19161_v41  ;;  %v19172_v60 = vld [vmem:[#allocation2 + $0x18c] ss:$16 sps:$4 sm:$0xff]  }
 0x115   :  { %v1604_v61 = vld [vmem:[#allocation2 + $0x1a8] sm:$0xff]  ;;  %v248_v41 = vld [vmem:[%s21257_s20 + $0xd8] sm:$0xff] }
 0x116   :  { %v16464_v5 = vcombine.high %v1604_v61, %v1604_v61  ;;  %v16463_v6 = vcombine.low %v1604_v61, %v1604_v61  ;;  %v1536_v61 = vld [vmem:[%s21257_s20 + $0x22] sm:$0xff] }
 0x118   :  { %v1756_v9 = vsel %vm511_vm0, %v16463_v6, 0 }
 0x119   :  { %16353 = vmatmul.mubr.msk.bf16.gmra.mrb[12].mxu0 %vm456_vm1, %v332_v59  ;;  %16372 = vmatmul.mubr.msk.bf16.gmra.mrb[12].mxu1 %vm456_vm1, %v332_v59  ;;  %v1603_v59 = vld [vmem:[#allocation2 + $0x1a0] sm:$0xff] }
 0x11a   :  { %596 = vmatprep.mubr.bf16.mxu0 %v19611_v0  ;;  %809 = vmatprep.mubr.bf16.mxu1 %v19611_v0  ;;  %v16462_v2 = vcombine.high %v1603_v59, %v1603_v59 }
 0x121   :  { %16354 = vmatmul.mubr.msk.bf16.gmra.mrb[16].mxu0 %vm456_vm1, %v333_v1  ;;  %16373 = vmatmul.mubr.msk.bf16.gmra.mrb[16].mxu1 %vm456_vm1, %v333_v1  ;;  %v19156_v1 = vld [vmem:[#allocation2 + $0x180] ss:$16 sps:$4 sm:$0xff]  }
 0x122   :  { %606 = vmatprep.mubr.bf16.mxu0 %v19611_v0  ;;  %819 = vmatprep.mubr.bf16.mxu1 %v19611_v0 }
 0x129   :  { %16355 = vmatmul.mubr.msk.bf16.gmra.mrb[20].mxu0 %vm456_vm1, %v334_v4  ;;  %16374 = vmatmul.mubr.msk.bf16.gmra.mrb[20].mxu1 %vm456_vm1, %v334_v4  ;;  %v16461_v4 = vcombine.low %v1603_v59, %v1603_v59  ;;  %v1535_v59 = vld [vmem:[%s21257_s20 + $0x1a] sm:$0xff] }
 0x12a   :  { %616 = vmatprep.mubr.bf16.mxu0 %v19611_v0  ;;  %829 = vmatprep.mubr.bf16.mxu1 %v19611_v0 }
 0x12b   :  { %v1750_v8 = vsel %vm511_vm0, %v16461_v4, 0  ;;  %v1540_v4 = vld [vmem:[%s21257_s20 + $0x42] sm:$0xff] }
 0x131   :  { %16356 = vmatmul.mubr.msk.bf16.gmra.mrb[24].mxu0 %vm456_vm1, %v335_v7  ;;  %16375 = vmatmul.mubr.msk.bf16.gmra.mrb[24].mxu1 %vm456_vm1, %v335_v7  ;;  %v259_v7 = vpack.c.bf16 %v226_v63, %v225_v62  ;;  %v1537_v62 = vld [vmem:[%s21257_s20 + $0x2a] sm:$0xff] }
 0x132   :  { %626 = vmatprep.mubr.bf16.mxu0 %v19611_v0  ;;  %839 = vmatprep.mubr.bf16.mxu1 %v19611_v0  ;;  %v1570_v63 = vpack.c.bf16 %v1537_v62, %v1536_v61 }
 0x139   :  { %16357 = vmatmul.mubr.msk.bf16.gmra.mrb[28].mxu0 %vm456_vm1, %v336_v10  ;;  %16376 = vmatmul.mubr.msk.bf16.gmra.mrb[28].mxu1 %vm456_vm1, %v336_v10  ;;  %v227_v10 = vld [vmem:[%s21257_s20 + $0x30] sm:$0xff] }
 0x13a   :  { %636 = vmatprep.mubr.bf16.mxu0 %v19611_v0  ;;  %849 = vmatprep.mubr.bf16.mxu1 %v19611_v0  ;;  %v260_v12 = vpack.c.bf16 %v228_v11, %v227_v10  ;;  %v1544_v10 = vld [vmem:[%s21257_s20 + $0x62] sm:$0xff]  ;;  %v1545_v11 = vld [vmem:[%s21257_s20 + $0x6a] sm:$0xff] }
 0x141   :  { %16358 = vmatmul.mubr.msk.bf16.gmra.mrb[32].mxu0 %vm456_vm1, %v337_v13  ;;  %16377 = vmatmul.mubr.msk.bf16.gmra.mrb[32].mxu1 %vm456_vm1, %v337_v13  ;;  %v229_v13 = vld [vmem:[%s21257_s20 + $0x40] sm:$0xff] }
 0x142   :  { %646 = vmatprep.mubr.bf16.mxu0 %v19611_v0  ;;  %859 = vmatprep.mubr.bf16.mxu1 %v19611_v0  ;;  %v261_v15 = vpack.c.bf16 %v230_v14, %v229_v13  ;;  %v1546_v13 = vld [vmem:[%s21257_s20 + $0x72] sm:$0xff]  ;;  %v1547_v14 = vld [vmem:[%s21257_s20 + $0x7a] sm:$0xff] }
 0x149   :  { %16359 = vmatmul.mubr.msk.bf16.gmra.mrb[36].mxu0 %vm456_vm1, %v338_v16  ;;  %16378 = vmatmul.mubr.msk.bf16.gmra.mrb[36].mxu1 %vm456_vm1, %v338_v16  ;;  %v231_v16 = vld [vmem:[%s21257_s20 + $0x50] sm:$0xff] }
 0x14a   :  { %656 = vmatprep.mubr.bf16.mxu0 %v19611_v0  ;;  %869 = vmatprep.mubr.bf16.mxu1 %v19611_v0  ;;  %v262_v18 = vpack.c.bf16 %v232_v17, %v231_v16  ;;  %v1548_v16 = vld [vmem:[%s21257_s20 + $0x82] sm:$0xff]  ;;  %v1549_v17 = vld [vmem:[%s21257_s20 + $0x8a] sm:$0xff] }
 0x151   :  { %16360 = vmatmul.mubr.msk.bf16.gmra.mrb[40].mxu0 %vm456_vm1, %v339_v19  ;;  %16379 = vmatmul.mubr.msk.bf16.gmra.mrb[40].mxu1 %vm456_vm1, %v339_v19  ;;  %v233_v19 = vld [vmem:[%s21257_s20 + $0x60] sm:$0xff] }
 0x152   :  { %666 = vmatprep.mubr.bf16.mxu0 %v19611_v0  ;;  %879 = vmatprep.mubr.bf16.mxu1 %v19611_v0  ;;  %v263_v21 = vpack.c.bf16 %v234_v20, %v233_v19  ;;  %v1550_v19 = vld [vmem:[%s21257_s20 + $0x92] sm:$0xff]  ;;  %v1551_v20 = vld [vmem:[%s21257_s20 + $0x9a] sm:$0xff] }
 0x159   :  { %16361 = vmatmul.mubr.msk.bf16.gmra.mrb[44].mxu0 %vm456_vm1, %v340_v22  ;;  %16380 = vmatmul.mubr.msk.bf16.gmra.mrb[44].mxu1 %vm456_vm1, %v340_v22  ;;  %v235_v22 = vld [vmem:[%s21257_s20 + $0x70] sm:$0xff] }
 0x15a   :  { %676 = vmatprep.mubr.bf16.mxu0 %v19611_v0  ;;  %889 = vmatprep.mubr.bf16.mxu1 %v19611_v0  ;;  %v264_v24 = vpack.c.bf16 %v236_v23, %v235_v22  ;;  %v1552_v22 = vld [vmem:[%s21257_s20 + $0xa2] sm:$0xff]  ;;  %v1553_v23 = vld [vmem:[%s21257_s20 + $0xaa] sm:$0xff] }
 0x161   :  { %16362 = vmatmul.mubr.msk.bf16.gmra.mrb[48].mxu0 %vm456_vm1, %v341_v25  ;;  %16381 = vmatmul.mubr.msk.bf16.gmra.mrb[48].mxu1 %vm456_vm1, %v341_v25  ;;  %v237_v25 = vld [vmem:[%s21257_s20 + $0x80] sm:$0xff] }
 0x162   :  { %686 = vmatprep.mubr.bf16.mxu0 %v19611_v0  ;;  %899 = vmatprep.mubr.bf16.mxu1 %v19611_v0  ;;  %v265_v27 = vpack.c.bf16 %v238_v26, %v237_v25  ;;  %v1554_v25 = vld [vmem:[%s21257_s20 + $0xb2] sm:$0xff]  ;;  %v1555_v26 = vld [vmem:[%s21257_s20 + $0xba] sm:$0xff] }
 0x169   :  { %16363 = vmatmul.mubr.msk.bf16.gmra.mrb[52].mxu0 %vm456_vm1, %v342_v28  ;;  %16382 = vmatmul.mubr.msk.bf16.gmra.mrb[52].mxu1 %vm456_vm1, %v342_v28  ;;  %v239_v28 = vld [vmem:[%s21257_s20 + $0x90] sm:$0xff] }
 0x16a   :  { %696 = vmatprep.mubr.bf16.mxu0 %v19611_v0  ;;  %909 = vmatprep.mubr.bf16.mxu1 %v19611_v0  ;;  %v266_v30 = vpack.c.bf16 %v240_v29, %v239_v28  ;;  %v1556_v28 = vld [vmem:[%s21257_s20 + $0xc2] sm:$0xff]  ;;  %v1557_v29 = vld [vmem:[%s21257_s20 + $0xca] sm:$0xff] }
 0x171   :  { %16364 = vmatmul.mubr.msk.bf16.gmra.mrb[56].mxu0 %vm456_vm1, %v343_v31  ;;  %16383 = vmatmul.mubr.msk.bf16.gmra.mrb[56].mxu1 %vm456_vm1, %v343_v31  ;;  %v241_v31 = vld [vmem:[%s21257_s20 + $0xa0] sm:$0xff] }
 0x172   :  { %706 = vmatprep.mubr.bf16.mxu0 %v19611_v0  ;;  %919 = vmatprep.mubr.bf16.mxu1 %v19611_v0  ;;  %v267_v33 = vpack.c.bf16 %v242_v32, %v241_v31  ;;  %v1558_v31 = vld [vmem:[%s21257_s20 + $0xd2] sm:$0xff]  ;;  %v1559_v32 = vld [vmem:[%s21257_s20 + $0xda] sm:$0xff] }
 0x179   :  { %16365 = vmatmul.mubr.msk.bf16.gmra.mrb[60].mxu0 %vm456_vm1, %v344_v34  ;;  %16384 = vmatmul.mubr.msk.bf16.gmra.mrb[60].mxu1 %vm456_vm1, %v344_v34  ;;  %v243_v34 = vld [vmem:[%s21257_s20 + $0xb0] sm:$0xff] }
 0x17a   :  { %716 = vmatprep.mubr.bf16.mxu0 %v19611_v0  ;;  %929 = vmatprep.mubr.bf16.mxu1 %v19611_v0  ;;  %v268_v36 = vpack.c.bf16 %v244_v35, %v243_v34  ;;  %v1560_v34 = vld [vmem:[%s21257_s20 + $0xe2] sm:$0xff]  ;;  %v1561_v35 = vld [vmem:[%s21257_s20 + $0xea] sm:$0xff] }
 0x181   :  { %16366 = vmatmul.mubr.msk.bf16.gmra.mrb[64].mxu0 %vm456_vm1, %v345_v37  ;;  %16385 = vmatmul.mubr.msk.bf16.gmra.mrb[64].mxu1 %vm456_vm1, %v345_v37  ;;  %v245_v37 = vld [vmem:[%s21257_s20 + $0xc0] sm:$0xff] }
 0x182   :  { %726 = vmatprep.mubr.bf16.mxu0 %v19611_v0  ;;  %939 = vmatprep.mubr.bf16.mxu1 %v19611_v0  ;;  %v269_v39 = vpack.c.bf16 %v246_v38, %v245_v37  ;;  %v1562_v37 = vld [vmem:[%s21257_s20 + $0xf2] sm:$0xff]  ;;  %v1563_v38 = vld [vmem:[%s21257_s20 + $0xfa] sm:$0xff] }
 0x189   :  { %16367 = vmatmul.mubr.msk.bf16.gmra.mrb[68].mxu0 %vm456_vm1, %v346_v40  ;;  %16386 = vmatmul.mubr.msk.bf16.gmra.mrb[68].mxu1 %vm456_vm1, %v346_v40  ;;  %v247_v40 = vld [vmem:[%s21257_s20 + $0xd0] sm:$0xff] }
 0x18a   :  { %1138 = vmatprep.mubr.bf16.mxu0 %v19611_v0  ;;  %1351 = vmatprep.mubr.bf16.mxu1 %v19611_v0  ;;  %v270_v42 = vpack.c.bf16 %v248_v41, %v247_v40  ;;  %v1564_v40 = vld [vmem:[%s21257_s20 + $0x102] sm:$0xff]  ;;  %v1565_v41 = vld [vmem:[%s21257_s20 + $0x10a] sm:$0xff] }
 0x191   :  { %16408 = vmatmul.mubr.msk.bf16.vlgmr.msra.gmra.mrb[0].mxu0 %vm456_vm1, %v257_v44  ;;  %16427 = vmatmul.mubr.msk.bf16.vlgmr.msra.gmra.mrb[0].mxu1 %vm456_vm1, %v257_v44  ;;  %v250_v44 = vld [vmem:[%s21257_s20 + $0xe8] sm:$0xff] }
 0x192   :  { %1148 = vmatprep.mubr.bf16.mxu0 %v19611_v0  ;;  %1361 = vmatprep.mubr.bf16.mxu1 %v19611_v0 }
 0x193   :  { %1762 = vmatpush1.bf16.msra.mxu0 %v19147_v45  ;;  %1975 = vmatpush1.bf16.msra.mxu1 %v19159_v46  ;;  %v271_v45 = vpack.c.bf16 %v250_v44, %v249_v43  ;;  %v251_v46 = vld [vmem:[%s21257_s20 + $0xf0] sm:$0xff]  ;;  %v1567_v44 = vld [vmem:[%s21257_s20 + $0x11a] sm:$0x3f] }
 0x194   :  { %1763 = vmatprep.subr.bf16.mxu0 %v19152_v47  ;;  %1976 = vmatprep.subr.bf16.mxu1 %v19165_v48  ;;  %v252_v47 = vld [vmem:[%s21257_s20 + $0xf8] sm:$0xff] }
 0x195   :  { %v272_v48 = vpack.c.bf16 %v252_v47, %v251_v46  ;;  %v1566_v43 = vld [vmem:[%s21257_s20 + $0x112] sm:$0xff]  ;;  %v2333_v46 = vlaneseq }
 0x197   :  { %1764 = vmatpush1.bf16.msra.mxu0 %v19150_v51  ;;  %1977 = vmatpush1.bf16.msra.mxu1 %v19163_v52  ;;  %v273_v51 = vpack.c.bf16 %v254_v50, %v253_v49  ;;  %v255_v52 = vld [vmem:[%s21257_s20 + $0x110] sm:$0xff]  ;;  %v20445_v47 = vshrl.u32 %v2333_v46, 7 }
 0x198   :  { %1765 = vmatprep.subr.bf16.mxu0 %v19155_v53  ;;  %1978 = vmatprep.subr.bf16.mxu1 %v19169_v54  ;;  %v256_v53 = vld [vmem:[%s21257_s20 + $0x118] sm:$0x3f]  ;;  %v2331_v50 = vld [vmem:[#allocation4] sm:$0xf] }
 0x199   :  { %16409 = vmatmul.mubr.msk.bf16.gmra.mrb[4].mxu0 %vm456_vm1, %v258_v55  ;;  %16428 = vmatmul.mubr.msk.bf16.gmra.mrb[4].mxu1 %vm456_vm1, %v258_v55  ;;  %v274_v54 = vpack.c.bf16 %v256_v53, %v255_v52  ;;  %v1532_v55 = vld [vmem:[%s21257_s20 + $0x2] sm:$0xff]  ;;  %v20451_v49 = vsub.s32 2, %v20445_v47  ;;  %v20457_v52 = vsub.s32 3, %v20445_v47 }
 0x19a   :  { %1158 = vmatprep.mubr.bf16.mxu0 %v19611_v0  ;;  %1371 = vmatprep.mubr.bf16.mxu1 %v19611_v0 }
 0x19b   :  { %1766 = vmatpush1.bf16.msra.mxu0 %v19153_v56  ;;  %1979 = vmatpush1.bf16.msra.mxu1 %v19167_v57  ;;  %v1533_v56 = vld [vmem:[%s21257_s20 + $0xa] sm:$0xff] }
 0x19c   :  { %1767 = vmatprep.subr.bf16.mxu0 %v19158_v58  ;;  %1980 = vmatprep.subr.bf16.mxu1 %v19172_v60  ;;  %v1568_v57 = vpack.c.bf16 %v1533_v56, %v1532_v55  ;;  %v1534_v58 = vld [vmem:[%s21257_s20 + $0x12] sm:$0xff]  ;;  %v20469_v56 = vrot.slane %v2331_v50, %v20457_v52 }
 0x19d   :  { %v1569_v60 = vpack.c.bf16 %v1535_v59, %v1534_v58 }
 0x19f   :  { %1768 = vmatpush1.bf16.msra.mxu0 %v19156_v1  ;;  %1981 = vmatpush1.bf16.msra.mxu1 %v19170_v3  ;;  %v1538_v1 = vld [vmem:[%s21257_s20 + $0x32] sm:$0xff] }
 0x1a0   :  { %16465 = vmatprep.subr.msk.bf16.mxu0 %vm511_vm0, %v16462_v2  ;;  %16484 = vmatprep.subr.msk.bf16.mxu1 %vm511_vm0, %v16464_v5  ;;  %v1539_v2 = vld [vmem:[%s21257_s20 + $0x3a] sm:$0xff]  ;;  %v1541_v5 = vld [vmem:[%s21257_s20 + $0x4a] sm:$0xff] }
 0x1a1   :  { %16410 = vmatmul.mubr.msk.bf16.gmra.mrb[8].mxu0 %vm456_vm1, %v259_v7  ;;  %16429 = vmatmul.mubr.msk.bf16.gmra.mrb[8].mxu1 %vm456_vm1, %v259_v7  ;;  %v1571_v3 = vpack.c.bf16 %v1539_v2, %v1538_v1  ;;  %v1572_v6 = vpack.c.bf16 %v1541_v5, %v1540_v4  ;;  %v1542_v7 = vld [vmem:[%s21257_s20 + $0x52] sm:$0xff] }
 0x1a2   :  { %1168 = vmatprep.mubr.bf16.mxu0 %v19611_v0  ;;  %1381 = vmatprep.mubr.bf16.mxu1 %v19611_v0 }
 0x1a3   :  { %1770 = vmatpush1.bf16.msra.mxu0 %v1750_v8  ;;  %1983 = vmatpush1.bf16.msra.mxu1 %v1756_v9  ;;  %v1543_v8 = vld [vmem:[%s21257_s20 + $0x5a] sm:$0xff] }
 0x1a4   :  { %v1573_v9 = vpack.c.bf16 %v1543_v8, %v1542_v7 }
 0x1a9   :  { %16411 = vmatmul.mubr.msk.bf16.gmra.mrb[12].mxu0 %vm456_vm1, %v260_v12  ;;  %16430 = vmatmul.mubr.msk.bf16.gmra.mrb[12].mxu1 %vm456_vm1, %v260_v12  ;;  %v1574_v12 = vpack.c.bf16 %v1545_v11, %v1544_v10 }
 0x1aa   :  { %1178 = vmatprep.mubr.bf16.mxu0 %v19611_v0  ;;  %1391 = vmatprep.mubr.bf16.mxu1 %v19611_v0 }
 0x1b1   :  { %16412 = vmatmul.mubr.msk.bf16.gmra.mrb[16].mxu0 %vm456_vm1, %v261_v15  ;;  %16431 = vmatmul.mubr.msk.bf16.gmra.mrb[16].mxu1 %vm456_vm1, %v261_v15  ;;  %v1575_v15 = vpack.c.bf16 %v1547_v14, %v1546_v13 }
 0x1b2   :  { %1188 = vmatprep.mubr.bf16.mxu0 %v19611_v0  ;;  %1401 = vmatprep.mubr.bf16.mxu1 %v19611_v0 }
 0x1b9   :  { %16413 = vmatmul.mubr.msk.bf16.gmra.mrb[20].mxu0 %vm456_vm1, %v262_v18  ;;  %16432 = vmatmul.mubr.msk.bf16.gmra.mrb[20].mxu1 %vm456_vm1, %v262_v18  ;;  %v1576_v18 = vpack.c.bf16 %v1549_v17, %v1548_v16 }
 0x1ba   :  { %1198 = vmatprep.mubr.bf16.mxu0 %v19611_v0  ;;  %1411 = vmatprep.mubr.bf16.mxu1 %v19611_v0 }
 0x1c1   :  { %16414 = vmatmul.mubr.msk.bf16.gmra.mrb[24].mxu0 %vm456_vm1, %v263_v21  ;;  %16433 = vmatmul.mubr.msk.bf16.gmra.mrb[24].mxu1 %vm456_vm1, %v263_v21  ;;  %v1577_v21 = vpack.c.bf16 %v1551_v20, %v1550_v19 }
 0x1c2   :  { %1208 = vmatprep.mubr.bf16.mxu0 %v19611_v0  ;;  %1421 = vmatprep.mubr.bf16.mxu1 %v19611_v0 }
 0x1c9   :  { %16415 = vmatmul.mubr.msk.bf16.gmra.mrb[28].mxu0 %vm456_vm1, %v264_v24  ;;  %16434 = vmatmul.mubr.msk.bf16.gmra.mrb[28].mxu1 %vm456_vm1, %v264_v24  ;;  %v1578_v24 = vpack.c.bf16 %v1553_v23, %v1552_v22 }
 0x1ca   :  { %1218 = vmatprep.mubr.bf16.mxu0 %v19611_v0  ;;  %1431 = vmatprep.mubr.bf16.mxu1 %v19611_v0 }
 0x1d1   :  { %16416 = vmatmul.mubr.msk.bf16.gmra.mrb[32].mxu0 %vm456_vm1, %v265_v27  ;;  %16435 = vmatmul.mubr.msk.bf16.gmra.mrb[32].mxu1 %vm456_vm1, %v265_v27  ;;  %v1579_v27 = vpack.c.bf16 %v1555_v26, %v1554_v25 }
 0x1d2   :  { %1228 = vmatprep.mubr.bf16.mxu0 %v19611_v0  ;;  %1441 = vmatprep.mubr.bf16.mxu1 %v19611_v0 }
 0x1d9   :  { %16417 = vmatmul.mubr.msk.bf16.gmra.mrb[36].mxu0 %vm456_vm1, %v266_v30  ;;  %16436 = vmatmul.mubr.msk.bf16.gmra.mrb[36].mxu1 %vm456_vm1, %v266_v30  ;;  %v1580_v30 = vpack.c.bf16 %v1557_v29, %v1556_v28  ;;  %v2642_v28 = vld [vmem:[%s21239_s4 + $0x8] sm:$0xff] }
 0x1da   :  { %1238 = vmatprep.mubr.bf16.mxu0 %v19611_v0  ;;  %1451 = vmatprep.mubr.bf16.mxu1 %v19611_v0 }
 0x1e1   :  { %16418 = vmatmul.mubr.msk.bf16.gmra.mrb[40].mxu0 %vm456_vm1, %v267_v33  ;;  %16437 = vmatmul.mubr.msk.bf16.gmra.mrb[40].mxu1 %vm456_vm1, %v267_v33  ;;  %v1581_v33 = vpack.c.bf16 %v1559_v32, %v1558_v31 }
 0x1e2   :  { %1248 = vmatprep.mubr.bf16.mxu0 %v19611_v0  ;;  %1461 = vmatprep.mubr.bf16.mxu1 %v19611_v0 }
 0x1e9   :  { %16419 = vmatmul.mubr.msk.bf16.gmra.mrb[44].mxu0 %vm456_vm1, %v268_v36  ;;  %16438 = vmatmul.mubr.msk.bf16.gmra.mrb[44].mxu1 %vm456_vm1, %v268_v36  ;;  %v1582_v36 = vpack.c.bf16 %v1561_v35, %v1560_v34 }
 0x1ea   :  { %1258 = vmatprep.mubr.bf16.mxu0 %v19611_v0  ;;  %1471 = vmatprep.mubr.bf16.mxu1 %v19611_v0 }
 0x1f1   :  { %16420 = vmatmul.mubr.msk.bf16.gmra.mrb[48].mxu0 %vm456_vm1, %v269_v39  ;;  %16439 = vmatmul.mubr.msk.bf16.gmra.mrb[48].mxu1 %vm456_vm1, %v269_v39  ;;  %v1583_v39 = vpack.c.bf16 %v1563_v38, %v1562_v37 }
 0x1f2   :  { %1268 = vmatprep.mubr.bf16.mxu0 %v19611_v0  ;;  %1481 = vmatprep.mubr.bf16.mxu1 %v19611_v0 }
 0x1f9   :  { %16421 = vmatmul.mubr.msk.bf16.gmra.mrb[52].mxu0 %vm456_vm1, %v270_v42  ;;  %16440 = vmatmul.mubr.msk.bf16.gmra.mrb[52].mxu1 %vm456_vm1, %v270_v42  ;;  %v1584_v42 = vpack.c.bf16 %v1565_v41, %v1564_v40 }
 0x1fa   :  { %1278 = vmatprep.mubr.bf16.mxu0 %v19611_v0  ;;  %1491 = vmatprep.mubr.bf16.mxu1 %v19611_v0 }
 0x201   :  { %16422 = vmatmul.mubr.msk.bf16.gmra.mrb[56].mxu0 %vm456_vm1, %v271_v45  ;;  %16441 = vmatmul.mubr.msk.bf16.gmra.mrb[56].mxu1 %vm456_vm1, %v271_v45  ;;  %v1585_v45 = vpack.c.bf16 %v1567_v44, %v1566_v43 }
 0x202   :  { %1288 = vmatprep.mubr.bf16.mxu0 %v19611_v0  ;;  %1501 = vmatprep.mubr.bf16.mxu1 %v19611_v0 }
 0x209   :  { %16423 = vmatmul.mubr.msk.bf16.gmra.mrb[60].mxu0 %vm456_vm1, %v272_v48  ;;  %16442 = vmatmul.mubr.msk.bf16.gmra.mrb[60].mxu1 %vm456_vm1, %v272_v48  ;;  %v20448_v48 = vsub.s32 0, %v20445_v47 }
 0x20a   :  { %1298 = vmatprep.mubr.bf16.mxu0 %v19611_v0  ;;  %1511 = vmatprep.mubr.bf16.mxu1 %v19611_v0 }
 0x20b   :  { %v20460_v53 = vrot.slane %v2331_v50, %v20448_v48 }
 0x211   :  { %16424 = vmatmul.mubr.msk.bf16.gmra.mrb[64].mxu0 %vm456_vm1, %v273_v51  ;;  %16443 = vmatmul.mubr.msk.bf16.gmra.mrb[64].mxu1 %vm456_vm1, %v273_v51  ;;  %v20454_v51 = vsub.s32 1, %v20445_v47 }
 0x212   :  { %1308 = vmatprep.mubr.bf16.mxu0 %v19611_v0  ;;  %1521 = vmatprep.mubr.bf16.mxu1 %v19611_v0 }
 0x213   :  { %v20466_v55 = vrot.slane %v2331_v50, %v20454_v51 }
 0x219   :  { %16425 = vmatmul.mubr.msk.bf16.gmra.mrb[68].mxu0 %vm456_vm1, %v274_v54  ;;  %16444 = vmatmul.mubr.msk.bf16.gmra.mrb[68].mxu1 %vm456_vm1, %v274_v54  ;;  %v20463_v54 = vrot.slane %v2331_v50, %v20451_v49 }
 0x21a   :  { %1793 = vmatprep.mubr.bf16.mxu0 %v19611_v0  ;;  %2006 = vmatprep.mubr.bf16.mxu1 %v19611_v0 }
 0x221   :  { %16466 = vmatmul.mubr.msk.bf16.vlgmr.msra.gmra.mrb[0].mxu0 %vm456_vm1, %v1568_v57  ;;  %16485 = vmatmul.mubr.msk.bf16.vlgmr.msra.gmra.mrb[0].mxu1 %vm456_vm1, %v1568_v57 }
 0x222   :  { %1803 = vmatprep.mubr.bf16.mxu0 %v19611_v0  ;;  %2016 = vmatprep.mubr.bf16.mxu1 %v19611_v0 }
 0x229   :  { %16467 = vmatmul.mubr.msk.bf16.gmra.mrb[4].mxu0 %vm456_vm1, %v1569_v60  ;;  %16486 = vmatmul.mubr.msk.bf16.gmra.mrb[4].mxu1 %vm456_vm1, %v1569_v60 }
 0x22a   :  { %1813 = vmatprep.mubr.bf16.mxu0 %v19611_v0  ;;  %2026 = vmatprep.mubr.bf16.mxu1 %v19611_v0 }
 0x231   :  { %16468 = vmatmul.mubr.msk.bf16.gmra.mrb[8].mxu0 %vm456_vm1, %v1570_v63  ;;  %16487 = vmatmul.mubr.msk.bf16.gmra.mrb[8].mxu1 %vm456_vm1, %v1570_v63 }
 0x232   :  { %1823 = vmatprep.mubr.bf16.mxu0 %v19611_v0  ;;  %2036 = vmatprep.mubr.bf16.mxu1 %v19611_v0 }
 0x239   :  { %16469 = vmatmul.mubr.msk.bf16.gmra.mrb[12].mxu0 %vm456_vm1, %v1571_v3  ;;  %16488 = vmatmul.mubr.msk.bf16.gmra.mrb[12].mxu1 %vm456_vm1, %v1571_v3 }
 0x23a   :  { %1833 = vmatprep.mubr.bf16.mxu0 %v19611_v0  ;;  %2046 = vmatprep.mubr.bf16.mxu1 %v19611_v0 }
 0x241   :  { %16470 = vmatmul.mubr.msk.bf16.gmra.mrb[16].mxu0 %vm456_vm1, %v1572_v6  ;;  %16489 = vmatmul.mubr.msk.bf16.gmra.mrb[16].mxu1 %vm456_vm1, %v1572_v6 }
 0x242   :  { %1843 = vmatprep.mubr.bf16.mxu0 %v19611_v0  ;;  %2056 = vmatprep.mubr.bf16.mxu1 %v19611_v0 }
 0x249   :  { %16471 = vmatmul.mubr.msk.bf16.gmra.mrb[20].mxu0 %vm456_vm1, %v1573_v9  ;;  %16490 = vmatmul.mubr.msk.bf16.gmra.mrb[20].mxu1 %vm456_vm1, %v1573_v9 }
 0x24a   :  { %1853 = vmatprep.mubr.bf16.mxu0 %v19611_v0  ;;  %2066 = vmatprep.mubr.bf16.mxu1 %v19611_v0 }
 0x251   :  { %16472 = vmatmul.mubr.msk.bf16.gmra.mrb[24].mxu0 %vm456_vm1, %v1574_v12  ;;  %16491 = vmatmul.mubr.msk.bf16.gmra.mrb[24].mxu1 %vm456_vm1, %v1574_v12 }
 0x252   :  { %1863 = vmatprep.mubr.bf16.mxu0 %v19611_v0  ;;  %2076 = vmatprep.mubr.bf16.mxu1 %v19611_v0 }
 0x259   :  { %16473 = vmatmul.mubr.msk.bf16.gmra.mrb[28].mxu0 %vm456_vm1, %v1575_v15  ;;  %16492 = vmatmul.mubr.msk.bf16.gmra.mrb[28].mxu1 %vm456_vm1, %v1575_v15 }
 0x25a   :  { %1873 = vmatprep.mubr.bf16.mxu0 %v19611_v0  ;;  %2086 = vmatprep.mubr.bf16.mxu1 %v19611_v0 }
 0x261   :  { %16474 = vmatmul.mubr.msk.bf16.gmra.mrb[32].mxu0 %vm456_vm1, %v1576_v18  ;;  %16493 = vmatmul.mubr.msk.bf16.gmra.mrb[32].mxu1 %vm456_vm1, %v1576_v18 }
 0x262   :  { %1883 = vmatprep.mubr.bf16.mxu0 %v19611_v0  ;;  %2096 = vmatprep.mubr.bf16.mxu1 %v19611_v0 }
 0x269   :  { %16475 = vmatmul.mubr.msk.bf16.gmra.mrb[36].mxu0 %vm456_vm1, %v1577_v21  ;;  %16494 = vmatmul.mubr.msk.bf16.gmra.mrb[36].mxu1 %vm456_vm1, %v1577_v21 }
 0x26a   :  { %1893 = vmatprep.mubr.bf16.mxu0 %v19611_v0  ;;  %2106 = vmatprep.mubr.bf16.mxu1 %v19611_v0 }
 0x271   :  { %16476 = vmatmul.mubr.msk.bf16.gmra.mrb[40].mxu0 %vm456_vm1, %v1578_v24  ;;  %16495 = vmatmul.mubr.msk.bf16.gmra.mrb[40].mxu1 %vm456_vm1, %v1578_v24 }
 0x272   :  { %1903 = vmatprep.mubr.bf16.mxu0 %v19611_v0  ;;  %2116 = vmatprep.mubr.bf16.mxu1 %v19611_v0 }
 0x279   :  { %16477 = vmatmul.mubr.msk.bf16.gmra.mrb[44].mxu0 %vm456_vm1, %v1579_v27  ;;  %16496 = vmatmul.mubr.msk.bf16.gmra.mrb[44].mxu1 %vm456_vm1, %v1579_v27 }
 0x27a   :  { %1913 = vmatprep.mubr.bf16.mxu0 %v19611_v0  ;;  %2126 = vmatprep.mubr.bf16.mxu1 %v19611_v0 }
 0x281   :  { %16478 = vmatmul.mubr.msk.bf16.gmra.mrb[48].mxu0 %vm456_vm1, %v1580_v30  ;;  %16497 = vmatmul.mubr.msk.bf16.gmra.mrb[48].mxu1 %vm456_vm1, %v1580_v30 }
 0x282   :  { %1923 = vmatprep.mubr.bf16.mxu0 %v19611_v0  ;;  %2136 = vmatprep.mubr.bf16.mxu1 %v19611_v0 }
 0x289   :  { %16479 = vmatmul.mubr.msk.bf16.gmra.mrb[52].mxu0 %vm456_vm1, %v1581_v33  ;;  %16498 = vmatmul.mubr.msk.bf16.gmra.mrb[52].mxu1 %vm456_vm1, %v1581_v33 }
 0x28a   :  { %1933 = vmatprep.mubr.bf16.mxu0 %v19611_v0  ;;  %2146 = vmatprep.mubr.bf16.mxu1 %v19611_v0 }
 0x291   :  { %16480 = vmatmul.mubr.msk.bf16.gmra.mrb[56].mxu0 %vm456_vm1, %v1582_v36  ;;  %16499 = vmatmul.mubr.msk.bf16.gmra.mrb[56].mxu1 %vm456_vm1, %v1582_v36 }
 0x292   :  { %1943 = vmatprep.mubr.bf16.mxu0 %v19611_v0  ;;  %2156 = vmatprep.mubr.bf16.mxu1 %v19611_v0 }
 0x299   :  { %16481 = vmatmul.mubr.msk.bf16.gmra.mrb[60].mxu0 %vm456_vm1, %v1583_v39  ;;  %16500 = vmatmul.mubr.msk.bf16.gmra.mrb[60].mxu1 %vm456_vm1, %v1583_v39 }
 0x29a   :  { %1953 = vmatprep.mubr.bf16.mxu0 %v19611_v0  ;;  %2166 = vmatprep.mubr.bf16.mxu1 %v19611_v0 }
 0x2a1   :  { %16482 = vmatmul.mubr.msk.bf16.gmra.mrb[64].mxu0 %vm456_vm1, %v1584_v42  ;;  %16501 = vmatmul.mubr.msk.bf16.gmra.mrb[64].mxu1 %vm456_vm1, %v1584_v42 }
 0x2a2   :  { %1963 = vmatprep.mubr.bf16.mxu0 %v19611_v0  ;;  %2176 = vmatprep.mubr.bf16.mxu1 %v19611_v0 }
 0x2a9   :  { %16483 = vmatmul.mubr.msk.bf16.gmra.mrb[68].mxu0 %vm456_vm1, %v1585_v45  ;;  %16502 = vmatmul.mubr.msk.bf16.gmra.mrb[68].mxu1 %vm456_vm1, %v1585_v45 }
 0x2aa   :  { %2731 = vmatprep.mubr.f32.mxu0 %v2642_v28  ;;  %2885 = vmatprep.mubr.f32.mxu1 %v2642_v28 }
 0x2f4   :  { %v1795_v57 = vpop.f32.mrb[0].mxu0  ;;  %v2008_v58 = vpop.f32.mrb[0].mxu1 }
 0x2f5   :  { %v2353_v59 = vadd.f32 %v20460_v53, %v1795_v57  ;;  %v2355_v60 = vadd.f32 %v20463_v54, %v2008_v58  ;;  %v1797_v61 = vpop.f32.mrb[1].mxu0  ;;  %v2010_v62 = vpop.f32.mrb[1].mxu1 }
 0x2f6   :  { %v2354_v63 = vadd.f32 %v20466_v55, %v1797_v61  ;;  %v2356_v1 = vadd.f32 %v20469_v56, %v2010_v62  ;;  %v1799_v2 = vpop.f32.mrb[2].mxu0  ;;  %v2012_v3 = vpop.f32.mrb[2].mxu1 }
 0x2f7   :  { %v2357_v4 = vadd.f32 %v20460_v53, %v1799_v2  ;;  %v2359_v5 = vadd.f32 %v20463_v54, %v2012_v3  ;;  %v1801_v6 = vpop.f32.mrb[3].mxu0  ;;  %v2014_v7 = vpop.f32.mrb[3].mxu1  ;;  %v2497_v10 = vmax.f32 %v2353_v59, 0.0  ;;  %v2499_v11 = vmax.f32 %v2355_v60, 0.0 }
 0x2f8   :  { %v2358_v8 = vadd.f32 %v20466_v55, %v1801_v6  ;;  %v2360_v9 = vadd.f32 %v20469_v56, %v2014_v7  ;;  %v2498_v14 = vmax.f32 %v2354_v63, 0.0  ;;  %v2500_v15 = vmax.f32 %v2356_v1, 0.0 }
 0x2f9   :  { %v2501_v12 = vmax.f32 %v2357_v4, 0.0  ;;  %v2503_v13 = vmax.f32 %v2359_v5, 0.0 }
 0x2fa   :  { %v2502_v16 = vmax.f32 %v2358_v8, 0.0  ;;  %v2504_v17 = vmax.f32 %v2360_v9, 0.0 }
 0x2fb   :  { %v18369_v18 = vpack.c.bf16 %v2501_v12, %v2497_v10  ;;  %v18443_v19 = vpack.c.bf16 %v2503_v13, %v2499_v11 }
 0x2fc   :  { %v18367_v20 = vpack.c.bf16 %v2502_v16, %v2498_v14  ;;  %v18441_v21 = vpack.c.bf16 %v2504_v17, %v2500_v15  ;;  %v1805_v22 = vpop.f32.mrb[4].mxu0  ;;  %v2018_v23 = vpop.f32.mrb[4].mxu1 }
 0x2fd   :  { %v2361_v24 = vadd.f32 %v20460_v53, %v1805_v22  ;;  %v2363_v25 = vadd.f32 %v20463_v54, %v2018_v23  ;;  %v1807_v26 = vpop.f32.mrb[5].mxu0  ;;  %v2020_v27 = vpop.f32.mrb[5].mxu1 }
 0x2fe   :  { %v2362_v29 = vadd.f32 %v20466_v55, %v1807_v26  ;;  %v2364_v30 = vadd.f32 %v20469_v56, %v2020_v27  ;;  %v1809_v31 = vpop.f32.mrb[6].mxu0  ;;  %v2022_v32 = vpop.f32.mrb[6].mxu1  ;;  %18368 = vmatprep.subr.bf16.mxu0 %v18367_v20  ;;  %18442 = vmatprep.subr.bf16.mxu1 %v18441_v21 }
 0x2ff   :  { %v2365_v33 = vadd.f32 %v20460_v53, %v1809_v31  ;;  %v2367_v34 = vadd.f32 %v20463_v54, %v2022_v32  ;;  %v1811_v35 = vpop.f32.mrb[7].mxu0  ;;  %v2024_v36 = vpop.f32.mrb[7].mxu1  ;;  %18370 = vmatpush1.bf16.msra.mxu0 %v18369_v18  ;;  %18444 = vmatpush1.bf16.msra.mxu1 %v18443_v19  ;;  %v2505_v39 = vmax.f32 %v2361_v24, 0.0  ;;  %v2507_v40 = vmax.f32 %v2363_v25, 0.0 }
 0x300   :  { %v2366_v37 = vadd.f32 %v20466_v55, %v1811_v35  ;;  %v2368_v38 = vadd.f32 %v20469_v56, %v2024_v36  ;;  %v2506_v43 = vmax.f32 %v2362_v29, 0.0  ;;  %v2508_v44 = vmax.f32 %v2364_v30, 0.0 }
 0x301   :  { %v2509_v41 = vmax.f32 %v2365_v33, 0.0  ;;  %v2511_v42 = vmax.f32 %v2367_v34, 0.0 }
 0x302   :  { %v2510_v45 = vmax.f32 %v2366_v37, 0.0  ;;  %v2512_v46 = vmax.f32 %v2368_v38, 0.0 }
 0x303   :  { %v18373_v50 = vpack.c.bf16 %v2509_v41, %v2505_v39  ;;  %v18447_v57 = vpack.c.bf16 %v2511_v42, %v2507_v40 }
 0x304   :  { %v18371_v58 = vpack.c.bf16 %v2510_v45, %v2506_v43  ;;  %v18445_v59 = vpack.c.bf16 %v2512_v46, %v2508_v44  ;;  %v1815_v60 = vpop.f32.mrb[8].mxu0  ;;  %v2028_v61 = vpop.f32.mrb[8].mxu1 }
 0x305   :  { %v2369_v62 = vadd.f32 %v20460_v53, %v1815_v60  ;;  %v2371_v63 = vadd.f32 %v20463_v54, %v2028_v61  ;;  %v1817_v1 = vpop.f32.mrb[9].mxu0  ;;  %v2030_v2 = vpop.f32.mrb[9].mxu1 }
 0x306   :  { %v2370_v3 = vadd.f32 %v20466_v55, %v1817_v1  ;;  %v2372_v4 = vadd.f32 %v20469_v56, %v2030_v2  ;;  %v1819_v5 = vpop.f32.mrb[10].mxu0  ;;  %v2032_v6 = vpop.f32.mrb[10].mxu1  ;;  %18372 = vmatprep.subr.bf16.mxu0 %v18371_v58  ;;  %18446 = vmatprep.subr.bf16.mxu1 %v18445_v59 }
 0x307   :  { %v2373_v7 = vadd.f32 %v20460_v53, %v1819_v5  ;;  %v2375_v8 = vadd.f32 %v20463_v54, %v2032_v6  ;;  %v1821_v9 = vpop.f32.mrb[11].mxu0  ;;  %v2034_v10 = vpop.f32.mrb[11].mxu1  ;;  %18374 = vmatpush1.bf16.msra.mxu0 %v18373_v50  ;;  %18448 = vmatpush1.bf16.msra.mxu1 %v18447_v57  ;;  %v2513_v13 = vmax.f32 %v2369_v62, 0.0  ;;  %v2515_v14 = vmax.f32 %v2371_v63, 0.0 }
 0x308   :  { %v2374_v11 = vadd.f32 %v20466_v55, %v1821_v9  ;;  %v2376_v12 = vadd.f32 %v20469_v56, %v2034_v10  ;;  %v2514_v17 = vmax.f32 %v2370_v3, 0.0  ;;  %v2516_v18 = vmax.f32 %v2372_v4, 0.0 }
 0x309   :  { %v2517_v15 = vmax.f32 %v2373_v7, 0.0  ;;  %v2519_v16 = vmax.f32 %v2375_v8, 0.0 }
 0x30a   :  { %v2518_v19 = vmax.f32 %v2374_v11, 0.0  ;;  %v2520_v20 = vmax.f32 %v2376_v12, 0.0 }
 0x30b   :  { %v18377_v21 = vpack.c.bf16 %v2517_v15, %v2513_v13  ;;  %v18451_v22 = vpack.c.bf16 %v2519_v16, %v2515_v14 }
 0x30c   :  { %v18375_v23 = vpack.c.bf16 %v2518_v19, %v2514_v17  ;;  %v18449_v24 = vpack.c.bf16 %v2520_v20, %v2516_v18  ;;  %v1825_v25 = vpop.f32.mrb[12].mxu0  ;;  %v2038_v26 = vpop.f32.mrb[12].mxu1 }
 0x30d   :  { %v2377_v27 = vadd.f32 %v20460_v53, %v1825_v25  ;;  %v2379_v28 = vadd.f32 %v20463_v54, %v2038_v26  ;;  %v1827_v29 = vpop.f32.mrb[13].mxu0  ;;  %v2040_v30 = vpop.f32.mrb[13].mxu1 }
 0x30e   :  { %v2378_v31 = vadd.f32 %v20466_v55, %v1827_v29  ;;  %v2380_v32 = vadd.f32 %v20469_v56, %v2040_v30  ;;  %v1829_v33 = vpop.f32.mrb[14].mxu0  ;;  %v2042_v34 = vpop.f32.mrb[14].mxu1  ;;  %18376 = vmatprep.subr.bf16.mxu0 %v18375_v23  ;;  %18450 = vmatprep.subr.bf16.mxu1 %v18449_v24 }
 0x30f   :  { %v2381_v35 = vadd.f32 %v20460_v53, %v1829_v33  ;;  %v2383_v36 = vadd.f32 %v20463_v54, %v2042_v34  ;;  %v1831_v37 = vpop.f32.mrb[15].mxu0  ;;  %v2044_v38 = vpop.f32.mrb[15].mxu1  ;;  %18378 = vmatpush1.bf16.msra.mxu0 %v18377_v21  ;;  %18452 = vmatpush1.bf16.msra.mxu1 %v18451_v22  ;;  %v2521_v41 = vmax.f32 %v2377_v27, 0.0  ;;  %v2523_v42 = vmax.f32 %v2379_v28, 0.0 }
 0x310   :  { %v2382_v39 = vadd.f32 %v20466_v55, %v1831_v37  ;;  %v2384_v40 = vadd.f32 %v20469_v56, %v2044_v38  ;;  %v2522_v45 = vmax.f32 %v2378_v31, 0.0  ;;  %v2524_v46 = vmax.f32 %v2380_v32, 0.0 }
 0x311   :  { %v2525_v43 = vmax.f32 %v2381_v35, 0.0  ;;  %v2527_v44 = vmax.f32 %v2383_v36, 0.0 }
 0x312   :  { %v2526_v50 = vmax.f32 %v2382_v39, 0.0  ;;  %v2528_v57 = vmax.f32 %v2384_v40, 0.0 }
 0x313   :  { %v18381_v58 = vpack.c.bf16 %v2525_v43, %v2521_v41  ;;  %v18455_v59 = vpack.c.bf16 %v2527_v44, %v2523_v42 }
 0x314   :  { %v18379_v60 = vpack.c.bf16 %v2526_v50, %v2522_v45  ;;  %v18453_v61 = vpack.c.bf16 %v2528_v57, %v2524_v46  ;;  %v1835_v62 = vpop.f32.mrb[16].mxu0  ;;  %v2048_v63 = vpop.f32.mrb[16].mxu1 }
 0x315   :  { %v2385_v1 = vadd.f32 %v20460_v53, %v1835_v62  ;;  %v2387_v2 = vadd.f32 %v20463_v54, %v2048_v63  ;;  %v1837_v3 = vpop.f32.mrb[17].mxu0  ;;  %v2050_v4 = vpop.f32.mrb[17].mxu1 }
 0x316   :  { %v2386_v5 = vadd.f32 %v20466_v55, %v1837_v3  ;;  %v2388_v6 = vadd.f32 %v20469_v56, %v2050_v4  ;;  %v1839_v7 = vpop.f32.mrb[18].mxu0  ;;  %v2052_v8 = vpop.f32.mrb[18].mxu1  ;;  %18380 = vmatprep.subr.bf16.mxu0 %v18379_v60  ;;  %18454 = vmatprep.subr.bf16.mxu1 %v18453_v61 }
 0x317   :  { %v2389_v9 = vadd.f32 %v20460_v53, %v1839_v7  ;;  %v2391_v10 = vadd.f32 %v20463_v54, %v2052_v8  ;;  %v1841_v11 = vpop.f32.mrb[19].mxu0  ;;  %v2054_v12 = vpop.f32.mrb[19].mxu1  ;;  %18382 = vmatpush1.bf16.msra.mxu0 %v18381_v58  ;;  %18456 = vmatpush1.bf16.msra.mxu1 %v18455_v59  ;;  %v2529_v15 = vmax.f32 %v2385_v1, 0.0  ;;  %v2531_v16 = vmax.f32 %v2387_v2, 0.0 }
 0x318   :  { %v2390_v13 = vadd.f32 %v20466_v55, %v1841_v11  ;;  %v2392_v14 = vadd.f32 %v20469_v56, %v2054_v12  ;;  %v2530_v19 = vmax.f32 %v2386_v5, 0.0  ;;  %v2532_v20 = vmax.f32 %v2388_v6, 0.0 }
 0x319   :  { %v2533_v17 = vmax.f32 %v2389_v9, 0.0  ;;  %v2535_v18 = vmax.f32 %v2391_v10, 0.0 }
 0x31a   :  { %v2534_v21 = vmax.f32 %v2390_v13, 0.0  ;;  %v2536_v22 = vmax.f32 %v2392_v14, 0.0 }
 0x31b   :  { %v18385_v23 = vpack.c.bf16 %v2533_v17, %v2529_v15  ;;  %v18459_v24 = vpack.c.bf16 %v2535_v18, %v2531_v16 }
 0x31c   :  { %v18383_v25 = vpack.c.bf16 %v2534_v21, %v2530_v19  ;;  %v18457_v26 = vpack.c.bf16 %v2536_v22, %v2532_v20  ;;  %v1845_v27 = vpop.f32.mrb[20].mxu0  ;;  %v2058_v28 = vpop.f32.mrb[20].mxu1 }
 0x31d   :  { %v2393_v29 = vadd.f32 %v20460_v53, %v1845_v27  ;;  %v2395_v30 = vadd.f32 %v20463_v54, %v2058_v28  ;;  %v1847_v31 = vpop.f32.mrb[21].mxu0  ;;  %v2060_v32 = vpop.f32.mrb[21].mxu1 }
 0x31e   :  { %v2394_v33 = vadd.f32 %v20466_v55, %v1847_v31  ;;  %v2396_v34 = vadd.f32 %v20469_v56, %v2060_v32  ;;  %v1849_v35 = vpop.f32.mrb[22].mxu0  ;;  %v2062_v36 = vpop.f32.mrb[22].mxu1  ;;  %18384 = vmatprep.subr.bf16.mxu0 %v18383_v25  ;;  %18458 = vmatprep.subr.bf16.mxu1 %v18457_v26 }
 0x31f   :  { %v2397_v37 = vadd.f32 %v20460_v53, %v1849_v35  ;;  %v2399_v38 = vadd.f32 %v20463_v54, %v2062_v36  ;;  %v1851_v39 = vpop.f32.mrb[23].mxu0  ;;  %v2064_v40 = vpop.f32.mrb[23].mxu1  ;;  %18386 = vmatpush1.bf16.msra.mxu0 %v18385_v23  ;;  %18460 = vmatpush1.bf16.msra.mxu1 %v18459_v24  ;;  %v2537_v43 = vmax.f32 %v2393_v29, 0.0  ;;  %v2539_v44 = vmax.f32 %v2395_v30, 0.0 }
 0x320   :  { %v2398_v41 = vadd.f32 %v20466_v55, %v1851_v39  ;;  %v2400_v42 = vadd.f32 %v20469_v56, %v2064_v40  ;;  %v2538_v50 = vmax.f32 %v2394_v33, 0.0  ;;  %v2540_v57 = vmax.f32 %v2396_v34, 0.0 }
 0x321   :  { %v2541_v45 = vmax.f32 %v2397_v37, 0.0  ;;  %v2543_v46 = vmax.f32 %v2399_v38, 0.0 }
 0x322   :  { %v2542_v58 = vmax.f32 %v2398_v41, 0.0  ;;  %v2544_v59 = vmax.f32 %v2400_v42, 0.0 }
 0x323   :  { %v18389_v60 = vpack.c.bf16 %v2541_v45, %v2537_v43  ;;  %v18463_v61 = vpack.c.bf16 %v2543_v46, %v2539_v44 }
 0x324   :  { %v18387_v62 = vpack.c.bf16 %v2542_v58, %v2538_v50  ;;  %v18461_v63 = vpack.c.bf16 %v2544_v59, %v2540_v57  ;;  %v1855_v1 = vpop.f32.mrb[24].mxu0  ;;  %v2068_v2 = vpop.f32.mrb[24].mxu1 }
 0x325   :  { %v2401_v3 = vadd.f32 %v20460_v53, %v1855_v1  ;;  %v2403_v4 = vadd.f32 %v20463_v54, %v2068_v2  ;;  %v1857_v5 = vpop.f32.mrb[25].mxu0  ;;  %v2070_v6 = vpop.f32.mrb[25].mxu1 }
 0x326   :  { %v2402_v7 = vadd.f32 %v20466_v55, %v1857_v5  ;;  %v2404_v8 = vadd.f32 %v20469_v56, %v2070_v6  ;;  %v1859_v9 = vpop.f32.mrb[26].mxu0  ;;  %v2072_v10 = vpop.f32.mrb[26].mxu1  ;;  %18388 = vmatprep.subr.bf16.mxu0 %v18387_v62  ;;  %18462 = vmatprep.subr.bf16.mxu1 %v18461_v63 }
 0x327   :  { %v2405_v11 = vadd.f32 %v20460_v53, %v1859_v9  ;;  %v2407_v12 = vadd.f32 %v20463_v54, %v2072_v10  ;;  %v1861_v13 = vpop.f32.mrb[27].mxu0  ;;  %v2074_v14 = vpop.f32.mrb[27].mxu1  ;;  %18390 = vmatpush1.bf16.msra.mxu0 %v18389_v60  ;;  %18464 = vmatpush1.bf16.msra.mxu1 %v18463_v61  ;;  %v2545_v17 = vmax.f32 %v2401_v3, 0.0  ;;  %v2547_v18 = vmax.f32 %v2403_v4, 0.0 }
 0x328   :  { %v2406_v15 = vadd.f32 %v20466_v55, %v1861_v13  ;;  %v2408_v16 = vadd.f32 %v20469_v56, %v2074_v14  ;;  %v2546_v21 = vmax.f32 %v2402_v7, 0.0  ;;  %v2548_v22 = vmax.f32 %v2404_v8, 0.0 }
 0x329   :  { %v2549_v19 = vmax.f32 %v2405_v11, 0.0  ;;  %v2551_v20 = vmax.f32 %v2407_v12, 0.0 }
 0x32a   :  { %v2550_v23 = vmax.f32 %v2406_v15, 0.0  ;;  %v2552_v24 = vmax.f32 %v2408_v16, 0.0 }
 0x32b   :  { %v18393_v25 = vpack.c.bf16 %v2549_v19, %v2545_v17  ;;  %v18467_v26 = vpack.c.bf16 %v2551_v20, %v2547_v18 }
 0x32c   :  { %v18391_v27 = vpack.c.bf16 %v2550_v23, %v2546_v21  ;;  %v18465_v28 = vpack.c.bf16 %v2552_v24, %v2548_v22  ;;  %v1865_v29 = vpop.f32.mrb[28].mxu0  ;;  %v2078_v30 = vpop.f32.mrb[28].mxu1 }
 0x32d   :  { %v2409_v31 = vadd.f32 %v20460_v53, %v1865_v29  ;;  %v2411_v32 = vadd.f32 %v20463_v54, %v2078_v30  ;;  %v1867_v33 = vpop.f32.mrb[29].mxu0  ;;  %v2080_v34 = vpop.f32.mrb[29].mxu1 }
 0x32e   :  { %v2410_v35 = vadd.f32 %v20466_v55, %v1867_v33  ;;  %v2412_v36 = vadd.f32 %v20469_v56, %v2080_v34  ;;  %v1869_v37 = vpop.f32.mrb[30].mxu0  ;;  %v2082_v38 = vpop.f32.mrb[30].mxu1  ;;  %18392 = vmatprep.subr.bf16.mxu0 %v18391_v27  ;;  %18466 = vmatprep.subr.bf16.mxu1 %v18465_v28 }
 0x32f   :  { %v2413_v39 = vadd.f32 %v20460_v53, %v1869_v37  ;;  %v2415_v40 = vadd.f32 %v20463_v54, %v2082_v38  ;;  %v1871_v41 = vpop.f32.mrb[31].mxu0  ;;  %v2084_v42 = vpop.f32.mrb[31].mxu1  ;;  %18394 = vmatpush1.bf16.msra.mxu0 %v18393_v25  ;;  %18468 = vmatpush1.bf16.msra.mxu1 %v18467_v26  ;;  %v2553_v45 = vmax.f32 %v2409_v31, 0.0  ;;  %v2555_v46 = vmax.f32 %v2411_v32, 0.0 }
 0x330   :  { %v2414_v43 = vadd.f32 %v20466_v55, %v1871_v41  ;;  %v2416_v44 = vadd.f32 %v20469_v56, %v2084_v42  ;;  %v2554_v58 = vmax.f32 %v2410_v35, 0.0  ;;  %v2556_v59 = vmax.f32 %v2412_v36, 0.0 }
 0x331   :  { %v2557_v50 = vmax.f32 %v2413_v39, 0.0  ;;  %v2559_v57 = vmax.f32 %v2415_v40, 0.0 }
 0x332   :  { %v2558_v60 = vmax.f32 %v2414_v43, 0.0  ;;  %v2560_v61 = vmax.f32 %v2416_v44, 0.0 }
 0x333   :  { %v18397_v62 = vpack.c.bf16 %v2557_v50, %v2553_v45  ;;  %v18471_v63 = vpack.c.bf16 %v2559_v57, %v2555_v46 }
 0x334   :  { %v18395_v1 = vpack.c.bf16 %v2558_v60, %v2554_v58  ;;  %v18469_v2 = vpack.c.bf16 %v2560_v61, %v2556_v59  ;;  %v1875_v3 = vpop.f32.mrb[32].mxu0  ;;  %v2088_v4 = vpop.f32.mrb[32].mxu1 }
 0x335   :  { %v2417_v5 = vadd.f32 %v20460_v53, %v1875_v3  ;;  %v2419_v6 = vadd.f32 %v20463_v54, %v2088_v4  ;;  %v1877_v7 = vpop.f32.mrb[33].mxu0  ;;  %v2090_v8 = vpop.f32.mrb[33].mxu1 }
 0x336   :  { %v2418_v9 = vadd.f32 %v20466_v55, %v1877_v7  ;;  %v2420_v10 = vadd.f32 %v20469_v56, %v2090_v8  ;;  %v1879_v11 = vpop.f32.mrb[34].mxu0  ;;  %v2092_v12 = vpop.f32.mrb[34].mxu1  ;;  %18396 = vmatprep.subr.bf16.mxu0 %v18395_v1  ;;  %18470 = vmatprep.subr.bf16.mxu1 %v18469_v2 }
 0x337   :  { %v2421_v13 = vadd.f32 %v20460_v53, %v1879_v11  ;;  %v2423_v14 = vadd.f32 %v20463_v54, %v2092_v12  ;;  %v1881_v15 = vpop.f32.mrb[35].mxu0  ;;  %v2094_v16 = vpop.f32.mrb[35].mxu1  ;;  %18398 = vmatpush1.bf16.msra.mxu0 %v18397_v62  ;;  %18472 = vmatpush1.bf16.msra.mxu1 %v18471_v63  ;;  %v2561_v19 = vmax.f32 %v2417_v5, 0.0  ;;  %v2563_v20 = vmax.f32 %v2419_v6, 0.0 }
 0x338   :  { %v2422_v17 = vadd.f32 %v20466_v55, %v1881_v15  ;;  %v2424_v18 = vadd.f32 %v20469_v56, %v2094_v16  ;;  %v2562_v23 = vmax.f32 %v2418_v9, 0.0  ;;  %v2564_v24 = vmax.f32 %v2420_v10, 0.0 }
 0x339   :  { %v2565_v21 = vmax.f32 %v2421_v13, 0.0  ;;  %v2567_v22 = vmax.f32 %v2423_v14, 0.0 }
 0x33a   :  { %v2566_v25 = vmax.f32 %v2422_v17, 0.0  ;;  %v2568_v26 = vmax.f32 %v2424_v18, 0.0 }
 0x33b   :  { %v18401_v27 = vpack.c.bf16 %v2565_v21, %v2561_v19  ;;  %v18475_v28 = vpack.c.bf16 %v2567_v22, %v2563_v20 }
 0x33c   :  { %v18399_v29 = vpack.c.bf16 %v2566_v25, %v2562_v23  ;;  %v18473_v30 = vpack.c.bf16 %v2568_v26, %v2564_v24  ;;  %v1885_v31 = vpop.f32.mrb[36].mxu0  ;;  %v2098_v32 = vpop.f32.mrb[36].mxu1 }
 0x33d   :  { %v2425_v33 = vadd.f32 %v20460_v53, %v1885_v31  ;;  %v2427_v34 = vadd.f32 %v20463_v54, %v2098_v32  ;;  %v1887_v35 = vpop.f32.mrb[37].mxu0  ;;  %v2100_v36 = vpop.f32.mrb[37].mxu1 }
 0x33e   :  { %v2426_v37 = vadd.f32 %v20466_v55, %v1887_v35  ;;  %v2428_v38 = vadd.f32 %v20469_v56, %v2100_v36  ;;  %v1889_v39 = vpop.f32.mrb[38].mxu0  ;;  %v2102_v40 = vpop.f32.mrb[38].mxu1  ;;  %18400 = vmatprep.subr.bf16.mxu0 %v18399_v29  ;;  %18474 = vmatprep.subr.bf16.mxu1 %v18473_v30 }
 0x33f   :  { %v2429_v41 = vadd.f32 %v20460_v53, %v1889_v39  ;;  %v2431_v42 = vadd.f32 %v20463_v54, %v2102_v40  ;;  %v1891_v43 = vpop.f32.mrb[39].mxu0  ;;  %v2104_v44 = vpop.f32.mrb[39].mxu1  ;;  %18402 = vmatpush1.bf16.msra.mxu0 %v18401_v27  ;;  %18476 = vmatpush1.bf16.msra.mxu1 %v18475_v28  ;;  %v2569_v50 = vmax.f32 %v2425_v33, 0.0  ;;  %v2571_v57 = vmax.f32 %v2427_v34, 0.0 }
 0x340   :  { %v2430_v45 = vadd.f32 %v20466_v55, %v1891_v43  ;;  %v2432_v46 = vadd.f32 %v20469_v56, %v2104_v44  ;;  %v2570_v60 = vmax.f32 %v2426_v37, 0.0  ;;  %v2572_v61 = vmax.f32 %v2428_v38, 0.0 }
 0x341   :  { %v2573_v58 = vmax.f32 %v2429_v41, 0.0  ;;  %v2575_v59 = vmax.f32 %v2431_v42, 0.0 }
 0x342   :  { %v2574_v62 = vmax.f32 %v2430_v45, 0.0  ;;  %v2576_v63 = vmax.f32 %v2432_v46, 0.0 }
 0x343   :  { %v18405_v1 = vpack.c.bf16 %v2573_v58, %v2569_v50  ;;  %v18479_v2 = vpack.c.bf16 %v2575_v59, %v2571_v57 }
 0x344   :  { %v18403_v3 = vpack.c.bf16 %v2574_v62, %v2570_v60  ;;  %v18477_v4 = vpack.c.bf16 %v2576_v63, %v2572_v61  ;;  %v1895_v5 = vpop.f32.mrb[40].mxu0  ;;  %v2108_v6 = vpop.f32.mrb[40].mxu1 }
 0x345   :  { %v2433_v7 = vadd.f32 %v20460_v53, %v1895_v5  ;;  %v2435_v8 = vadd.f32 %v20463_v54, %v2108_v6  ;;  %v1897_v9 = vpop.f32.mrb[41].mxu0  ;;  %v2110_v10 = vpop.f32.mrb[41].mxu1 }
 0x346   :  { %v2434_v11 = vadd.f32 %v20466_v55, %v1897_v9  ;;  %v2436_v12 = vadd.f32 %v20469_v56, %v2110_v10  ;;  %v1899_v13 = vpop.f32.mrb[42].mxu0  ;;  %v2112_v14 = vpop.f32.mrb[42].mxu1  ;;  %18404 = vmatprep.subr.bf16.mxu0 %v18403_v3  ;;  %18478 = vmatprep.subr.bf16.mxu1 %v18477_v4 }
 0x347   :  { %v2437_v15 = vadd.f32 %v20460_v53, %v1899_v13  ;;  %v2439_v16 = vadd.f32 %v20463_v54, %v2112_v14  ;;  %v1901_v17 = vpop.f32.mrb[43].mxu0  ;;  %v2114_v18 = vpop.f32.mrb[43].mxu1  ;;  %18406 = vmatpush1.bf16.msra.mxu0 %v18405_v1  ;;  %18480 = vmatpush1.bf16.msra.mxu1 %v18479_v2  ;;  %v2577_v21 = vmax.f32 %v2433_v7, 0.0  ;;  %v2579_v22 = vmax.f32 %v2435_v8, 0.0 }
 0x348   :  { %v2438_v19 = vadd.f32 %v20466_v55, %v1901_v17  ;;  %v2440_v20 = vadd.f32 %v20469_v56, %v2114_v18  ;;  %v2578_v25 = vmax.f32 %v2434_v11, 0.0  ;;  %v2580_v26 = vmax.f32 %v2436_v12, 0.0 }
 0x349   :  { %v2581_v23 = vmax.f32 %v2437_v15, 0.0  ;;  %v2583_v24 = vmax.f32 %v2439_v16, 0.0 }
 0x34a   :  { %v2582_v27 = vmax.f32 %v2438_v19, 0.0  ;;  %v2584_v28 = vmax.f32 %v2440_v20, 0.0 }
 0x34b   :  { %v18409_v29 = vpack.c.bf16 %v2581_v23, %v2577_v21  ;;  %v18483_v30 = vpack.c.bf16 %v2583_v24, %v2579_v22 }
 0x34c   :  { %v18407_v31 = vpack.c.bf16 %v2582_v27, %v2578_v25  ;;  %v18481_v32 = vpack.c.bf16 %v2584_v28, %v2580_v26  ;;  %v1905_v33 = vpop.f32.mrb[44].mxu0  ;;  %v2118_v34 = vpop.f32.mrb[44].mxu1 }
 0x34d   :  { %v2441_v35 = vadd.f32 %v20460_v53, %v1905_v33  ;;  %v2443_v36 = vadd.f32 %v20463_v54, %v2118_v34  ;;  %v1907_v37 = vpop.f32.mrb[45].mxu0  ;;  %v2120_v38 = vpop.f32.mrb[45].mxu1 }
 0x34e   :  { %v2442_v39 = vadd.f32 %v20466_v55, %v1907_v37  ;;  %v2444_v40 = vadd.f32 %v20469_v56, %v2120_v38  ;;  %v1909_v41 = vpop.f32.mrb[46].mxu0  ;;  %v2122_v42 = vpop.f32.mrb[46].mxu1  ;;  %18408 = vmatprep.subr.bf16.mxu0 %v18407_v31  ;;  %18482 = vmatprep.subr.bf16.mxu1 %v18481_v32 }
 0x34f   :  { %v2445_v43 = vadd.f32 %v20460_v53, %v1909_v41  ;;  %v2447_v44 = vadd.f32 %v20463_v54, %v2122_v42  ;;  %v1911_v45 = vpop.f32.mrb[47].mxu0  ;;  %v2124_v46 = vpop.f32.mrb[47].mxu1  ;;  %18410 = vmatpush1.bf16.msra.mxu0 %v18409_v29  ;;  %18484 = vmatpush1.bf16.msra.mxu1 %v18483_v30  ;;  %v2585_v58 = vmax.f32 %v2441_v35, 0.0  ;;  %v2587_v59 = vmax.f32 %v2443_v36, 0.0 }
 0x350   :  { %v2446_v50 = vadd.f32 %v20466_v55, %v1911_v45  ;;  %v2448_v57 = vadd.f32 %v20469_v56, %v2124_v46  ;;  %v2586_v62 = vmax.f32 %v2442_v39, 0.0  ;;  %v2588_v63 = vmax.f32 %v2444_v40, 0.0 }
 0x351   :  { %v2589_v60 = vmax.f32 %v2445_v43, 0.0  ;;  %v2591_v61 = vmax.f32 %v2447_v44, 0.0 }
 0x352   :  { %v2590_v1 = vmax.f32 %v2446_v50, 0.0  ;;  %v2592_v2 = vmax.f32 %v2448_v57, 0.0 }
 0x353   :  { %v18413_v3 = vpack.c.bf16 %v2589_v60, %v2585_v58  ;;  %v18487_v4 = vpack.c.bf16 %v2591_v61, %v2587_v59 }
 0x354   :  { %v18411_v5 = vpack.c.bf16 %v2590_v1, %v2586_v62  ;;  %v18485_v6 = vpack.c.bf16 %v2592_v2, %v2588_v63  ;;  %v1915_v7 = vpop.f32.mrb[48].mxu0  ;;  %v2128_v8 = vpop.f32.mrb[48].mxu1 }
 0x355   :  { %v2449_v9 = vadd.f32 %v20460_v53, %v1915_v7  ;;  %v2451_v10 = vadd.f32 %v20463_v54, %v2128_v8  ;;  %v1917_v11 = vpop.f32.mrb[49].mxu0  ;;  %v2130_v12 = vpop.f32.mrb[49].mxu1 }
 0x356   :  { %v2450_v13 = vadd.f32 %v20466_v55, %v1917_v11  ;;  %v2452_v14 = vadd.f32 %v20469_v56, %v2130_v12  ;;  %v1919_v15 = vpop.f32.mrb[50].mxu0  ;;  %v2132_v16 = vpop.f32.mrb[50].mxu1  ;;  %18412 = vmatprep.subr.bf16.mxu0 %v18411_v5  ;;  %18486 = vmatprep.subr.bf16.mxu1 %v18485_v6 }
 0x357   :  { %v2453_v17 = vadd.f32 %v20460_v53, %v1919_v15  ;;  %v2455_v18 = vadd.f32 %v20463_v54, %v2132_v16  ;;  %v1921_v19 = vpop.f32.mrb[51].mxu0  ;;  %v2134_v20 = vpop.f32.mrb[51].mxu1  ;;  %18414 = vmatpush1.bf16.msra.mxu0 %v18413_v3  ;;  %18488 = vmatpush1.bf16.msra.mxu1 %v18487_v4  ;;  %v2593_v23 = vmax.f32 %v2449_v9, 0.0  ;;  %v2595_v24 = vmax.f32 %v2451_v10, 0.0 }
 0x358   :  { %v2454_v21 = vadd.f32 %v20466_v55, %v1921_v19  ;;  %v2456_v22 = vadd.f32 %v20469_v56, %v2134_v20  ;;  %v2594_v27 = vmax.f32 %v2450_v13, 0.0  ;;  %v2596_v28 = vmax.f32 %v2452_v14, 0.0 }
 0x359   :  { %v2597_v25 = vmax.f32 %v2453_v17, 0.0  ;;  %v2599_v26 = vmax.f32 %v2455_v18, 0.0 }
 0x35a   :  { %v2598_v29 = vmax.f32 %v2454_v21, 0.0  ;;  %v2600_v30 = vmax.f32 %v2456_v22, 0.0 }
 0x35b   :  { %v18417_v31 = vpack.c.bf16 %v2597_v25, %v2593_v23  ;;  %v18491_v32 = vpack.c.bf16 %v2599_v26, %v2595_v24 }
 0x35c   :  { %v18415_v33 = vpack.c.bf16 %v2598_v29, %v2594_v27  ;;  %v18489_v34 = vpack.c.bf16 %v2600_v30, %v2596_v28  ;;  %v1925_v35 = vpop.f32.mrb[52].mxu0  ;;  %v2138_v36 = vpop.f32.mrb[52].mxu1 }
 0x35d   :  { %v2457_v37 = vadd.f32 %v20460_v53, %v1925_v35  ;;  %v2459_v38 = vadd.f32 %v20463_v54, %v2138_v36  ;;  %v1927_v39 = vpop.f32.mrb[53].mxu0  ;;  %v2140_v40 = vpop.f32.mrb[53].mxu1 }
 0x35e   :  { %v2458_v41 = vadd.f32 %v20466_v55, %v1927_v39  ;;  %v2460_v42 = vadd.f32 %v20469_v56, %v2140_v40  ;;  %v1929_v43 = vpop.f32.mrb[54].mxu0  ;;  %v2142_v44 = vpop.f32.mrb[54].mxu1  ;;  %18416 = vmatprep.subr.bf16.mxu0 %v18415_v33  ;;  %18490 = vmatprep.subr.bf16.mxu1 %v18489_v34 }
 0x35f   :  { %v2461_v45 = vadd.f32 %v20460_v53, %v1929_v43  ;;  %v2463_v46 = vadd.f32 %v20463_v54, %v2142_v44  ;;  %v1931_v50 = vpop.f32.mrb[55].mxu0  ;;  %v2144_v57 = vpop.f32.mrb[55].mxu1  ;;  %18418 = vmatpush1.bf16.msra.mxu0 %v18417_v31  ;;  %18492 = vmatpush1.bf16.msra.mxu1 %v18491_v32  ;;  %v2601_v60 = vmax.f32 %v2457_v37, 0.0  ;;  %v2603_v61 = vmax.f32 %v2459_v38, 0.0 }
 0x360   :  { %v2462_v58 = vadd.f32 %v20466_v55, %v1931_v50  ;;  %v2464_v59 = vadd.f32 %v20469_v56, %v2144_v57  ;;  %v2602_v1 = vmax.f32 %v2458_v41, 0.0  ;;  %v2604_v2 = vmax.f32 %v2460_v42, 0.0 }
 0x361   :  { %v2605_v62 = vmax.f32 %v2461_v45, 0.0  ;;  %v2607_v63 = vmax.f32 %v2463_v46, 0.0 }
 0x362   :  { %v2606_v3 = vmax.f32 %v2462_v58, 0.0  ;;  %v2608_v4 = vmax.f32 %v2464_v59, 0.0 }
 0x363   :  { %v18421_v5 = vpack.c.bf16 %v2605_v62, %v2601_v60  ;;  %v18495_v6 = vpack.c.bf16 %v2607_v63, %v2603_v61 }
 0x364   :  { %v18419_v7 = vpack.c.bf16 %v2606_v3, %v2602_v1  ;;  %v18493_v8 = vpack.c.bf16 %v2608_v4, %v2604_v2  ;;  %v1935_v9 = vpop.f32.mrb[56].mxu0  ;;  %v2148_v10 = vpop.f32.mrb[56].mxu1 }
 0x365   :  { %v2465_v11 = vadd.f32 %v20460_v53, %v1935_v9  ;;  %v2467_v12 = vadd.f32 %v20463_v54, %v2148_v10  ;;  %v1937_v13 = vpop.f32.mrb[57].mxu0  ;;  %v2150_v14 = vpop.f32.mrb[57].mxu1 }
 0x366   :  { %v2466_v15 = vadd.f32 %v20466_v55, %v1937_v13  ;;  %v2468_v16 = vadd.f32 %v20469_v56, %v2150_v14  ;;  %v1939_v17 = vpop.f32.mrb[58].mxu0  ;;  %v2152_v18 = vpop.f32.mrb[58].mxu1  ;;  %18420 = vmatprep.subr.bf16.mxu0 %v18419_v7  ;;  %18494 = vmatprep.subr.bf16.mxu1 %v18493_v8 }
 0x367   :  { %v2469_v19 = vadd.f32 %v20460_v53, %v1939_v17  ;;  %v2471_v20 = vadd.f32 %v20463_v54, %v2152_v18  ;;  %v1941_v21 = vpop.f32.mrb[59].mxu0  ;;  %v2154_v22 = vpop.f32.mrb[59].mxu1  ;;  %18422 = vmatpush1.bf16.msra.mxu0 %v18421_v5  ;;  %18496 = vmatpush1.bf16.msra.mxu1 %v18495_v6  ;;  %v2609_v25 = vmax.f32 %v2465_v11, 0.0  ;;  %v2611_v26 = vmax.f32 %v2467_v12, 0.0 }
 0x368   :  { %v2470_v23 = vadd.f32 %v20466_v55, %v1941_v21  ;;  %v2472_v24 = vadd.f32 %v20469_v56, %v2154_v22  ;;  %v2610_v29 = vmax.f32 %v2466_v15, 0.0  ;;  %v2612_v30 = vmax.f32 %v2468_v16, 0.0 }
 0x369   :  { %v2613_v27 = vmax.f32 %v2469_v19, 0.0  ;;  %v2615_v28 = vmax.f32 %v2471_v20, 0.0 }
 0x36a   :  { %v2614_v31 = vmax.f32 %v2470_v23, 0.0  ;;  %v2616_v32 = vmax.f32 %v2472_v24, 0.0 }
 0x36b   :  { %v18425_v33 = vpack.c.bf16 %v2613_v27, %v2609_v25  ;;  %v18499_v34 = vpack.c.bf16 %v2615_v28, %v2611_v26  ;;  %v2641_v25 = vld [vmem:[%s21239_s4] sm:$0xff] }
 0x36c   :  { %v18423_v35 = vpack.c.bf16 %v2614_v31, %v2610_v29  ;;  %v18497_v36 = vpack.c.bf16 %v2616_v32, %v2612_v30  ;;  %v1945_v37 = vpop.f32.mrb[60].mxu0  ;;  %v2158_v38 = vpop.f32.mrb[60].mxu1  ;;  %v2645_v28 = vld [vmem:[%s21239_s4 + $0x20] sm:$0xff] }
 0x36d   :  { %v2473_v39 = vadd.f32 %v20460_v53, %v1945_v37  ;;  %v2475_v40 = vadd.f32 %v20463_v54, %v2158_v38  ;;  %v1947_v41 = vpop.f32.mrb[61].mxu0  ;;  %v2160_v42 = vpop.f32.mrb[61].mxu1 }
 0x36e   :  { %v2474_v43 = vadd.f32 %v20466_v55, %v1947_v41  ;;  %v2476_v44 = vadd.f32 %v20469_v56, %v2160_v42  ;;  %v1949_v45 = vpop.f32.mrb[62].mxu0  ;;  %v2162_v46 = vpop.f32.mrb[62].mxu1  ;;  %18424 = vmatprep.subr.bf16.mxu0 %v18423_v35  ;;  %18498 = vmatprep.subr.bf16.mxu1 %v18497_v36 }
 0x36f   :  { %v2477_v50 = vadd.f32 %v20460_v53, %v1949_v45  ;;  %v2479_v57 = vadd.f32 %v20463_v54, %v2162_v46  ;;  %v1951_v58 = vpop.f32.mrb[63].mxu0  ;;  %v2164_v59 = vpop.f32.mrb[63].mxu1  ;;  %18426 = vmatpush1.bf16.msra.mxu0 %v18425_v33  ;;  %18500 = vmatpush1.bf16.msra.mxu1 %v18499_v34  ;;  %v2617_v62 = vmax.f32 %v2473_v39, 0.0  ;;  %v2619_v63 = vmax.f32 %v2475_v40, 0.0 }
 0x370   :  { %v2478_v60 = vadd.f32 %v20466_v55, %v1951_v58  ;;  %v2480_v61 = vadd.f32 %v20469_v56, %v2164_v59  ;;  %v2618_v3 = vmax.f32 %v2474_v43, 0.0  ;;  %v2620_v4 = vmax.f32 %v2476_v44, 0.0 }
 0x371   :  { %v2621_v1 = vmax.f32 %v2477_v50, 0.0  ;;  %v2623_v2 = vmax.f32 %v2479_v57, 0.0  ;;  %v2644_v50 = vld [vmem:[%s21239_s4 + $0x18] sm:$0xff] }
 0x372   :  { %v2622_v5 = vmax.f32 %v2478_v60, 0.0  ;;  %v2624_v6 = vmax.f32 %v2480_v61, 0.0 }
 0x373   :  { %v18429_v7 = vpack.c.bf16 %v2621_v1, %v2617_v62  ;;  %v18503_v8 = vpack.c.bf16 %v2623_v2, %v2619_v63 }
 0x374   :  { %v18427_v9 = vpack.c.bf16 %v2622_v5, %v2618_v3  ;;  %v18501_v10 = vpack.c.bf16 %v2624_v6, %v2620_v4  ;;  %v1955_v11 = vpop.f32.mrb[64].mxu0  ;;  %v2168_v12 = vpop.f32.mrb[64].mxu1  ;;  %v2991_v4 = vld [vmem:[%s21240_s5 + $0x80] sm:$0xff] }
 0x375   :  { %v2481_v13 = vadd.f32 %v20460_v53, %v1955_v11  ;;  %v2483_v14 = vadd.f32 %v20463_v54, %v2168_v12  ;;  %v1957_v15 = vpop.f32.mrb[65].mxu0  ;;  %v2170_v16 = vpop.f32.mrb[65].mxu1 }
 0x376   :  { %v2482_v17 = vadd.f32 %v20466_v55, %v1957_v15  ;;  %v2484_v18 = vadd.f32 %v20469_v56, %v2170_v16  ;;  %v1959_v19 = vpop.f32.mrb[66].mxu0  ;;  %v2172_v20 = vpop.f32.mrb[66].mxu1  ;;  %18428 = vmatprep.subr.bf16.mxu0 %v18427_v9  ;;  %18502 = vmatprep.subr.bf16.mxu1 %v18501_v10  ;;  %v3015_v15 = vld [vmem:[%s21240_s5 + $0x140] sm:$0xff] }
 0x377   :  { %v2485_v21 = vadd.f32 %v20460_v53, %v1959_v19  ;;  %v2487_v22 = vadd.f32 %v20463_v54, %v2172_v20  ;;  %v1961_v23 = vpop.f32.mrb[67].mxu0  ;;  %v2174_v24 = vpop.f32.mrb[67].mxu1  ;;  %18430 = vmatpush1.bf16.msra.mxu0 %v18429_v7  ;;  %18504 = vmatpush1.bf16.msra.mxu1 %v18503_v8  ;;  %v2625_v29 = vmax.f32 %v2481_v13, 0.0  ;;  %v2627_v30 = vmax.f32 %v2483_v14, 0.0  ;;  %v2975_v19 = vld [vmem:[%s21240_s5] sm:$0xff]  ;;  %v2976_v20 = vld [vmem:[%s21240_s5 + $0x8] sm:$0xff] }
 0x378   :  { %v2486_v26 = vadd.f32 %v20466_v55, %v1961_v23  ;;  %v2488_v27 = vadd.f32 %v20469_v56, %v2174_v24  ;;  %v2626_v33 = vmax.f32 %v2482_v17, 0.0  ;;  %v2628_v34 = vmax.f32 %v2484_v18, 0.0  ;;  %v3008_v23 = vld [vmem:[%s21240_s5 + $0x108] sm:$0xff]  ;;  %v2993_v24 = vld [vmem:[%s21240_s5 + $0x90] sm:$0xff] }
 0x379   :  { %v2629_v31 = vmax.f32 %v2485_v21, 0.0  ;;  %v2631_v32 = vmax.f32 %v2487_v22, 0.0  ;;  %v19612_v8 = vmov 0.0   ;;  %v3007_v22 = vld [vmem:[%s21240_s5 + $0x100] sm:$0xff] }
 0x37a   :  { %v2630_v35 = vmax.f32 %v2486_v26, 0.0  ;;  %v2632_v36 = vmax.f32 %v2488_v27, 0.0  ;;  %2732 = vmatmul.mubr.f32.vlgmr.msra.gmra.mrb[72].mxu0 %v2641_v25  ;;  %2886 = vmatmul.mubr.f32.vlgmr.msra.gmra.mrb[72].mxu1 %v2641_v25  ;;  %v2994_v25 = vld [vmem:[%s21240_s5 + $0x98] sm:$0xff]  ;;  %v3025_v26 = vld [vmem:[%s21240_s5 + $0x190] sm:$0xff] }
 0x37b   :  { %v18433_v37 = vpack.c.bf16 %v2629_v31, %v2625_v29  ;;  %v18507_v38 = vpack.c.bf16 %v2631_v32, %v2627_v30  ;;  %2737 = vmatprep.mubr.f32.mxu0 %v2645_v28  ;;  %2891 = vmatprep.mubr.f32.mxu1 %v2645_v28  ;;  %v3026_v27 = vld [vmem:[%s21240_s5 + $0x198] sm:$0xff]  ;;  %v2643_v28 = vld [vmem:[%s21239_s4 + $0x10] sm:$0xff]  ;;  %v18517_v29 = vpack.c.bf16 %v2976_v20, %v2975_v19 }
 0x37c   :  { %v18431_v39 = vpack.c.bf16 %v2630_v35, %v2626_v33  ;;  %v18505_v40 = vpack.c.bf16 %v2632_v36, %v2628_v34  ;;  %v1965_v41 = vpop.f32.mrb[68].mxu0  ;;  %v2178_v42 = vpop.f32.mrb[68].mxu1  ;;  %v18549_v30 = vpack.c.bf16 %v3008_v23, %v3007_v22  ;;  %v2977_v31 = vld [vmem:[%s21240_s5 + $0x10] sm:$0xff]  ;;  %v2978_v32 = vld [vmem:[%s21240_s5 + $0x18] sm:$0xff]  ;;  %v18519_v33 = vpack.c.bf16 %v2994_v25, %v2993_v24 }
 0x37d   :  { %v2489_v43 = vadd.f32 %v20460_v53, %v1965_v41  ;;  %v2491_v44 = vadd.f32 %v20463_v54, %v2178_v42  ;;  %v1967_v45 = vpop.f32.mrb[69].mxu0  ;;  %v2180_v46 = vpop.f32.mrb[69].mxu1  ;;  %v18551_v34 = vpack.c.bf16 %v3026_v27, %v3025_v26  ;;  %v3009_v35 = vld [vmem:[%s21240_s5 + $0x110] sm:$0xff]  ;;  %v3010_v36 = vld [vmem:[%s21240_s5 + $0x118] sm:$0xff]  ;;  %v2646_v41 = vld [vmem:[%s21239_s4 + $0x28] sm:$0xff]  ;;  %v18521_v42 = vpack.c.bf16 %v2978_v32, %v2977_v31 }
 0x37e   :  { %v2490_v57 = vadd.f32 %v20466_v55, %v1967_v45  ;;  %v2492_v58 = vadd.f32 %v20469_v56, %v2180_v46  ;;  %v1969_v59 = vpop.f32.mrb[70].mxu0  ;;  %v2182_v60 = vpop.f32.mrb[70].mxu1  ;;  %18432 = vmatprep.subr.bf16.mxu0 %v18431_v39  ;;  %18506 = vmatprep.subr.bf16.mxu1 %v18505_v40  ;;  %v3027_v39 = vld [vmem:[%s21240_s5 + $0x1a0] sm:$0xff]  ;;  %v3028_v40 = vld [vmem:[%s21240_s5 + $0x1a8] sm:$0xff]  ;;  %v3033_v19 = vld [vmem:[%s21240_s5 + $0x1d0] sm:$0xff] }
 0x37f   :  { %v2493_v61 = vadd.f32 %v20460_v53, %v1969_v59  ;;  %v2495_v62 = vadd.f32 %v20463_v54, %v2182_v60  ;;  %v1971_v63 = vpop.f32.mrb[71].mxu0  ;;  %v2184_v1 = vpop.f32.mrb[71].mxu1  ;;  %18434 = vmatpush1.bf16.msra.mxu0 %v18433_v37  ;;  %18508 = vmatpush1.bf16.msra.mxu1 %v18507_v38  ;;  %v2992_v53 = vld [vmem:[%s21240_s5 + $0x88] sm:$0xff]  ;;  %v2633_v54 = vmax.f32 %v2489_v43, 0.0  ;;  %v2635_v5 = vmax.f32 %v2491_v44, 0.0  ;;  %v2995_v37 = vld [vmem:[%s21240_s5 + $0xa0] sm:$0xff] }
 0x380   :  { %v2494_v2 = vadd.f32 %v20466_v55, %v1971_v63  ;;  %v2496_v3 = vadd.f32 %v20469_v56, %v2184_v1  ;;  %2738 = vmatmul.mubr.f32.gmra.mrb[74].mxu0 %v2644_v50  ;;  %2892 = vmatmul.mubr.f32.gmra.mrb[74].mxu1 %v2644_v50  ;;  %v3023_v55 = vld [vmem:[%s21240_s5 + $0x180] sm:$0xff]  ;;  %v3024_v56 = vld [vmem:[%s21240_s5 + $0x188] sm:$0xff]  ;;  %v2634_v9 = vmax.f32 %v2490_v57, 0.0  ;;  %v2636_v10 = vmax.f32 %v2492_v58, 0.0  ;;  %v2997_v59 = vld [vmem:[%s21240_s5 + $0xb0] sm:$0xff] }
 0x381   :  { %v2637_v6 = vmax.f32 %v2493_v61, 0.0  ;;  %v2639_v7 = vmax.f32 %v2495_v62, 0.0  ;;  %2808 = vmatprep.mubr.f32.mxu0 %v19612_v8  ;;  %2962 = vmatprep.mubr.f32.mxu1 %v19612_v8  ;;  %v18515_v18 = vpack.c.bf16 %v2992_v53, %v2991_v4  ;;  %v18547_v21 = vpack.c.bf16 %v3024_v56, %v3023_v55  ;;  %v2996_v38 = vld [vmem:[%s21240_s5 + $0xa8] sm:$0xff]  ;;  %v2979_v44 = vld [vmem:[%s21240_s5 + $0x20] sm:$0xff]  ;;  %v2998_v60 = vld [vmem:[%s21240_s5 + $0xb8] sm:$0xff] }
 0x382   :  { %v2638_v11 = vmax.f32 %v2494_v2, 0.0  ;;  %v2640_v12 = vmax.f32 %v2496_v3, 0.0  ;;  %v18553_v43 = vpack.c.bf16 %v3010_v36, %v3009_v35  ;;  %v2980_v45 = vld [vmem:[%s21240_s5 + $0x28] sm:$0xff]  ;;  %v18523_v46 = vpack.c.bf16 %v2996_v38, %v2995_v37  ;;  %v3011_v57 = vld [vmem:[%s21240_s5 + $0x120] sm:$0xff]  ;;  %v3029_v61 = vld [vmem:[%s21240_s5 + $0x1b0] sm:$0xff] }
 0x383   :  { %v18438_v13 = vpack.c.bf16 %v2637_v6, %v2633_v54  ;;  %v18512_v14 = vpack.c.bf16 %v2639_v7, %v2635_v5  ;;  %v18555_v50 = vpack.c.bf16 %v3028_v40, %v3027_v39  ;;  %v3012_v58 = vld [vmem:[%s21240_s5 + $0x128] sm:$0xff]  ;;  %v3030_v62 = vld [vmem:[%s21240_s5 + $0x1b8] sm:$0xff]  ;;  %v18525_v63 = vpack.c.bf16 %v2980_v45, %v2979_v44  ;;  %v2981_v2 = vld [vmem:[%s21240_s5 + $0x30] sm:$0xff] }
 0x384   :  { %v18435_v16 = vpack.c.bf16 %v2638_v11, %v2634_v9  ;;  %v18509_v17 = vpack.c.bf16 %v2640_v12, %v2636_v10  ;;  %v18557_v1 = vpack.c.bf16 %v3012_v58, %v3011_v57  ;;  %v2982_v3 = vld [vmem:[%s21240_s5 + $0x38] sm:$0xff]  ;;  %v18527_v4 = vpack.c.bf16 %v2998_v60, %v2997_v59  ;;  %v3013_v54 = vld [vmem:[%s21240_s5 + $0x130] sm:$0xff]  ;;  %v2999_v6 = vld [vmem:[%s21240_s5 + $0xc0] sm:$0xff] }
 0x385   :  { %v18559_v53 = vpack.c.bf16 %v3030_v62, %v3029_v61  ;;  %v3014_v5 = vld [vmem:[%s21240_s5 + $0x138] sm:$0xff]  ;;  %v3000_v7 = vld [vmem:[%s21240_s5 + $0xc8] sm:$0xff]  ;;  %v3031_v55 = vld [vmem:[%s21240_s5 + $0x1c0] sm:$0xff]  ;;  %v18529_v9 = vpack.c.bf16 %v2982_v3, %v2981_v2 }
 0x386   :  { %18437 = vmatprep.subr.msk.bf16.mxu0 %vm20642_vm4, %v18435_v16  ;;  %18511 = vmatprep.subr.msk.bf16.mxu1 %vm20642_vm4, %v18509_v17  ;;  %v3032_v56 = vld [vmem:[%s21240_s5 + $0x1c8] sm:$0xff]  ;;  %v18561_v10 = vpack.c.bf16 %v3014_v5, %v3013_v54  ;;  %v2983_v11 = vld [vmem:[%s21240_s5 + $0x40] sm:$0xff]  ;;  %v3001_v17 = vld [vmem:[%s21240_s5 + $0xd0] sm:$0xff] }
 0x387   :  { %18440 = vmatpush1.bf16.msk.msra.mxu0 %vm20642_vm4, %v18438_v13  ;;  %18514 = vmatpush1.bf16.msk.msra.mxu1 %vm20642_vm4, %v18512_v14  ;;  %v2984_v12 = vld [vmem:[%s21240_s5 + $0x48] sm:$0xff]  ;;  %v18531_v13 = vpack.c.bf16 %v3000_v7, %v2999_v6  ;;  %v18563_v14 = vpack.c.bf16 %v3032_v56, %v3031_v55  ;;  %v3034_v20 = vld [vmem:[%s21240_s5 + $0x1d8] sm:$0xff]  ;;  %v2985_v23 = vld [vmem:[%s21240_s5 + $0x50] sm:$0xff] }
 0x388   :  { %18516 = vmatprep.subr.bf16.mxu0 %v18515_v18  ;;  %18548 = vmatprep.subr.bf16.mxu1 %v18547_v21  ;;  %v3016_v16 = vld [vmem:[%s21240_s5 + $0x148] sm:$0xff]  ;;  %v3002_v18 = vld [vmem:[%s21240_s5 + $0xd8] sm:$0xff]  ;;  %v18533_v21 = vpack.c.bf16 %v2984_v12, %v2983_v11  ;;  %v18567_v26 = vpack.c.bf16 %v3034_v20, %v3033_v19  ;;  %v3017_v27 = vld [vmem:[%s21240_s5 + $0x150] sm:$0xff] }
 0x389   :  { %v18565_v22 = vpack.c.bf16 %v3016_v16, %v3015_v15  ;;  %v2986_v24 = vld [vmem:[%s21240_s5 + $0x58] sm:$0xff]  ;;  %v18535_v25 = vpack.c.bf16 %v3002_v18, %v3001_v17  ;;  %v3035_v31 = vld [vmem:[%s21240_s5 + $0x1e0] sm:$0xff]  ;;  %v3036_v32 = vld [vmem:[%s21240_s5 + $0x1e8] sm:$0xff] }
 0x38a   :  { %16505 = vmatmul.mubr.msk.f32.vlgmr.msra.gmra.mrb[72].mxu0 %vm2647_vm5, %v2643_v28  ;;  %16509 = vmatmul.mubr.msk.f32.vlgmr.msra.gmra.mrb[72].mxu1 %vm2647_vm5, %v2643_v28  ;;  %v3018_v28 = vld [vmem:[%s21240_s5 + $0x158] sm:$0xff]  ;;  %v2987_v35 = vld [vmem:[%s21240_s5 + $0x60] sm:$0xff]  ;;  %v2988_v36 = vld [vmem:[%s21240_s5 + $0x68] sm:$0xff]  ;;  %v18571_v38 = vpack.c.bf16 %v3036_v32, %v3035_v31 }
 0x38b   :  { %2814 = vmatprep.mubr.f32.mxu0 %v19612_v8  ;;  %2968 = vmatprep.mubr.f32.mxu1 %v19612_v8  ;;  %v3019_v39 = vld [vmem:[%s21240_s5 + $0x160] sm:$0xff]  ;;  %v3020_v40 = vld [vmem:[%s21240_s5 + $0x168] sm:$0xff]  ;;  %v3038_v44 = vld [vmem:[%s21240_s5 + $0x1f8] sm:$0xff]  ;;  %v18541_v45 = vpack.c.bf16 %v2988_v36, %v2987_v35 }
 0x38c   :  { %18518 = vmatpush3.bf16.msra.mxu0 %v18517_v29  ;;  %18550 = vmatpush3.bf16.msra.mxu1 %v18549_v30  ;;  %v3003_v29 = vld [vmem:[%s21240_s5 + $0xe0] sm:$0xff]  ;;  %v3004_v30 = vld [vmem:[%s21240_s5 + $0xe8] sm:$0xff]  ;;  %v2989_v57 = vld [vmem:[%s21240_s5 + $0x70] sm:$0xff] }
 0x38d   :  { %18520 = vmatprep.subr.bf16.mxu0 %v18519_v33  ;;  %18552 = vmatprep.subr.bf16.mxu1 %v18551_v34  ;;  %v18537_v33 = vpack.c.bf16 %v2986_v24, %v2985_v23  ;;  %v18569_v34 = vpack.c.bf16 %v3018_v28, %v3017_v27  ;;  %v18539_v37 = vpack.c.bf16 %v3004_v30, %v3003_v29  ;;  %v2990_v58 = vld [vmem:[%s21240_s5 + $0x78] sm:$0xff]  ;;  %v3021_v61 = vld [vmem:[%s21240_s5 + $0x170] sm:$0xff]  ;;  %v3190_v15 = vld [vmem:[%s21260_s14 + $0x8] sm:$0xff] }
 0x38e   :  { %16506 = vmatmul.mubr.msk.f32.gmra.mrb[74].mxu0 %vm2647_vm5, %v2646_v41  ;;  %16510 = vmatmul.mubr.msk.f32.gmra.mrb[74].mxu1 %vm2647_vm5, %v2646_v41  ;;  %v3005_v41 = vld [vmem:[%s21240_s5 + $0xf0] sm:$0xff]  ;;  %v18545_v60 = vpack.c.bf16 %v2990_v58, %v2989_v57  ;;  %v3022_v62 = vld [vmem:[%s21240_s5 + $0x178] sm:$0xff] }
 0x38f   :  { %v19183_v6 = vld [vmem:[#allocation9 + $0x24] ss:$16 sps:$4 sm:$0xff]   ;;  %v19181_v12 = vld [vmem:[#allocation9 + $0x20] ss:$16 sps:$4 sm:$0xff]   ;;  %v19186_v17 = vld [vmem:[#allocation9 + $0xc] ss:$16 sps:$4 sm:$0xff]  }
 0x390   :  { %18522 = vmatpush3.bf16.msra.mxu0 %v18521_v42  ;;  %18554 = vmatpush3.bf16.msra.mxu1 %v18553_v43  ;;  %v3006_v42 = vld [vmem:[%s21240_s5 + $0xf8] sm:$0xff]  ;;  %v3037_v43 = vld [vmem:[%s21240_s5 + $0x1f0] sm:$0xff] }
 0x391   :  { %18524 = vmatprep.subr.bf16.mxu0 %v18523_v46  ;;  %18556 = vmatprep.subr.bf16.mxu1 %v18555_v50  ;;  %v18573_v46 = vpack.c.bf16 %v3020_v40, %v3019_v39  ;;  %v18543_v50 = vpack.c.bf16 %v3006_v42, %v3005_v41  ;;  %v18575_v59 = vpack.c.bf16 %v3038_v44, %v3037_v43  ;;  %v19176_v56 = vld [vmem:[#allocation6 + $0x8] sm:$0xff]   ;;  %v19198_v24 = vld [vmem:[#allocation9 + $0x4c] ss:$16 sps:$4 sm:$0xff]   ;;  %v3615_v44 = vld [vmem:[#allocation13] sm:$0xff] }
 0x392   :  { %v19187_v18 = vld [vmem:[#allocation9 + $0x40] ss:$16 sps:$4 sm:$0xff]   ;;  %v19195_v19 = vld [vmem:[#allocation9 + $0x64] ss:$16 sps:$4 sm:$0xff]   ;;  %v19202_v27 = vld [vmem:[#allocation9 + $0x68] ss:$16 sps:$4 sm:$0xff]  }
 0x393   :  { %v19193_v23 = vld [vmem:[#allocation9 + $0x60] ss:$16 sps:$4 sm:$0xff]   ;;  %v19201_v28 = vld [vmem:[#allocation9 + $0x84] ss:$16 sps:$4 sm:$0xff]   ;;  %v19210_v29 = vld [vmem:[#allocation9 + $0x8c] ss:$16 sps:$4 sm:$0xff]  }
 0x394   :  { %18526 = vmatpush3.bf16.msra.mxu0 %v18525_v63  ;;  %18558 = vmatpush3.bf16.msra.mxu1 %v18557_v1  ;;  %v18577_v63 = vpack.c.bf16 %v3022_v62, %v3021_v61  ;;  %v19180_v1 = vld [vmem:[#allocation9 + $0x4] ss:$16 sps:$4 sm:$0xff]   ;;  %v19199_v30 = vld [vmem:[#allocation9 + $0x80] ss:$16 sps:$4 sm:$0xff]   ;;  %v19208_v31 = vld [vmem:[#allocation9 + $0x88] ss:$16 sps:$4 sm:$0xff]  }
 0x395   :  { %18528 = vmatprep.subr.bf16.mxu0 %v18527_v4  ;;  %18560 = vmatprep.subr.bf16.mxu1 %v18559_v53  ;;  %v19175_v4 = vld [vmem:[#allocation6] sm:$0xff]   ;;  %v19207_v32 = vld [vmem:[#allocation9 + $0xa4] ss:$16 sps:$4 sm:$0xff]  }
 0x396   :  { %v19178_v53 = vld [vmem:[#allocation9] ss:$16 sps:$4 sm:$0xff]   ;;  %v19214_v35 = vld [vmem:[#allocation9 + $0xa8] ss:$16 sps:$4 sm:$0xff]   ;;  %v19213_v36 = vld [vmem:[#allocation9 + $0xc4] ss:$16 sps:$4 sm:$0xff]  }
 0x397   :  { %v19220_v39 = vld [vmem:[#allocation9 + $0xc8] ss:$16 sps:$4 sm:$0xff]   ;;  %v19219_v40 = vld [vmem:[#allocation9 + $0xe4] ss:$16 sps:$4 sm:$0xff]   ;;  %v19225_v41 = vld [vmem:[#allocation9 + $0xec] ss:$16 sps:$4 sm:$0xff]  }
 0x398   :  { %18530 = vmatpush3.bf16.msra.mxu0 %v18529_v9  ;;  %18562 = vmatpush3.bf16.msra.mxu1 %v18561_v10  ;;  %v19177_v9 = vld [vmem:[#allocation6 + $0x10] ss:$0 sps:$4 sm:$0xff]   ;;  %v19217_v42 = vld [vmem:[#allocation9 + $0xe0] ss:$16 sps:$4 sm:$0xff]  }
 0x399   :  { %18532 = vmatprep.subr.bf16.mxu0 %v18531_v13  ;;  %18564 = vmatprep.subr.bf16.mxu1 %v18563_v14  ;;  %v19189_v13 = vld [vmem:[#allocation9 + $0x44] ss:$16 sps:$4 sm:$0xff]   ;;  %v3224_v16 = vsel %vm511_vm0, %v19177_v9, 0  ;;  %v19223_v43 = vld [vmem:[#allocation9 + $0xe8] ss:$16 sps:$4 sm:$0xff]   ;;  %v3624_v58 = vld [vmem:[#allocation13 + $0x48] sm:$0xff] }
 0x39a   :  { %v3189_v14 = vld [vmem:[%s21260_s14] sm:$0xff] }
 0x39b   :  { %v3191_v20 = vpack.c.bf16 %v3190_v15, %v3189_v14 }
 0x39c   :  { %18534 = vmatpush3.bf16.msra.mxu0 %v18533_v21  ;;  %18566 = vmatpush3.bf16.msra.mxu1 %v18565_v22  ;;  %v19184_v21 = vld [vmem:[#allocation9 + $0x8] ss:$16 sps:$4 sm:$0xff]   ;;  %v19192_v22 = vld [vmem:[#allocation9 + $0x2c] ss:$16 sps:$4 sm:$0xff]  }
 0x39d   :  { %18536 = vmatprep.subr.bf16.mxu0 %v18535_v25  ;;  %18568 = vmatprep.subr.bf16.mxu1 %v18567_v26  ;;  %v19196_v25 = vld [vmem:[#allocation9 + $0x48] ss:$16 sps:$4 sm:$0xff]   ;;  %v19204_v26 = vld [vmem:[#allocation9 + $0x6c] ss:$16 sps:$4 sm:$0xff]  }
 0x3a0   :  { %18538 = vmatpush3.bf16.msra.mxu0 %v18537_v33  ;;  %18570 = vmatpush3.bf16.msra.mxu1 %v18569_v34  ;;  %v19216_v33 = vld [vmem:[#allocation9 + $0xac] ss:$16 sps:$4 sm:$0xff]   ;;  %v19205_v34 = vld [vmem:[#allocation9 + $0xa0] ss:$16 sps:$4 sm:$0xff]  }
 0x3a1   :  { %18540 = vmatprep.subr.bf16.mxu0 %v18539_v37  ;;  %18572 = vmatprep.subr.bf16.mxu1 %v18571_v38  ;;  %v19222_v37 = vld [vmem:[#allocation9 + $0xcc] ss:$16 sps:$4 sm:$0xff]   ;;  %v19211_v38 = vld [vmem:[#allocation9 + $0xc0] ss:$16 sps:$4 sm:$0xff]  }
 0x3a4   :  { %18542 = vmatpush3.bf16.msra.mxu0 %v18541_v45  ;;  %18574 = vmatpush3.bf16.msra.mxu1 %v18573_v46  ;;  %v3623_v45 = vld [vmem:[#allocation13 + $0x40] sm:$0xff]  ;;  %v3616_v46 = vld [vmem:[#allocation13 + $0x8] sm:$0xff] }
 0x3a5   :  { %18544 = vmatprep.subr.bf16.mxu0 %v18543_v50  ;;  %18576 = vmatprep.subr.bf16.mxu1 %v18575_v59  ;;  %v16548_v50 = vcombine.low %v3615_v44, %v3623_v45  ;;  %v16549_v57 = vcombine.high %v3615_v44, %v3623_v45  ;;  %v16550_v59 = vcombine.low %v3616_v46, %v3624_v58  ;;  %v3688_v44 = vld [vmem:[#allocation13 + $0x248] sm:$0xff] }
 0x3a8   :  { %18546 = vmatpush3.bf16.msra.mxu0 %v18545_v60  ;;  %18578 = vmatpush3.bf16.msra.mxu1 %v18577_v63  ;;  %v16551_v60 = vcombine.high %v3616_v46, %v3624_v58  ;;  %v3695_v58 = vld [vmem:[#allocation13 + $0x280] sm:$0xff] }
 0x3a9   :  { %18357 = vmatprep.subr.bf16.mxu0 %v19612_v8  ;;  %3484 = vmatprep.subr.bf16.mxu1 %v19180_v1 }
 0x45d   :  { %v2810_v2 = vpop.f32.mrb[72].mxu0  ;;  %v2964_v3 = vpop.f32.mrb[72].mxu1 }
 0x45e   :  { %v2812_v54 = vpop.f32.mrb[73].mxu0  ;;  %v2966_v5 = vpop.f32.mrb[73].mxu1 }
 0x45f   :  { %3103 = vmatprep.mubr.f32.mxu0 %v2812_v54  ;;  %3178 = vmatprep.mubr.f32.mxu1 %v2966_v5 }
 0x460   :  { %3104 = vmatmul.mubr.f32.vlgmr.msra.gmra.mrb[76].mxu0 %v2810_v2  ;;  %3179 = vmatmul.mubr.f32.vlgmr.msra.gmra.mrb[76].mxu1 %v2964_v3 }
 0x461   :  { %18358 = vmatpush3.bf16.msra.mxu0 %v19175_v4  ;;  %v2816_v7 = vpop.f32.mrb[74].mxu0  ;;  %v2970_v55 = vpop.f32.mrb[74].mxu1  ;;  %3485 = vmatpush1.bf16.msra.mxu1 %v19178_v53 }
 0x462   :  { %v2818_v10 = vpop.f32.mrb[75].mxu0  ;;  %v2972_v11 = vpop.f32.mrb[75].mxu1  ;;  %18359 = vmatprep.subr.bf16.mxu0 %v19612_v8  ;;  %3486 = vmatprep.subr.bf16.mxu1 %v19183_v6 }
 0x463   :  { %3108 = vmatprep.mubr.f32.mxu0 %v2818_v10  ;;  %3183 = vmatprep.mubr.f32.mxu1 %v2972_v11  ;;  %v16511_v10 = vld [vmem:[#allocation7] ss:$0 sm:$0xff] }
 0x464   :  { %3109 = vmatmul.mubr.f32.gmra.mrb[78].mxu0 %v2816_v7  ;;  %3184 = vmatmul.mubr.f32.gmra.mrb[78].mxu1 %v2970_v55 }
 0x465   :  { %18360 = vmatpush3.bf16.msra.mxu0 %v19176_v56  ;;  %18363 = vmatprep.mubr.msk.bf16.mxu0 %vm19614_vm6, %v19612_v8 }
 0x466   :  { %18361 = vmatprep.subr.bf16.mxu0 %v19612_v8  ;;  %3487 = vmatpush1.bf16.msra.mxu1 %v19181_v12  ;;  %v19190_v8 = vld [vmem:[#allocation9 + $0x28] ss:$16 sps:$4 sm:$0xff]  }
 0x467   :  { %3488 = vmatprep.subr.bf16.mxu1 %v19189_v13  ;;  %3516 = vmatprep.mubr.bf16.mxu1 %v19611_v0 }
 0x469   :  { %18362 = vmatpush3.bf16.msra.mxu0 %v3224_v16 }
 0x46a   :  { %3527 = vmatprep.subr.bf16.mxu0 %v19186_v17  ;;  %3489 = vmatpush1.bf16.msra.mxu1 %v19187_v18  ;;  %v3631_v17 = vld [vmem:[#allocation13 + $0x80] sm:$0xff] }
 0x46b   :  { %3490 = vmatprep.subr.bf16.mxu1 %v19195_v19  ;;  %v3639_v18 = vld [vmem:[#allocation13 + $0xc0] sm:$0xff]  ;;  %v3632_v19 = vld [vmem:[#allocation13 + $0x88] sm:$0xff] }
 0x46c   :  { %18364 = vmatmul.mubr.msk.bf16.vlgmr.msra.gmra.mrb[80].mxu0 %vm3219_vm7, %v3191_v20  ;;  %v3640_v20 = vld [vmem:[#allocation13 + $0xc8] sm:$0xff] }
 0x46d   :  { %3528 = vmatpush1.bf16.msra.mxu0 %v19184_v21  ;;  %3559 = vmatprep.mubr.bf16.mxu0 %v19611_v0 }
 0x46e   :  { %3529 = vmatprep.subr.bf16.mxu0 %v19192_v22  ;;  %3491 = vmatpush1.bf16.msra.mxu1 %v19193_v23 }
 0x46f   :  { %3492 = vmatprep.subr.bf16.mxu1 %v19201_v28  ;;  %v3656_v28 = vld [vmem:[#allocation13 + $0x148] sm:$0xff] }
 0x471   :  { %3530 = vmatpush1.bf16.msra.mxu0 %v19190_v8  ;;  %v16565_v8 = vcombine.high %v3631_v17, %v3639_v18 }
 0x472   :  { %3531 = vmatprep.subr.bf16.mxu0 %v19198_v24  ;;  %3493 = vmatpush1.bf16.msra.mxu1 %v19199_v30  ;;  %v16567_v24 = vcombine.high %v3632_v19, %v3640_v20  ;;  %v16566_v30 = vcombine.low %v3632_v19, %v3640_v20  ;;  %v3744_v19 = vld [vmem:[#allocation13 + $0x408] sm:$0xff] }
 0x473   :  { %3494 = vmatprep.subr.bf16.mxu1 %v19207_v32  ;;  %v3752_v20 = vld [vmem:[#allocation13 + $0x448] sm:$0xff] }
 0x475   :  { %3532 = vmatpush1.bf16.msra.mxu0 %v19196_v25  ;;  %v3647_v25 = vld [vmem:[#allocation13 + $0x100] sm:$0xff] }
 0x476   :  { %3533 = vmatprep.subr.bf16.mxu0 %v19204_v26  ;;  %3495 = vmatpush1.bf16.msra.mxu1 %v19205_v34  ;;  %v3655_v26 = vld [vmem:[#allocation13 + $0x140] sm:$0xff] }
 0x477   :  { %3496 = vmatprep.subr.bf16.mxu1 %v19213_v36  ;;  %v3671_v34 = vld [vmem:[#allocation13 + $0x1c0] sm:$0xff]  ;;  %v3672_v36 = vld [vmem:[#allocation13 + $0x1c8] sm:$0xff] }
 0x479   :  { %3534 = vmatpush1.bf16.msra.mxu0 %v19202_v27  ;;  %v3648_v27 = vld [vmem:[#allocation13 + $0x108] sm:$0xff] }
 0x47a   :  { %3535 = vmatprep.subr.bf16.mxu0 %v19210_v29  ;;  %3497 = vmatpush1.bf16.msra.mxu1 %v19211_v38  ;;  %v16564_v29 = vcombine.low %v3631_v17, %v3639_v18  ;;  %v16583_v32 = vcombine.high %v3648_v27, %v3656_v28  ;;  %v16582_v38 = vcombine.low %v3648_v27, %v3656_v28  ;;  %v3743_v17 = vld [vmem:[#allocation13 + $0x400] sm:$0xff]  ;;  %v3768_v27 = vld [vmem:[#allocation13 + $0x4c8] sm:$0xff] }
 0x47b   :  { %3498 = vmatprep.subr.bf16.mxu1 %v19219_v40  ;;  %v3751_v18 = vld [vmem:[#allocation13 + $0x440] sm:$0xff] }
 0x47c   :  { %v16676_v28 = vcombine.low %v3743_v17, %v3751_v18 }
 0x47d   :  { %3536 = vmatpush1.bf16.msra.mxu0 %v19208_v31  ;;  %v16581_v31 = vcombine.high %v3647_v25, %v3655_v26 }
 0x47e   :  { %3537 = vmatprep.subr.bf16.mxu0 %v19216_v33  ;;  %3499 = vmatpush1.bf16.msra.mxu1 %v19217_v42  ;;  %v3663_v33 = vld [vmem:[#allocation13 + $0x180] sm:$0xff] }
 0x47f   :  { %6687 = vmatprep.subr.bf16.mxu1 %v16549_v57  ;;  %v3687_v42 = vld [vmem:[#allocation13 + $0x240] sm:$0xff]  ;;  %v16596_v45 = vcombine.low %v3663_v33, %v3671_v34 }
 0x481   :  { %3538 = vmatpush1.bf16.msra.mxu0 %v19214_v35  ;;  %v3664_v35 = vld [vmem:[#allocation13 + $0x188] sm:$0xff] }
 0x482   :  { %3539 = vmatprep.subr.bf16.mxu0 %v19222_v37  ;;  %v16580_v37 = vcombine.low %v3647_v25, %v3655_v26  ;;  %v16599_v40 = vcombine.high %v3664_v35, %v3672_v36  ;;  %v16598_v46 = vcombine.low %v3664_v35, %v3672_v36  ;;  %v3767_v25 = vld [vmem:[#allocation13 + $0x4c0] sm:$0xff]  ;;  %v3760_v26 = vld [vmem:[#allocation13 + $0x488] sm:$0xff] }
 0x483   :  { %v3784_v35 = vld [vmem:[#allocation13 + $0x548] sm:$0xff] }
 0x485   :  { %3540 = vmatpush1.bf16.msra.mxu0 %v19220_v39  ;;  %v16597_v39 = vcombine.high %v3663_v33, %v3671_v34  ;;  %v3783_v33 = vld [vmem:[#allocation13 + $0x540] sm:$0xff]  ;;  %v3776_v34 = vld [vmem:[#allocation13 + $0x508] sm:$0xff] }
 0x486   :  { %3541 = vmatprep.subr.bf16.mxu0 %v19225_v41  ;;  %v3679_v41 = vld [vmem:[#allocation13 + $0x200] sm:$0xff] }
 0x489   :  { %3542 = vmatpush1.bf16.msra.mxu0 %v19223_v43  ;;  %v3680_v43 = vld [vmem:[#allocation13 + $0x208] sm:$0xff] }
 0x48a   :  { %6773 = vmatprep.subr.bf16.mxu0 %v16551_v60  ;;  %v16615_v57 = vcombine.high %v3680_v43, %v3688_v44  ;;  %v3696_v60 = vld [vmem:[#allocation13 + $0x288] sm:$0xff] }
 0x533   :  { %v18221_v61 = vpop.f32.mrb[76].mxu0  ;;  %v18259_v62 = vpop.f32.mrb[76].mxu1 }
 0x534   :  { %v18222_v63 = vpop.f32.mrb[77].mxu0  ;;  %v18260_v1 = vpop.f32.mrb[77].mxu1 }
 0x535   :  { %v18223_v2 = vadd.f32 %v18222_v63, %v18221_v61  ;;  %v18261_v3 = vadd.f32 %v18260_v1, %v18259_v62  ;;  %v3704_v61 = vld [vmem:[#allocation13 + $0x2c8] sm:$0xff]  ;;  %v16612_v62 = vcombine.low %v3679_v41, %v3687_v42  ;;  %v16614_v63 = vcombine.low %v3680_v43, %v3688_v44 }
 0x536   :  { %v3800_v43 = vld [vmem:[#allocation13 + $0x5c8] sm:$0xff] }
 0x537   :  { %v3181_v4 = vadd.f32 %v18261_v3, %v18223_v2  ;;  %v18224_v53 = vpop.f32.mrb[78].mxu0  ;;  %v18262_v54 = vpop.f32.mrb[78].mxu1  ;;  %v16631_v2 = vcombine.high %v3696_v60, %v3704_v61  ;;  %v3711_v3 = vld [vmem:[#allocation13 + $0x300] sm:$0xff] }
 0x538   :  { %v18225_v5 = vpop.f32.mrb[79].mxu0  ;;  %v18263_v6 = vpop.f32.mrb[79].mxu1 }
 0x539   :  { %v18226_v7 = vadd.f32 %v18225_v5, %v18224_v53  ;;  %v18264_v55 = vadd.f32 %v18263_v6, %v18262_v54  ;;  %v3712_v53 = vld [vmem:[#allocation13 + $0x308] sm:$0xff]  ;;  %v16630_v6 = vcombine.low %v3696_v60, %v3704_v61 }
 0x53a   :  { %v3720_v54 = vld [vmem:[#allocation13 + $0x348] sm:$0xff] }
 0x53b   :  { %v3186_v56 = vadd.f32 %v18264_v55, %v18226_v7  ;;  %v16647_v55 = vcombine.high %v3712_v53, %v3720_v54  ;;  %v3816_v60 = vld [vmem:[#allocation13 + $0x648] sm:$0xff] }
 0x53d   :  { %v20859_v9 = vpack.c.bf16 %v3186_v56, %v3181_v4  ;;  %v3719_v4 = vld [vmem:[#allocation13 + $0x340] sm:$0xff] }
 0x53e   :  { %v16645_v7 = vcombine.high %v3711_v3, %v3719_v4  ;;  %v3727_v56 = vld [vmem:[#allocation13 + $0x380] sm:$0xff] }
 0x53f   :  { %v3260_v11 = vpop.f32.mrb[80].mxu0 }
 0x540   :  { %v3261_v12 = vadd.f32 %v16511_v10, %v3260_v11  ;;  %v18365_v13 = vpop.f32.mrb[81].mxu0  ;;  %v3728_v11 = vld [vmem:[#allocation13 + $0x388] sm:$0xff] }
 0x541   :  { %v3263_v14 = vpop.f32.mrb[82].mxu0  ;;  %v16644_v13 = vcombine.low %v3711_v3, %v3719_v4  ;;  %v3831_v3 = vld [vmem:[#allocation13 + $0x6c0] sm:$0xff]  ;;  %v3824_v4 = vld [vmem:[#allocation13 + $0x688] sm:$0xff] }
 0x542   :  { %v3264_v15 = vadd.f32 %v16511_v10, %v3263_v14  ;;  %v18366_v16 = vpop.f32.mrb[83].mxu0  ;;  %v3267_v21 = vmax.f32 %v3261_v12, 0.0  ;;  %v3735_v10 = vld [vmem:[#allocation13 + $0x3c0] sm:$0xff]  ;;  %v3736_v12 = vld [vmem:[#allocation13 + $0x3c8] sm:$0xff]  ;;  %v16646_v14 = vcombine.low %v3712_v53, %v3720_v54 }
 0x543   :  { %v16663_v16 = vcombine.high %v3728_v11, %v3736_v12  ;;  %v3832_v53 = vld [vmem:[#allocation13 + $0x6c8] sm:$0xff] }
 0x544   :  { %v3268_v22 = vmax.f32 %v3264_v15, 0.0  ;;  %v16661_v15 = vcombine.high %v3727_v56, %v3735_v10 }
 0x546   :  { %v3269_v23 = vpack.c.bf16 %v3268_v22, %v3267_v21  ;;  %v16660_v21 = vcombine.low %v3727_v56, %v3735_v10  ;;  %v16662_v22 = vcombine.low %v3728_v11, %v3736_v12  ;;  %v16758_v56 = vcombine.low %v3824_v4, %v3832_v53  ;;  %v3839_v10 = vld [vmem:[#allocation13 + $0x700] sm:$0xff]  ;;  %v3840_v12 = vld [vmem:[#allocation13 + $0x708] sm:$0xff] }
 0x547   :  { %v3847_v11 = vld [vmem:[#allocation13 + $0x740] sm:$0xff] }
 0x548   :  { %3517 = vmatmul.mubr.bf16.vlgmr.msra.gmra.mrb[80].mxu1 %v3269_v23  ;;  %3560 = vmatmul.mubr.bf16.vlgmr.msra.gmra.mrb[84].mxu0 %v3269_v23  ;;  %v16677_v23 = vcombine.high %v3743_v17, %v3751_v18  ;;  %v3855_v18 = vld [vmem:[#allocation13 + $0x780] sm:$0xff] }
 0x549   :  { %6688 = vmatpush1.bf16.msra.mxu1 %v16548_v50  ;;  %6774 = vmatpush1.bf16.msra.mxu0 %v16550_v59  ;;  %v16613_v50 = vcombine.high %v3679_v41, %v3687_v42  ;;  %v3703_v59 = vld [vmem:[#allocation13 + $0x2c0] sm:$0xff]  ;;  %v3792_v42 = vld [vmem:[#allocation13 + $0x588] sm:$0xff] }
 0x54a   :  { %6689 = vmatprep.subr.bf16.mxu1 %v16565_v8  ;;  %6775 = vmatprep.subr.bf16.mxu0 %v16567_v24  ;;  %v16629_v1 = vcombine.high %v3695_v58, %v3703_v59  ;;  %v16628_v5 = vcombine.low %v3695_v58, %v3703_v59  ;;  %v16679_v8 = vcombine.high %v3744_v19, %v3752_v20  ;;  %v3759_v24 = vld [vmem:[#allocation13 + $0x480] sm:$0xff]  ;;  %v3808_v59 = vld [vmem:[#allocation13 + $0x608] sm:$0xff] }
 0x54b   :  { %v16692_v36 = vcombine.low %v3759_v24, %v3767_v25  ;;  %v3799_v41 = vld [vmem:[#allocation13 + $0x5c0] sm:$0xff] }
 0x54c   :  { %v3815_v58 = vld [vmem:[#allocation13 + $0x640] sm:$0xff] }
 0x54d   :  { %6690 = vmatpush1.bf16.msra.mxu1 %v16564_v29  ;;  %6776 = vmatpush1.bf16.msra.mxu0 %v16566_v30  ;;  %v16678_v29 = vcombine.low %v3744_v19, %v3752_v20  ;;  %v16693_v30 = vcombine.high %v3759_v24, %v3767_v25  ;;  %v3863_v19 = vld [vmem:[#allocation13 + $0x7c0] sm:$0xff]  ;;  %v3856_v20 = vld [vmem:[#allocation13 + $0x788] sm:$0xff] }
 0x54e   :  { %6691 = vmatprep.subr.bf16.mxu1 %v16581_v31  ;;  %6777 = vmatprep.subr.bf16.mxu0 %v16583_v32  ;;  %v16695_v31 = vcombine.high %v3760_v26, %v3768_v27  ;;  %v3775_v32 = vld [vmem:[#allocation13 + $0x500] sm:$0xff] }
 0x54f   :  { %v16708_v44 = vcombine.low %v3775_v32, %v3783_v33  ;;  %v3871_v25 = vld [vmem:[#allocation13 + $0x800] sm:$0xff] }
 0x551   :  { %6692 = vmatpush1.bf16.msra.mxu1 %v16580_v37  ;;  %6778 = vmatpush1.bf16.msra.mxu0 %v16582_v38  ;;  %v16694_v37 = vcombine.low %v3760_v26, %v3768_v27  ;;  %v16709_v38 = vcombine.high %v3775_v32, %v3783_v33  ;;  %v3879_v26 = vld [vmem:[#allocation13 + $0x840] sm:$0xff]  ;;  %v3872_v27 = vld [vmem:[#allocation13 + $0x808] sm:$0xff]  ;;  %v3302_v33 = vld [vmem:[#allocation10] sm:$0xf] }
 0x552   :  { %6693 = vmatprep.subr.bf16.mxu1 %v16597_v39  ;;  %6779 = vmatprep.subr.bf16.mxu0 %v16599_v40  ;;  %v16711_v39 = vcombine.high %v3776_v34, %v3784_v35  ;;  %v3791_v40 = vld [vmem:[#allocation13 + $0x580] sm:$0xff] }
 0x553   :  { %v16724_v61 = vcombine.low %v3791_v40, %v3799_v41 }
 0x555   :  { %6694 = vmatpush1.bf16.msra.mxu1 %v16596_v45  ;;  %6780 = vmatpush1.bf16.msra.mxu0 %v16598_v46  ;;  %v16710_v45 = vcombine.low %v3776_v34, %v3784_v35  ;;  %v16725_v46 = vcombine.high %v3791_v40, %v3799_v41  ;;  %v3307_v34 = vrot.slane %v3302_v33, %v20448_v48 }
 0x556   :  { %6695 = vmatprep.subr.bf16.mxu1 %v16613_v50  ;;  %6781 = vmatprep.subr.bf16.mxu0 %v16615_v57  ;;  %v16727_v50 = vcombine.high %v3792_v42, %v3800_v43  ;;  %v3807_v57 = vld [vmem:[#allocation13 + $0x600] sm:$0xff]  ;;  %v3315_v35 = vrot.slane %v3302_v33, %v20451_v49 }
 0x557   :  { %v16740_v54 = vcombine.low %v3807_v57, %v3815_v58 }
 0x559   :  { %6696 = vmatpush1.bf16.msra.mxu1 %v16612_v62  ;;  %6782 = vmatpush1.bf16.msra.mxu0 %v16614_v63  ;;  %v16726_v62 = vcombine.low %v3792_v42, %v3800_v43  ;;  %v16741_v63 = vcombine.high %v3807_v57, %v3815_v58 }
 0x55a   :  { %6697 = vmatprep.subr.bf16.mxu1 %v16629_v1  ;;  %6783 = vmatprep.subr.bf16.mxu0 %v16631_v2  ;;  %v16743_v1 = vcombine.high %v3808_v59, %v3816_v60  ;;  %v3823_v2 = vld [vmem:[#allocation13 + $0x680] sm:$0xff] }
 0x55d   :  { %6698 = vmatpush1.bf16.msra.mxu1 %v16628_v5  ;;  %6784 = vmatpush1.bf16.msra.mxu0 %v16630_v6  ;;  %v16742_v5 = vcombine.low %v3808_v59, %v3816_v60  ;;  %v16757_v6 = vcombine.high %v3823_v2, %v3831_v3 }
 0x55e   :  { %6699 = vmatprep.subr.bf16.mxu1 %v16645_v7  ;;  %6785 = vmatprep.subr.bf16.mxu0 %v16647_v55  ;;  %v16759_v7 = vcombine.high %v3824_v4, %v3832_v53  ;;  %v16756_v55 = vcombine.low %v3823_v2, %v3831_v3  ;;  %v3887_v4 = vld [vmem:[#allocation13 + $0x880] sm:$0xff] }
 0x55f   :  { %v3895_v53 = vld [vmem:[#allocation13 + $0x8c0] sm:$0xff] }
 0x561   :  { %6700 = vmatpush1.bf16.msra.mxu1 %v16644_v13  ;;  %6786 = vmatpush1.bf16.msra.mxu0 %v16646_v14  ;;  %v16773_v13 = vcombine.high %v3839_v10, %v3847_v11  ;;  %v3848_v14 = vld [vmem:[#allocation13 + $0x748] sm:$0xff] }
 0x562   :  { %6701 = vmatprep.subr.bf16.mxu1 %v16661_v15  ;;  %6787 = vmatprep.subr.bf16.mxu0 %v16663_v16  ;;  %v16772_v15 = vcombine.low %v3839_v10, %v3847_v11  ;;  %v16774_v16 = vcombine.low %v3840_v12, %v3848_v14  ;;  %v16775_v17 = vcombine.high %v3840_v12, %v3848_v14 }
 0x563   :  { %v16821_v14 = vcombine.high %v3887_v4, %v3895_v53 }
 0x565   :  { %6702 = vmatpush1.bf16.msra.mxu1 %v16660_v21  ;;  %6788 = vmatpush1.bf16.msra.mxu0 %v16662_v22  ;;  %v16789_v21 = vcombine.high %v3855_v18, %v3863_v19  ;;  %v3864_v22 = vld [vmem:[#allocation13 + $0x7c8] sm:$0xff] }
 0x566   :  { %6703 = vmatprep.subr.bf16.mxu1 %v16677_v23  ;;  %6789 = vmatprep.subr.bf16.mxu0 %v16679_v8  ;;  %v16788_v23 = vcombine.low %v3855_v18, %v3863_v19  ;;  %v16790_v8 = vcombine.low %v3856_v20, %v3864_v22  ;;  %v16791_v24 = vcombine.high %v3856_v20, %v3864_v22  ;;  %v3904_v18 = vld [vmem:[#allocation13 + $0x908] sm:$0xff] }
 0x567   :  { %v3912_v19 = vld [vmem:[#allocation13 + $0x948] sm:$0xff]  ;;  %v16820_v20 = vcombine.low %v3887_v4, %v3895_v53 }
 0x568   :  { %v3992_v4 = vld [vmem:[#allocation13 + $0xbc8] sm:$0xff] }
 0x569   :  { %6704 = vmatpush1.bf16.msra.mxu1 %v16676_v28  ;;  %6790 = vmatpush1.bf16.msra.mxu0 %v16678_v29  ;;  %v16805_v28 = vcombine.high %v3871_v25, %v3879_v26  ;;  %v3880_v29 = vld [vmem:[#allocation13 + $0x848] sm:$0xff] }
 0x56a   :  { %6705 = vmatprep.subr.bf16.mxu1 %v16693_v30  ;;  %6791 = vmatprep.subr.bf16.mxu0 %v16695_v31  ;;  %v16804_v30 = vcombine.low %v3871_v25, %v3879_v26  ;;  %v16806_v31 = vcombine.low %v3872_v27, %v3880_v29  ;;  %v16807_v32 = vcombine.high %v3872_v27, %v3880_v29  ;;  %v3920_v25 = vld [vmem:[#allocation13 + $0x988] sm:$0xff] }
 0x56b   :  { %v3928_v26 = vld [vmem:[#allocation13 + $0x9c8] sm:$0xff] }
 0x56d   :  { %6706 = vmatpush1.bf16.msra.mxu1 %v16692_v36  ;;  %6792 = vmatpush1.bf16.msra.mxu0 %v16694_v37  ;;  %v3311_v36 = vrot.slane %v3302_v33, %v20454_v51  ;;  %v3319_v37 = vrot.slane %v3302_v33, %v20457_v52  ;;  %v3936_v33 = vld [vmem:[#allocation13 + $0xa08] sm:$0xff] }
 0x56e   :  { %6707 = vmatprep.subr.bf16.mxu1 %v16709_v38  ;;  %6793 = vmatprep.subr.bf16.mxu0 %v16711_v39 }
 0x571   :  { %6708 = vmatpush1.bf16.msra.mxu1 %v16708_v44  ;;  %6794 = vmatpush1.bf16.msra.mxu0 %v16710_v45 }
 0x572   :  { %6709 = vmatprep.subr.bf16.mxu1 %v16725_v46  ;;  %6795 = vmatprep.subr.bf16.mxu0 %v16727_v50 }
 0x575   :  { %6710 = vmatpush1.bf16.msra.mxu1 %v16724_v61  ;;  %6796 = vmatpush1.bf16.msra.mxu0 %v16726_v62 }
 0x576   :  { %6711 = vmatprep.subr.bf16.mxu1 %v16741_v63  ;;  %6797 = vmatprep.subr.bf16.mxu0 %v16743_v1 }
 0x579   :  { %6712 = vmatpush1.bf16.msra.mxu1 %v16740_v54  ;;  %6798 = vmatpush1.bf16.msra.mxu0 %v16742_v5 }
 0x57a   :  { %6713 = vmatprep.subr.bf16.mxu1 %v16757_v6  ;;  %6799 = vmatprep.subr.bf16.mxu0 %v16759_v7 }
 0x57d   :  { %6714 = vmatpush1.bf16.msra.mxu1 %v16756_v55  ;;  %6800 = vmatpush1.bf16.msra.mxu0 %v16758_v56  ;;  %v3888_v55 = vld [vmem:[#allocation13 + $0x888] sm:$0xff] }
 0x57e   :  { %6715 = vmatprep.subr.bf16.mxu1 %v16773_v13  ;;  %6801 = vmatprep.subr.bf16.mxu0 %v16775_v17  ;;  %v3896_v56 = vld [vmem:[#allocation13 + $0x8c8] sm:$0xff]  ;;  %v3911_v17 = vld [vmem:[#allocation13 + $0x940] sm:$0xff] }
 0x581   :  { %6716 = vmatpush1.bf16.msra.mxu1 %v16772_v15  ;;  %6802 = vmatpush1.bf16.msra.mxu0 %v16774_v16  ;;  %v16823_v15 = vcombine.high %v3888_v55, %v3896_v56  ;;  %v3903_v16 = vld [vmem:[#allocation13 + $0x900] sm:$0xff] }
 0x582   :  { %6717 = vmatprep.subr.bf16.mxu1 %v16789_v21  ;;  %6803 = vmatprep.subr.bf16.mxu0 %v16791_v24  ;;  %v16822_v21 = vcombine.low %v3888_v55, %v3896_v56  ;;  %v16837_v22 = vcombine.high %v3903_v16, %v3911_v17  ;;  %v3927_v24 = vld [vmem:[#allocation13 + $0x9c0] sm:$0xff]  ;;  %v16836_v27 = vcombine.low %v3903_v16, %v3911_v17  ;;  %v4000_v56 = vld [vmem:[#allocation13 + $0xc08] sm:$0xff] }
 0x583   :  { %v4007_v55 = vld [vmem:[#allocation13 + $0xc40] sm:$0xff] }
 0x585   :  { %6718 = vmatpush1.bf16.msra.mxu1 %v16788_v23  ;;  %6804 = vmatpush1.bf16.msra.mxu0 %v16790_v8  ;;  %v16839_v23 = vcombine.high %v3904_v18, %v3912_v19  ;;  %v3919_v8 = vld [vmem:[#allocation13 + $0x980] sm:$0xff] }
 0x586   :  { %6730 = vmatprep.subr.bf16.mxu1 %v16805_v28  ;;  %6816 = vmatprep.subr.bf16.mxu0 %v16807_v32  ;;  %v16838_v28 = vcombine.low %v3904_v18, %v3912_v19  ;;  %v16853_v29 = vcombine.high %v3919_v8, %v3927_v24  ;;  %v3943_v32 = vld [vmem:[#allocation13 + $0xa40] sm:$0xff] }
 0x587   :  { %v4015_v19 = vld [vmem:[#allocation13 + $0xc80] sm:$0xff] }
 0x61b   :  { %v3518_v38 = vpop.f32.mrb[80].mxu1  ;;  %v3561_v39 = vpop.f32.mrb[84].mxu0 }
 0x61c   :  { %v3519_v40 = vadd.f32 %v3518_v38, %v3307_v34  ;;  %v3520_v41 = vpop.f32.mrb[81].mxu1  ;;  %v3562_v42 = vadd.f32 %v3561_v39, %v3315_v35  ;;  %v3563_v43 = vpop.f32.mrb[85].mxu0  ;;  %v3951_v39 = vld [vmem:[#allocation13 + $0xa80] sm:$0xff] }
 0x61d   :  { %v3521_v44 = vadd.f32 %v3520_v41, %v3311_v36  ;;  %v3522_v45 = vpop.f32.mrb[82].mxu1  ;;  %v3564_v46 = vadd.f32 %v3563_v43, %v3319_v37  ;;  %v3565_v50 = vpop.f32.mrb[86].mxu0  ;;  %v3952_v41 = vld [vmem:[#allocation13 + $0xa88] sm:$0xff] }
 0x61e   :  { %v3523_v57 = vadd.f32 %v3522_v45, %v3307_v34  ;;  %v3524_v58 = vpop.f32.mrb[83].mxu1  ;;  %v3566_v59 = vadd.f32 %v3565_v50, %v3315_v35  ;;  %v3567_v60 = vpop.f32.mrb[87].mxu0  ;;  %v3570_v63 = vmax.f32 %v3519_v40, 0.0  ;;  %v3572_v2 = vmax.f32 %v3562_v42, 0.0  ;;  %v3944_v34 = vld [vmem:[#allocation13 + $0xa48] sm:$0xff]  ;;  %v3959_v40 = vld [vmem:[#allocation13 + $0xac0] sm:$0xff] }
 0x61f   :  { %v3525_v61 = vadd.f32 %v3524_v58, %v3311_v36  ;;  %v3568_v62 = vadd.f32 %v3567_v60, %v3319_v37  ;;  %v3571_v54 = vmax.f32 %v3521_v44, 0.0  ;;  %v3573_v6 = vmax.f32 %v3564_v46, 0.0  ;;  %v3960_v42 = vld [vmem:[#allocation13 + $0xac8] sm:$0xff]  ;;  %v3967_v50 = vld [vmem:[#allocation13 + $0xb00] sm:$0xff] }
 0x620   :  { %v3574_v1 = vmax.f32 %v3523_v57, 0.0  ;;  %v3576_v3 = vmax.f32 %v3566_v59, 0.0  ;;  %v16852_v35 = vcombine.low %v3919_v8, %v3927_v24  ;;  %v16854_v36 = vcombine.low %v3920_v25, %v3928_v26  ;;  %v3975_v57 = vld [vmem:[#allocation13 + $0xb40] sm:$0xff]  ;;  %v3968_v58 = vld [vmem:[#allocation13 + $0xb08] sm:$0xff] }
 0x621   :  { %v3575_v5 = vmax.f32 %v3525_v61, 0.0  ;;  %v3577_v7 = vmax.f32 %v3568_v62, 0.0  ;;  %v16871_v38 = vcombine.high %v3936_v33, %v3944_v34  ;;  %v16870_v44 = vcombine.low %v3936_v33, %v3944_v34  ;;  %v3976_v59 = vld [vmem:[#allocation13 + $0xb48] sm:$0xff]  ;;  %v4047_v34 = vld [vmem:[#allocation13 + $0xd80] sm:$0xff] }
 0x622   :  { %v20865_v10 = vpack.c.bf16 %v3574_v1, %v3570_v63  ;;  %v20867_v11 = vpack.c.bf16 %v3576_v3, %v3572_v2  ;;  %v16885_v45 = vcombine.high %v3951_v39, %v3959_v40  ;;  %v16887_v46 = vcombine.high %v3952_v41, %v3960_v42  ;;  %v3983_v1 = vld [vmem:[#allocation13 + $0xb80] sm:$0xff]  ;;  %v3984_v3 = vld [vmem:[#allocation13 + $0xb88] sm:$0xff] }
 0x623   :  { %v20869_v12 = vpack.c.bf16 %v3575_v5, %v3571_v54  ;;  %v20871_v13 = vpack.c.bf16 %v3577_v7, %v3573_v6  ;;  %v16884_v60 = vcombine.low %v3951_v39, %v3959_v40  ;;  %v16886_v61 = vcombine.low %v3952_v41, %v3960_v42  ;;  %v3991_v2 = vld [vmem:[#allocation13 + $0xbc0] sm:$0xff] }
 0x624   :  { %v16901_v62 = vcombine.high %v3967_v50, %v3975_v57  ;;  %v16903_v63 = vcombine.high %v3968_v58, %v3976_v59  ;;  %v16900_v53 = vcombine.low %v3967_v50, %v3975_v57  ;;  %v16902_v54 = vcombine.low %v3968_v58, %v3976_v59  ;;  %v3999_v7 = vld [vmem:[#allocation13 + $0xc00] sm:$0xff] }
 0x625   :  { %6719 = vmatprep.mubr.bf16.mxu1 %v20869_v12  ;;  %6805 = vmatprep.mubr.bf16.mxu0 %v20869_v12  ;;  %v16917_v5 = vcombine.high %v3983_v1, %v3991_v2  ;;  %v16919_v6 = vcombine.high %v3984_v3, %v3992_v4  ;;  %v16918_v16 = vcombine.low %v3984_v3, %v3992_v4  ;;  %v4063_v42 = vld [vmem:[#allocation13 + $0xe00] sm:$0xff] }
 0x626   :  { %6720 = vmatmul.mubr.bf16.vlgmr.msra.gmra.mrb[84].mxu1 %v20865_v10  ;;  %6806 = vmatmul.mubr.bf16.vlgmr.msra.gmra.mrb[88].mxu0 %v20865_v10  ;;  %v16933_v17 = vcombine.high %v3999_v7, %v4007_v55  ;;  %v4079_v59 = vld [vmem:[#allocation13 + $0xe80] sm:$0xff] }
 0x627   :  { %6731 = vmatpush1.bf16.msra.mxu1 %v16804_v30  ;;  %6817 = vmatpush1.bf16.msra.mxu0 %v16806_v31  ;;  %v16855_v30 = vcombine.high %v3920_v25, %v3928_v26  ;;  %v3935_v31 = vld [vmem:[#allocation13 + $0xa00] sm:$0xff] }
 0x628   :  { %6732 = vmatprep.subr.bf16.mxu1 %v16821_v14  ;;  %6818 = vmatprep.subr.bf16.mxu0 %v16823_v15  ;;  %v16869_v37 = vcombine.high %v3935_v31, %v3943_v32  ;;  %v16868_v43 = vcombine.low %v3935_v31, %v3943_v32  ;;  %v4008_v14 = vld [vmem:[#allocation13 + $0xc48] sm:$0xff]  ;;  %v16916_v15 = vcombine.low %v3983_v1, %v3991_v2  ;;  %v4031_v26 = vld [vmem:[#allocation13 + $0xd00] sm:$0xff] }
 0x629   :  { %6762 = vmatprep.mubr.bf16.mxu1 %v20871_v13  ;;  %6848 = vmatprep.mubr.bf16.mxu0 %v20871_v13  ;;  %v16935_v18 = vcombine.high %v4000_v56, %v4008_v14  ;;  %v16934_v8 = vcombine.low %v4000_v56, %v4008_v14  ;;  %v4095_v4 = vld [vmem:[#allocation13 + $0xf00] sm:$0xff] }
 0x62a   :  { %v4111_v14 = vld [vmem:[#allocation13 + $0xf80] sm:$0xff] }
 0x62b   :  { %6733 = vmatpush1.bf16.msra.mxu1 %v16820_v20  ;;  %6819 = vmatpush1.bf16.msra.mxu0 %v16822_v21  ;;  %v4023_v20 = vld [vmem:[#allocation13 + $0xcc0] sm:$0xff]  ;;  %v4016_v21 = vld [vmem:[#allocation13 + $0xc88] sm:$0xff] }
 0x62c   :  { %6734 = vmatprep.subr.bf16.mxu1 %v16837_v22  ;;  %6820 = vmatprep.subr.bf16.mxu0 %v16839_v23  ;;  %v4024_v22 = vld [vmem:[#allocation13 + $0xcc8] sm:$0xff]  ;;  %v16932_v23 = vcombine.low %v3999_v7, %v4007_v55  ;;  %v16949_v24 = vcombine.high %v4015_v19, %v4023_v20 }
 0x62d   :  { %v16951_v25 = vcombine.high %v4016_v21, %v4024_v22  ;;  %v16950_v31 = vcombine.low %v4016_v21, %v4024_v22  ;;  %v3617_v22 = vld [vmem:[#allocation13 + $0x10] sm:$0xff] }
 0x62f   :  { %6735 = vmatpush1.bf16.msra.mxu1 %v16836_v27  ;;  %6821 = vmatpush1.bf16.msra.mxu0 %v16838_v28  ;;  %v4039_v27 = vld [vmem:[#allocation13 + $0xd40] sm:$0xff]  ;;  %v4032_v28 = vld [vmem:[#allocation13 + $0xd08] sm:$0xff] }
 0x630   :  { %6736 = vmatprep.subr.bf16.mxu1 %v16853_v29  ;;  %6822 = vmatprep.subr.bf16.mxu0 %v16855_v30  ;;  %v4040_v29 = vld [vmem:[#allocation13 + $0xd48] sm:$0xff]  ;;  %v16948_v30 = vcombine.low %v4015_v19, %v4023_v20  ;;  %v16965_v32 = vcombine.high %v4031_v26, %v4039_v27 }
 0x631   :  { %v16967_v33 = vcombine.high %v4032_v28, %v4040_v29  ;;  %v16966_v39 = vcombine.low %v4032_v28, %v4040_v29  ;;  %v3633_v29 = vld [vmem:[#allocation13 + $0x90] sm:$0xff] }
 0x633   :  { %6737 = vmatpush1.bf16.msra.mxu1 %v16852_v35  ;;  %6823 = vmatpush1.bf16.msra.mxu0 %v16854_v36  ;;  %v4055_v35 = vld [vmem:[#allocation13 + $0xdc0] sm:$0xff]  ;;  %v4048_v36 = vld [vmem:[#allocation13 + $0xd88] sm:$0xff] }
 0x634   :  { %6738 = vmatprep.subr.bf16.mxu1 %v16869_v37  ;;  %6824 = vmatprep.subr.bf16.mxu0 %v16871_v38  ;;  %v4056_v37 = vld [vmem:[#allocation13 + $0xdc8] sm:$0xff]  ;;  %v16964_v38 = vcombine.low %v4031_v26, %v4039_v27  ;;  %v16981_v40 = vcombine.high %v4047_v34, %v4055_v35 }
 0x635   :  { %v16983_v41 = vcombine.high %v4048_v36, %v4056_v37  ;;  %v16982_v50 = vcombine.low %v4048_v36, %v4056_v37  ;;  %v3649_v37 = vld [vmem:[#allocation13 + $0x110] sm:$0xff] }
 0x637   :  { %6739 = vmatpush1.bf16.msra.mxu1 %v16868_v43  ;;  %6825 = vmatpush1.bf16.msra.mxu0 %v16870_v44  ;;  %v4071_v43 = vld [vmem:[#allocation13 + $0xe40] sm:$0xff]  ;;  %v4064_v44 = vld [vmem:[#allocation13 + $0xe08] sm:$0xff] }
 0x638   :  { %6740 = vmatprep.subr.bf16.mxu1 %v16885_v45  ;;  %6826 = vmatprep.subr.bf16.mxu0 %v16887_v46  ;;  %v4072_v45 = vld [vmem:[#allocation13 + $0xe48] sm:$0xff]  ;;  %v16980_v46 = vcombine.low %v4047_v34, %v4055_v35  ;;  %v16997_v57 = vcombine.high %v4063_v42, %v4071_v43 }
 0x639   :  { %v16999_v58 = vcombine.high %v4064_v44, %v4072_v45  ;;  %v16998_v1 = vcombine.low %v4064_v44, %v4072_v45  ;;  %v3665_v45 = vld [vmem:[#allocation13 + $0x190] sm:$0xff] }
 0x63b   :  { %6741 = vmatpush1.bf16.msra.mxu1 %v16884_v60  ;;  %6827 = vmatpush1.bf16.msra.mxu0 %v16886_v61  ;;  %v4087_v60 = vld [vmem:[#allocation13 + $0xec0] sm:$0xff]  ;;  %v4080_v61 = vld [vmem:[#allocation13 + $0xe88] sm:$0xff] }
 0x63c   :  { %6742 = vmatprep.subr.bf16.mxu1 %v16901_v62  ;;  %6828 = vmatprep.subr.bf16.mxu0 %v16903_v63  ;;  %v4088_v62 = vld [vmem:[#allocation13 + $0xec8] sm:$0xff]  ;;  %v16996_v63 = vcombine.low %v4063_v42, %v4071_v43  ;;  %v17013_v2 = vcombine.high %v4079_v59, %v4087_v60 }
 0x63d   :  { %v17015_v3 = vcombine.high %v4080_v61, %v4088_v62  ;;  %v17014_v7 = vcombine.low %v4080_v61, %v4088_v62  ;;  %v3681_v62 = vld [vmem:[#allocation13 + $0x210] sm:$0xff] }
 0x63f   :  { %6743 = vmatpush1.bf16.msra.mxu1 %v16900_v53  ;;  %6829 = vmatpush1.bf16.msra.mxu0 %v16902_v54  ;;  %v4103_v53 = vld [vmem:[#allocation13 + $0xf40] sm:$0xff]  ;;  %v4096_v54 = vld [vmem:[#allocation13 + $0xf08] sm:$0xff] }
 0x640   :  { %6744 = vmatprep.subr.bf16.mxu1 %v16917_v5  ;;  %6830 = vmatprep.subr.bf16.mxu0 %v16919_v6  ;;  %v4104_v5 = vld [vmem:[#allocation13 + $0xf48] sm:$0xff]  ;;  %v17012_v6 = vcombine.low %v4079_v59, %v4087_v60  ;;  %v17029_v55 = vcombine.high %v4095_v4, %v4103_v53 }
 0x641   :  { %v17031_v56 = vcombine.high %v4096_v54, %v4104_v5  ;;  %v17030_v19 = vcombine.low %v4096_v54, %v4104_v5  ;;  %v3697_v5 = vld [vmem:[#allocation13 + $0x290] sm:$0xff] }
 0x643   :  { %6745 = vmatpush1.bf16.msra.mxu1 %v16916_v15  ;;  %6831 = vmatpush1.bf16.msra.mxu0 %v16918_v16  ;;  %v4119_v15 = vld [vmem:[#allocation13 + $0xfc0] sm:$0xff]  ;;  %v4112_v16 = vld [vmem:[#allocation13 + $0xf88] sm:$0xff] }
 0x644   :  { %6746 = vmatprep.subr.bf16.mxu1 %v16933_v17  ;;  %6832 = vmatprep.subr.bf16.mxu0 %v16935_v18  ;;  %v4120_v17 = vld [vmem:[#allocation13 + $0xfc8] sm:$0xff]  ;;  %v17028_v18 = vcombine.low %v4095_v4, %v4103_v53  ;;  %v17045_v20 = vcombine.high %v4111_v14, %v4119_v15 }
 0x645   :  { %v17047_v21 = vcombine.high %v4112_v16, %v4120_v17  ;;  %v17046_v26 = vcombine.low %v4112_v16, %v4120_v17  ;;  %v3713_v17 = vld [vmem:[#allocation13 + $0x310] sm:$0xff] }
 0x647   :  { %6747 = vmatpush1.bf16.msra.mxu1 %v16932_v23  ;;  %6833 = vmatpush1.bf16.msra.mxu0 %v16934_v8  ;;  %v3625_v23 = vld [vmem:[#allocation13 + $0x50] sm:$0xff]  ;;  %v3618_v8 = vld [vmem:[#allocation13 + $0x18] sm:$0xff] }
 0x648   :  { %6748 = vmatprep.subr.bf16.mxu1 %v16949_v24  ;;  %6834 = vmatprep.subr.bf16.mxu0 %v16951_v25  ;;  %v3626_v24 = vld [vmem:[#allocation13 + $0x58] sm:$0xff]  ;;  %v17044_v25 = vcombine.low %v4111_v14, %v4119_v15  ;;  %v16553_v27 = vcombine.high %v3617_v22, %v3625_v23 }
 0x649   :  { %v16555_v28 = vcombine.high %v3618_v8, %v3626_v24  ;;  %v16554_v34 = vcombine.low %v3618_v8, %v3626_v24  ;;  %v3729_v24 = vld [vmem:[#allocation13 + $0x390] sm:$0xff] }
 0x64b   :  { %6749 = vmatpush1.bf16.msra.mxu1 %v16948_v30  ;;  %6835 = vmatpush1.bf16.msra.mxu0 %v16950_v31  ;;  %v3641_v30 = vld [vmem:[#allocation13 + $0xd0] sm:$0xff]  ;;  %v3634_v31 = vld [vmem:[#allocation13 + $0x98] sm:$0xff] }
 0x64c   :  { %6750 = vmatprep.subr.bf16.mxu1 %v16965_v32  ;;  %6836 = vmatprep.subr.bf16.mxu0 %v16967_v33  ;;  %v3642_v32 = vld [vmem:[#allocation13 + $0xd8] sm:$0xff]  ;;  %v16552_v33 = vcombine.low %v3617_v22, %v3625_v23  ;;  %v16569_v35 = vcombine.high %v3633_v29, %v3641_v30 }
 0x64d   :  { %v16571_v36 = vcombine.high %v3634_v31, %v3642_v32  ;;  %v16570_v42 = vcombine.low %v3634_v31, %v3642_v32  ;;  %v3745_v32 = vld [vmem:[#allocation13 + $0x410] sm:$0xff] }
 0x64f   :  { %6751 = vmatpush1.bf16.msra.mxu1 %v16964_v38  ;;  %6837 = vmatpush1.bf16.msra.mxu0 %v16966_v39  ;;  %v3657_v38 = vld [vmem:[#allocation13 + $0x150] sm:$0xff]  ;;  %v3650_v39 = vld [vmem:[#allocation13 + $0x118] sm:$0xff] }
 0x650   :  { %6752 = vmatprep.subr.bf16.mxu1 %v16981_v40  ;;  %6838 = vmatprep.subr.bf16.mxu0 %v16983_v41  ;;  %v3658_v40 = vld [vmem:[#allocation13 + $0x158] sm:$0xff]  ;;  %v16568_v41 = vcombine.low %v3633_v29, %v3641_v30  ;;  %v16585_v43 = vcombine.high %v3649_v37, %v3657_v38 }
 0x651   :  { %v16587_v44 = vcombine.high %v3650_v39, %v3658_v40  ;;  %v16586_v59 = vcombine.low %v3650_v39, %v3658_v40  ;;  %v3761_v40 = vld [vmem:[#allocation13 + $0x490] sm:$0xff] }
 0x653   :  { %6753 = vmatpush1.bf16.msra.mxu1 %v16980_v46  ;;  %6839 = vmatpush1.bf16.msra.mxu0 %v16982_v50  ;;  %v3673_v46 = vld [vmem:[#allocation13 + $0x1d0] sm:$0xff]  ;;  %v3666_v50 = vld [vmem:[#allocation13 + $0x198] sm:$0xff] }
 0x654   :  { %6754 = vmatprep.subr.bf16.mxu1 %v16997_v57  ;;  %6840 = vmatprep.subr.bf16.mxu0 %v16999_v58  ;;  %v3674_v57 = vld [vmem:[#allocation13 + $0x1d8] sm:$0xff]  ;;  %v16584_v58 = vcombine.low %v3649_v37, %v3657_v38  ;;  %v16601_v60 = vcombine.high %v3665_v45, %v3673_v46 }
 0x655   :  { %v16603_v61 = vcombine.high %v3666_v50, %v3674_v57  ;;  %v16602_v4 = vcombine.low %v3666_v50, %v3674_v57  ;;  %v3777_v57 = vld [vmem:[#allocation13 + $0x510] sm:$0xff] }
 0x657   :  { %6755 = vmatpush1.bf16.msra.mxu1 %v16996_v63  ;;  %6841 = vmatpush1.bf16.msra.mxu0 %v16998_v1  ;;  %v3689_v63 = vld [vmem:[#allocation13 + $0x250] sm:$0xff]  ;;  %v3682_v1 = vld [vmem:[#allocation13 + $0x218] sm:$0xff] }
 0x658   :  { %6756 = vmatprep.subr.bf16.mxu1 %v17013_v2  ;;  %6842 = vmatprep.subr.bf16.mxu0 %v17015_v3  ;;  %v3690_v2 = vld [vmem:[#allocation13 + $0x258] sm:$0xff]  ;;  %v16600_v3 = vcombine.low %v3665_v45, %v3673_v46  ;;  %v16617_v53 = vcombine.high %v3681_v62, %v3689_v63 }
 0x659   :  { %v16619_v54 = vcombine.high %v3682_v1, %v3690_v2  ;;  %v16618_v14 = vcombine.low %v3682_v1, %v3690_v2  ;;  %v3793_v2 = vld [vmem:[#allocation13 + $0x590] sm:$0xff] }
 0x65b   :  { %6757 = vmatpush1.bf16.msra.mxu1 %v17012_v6  ;;  %6843 = vmatpush1.bf16.msra.mxu0 %v17014_v7  ;;  %v3705_v6 = vld [vmem:[#allocation13 + $0x2d0] sm:$0xff]  ;;  %v3698_v7 = vld [vmem:[#allocation13 + $0x298] sm:$0xff] }
 0x65c   :  { %6758 = vmatprep.subr.bf16.mxu1 %v17029_v55  ;;  %6844 = vmatprep.subr.bf16.mxu0 %v17031_v56  ;;  %v3706_v55 = vld [vmem:[#allocation13 + $0x2d8] sm:$0xff]  ;;  %v16616_v56 = vcombine.low %v3681_v62, %v3689_v63  ;;  %v16633_v15 = vcombine.high %v3697_v5, %v3705_v6 }
 0x65d   :  { %v16635_v16 = vcombine.high %v3698_v7, %v3706_v55  ;;  %v16634_v22 = vcombine.low %v3698_v7, %v3706_v55  ;;  %v3809_v55 = vld [vmem:[#allocation13 + $0x610] sm:$0xff] }
 0x65f   :  { %6759 = vmatpush1.bf16.msra.mxu1 %v17028_v18  ;;  %6845 = vmatpush1.bf16.msra.mxu0 %v17030_v19  ;;  %v3721_v18 = vld [vmem:[#allocation13 + $0x350] sm:$0xff]  ;;  %v3714_v19 = vld [vmem:[#allocation13 + $0x318] sm:$0xff] }
 0x660   :  { %6760 = vmatprep.subr.bf16.mxu1 %v17045_v20  ;;  %6846 = vmatprep.subr.bf16.mxu0 %v17047_v21  ;;  %v3722_v20 = vld [vmem:[#allocation13 + $0x358] sm:$0xff]  ;;  %v16632_v21 = vcombine.low %v3697_v5, %v3705_v6  ;;  %v16649_v23 = vcombine.high %v3713_v17, %v3721_v18 }
 0x661   :  { %v16651_v8 = vcombine.high %v3714_v19, %v3722_v20  ;;  %v16650_v29 = vcombine.low %v3714_v19, %v3722_v20  ;;  %v3825_v20 = vld [vmem:[#allocation13 + $0x690] sm:$0xff] }
 0x663   :  { %6761 = vmatpush1.bf16.msra.mxu1 %v17044_v25  ;;  %6847 = vmatpush1.bf16.msra.mxu0 %v17046_v26  ;;  %v3737_v25 = vld [vmem:[#allocation13 + $0x3d0] sm:$0xff]  ;;  %v3730_v26 = vld [vmem:[#allocation13 + $0x398] sm:$0xff] }
 0x664   :  { %6859 = vmatprep.subr.bf16.mxu1 %v16553_v27  ;;  %6945 = vmatprep.subr.bf16.mxu0 %v16555_v28  ;;  %v3738_v27 = vld [vmem:[#allocation13 + $0x3d8] sm:$0xff]  ;;  %v16648_v28 = vcombine.low %v3713_v17, %v3721_v18  ;;  %v16665_v30 = vcombine.high %v3729_v24, %v3737_v25 }
 0x665   :  { %v16667_v31 = vcombine.high %v3730_v26, %v3738_v27  ;;  %v16666_v37 = vcombine.low %v3730_v26, %v3738_v27  ;;  %v3841_v27 = vld [vmem:[#allocation13 + $0x710] sm:$0xff] }
 0x666   :  { %6763 = vmatmul.mubr.bf16.vlgmr.msra.gmra.mrb[84].mxu1 %v20867_v11  ;;  %6849 = vmatmul.mubr.bf16.vlgmr.msra.gmra.mrb[88].mxu0 %v20867_v11 }
 0x667   :  { %6860 = vmatpush1.bf16.msra.mxu1 %v16552_v33  ;;  %6891 = vmatprep.mubr.bf16.mxu1 %v20869_v12  ;;  %v3753_v33 = vld [vmem:[#allocation13 + $0x450] sm:$0xff] }
 0x668   :  { %6946 = vmatpush1.bf16.msra.mxu0 %v16554_v34  ;;  %6977 = vmatprep.mubr.bf16.mxu0 %v20869_v12  ;;  %v3746_v34 = vld [vmem:[#allocation13 + $0x418] sm:$0xff]  ;;  %v16681_v38 = vcombine.high %v3745_v32, %v3753_v33 }
 0x669   :  { %6861 = vmatprep.subr.bf16.mxu1 %v16569_v35  ;;  %6947 = vmatprep.subr.bf16.mxu0 %v16571_v36  ;;  %v3754_v35 = vld [vmem:[#allocation13 + $0x458] sm:$0xff]  ;;  %v16664_v36 = vcombine.low %v3729_v24, %v3737_v25 }
 0x66a   :  { %v16683_v39 = vcombine.high %v3746_v34, %v3754_v35  ;;  %v16682_v45 = vcombine.low %v3746_v34, %v3754_v35  ;;  %v3857_v35 = vld [vmem:[#allocation13 + $0x790] sm:$0xff] }
 0x66b   :  { %6862 = vmatpush1.bf16.msra.mxu1 %v16568_v41  ;;  %v3769_v41 = vld [vmem:[#allocation13 + $0x4d0] sm:$0xff] }
 0x66c   :  { %6948 = vmatpush1.bf16.msra.mxu0 %v16570_v42  ;;  %6863 = vmatprep.subr.bf16.mxu1 %v16585_v43  ;;  %v3762_v42 = vld [vmem:[#allocation13 + $0x498] sm:$0xff]  ;;  %v16697_v46 = vcombine.high %v3761_v40, %v3769_v41 }
 0x66d   :  { %6949 = vmatprep.subr.bf16.mxu0 %v16587_v44  ;;  %v3770_v43 = vld [vmem:[#allocation13 + $0x4d8] sm:$0xff]  ;;  %v16680_v44 = vcombine.low %v3745_v32, %v3753_v33 }
 0x66e   :  { %v16699_v50 = vcombine.high %v3762_v42, %v3770_v43  ;;  %v16698_v62 = vcombine.low %v3762_v42, %v3770_v43  ;;  %v3873_v43 = vld [vmem:[#allocation13 + $0x810] sm:$0xff] }
 0x66f   :  { %6864 = vmatpush1.bf16.msra.mxu1 %v16584_v58  ;;  %v3785_v58 = vld [vmem:[#allocation13 + $0x550] sm:$0xff] }
 0x670   :  { %6950 = vmatpush1.bf16.msra.mxu0 %v16586_v59  ;;  %6865 = vmatprep.subr.bf16.mxu1 %v16601_v60  ;;  %v3778_v59 = vld [vmem:[#allocation13 + $0x518] sm:$0xff]  ;;  %v16713_v63 = vcombine.high %v3777_v57, %v3785_v58 }
 0x671   :  { %6951 = vmatprep.subr.bf16.mxu0 %v16603_v61  ;;  %v3786_v60 = vld [vmem:[#allocation13 + $0x558] sm:$0xff]  ;;  %v16696_v61 = vcombine.low %v3761_v40, %v3769_v41 }
 0x672   :  { %v16715_v1 = vcombine.high %v3778_v59, %v3786_v60  ;;  %v16714_v5 = vcombine.low %v3778_v59, %v3786_v60  ;;  %v3889_v60 = vld [vmem:[#allocation13 + $0x890] sm:$0xff] }
 0x673   :  { %6866 = vmatpush1.bf16.msra.mxu1 %v16600_v3  ;;  %v3801_v3 = vld [vmem:[#allocation13 + $0x5d0] sm:$0xff] }
 0x674   :  { %6952 = vmatpush1.bf16.msra.mxu0 %v16602_v4  ;;  %6867 = vmatprep.subr.bf16.mxu1 %v16617_v53  ;;  %v3794_v4 = vld [vmem:[#allocation13 + $0x598] sm:$0xff]  ;;  %v16729_v6 = vcombine.high %v3793_v2, %v3801_v3 }
 0x675   :  { %6953 = vmatprep.subr.bf16.mxu0 %v16619_v54  ;;  %v3802_v53 = vld [vmem:[#allocation13 + $0x5d8] sm:$0xff]  ;;  %v16712_v54 = vcombine.low %v3777_v57, %v3785_v58 }
 0x676   :  { %v16731_v7 = vcombine.high %v3794_v4, %v3802_v53  ;;  %v16730_v17 = vcombine.low %v3794_v4, %v3802_v53  ;;  %v3905_v4 = vld [vmem:[#allocation13 + $0x910] sm:$0xff] }
 0x677   :  { %6868 = vmatpush1.bf16.msra.mxu1 %v16616_v56  ;;  %v3817_v56 = vld [vmem:[#allocation13 + $0x650] sm:$0xff] }
 0x678   :  { %6954 = vmatpush1.bf16.msra.mxu0 %v16618_v14  ;;  %6869 = vmatprep.subr.bf16.mxu1 %v16633_v15  ;;  %v3810_v14 = vld [vmem:[#allocation13 + $0x618] sm:$0xff]  ;;  %v16745_v18 = vcombine.high %v3809_v55, %v3817_v56  ;;  %v3913_v53 = vld [vmem:[#allocation13 + $0x950] sm:$0xff] }
 0x679   :  { %6955 = vmatprep.subr.bf16.mxu0 %v16635_v16  ;;  %v3818_v15 = vld [vmem:[#allocation13 + $0x658] sm:$0xff]  ;;  %v16728_v16 = vcombine.low %v3793_v2, %v3801_v3 }
 0x67a   :  { %v16747_v19 = vcombine.high %v3810_v14, %v3818_v15  ;;  %v16746_v24 = vcombine.low %v3810_v14, %v3818_v15  ;;  %v3921_v15 = vld [vmem:[#allocation13 + $0x990] sm:$0xff] }
 0x67b   :  { %6870 = vmatpush1.bf16.msra.mxu1 %v16632_v21  ;;  %v3833_v21 = vld [vmem:[#allocation13 + $0x6d0] sm:$0xff] }
 0x67c   :  { %6956 = vmatpush1.bf16.msra.mxu0 %v16634_v22  ;;  %6871 = vmatprep.subr.bf16.mxu1 %v16649_v23  ;;  %v3826_v22 = vld [vmem:[#allocation13 + $0x698] sm:$0xff]  ;;  %v16761_v25 = vcombine.high %v3825_v20, %v3833_v21 }
 0x67d   :  { %6957 = vmatprep.subr.bf16.mxu0 %v16651_v8  ;;  %v3834_v23 = vld [vmem:[#allocation13 + $0x6d8] sm:$0xff]  ;;  %v16744_v8 = vcombine.low %v3809_v55, %v3817_v56  ;;  %v16841_v56 = vcombine.high %v3905_v4, %v3913_v53 }
 0x67e   :  { %v16763_v26 = vcombine.high %v3826_v22, %v3834_v23  ;;  %v16762_v32 = vcombine.low %v3826_v22, %v3834_v23  ;;  %v3937_v23 = vld [vmem:[#allocation13 + $0xa10] sm:$0xff] }
 0x67f   :  { %6872 = vmatpush1.bf16.msra.mxu1 %v16648_v28  ;;  %v3849_v28 = vld [vmem:[#allocation13 + $0x750] sm:$0xff] }
 0x680   :  { %6958 = vmatpush1.bf16.msra.mxu0 %v16650_v29  ;;  %6873 = vmatprep.subr.bf16.mxu1 %v16665_v30  ;;  %v3842_v29 = vld [vmem:[#allocation13 + $0x718] sm:$0xff]  ;;  %v16777_v33 = vcombine.high %v3841_v27, %v3849_v28 }
 0x681   :  { %6959 = vmatprep.subr.bf16.mxu0 %v16667_v31  ;;  %v3850_v30 = vld [vmem:[#allocation13 + $0x758] sm:$0xff]  ;;  %v16760_v31 = vcombine.low %v3825_v20, %v3833_v21 }
 0x682   :  { %v16779_v34 = vcombine.high %v3842_v29, %v3850_v30  ;;  %v16778_v40 = vcombine.low %v3842_v29, %v3850_v30  ;;  %v3953_v30 = vld [vmem:[#allocation13 + $0xa90] sm:$0xff] }
 0x683   :  { %6874 = vmatpush1.bf16.msra.mxu1 %v16664_v36  ;;  %v3865_v36 = vld [vmem:[#allocation13 + $0x7d0] sm:$0xff] }
 0x684   :  { %6960 = vmatpush1.bf16.msra.mxu0 %v16666_v37  ;;  %6875 = vmatprep.subr.bf16.mxu1 %v16681_v38  ;;  %v3858_v37 = vld [vmem:[#allocation13 + $0x798] sm:$0xff]  ;;  %v16793_v41 = vcombine.high %v3857_v35, %v3865_v36 }
 0x685   :  { %6961 = vmatprep.subr.bf16.mxu0 %v16683_v39  ;;  %v3866_v38 = vld [vmem:[#allocation13 + $0x7d8] sm:$0xff]  ;;  %v16776_v39 = vcombine.low %v3841_v27, %v3849_v28 }
 0x686   :  { %v16795_v42 = vcombine.high %v3858_v37, %v3866_v38  ;;  %v16794_v57 = vcombine.low %v3858_v37, %v3866_v38  ;;  %v3969_v38 = vld [vmem:[#allocation13 + $0xb10] sm:$0xff] }
 0x687   :  { %6876 = vmatpush1.bf16.msra.mxu1 %v16680_v44  ;;  %v3881_v44 = vld [vmem:[#allocation13 + $0x850] sm:$0xff] }
 0x688   :  { %6962 = vmatpush1.bf16.msra.mxu0 %v16682_v45  ;;  %6877 = vmatprep.subr.bf16.mxu1 %v16697_v46  ;;  %v3874_v45 = vld [vmem:[#allocation13 + $0x818] sm:$0xff]  ;;  %v16809_v58 = vcombine.high %v3873_v43, %v3881_v44 }
 0x689   :  { %6963 = vmatprep.subr.bf16.mxu0 %v16699_v50  ;;  %v3882_v46 = vld [vmem:[#allocation13 + $0x858] sm:$0xff]  ;;  %v16792_v50 = vcombine.low %v3857_v35, %v3865_v36 }
 0x68a   :  { %v16811_v59 = vcombine.high %v3874_v45, %v3882_v46  ;;  %v16810_v2 = vcombine.low %v3874_v45, %v3882_v46  ;;  %v3985_v46 = vld [vmem:[#allocation13 + $0xb90] sm:$0xff] }
 0x68b   :  { %6878 = vmatpush1.bf16.msra.mxu1 %v16696_v61  ;;  %v3897_v61 = vld [vmem:[#allocation13 + $0x8d0] sm:$0xff] }
 0x68c   :  { %6964 = vmatpush1.bf16.msra.mxu0 %v16698_v62  ;;  %6879 = vmatprep.subr.bf16.mxu1 %v16713_v63  ;;  %v16808_v62 = vcombine.low %v3873_v43, %v3881_v44  ;;  %v3890_v63 = vld [vmem:[#allocation13 + $0x898] sm:$0xff]  ;;  %v16825_v3 = vcombine.high %v3889_v60, %v3897_v61 }
 0x68d   :  { %6965 = vmatprep.subr.bf16.mxu0 %v16715_v1  ;;  %v3898_v1 = vld [vmem:[#allocation13 + $0x8d8] sm:$0xff] }
 0x68e   :  { %v16826_v55 = vcombine.low %v3890_v63, %v3898_v1 }
 0x68f   :  { %6880 = vmatpush1.bf16.msra.mxu1 %v16712_v54  ;;  %v16827_v54 = vcombine.high %v3890_v63, %v3898_v1  ;;  %v4001_v63 = vld [vmem:[#allocation13 + $0xc10] sm:$0xff] }
 0x690   :  { %6966 = vmatpush1.bf16.msra.mxu0 %v16714_v5  ;;  %6881 = vmatprep.subr.bf16.mxu1 %v16729_v6  ;;  %v3906_v5 = vld [vmem:[#allocation13 + $0x918] sm:$0xff]  ;;  %v4009_v1 = vld [vmem:[#allocation13 + $0xc50] sm:$0xff] }
 0x691   :  { %6967 = vmatprep.subr.bf16.mxu0 %v16731_v7  ;;  %v3914_v6 = vld [vmem:[#allocation13 + $0x958] sm:$0xff]  ;;  %v16824_v7 = vcombine.low %v3889_v60, %v3897_v61 }
 0x692   :  { %v16843_v14 = vcombine.high %v3906_v5, %v3914_v6  ;;  %v16842_v20 = vcombine.low %v3906_v5, %v3914_v6  ;;  %v4017_v6 = vld [vmem:[#allocation13 + $0xc90] sm:$0xff] }
 0x693   :  { %6882 = vmatpush1.bf16.msra.mxu1 %v16728_v16  ;;  %v3929_v16 = vld [vmem:[#allocation13 + $0x9d0] sm:$0xff] }
 0x694   :  { %6968 = vmatpush1.bf16.msra.mxu0 %v16730_v17  ;;  %6883 = vmatprep.subr.bf16.mxu1 %v16745_v18  ;;  %v3922_v17 = vld [vmem:[#allocation13 + $0x998] sm:$0xff]  ;;  %v16857_v21 = vcombine.high %v3921_v15, %v3929_v16 }
 0x695   :  { %6969 = vmatprep.subr.bf16.mxu0 %v16747_v19  ;;  %v3930_v18 = vld [vmem:[#allocation13 + $0x9d8] sm:$0xff]  ;;  %v16840_v19 = vcombine.low %v3905_v4, %v3913_v53 }
 0x696   :  { %v16859_v22 = vcombine.high %v3922_v17, %v3930_v18  ;;  %v16858_v27 = vcombine.low %v3922_v17, %v3930_v18  ;;  %v4033_v18 = vld [vmem:[#allocation13 + $0xd10] sm:$0xff] }
 0x697   :  { %6884 = vmatpush1.bf16.msra.mxu1 %v16744_v8  ;;  %v3945_v8 = vld [vmem:[#allocation13 + $0xa50] sm:$0xff] }
 0x698   :  { %6970 = vmatpush1.bf16.msra.mxu0 %v16746_v24  ;;  %6885 = vmatprep.subr.bf16.mxu1 %v16761_v25  ;;  %v3938_v24 = vld [vmem:[#allocation13 + $0xa18] sm:$0xff]  ;;  %v16873_v28 = vcombine.high %v3937_v23, %v3945_v8 }
 0x699   :  { %6971 = vmatprep.subr.bf16.mxu0 %v16763_v26  ;;  %v3946_v25 = vld [vmem:[#allocation13 + $0xa58] sm:$0xff]  ;;  %v16856_v26 = vcombine.low %v3921_v15, %v3929_v16 }
 0x69a   :  { %v16875_v29 = vcombine.high %v3938_v24, %v3946_v25  ;;  %v16874_v35 = vcombine.low %v3938_v24, %v3946_v25  ;;  %v4049_v25 = vld [vmem:[#allocation13 + $0xd90] sm:$0xff] }
 0x69b   :  { %6886 = vmatpush1.bf16.msra.mxu1 %v16760_v31  ;;  %v3961_v31 = vld [vmem:[#allocation13 + $0xad0] sm:$0xff] }
 0x69c   :  { %6972 = vmatpush1.bf16.msra.mxu0 %v16762_v32  ;;  %6887 = vmatprep.subr.bf16.mxu1 %v16777_v33  ;;  %v3954_v32 = vld [vmem:[#allocation13 + $0xa98] sm:$0xff]  ;;  %v16889_v36 = vcombine.high %v3953_v30, %v3961_v31 }
 0x69d   :  { %6973 = vmatprep.subr.bf16.mxu0 %v16779_v34  ;;  %v3962_v33 = vld [vmem:[#allocation13 + $0xad8] sm:$0xff]  ;;  %v16872_v34 = vcombine.low %v3937_v23, %v3945_v8 }
 0x69e   :  { %v16891_v37 = vcombine.high %v3954_v32, %v3962_v33  ;;  %v16890_v43 = vcombine.low %v3954_v32, %v3962_v33  ;;  %v4065_v33 = vld [vmem:[#allocation13 + $0xe10] sm:$0xff] }
 0x69f   :  { %6888 = vmatpush1.bf16.msra.mxu1 %v16776_v39  ;;  %v3977_v39 = vld [vmem:[#allocation13 + $0xb50] sm:$0xff] }
 0x6a0   :  { %6974 = vmatpush1.bf16.msra.mxu0 %v16778_v40  ;;  %6889 = vmatprep.subr.bf16.mxu1 %v16793_v41  ;;  %v3970_v40 = vld [vmem:[#allocation13 + $0xb18] sm:$0xff]  ;;  %v16905_v44 = vcombine.high %v3969_v38, %v3977_v39 }
 0x6a1   :  { %6975 = vmatprep.subr.bf16.mxu0 %v16795_v42  ;;  %v3978_v41 = vld [vmem:[#allocation13 + $0xb58] sm:$0xff]  ;;  %v16888_v42 = vcombine.low %v3953_v30, %v3961_v31 }
 0x6a2   :  { %v16907_v45 = vcombine.high %v3970_v40, %v3978_v41  ;;  %v16906_v60 = vcombine.low %v3970_v40, %v3978_v41  ;;  %v4081_v41 = vld [vmem:[#allocation13 + $0xe90] sm:$0xff] }
 0x6a3   :  { %6890 = vmatpush1.bf16.msra.mxu1 %v16792_v50  ;;  %v3993_v50 = vld [vmem:[#allocation13 + $0xbd0] sm:$0xff] }
 0x6a4   :  { %6976 = vmatpush1.bf16.msra.mxu0 %v16794_v57  ;;  %6902 = vmatprep.subr.bf16.mxu1 %v16809_v58  ;;  %v3986_v57 = vld [vmem:[#allocation13 + $0xb98] sm:$0xff]  ;;  %v16921_v61 = vcombine.high %v3985_v46, %v3993_v50  ;;  %v16920_v4 = vcombine.low %v3985_v46, %v3993_v50 }
 0x6a5   :  { %6988 = vmatprep.subr.bf16.mxu0 %v16811_v59  ;;  %v3994_v58 = vld [vmem:[#allocation13 + $0xbd8] sm:$0xff]  ;;  %v16904_v59 = vcombine.low %v3969_v38, %v3977_v39 }
 0x6a6   :  { %6892 = vmatmul.mubr.bf16.vlgmr.msra.gmra.mrb[88].mxu1 %v20865_v10  ;;  %v16922_v53 = vcombine.low %v3986_v57, %v3994_v58 }
 0x6a7   :  { %6978 = vmatmul.mubr.bf16.vlgmr.msra.gmra.mrb[92].mxu0 %v20865_v10  ;;  %6903 = vmatpush1.bf16.msra.mxu1 %v16808_v62  ;;  %v16923_v62 = vcombine.high %v3986_v57, %v3994_v58  ;;  %v4097_v58 = vld [vmem:[#allocation13 + $0xf10] sm:$0xff] }
 0x6a8   :  { %6934 = vmatprep.mubr.bf16.mxu1 %v20871_v13  ;;  %6989 = vmatpush1.bf16.msra.mxu0 %v16810_v2  ;;  %v4002_v2 = vld [vmem:[#allocation13 + $0xc18] sm:$0xff] }
 0x6a9   :  { %7020 = vmatprep.mubr.bf16.mxu0 %v20871_v13  ;;  %6904 = vmatprep.subr.bf16.mxu1 %v16825_v3  ;;  %v4010_v3 = vld [vmem:[#allocation13 + $0xc58] sm:$0xff] }
 0x6aa   :  { %6990 = vmatprep.subr.bf16.mxu0 %v16827_v54  ;;  %v16937_v54 = vcombine.high %v4001_v63, %v4009_v1  ;;  %v16939_v5 = vcombine.high %v4002_v2, %v4010_v3  ;;  %v16938_v15 = vcombine.low %v4002_v2, %v4010_v3  ;;  %v4113_v3 = vld [vmem:[#allocation13 + $0xf90] sm:$0xff] }
 0x6ab   :  { %6905 = vmatpush1.bf16.msra.mxu1 %v16824_v7  ;;  %v4025_v7 = vld [vmem:[#allocation13 + $0xcd0] sm:$0xff] }
 0x6ac   :  { %6991 = vmatpush1.bf16.msra.mxu0 %v16826_v55  ;;  %6906 = vmatprep.subr.bf16.mxu1 %v16841_v56  ;;  %v4018_v55 = vld [vmem:[#allocation13 + $0xc98] sm:$0xff]  ;;  %v16953_v16 = vcombine.high %v4017_v6, %v4025_v7 }
 0x6ad   :  { %6992 = vmatprep.subr.bf16.mxu0 %v16843_v14  ;;  %v4026_v56 = vld [vmem:[#allocation13 + $0xcd8] sm:$0xff]  ;;  %v16936_v14 = vcombine.low %v4001_v63, %v4009_v1 }
 0x6ae   :  { %v16955_v17 = vcombine.high %v4018_v55, %v4026_v56  ;;  %v16954_v23 = vcombine.low %v4018_v55, %v4026_v56  ;;  %v3619_v56 = vld [vmem:[#allocation13 + $0x20] sm:$0xff] }
 0x6af   :  { %6907 = vmatpush1.bf16.msra.mxu1 %v16840_v19  ;;  %v4041_v19 = vld [vmem:[#allocation13 + $0xd50] sm:$0xff] }
 0x6b0   :  { %6993 = vmatpush1.bf16.msra.mxu0 %v16842_v20  ;;  %6908 = vmatprep.subr.bf16.mxu1 %v16857_v21  ;;  %v4034_v20 = vld [vmem:[#allocation13 + $0xd18] sm:$0xff]  ;;  %v16969_v8 = vcombine.high %v4033_v18, %v4041_v19 }
 0x6b1   :  { %6994 = vmatprep.subr.bf16.mxu0 %v16859_v22  ;;  %v4042_v21 = vld [vmem:[#allocation13 + $0xd58] sm:$0xff]  ;;  %v16952_v22 = vcombine.low %v4017_v6, %v4025_v7 }
 0x6b2   :  { %v16971_v24 = vcombine.high %v4034_v20, %v4042_v21  ;;  %v16970_v30 = vcombine.low %v4034_v20, %v4042_v21  ;;  %v3635_v21 = vld [vmem:[#allocation13 + $0xa0] sm:$0xff] }
 0x6b3   :  { %6909 = vmatpush1.bf16.msra.mxu1 %v16856_v26  ;;  %v4057_v26 = vld [vmem:[#allocation13 + $0xdd0] sm:$0xff] }
 0x6b4   :  { %6995 = vmatpush1.bf16.msra.mxu0 %v16858_v27  ;;  %6910 = vmatprep.subr.bf16.mxu1 %v16873_v28  ;;  %v4050_v27 = vld [vmem:[#allocation13 + $0xd98] sm:$0xff]  ;;  %v16985_v31 = vcombine.high %v4049_v25, %v4057_v26 }
 0x6b5   :  { %6996 = vmatprep.subr.bf16.mxu0 %v16875_v29  ;;  %v4058_v28 = vld [vmem:[#allocation13 + $0xdd8] sm:$0xff]  ;;  %v16968_v29 = vcombine.low %v4033_v18, %v4041_v19 }
 0x6b6   :  { %v16987_v32 = vcombine.high %v4050_v27, %v4058_v28  ;;  %v16986_v38 = vcombine.low %v4050_v27, %v4058_v28  ;;  %v3651_v27 = vld [vmem:[#allocation13 + $0x120] sm:$0xff] }
 0x6b7   :  { %6911 = vmatpush1.bf16.msra.mxu1 %v16872_v34  ;;  %v4073_v34 = vld [vmem:[#allocation13 + $0xe50] sm:$0xff]  ;;  %v3659_v28 = vld [vmem:[#allocation13 + $0x160] sm:$0xff] }
 0x6b8   :  { %6997 = vmatpush1.bf16.msra.mxu0 %v16874_v35  ;;  %6912 = vmatprep.subr.bf16.mxu1 %v16889_v36  ;;  %v4066_v35 = vld [vmem:[#allocation13 + $0xe18] sm:$0xff]  ;;  %v17001_v39 = vcombine.high %v4065_v33, %v4073_v34 }
 0x6b9   :  { %6998 = vmatprep.subr.bf16.mxu0 %v16891_v37  ;;  %v4074_v36 = vld [vmem:[#allocation13 + $0xe58] sm:$0xff]  ;;  %v16984_v37 = vcombine.low %v4049_v25, %v4057_v26 }
 0x6ba   :  { %v17003_v40 = vcombine.high %v4066_v35, %v4074_v36  ;;  %v17002_v46 = vcombine.low %v4066_v35, %v4074_v36  ;;  %v3667_v36 = vld [vmem:[#allocation13 + $0x1a0] sm:$0xff] }
 0x6bb   :  { %6913 = vmatpush1.bf16.msra.mxu1 %v16888_v42  ;;  %v4089_v42 = vld [vmem:[#allocation13 + $0xed0] sm:$0xff] }
 0x6bc   :  { %6999 = vmatpush1.bf16.msra.mxu0 %v16890_v43  ;;  %6914 = vmatprep.subr.bf16.mxu1 %v16905_v44  ;;  %v4082_v43 = vld [vmem:[#allocation13 + $0xe98] sm:$0xff]  ;;  %v17017_v50 = vcombine.high %v4081_v41, %v4089_v42 }
 0x6bd   :  { %7000 = vmatprep.subr.bf16.mxu0 %v16907_v45  ;;  %v4090_v44 = vld [vmem:[#allocation13 + $0xed8] sm:$0xff]  ;;  %v17000_v45 = vcombine.low %v4065_v33, %v4073_v34  ;;  %v16589_v34 = vcombine.high %v3651_v27, %v3659_v28 }
 0x6be   :  { %v17019_v57 = vcombine.high %v4082_v43, %v4090_v44  ;;  %v17018_v63 = vcombine.low %v4082_v43, %v4090_v44  ;;  %v3683_v44 = vld [vmem:[#allocation13 + $0x220] sm:$0xff] }
 0x6bf   :  { %6915 = vmatpush1.bf16.msra.mxu1 %v16904_v59  ;;  %v4105_v59 = vld [vmem:[#allocation13 + $0xf50] sm:$0xff] }
 0x6c0   :  { %7001 = vmatpush1.bf16.msra.mxu0 %v16906_v60  ;;  %6916 = vmatprep.subr.bf16.mxu1 %v16921_v61  ;;  %v4098_v60 = vld [vmem:[#allocation13 + $0xf18] sm:$0xff]  ;;  %v17033_v1 = vcombine.high %v4097_v58, %v4105_v59 }
 0x6c1   :  { %7002 = vmatprep.subr.bf16.mxu0 %v16923_v62  ;;  %v4106_v61 = vld [vmem:[#allocation13 + $0xf58] sm:$0xff]  ;;  %v17016_v62 = vcombine.low %v4081_v41, %v4089_v42 }
 0x6c2   :  { %v17035_v2 = vcombine.high %v4098_v60, %v4106_v61  ;;  %v17034_v6 = vcombine.low %v4098_v60, %v4106_v61  ;;  %v3699_v61 = vld [vmem:[#allocation13 + $0x2a0] sm:$0xff] }
 0x6c3   :  { %6917 = vmatpush1.bf16.msra.mxu1 %v16920_v4  ;;  %v4121_v4 = vld [vmem:[#allocation13 + $0xfd0] sm:$0xff] }
 0x6c4   :  { %7003 = vmatpush1.bf16.msra.mxu0 %v16922_v53  ;;  %6918 = vmatprep.subr.bf16.mxu1 %v16937_v54  ;;  %v4114_v53 = vld [vmem:[#allocation13 + $0xf98] sm:$0xff]  ;;  %v17049_v7 = vcombine.high %v4113_v3, %v4121_v4 }
 0x6c5   :  { %7004 = vmatprep.subr.bf16.mxu0 %v16939_v5  ;;  %v4122_v54 = vld [vmem:[#allocation13 + $0xfd8] sm:$0xff]  ;;  %v17032_v5 = vcombine.low %v4097_v58, %v4105_v59 }
 0x6c6   :  { %v17051_v55 = vcombine.high %v4114_v53, %v4122_v54  ;;  %v17050_v18 = vcombine.low %v4114_v53, %v4122_v54  ;;  %v3715_v54 = vld [vmem:[#allocation13 + $0x320] sm:$0xff] }
 0x6c7   :  { %6919 = vmatpush1.bf16.msra.mxu1 %v16936_v14  ;;  %v3627_v14 = vld [vmem:[#allocation13 + $0x60] sm:$0xff] }
 0x6c8   :  { %7005 = vmatpush1.bf16.msra.mxu0 %v16938_v15  ;;  %6920 = vmatprep.subr.bf16.mxu1 %v16953_v16  ;;  %v3620_v15 = vld [vmem:[#allocation13 + $0x28] sm:$0xff]  ;;  %v16557_v19 = vcombine.high %v3619_v56, %v3627_v14 }
 0x6c9   :  { %7006 = vmatprep.subr.bf16.mxu0 %v16955_v17  ;;  %v3628_v16 = vld [vmem:[#allocation13 + $0x68] sm:$0xff]  ;;  %v17048_v17 = vcombine.low %v4113_v3, %v4121_v4 }
 0x6ca   :  { %v16559_v20 = vcombine.high %v3620_v15, %v3628_v16  ;;  %v16558_v25 = vcombine.low %v3620_v15, %v3628_v16  ;;  %v3731_v16 = vld [vmem:[#allocation13 + $0x3a0] sm:$0xff] }
 0x6cb   :  { %6921 = vmatpush1.bf16.msra.mxu1 %v16952_v22  ;;  %v3643_v22 = vld [vmem:[#allocation13 + $0xe0] sm:$0xff] }
 0x6cc   :  { %7007 = vmatpush1.bf16.msra.mxu0 %v16954_v23  ;;  %6922 = vmatprep.subr.bf16.mxu1 %v16969_v8  ;;  %v16556_v23 = vcombine.low %v3619_v56, %v3627_v14  ;;  %v3636_v8 = vld [vmem:[#allocation13 + $0xa8] sm:$0xff]  ;;  %v16573_v26 = vcombine.high %v3635_v21, %v3643_v22 }
 0x6cd   :  { %7008 = vmatprep.subr.bf16.mxu0 %v16971_v24  ;;  %v3644_v24 = vld [vmem:[#allocation13 + $0xe8] sm:$0xff] }
 0x6ce   :  { %v16574_v33 = vcombine.low %v3636_v8, %v3644_v24 }
 0x6cf   :  { %6923 = vmatpush1.bf16.msra.mxu1 %v16968_v29  ;;  %v16575_v29 = vcombine.high %v3636_v8, %v3644_v24  ;;  %v3747_v8 = vld [vmem:[#allocation13 + $0x420] sm:$0xff] }
 0x6d0   :  { %7009 = vmatpush1.bf16.msra.mxu0 %v16970_v30  ;;  %6924 = vmatprep.subr.bf16.mxu1 %v16985_v31  ;;  %v3652_v30 = vld [vmem:[#allocation13 + $0x128] sm:$0xff]  ;;  %v3755_v24 = vld [vmem:[#allocation13 + $0x460] sm:$0xff] }
 0x6d1   :  { %7010 = vmatprep.subr.bf16.mxu0 %v16987_v32  ;;  %v3660_v31 = vld [vmem:[#allocation13 + $0x168] sm:$0xff]  ;;  %v16572_v32 = vcombine.low %v3635_v21, %v3643_v22 }
 0x6d2   :  { %v16591_v35 = vcombine.high %v3652_v30, %v3660_v31  ;;  %v16590_v41 = vcombine.low %v3652_v30, %v3660_v31  ;;  %v3763_v31 = vld [vmem:[#allocation13 + $0x4a0] sm:$0xff] }
 0x6d3   :  { %6925 = vmatpush1.bf16.msra.mxu1 %v16984_v37  ;;  %v3675_v37 = vld [vmem:[#allocation13 + $0x1e0] sm:$0xff] }
 0x6d4   :  { %7011 = vmatpush1.bf16.msra.mxu0 %v16986_v38  ;;  %6926 = vmatprep.subr.bf16.mxu1 %v17001_v39  ;;  %v3668_v38 = vld [vmem:[#allocation13 + $0x1a8] sm:$0xff]  ;;  %v16605_v42 = vcombine.high %v3667_v36, %v3675_v37 }
 0x6d5   :  { %7012 = vmatprep.subr.bf16.mxu0 %v17003_v40  ;;  %v3676_v39 = vld [vmem:[#allocation13 + $0x1e8] sm:$0xff]  ;;  %v16588_v40 = vcombine.low %v3651_v27, %v3659_v28 }
 0x6d6   :  { %v16607_v43 = vcombine.high %v3668_v38, %v3676_v39  ;;  %v16606_v58 = vcombine.low %v3668_v38, %v3676_v39  ;;  %v3779_v39 = vld [vmem:[#allocation13 + $0x520] sm:$0xff] }
 0x6d7   :  { %6927 = vmatpush1.bf16.msra.mxu1 %v17000_v45  ;;  %v3691_v45 = vld [vmem:[#allocation13 + $0x260] sm:$0xff] }
 0x6d8   :  { %7013 = vmatpush1.bf16.msra.mxu0 %v17002_v46  ;;  %6928 = vmatprep.subr.bf16.mxu1 %v17017_v50  ;;  %v3684_v46 = vld [vmem:[#allocation13 + $0x228] sm:$0xff]  ;;  %v16621_v59 = vcombine.high %v3683_v44, %v3691_v45 }
 0x6d9   :  { %7014 = vmatprep.subr.bf16.mxu0 %v17019_v57  ;;  %v3692_v50 = vld [vmem:[#allocation13 + $0x268] sm:$0xff]  ;;  %v16604_v57 = vcombine.low %v3667_v36, %v3675_v37 }
 0x6da   :  { %v16623_v60 = vcombine.high %v3684_v46, %v3692_v50  ;;  %v16622_v3 = vcombine.low %v3684_v46, %v3692_v50  ;;  %v3795_v50 = vld [vmem:[#allocation13 + $0x5a0] sm:$0xff] }
 0x6db   :  { %6929 = vmatpush1.bf16.msra.mxu1 %v17016_v62  ;;  %v3707_v62 = vld [vmem:[#allocation13 + $0x2e0] sm:$0xff] }
 0x6dc   :  { %7015 = vmatpush1.bf16.msra.mxu0 %v17018_v63  ;;  %6930 = vmatprep.subr.bf16.mxu1 %v17033_v1  ;;  %v3700_v63 = vld [vmem:[#allocation13 + $0x2a8] sm:$0xff]  ;;  %v16637_v4 = vcombine.high %v3699_v61, %v3707_v62 }
 0x6dd   :  { %7016 = vmatprep.subr.bf16.mxu0 %v17035_v2  ;;  %v3708_v1 = vld [vmem:[#allocation13 + $0x2e8] sm:$0xff]  ;;  %v16620_v2 = vcombine.low %v3683_v44, %v3691_v45 }
 0x6de   :  { %v16639_v53 = vcombine.high %v3700_v63, %v3708_v1  ;;  %v16638_v56 = vcombine.low %v3700_v63, %v3708_v1  ;;  %v3811_v1 = vld [vmem:[#allocation13 + $0x620] sm:$0xff] }
 0x6df   :  { %6931 = vmatpush1.bf16.msra.mxu1 %v17032_v5  ;;  %v3723_v5 = vld [vmem:[#allocation13 + $0x360] sm:$0xff] }
 0x6e0   :  { %7017 = vmatpush1.bf16.msra.mxu0 %v17034_v6  ;;  %6932 = vmatprep.subr.bf16.mxu1 %v17049_v7  ;;  %v3716_v6 = vld [vmem:[#allocation13 + $0x328] sm:$0xff]  ;;  %v16653_v14 = vcombine.high %v3715_v54, %v3723_v5 }
 0x6e1   :  { %7018 = vmatprep.subr.bf16.mxu0 %v17051_v55  ;;  %v3724_v7 = vld [vmem:[#allocation13 + $0x368] sm:$0xff]  ;;  %v16636_v55 = vcombine.low %v3699_v61, %v3707_v62 }
 0x6e2   :  { %v16655_v15 = vcombine.high %v3716_v6, %v3724_v7  ;;  %v16654_v21 = vcombine.low %v3716_v6, %v3724_v7  ;;  %v3827_v7 = vld [vmem:[#allocation13 + $0x6a0] sm:$0xff] }
 0x6e3   :  { %6933 = vmatpush1.bf16.msra.mxu1 %v17048_v17  ;;  %v3739_v17 = vld [vmem:[#allocation13 + $0x3e0] sm:$0xff] }
 0x6e4   :  { %7019 = vmatpush1.bf16.msra.mxu0 %v17050_v18  ;;  %7031 = vmatprep.subr.bf16.mxu1 %v16557_v19  ;;  %v3732_v18 = vld [vmem:[#allocation13 + $0x3a8] sm:$0xff]  ;;  %v16669_v22 = vcombine.high %v3731_v16, %v3739_v17  ;;  %v16668_v27 = vcombine.low %v3731_v16, %v3739_v17 }
 0x6e5   :  { %7117 = vmatprep.subr.bf16.mxu0 %v16559_v20  ;;  %v3740_v19 = vld [vmem:[#allocation13 + $0x3e8] sm:$0xff]  ;;  %v16652_v20 = vcombine.low %v3715_v54, %v3723_v5 }
 0x6e6   :  { %6935 = vmatmul.mubr.bf16.vlgmr.msra.gmra.mrb[88].mxu1 %v20867_v11  ;;  %v16670_v28 = vcombine.low %v3732_v18, %v3740_v19 }
 0x6e7   :  { %7021 = vmatmul.mubr.bf16.vlgmr.msra.gmra.mrb[92].mxu0 %v20867_v11  ;;  %7032 = vmatpush1.bf16.msra.mxu1 %v16556_v23  ;;  %v16671_v23 = vcombine.high %v3732_v18, %v3740_v19  ;;  %v3843_v19 = vld [vmem:[#allocation13 + $0x720] sm:$0xff] }
 0x6e8   :  { %7063 = vmatprep.mubr.bf16.mxu1 %v20869_v12  ;;  %7118 = vmatpush1.bf16.msra.mxu0 %v16558_v25  ;;  %v3748_v25 = vld [vmem:[#allocation13 + $0x428] sm:$0xff] }
 0x6e9   :  { %7149 = vmatprep.mubr.bf16.mxu0 %v20869_v12  ;;  %7033 = vmatprep.subr.bf16.mxu1 %v16573_v26  ;;  %v3756_v26 = vld [vmem:[#allocation13 + $0x468] sm:$0xff] }
 0x6ea   :  { %7119 = vmatprep.subr.bf16.mxu0 %v16575_v29  ;;  %v16685_v29 = vcombine.high %v3747_v8, %v3755_v24  ;;  %v16687_v30 = vcombine.high %v3748_v25, %v3756_v26  ;;  %v16686_v36 = vcombine.low %v3748_v25, %v3756_v26  ;;  %v3859_v26 = vld [vmem:[#allocation13 + $0x7a0] sm:$0xff] }
 0x6eb   :  { %7034 = vmatpush1.bf16.msra.mxu1 %v16572_v32  ;;  %v3771_v32 = vld [vmem:[#allocation13 + $0x4e0] sm:$0xff] }
 0x6ec   :  { %7120 = vmatpush1.bf16.msra.mxu0 %v16574_v33  ;;  %7035 = vmatprep.subr.bf16.mxu1 %v16589_v34  ;;  %v3764_v33 = vld [vmem:[#allocation13 + $0x4a8] sm:$0xff]  ;;  %v16701_v37 = vcombine.high %v3763_v31, %v3771_v32 }
 0x6ed   :  { %7121 = vmatprep.subr.bf16.mxu0 %v16591_v35  ;;  %v3772_v34 = vld [vmem:[#allocation13 + $0x4e8] sm:$0xff]  ;;  %v16684_v35 = vcombine.low %v3747_v8, %v3755_v24 }
 0x6ee   :  { %v16703_v38 = vcombine.high %v3764_v33, %v3772_v34  ;;  %v16702_v44 = vcombine.low %v3764_v33, %v3772_v34  ;;  %v3875_v34 = vld [vmem:[#allocation13 + $0x820] sm:$0xff] }
 0x6ef   :  { %7036 = vmatpush1.bf16.msra.mxu1 %v16588_v40  ;;  %v3787_v40 = vld [vmem:[#allocation13 + $0x560] sm:$0xff] }
 0x6f0   :  { %7122 = vmatpush1.bf16.msra.mxu0 %v16590_v41  ;;  %7037 = vmatprep.subr.bf16.mxu1 %v16605_v42  ;;  %v3780_v41 = vld [vmem:[#allocation13 + $0x528] sm:$0xff]  ;;  %v16717_v45 = vcombine.high %v3779_v39, %v3787_v40 }
 0x6f1   :  { %7123 = vmatprep.subr.bf16.mxu0 %v16607_v43  ;;  %v3788_v42 = vld [vmem:[#allocation13 + $0x568] sm:$0xff]  ;;  %v16700_v43 = vcombine.low %v3763_v31, %v3771_v32 }
 0x6f2   :  { %v16719_v46 = vcombine.high %v3780_v41, %v3788_v42  ;;  %v16718_v61 = vcombine.low %v3780_v41, %v3788_v42  ;;  %v3891_v42 = vld [vmem:[#allocation13 + $0x8a0] sm:$0xff] }
 0x6f3   :  { %7038 = vmatpush1.bf16.msra.mxu1 %v16604_v57  ;;  %v3803_v57 = vld [vmem:[#allocation13 + $0x5e0] sm:$0xff] }
 0x6f4   :  { %7124 = vmatpush1.bf16.msra.mxu0 %v16606_v58  ;;  %7039 = vmatprep.subr.bf16.mxu1 %v16621_v59  ;;  %v3796_v58 = vld [vmem:[#allocation13 + $0x5a8] sm:$0xff]  ;;  %v16733_v62 = vcombine.high %v3795_v50, %v3803_v57 }
 0x6f5   :  { %7125 = vmatprep.subr.bf16.mxu0 %v16623_v60  ;;  %v3804_v59 = vld [vmem:[#allocation13 + $0x5e8] sm:$0xff]  ;;  %v16716_v60 = vcombine.low %v3779_v39, %v3787_v40 }
 0x6f6   :  { %v16735_v63 = vcombine.high %v3796_v58, %v3804_v59  ;;  %v16734_v54 = vcombine.low %v3796_v58, %v3804_v59  ;;  %v3907_v58 = vld [vmem:[#allocation13 + $0x920] sm:$0xff] }
 0x6f7   :  { %7040 = vmatpush1.bf16.msra.mxu1 %v16620_v2  ;;  %v3819_v2 = vld [vmem:[#allocation13 + $0x660] sm:$0xff] }
 0x6f8   :  { %7126 = vmatpush1.bf16.msra.mxu0 %v16622_v3  ;;  %7041 = vmatprep.subr.bf16.mxu1 %v16637_v4  ;;  %v3812_v3 = vld [vmem:[#allocation13 + $0x628] sm:$0xff]  ;;  %v16749_v5 = vcombine.high %v3811_v1, %v3819_v2  ;;  %v3915_v59 = vld [vmem:[#allocation13 + $0x960] sm:$0xff] }
 0x6f9   :  { %7127 = vmatprep.subr.bf16.mxu0 %v16639_v53  ;;  %v3820_v4 = vld [vmem:[#allocation13 + $0x668] sm:$0xff]  ;;  %v16732_v53 = vcombine.low %v3795_v50, %v3803_v57 }
 0x6fa   :  { %v16751_v6 = vcombine.high %v3812_v3, %v3820_v4  ;;  %v16750_v16 = vcombine.low %v3812_v3, %v3820_v4  ;;  %v3923_v4 = vld [vmem:[#allocation13 + $0x9a0] sm:$0xff] }
 0x6fb   :  { %7042 = vmatpush1.bf16.msra.mxu1 %v16636_v55  ;;  %v3835_v55 = vld [vmem:[#allocation13 + $0x6e0] sm:$0xff] }
 0x6fc   :  { %7128 = vmatpush1.bf16.msra.mxu0 %v16638_v56  ;;  %7043 = vmatprep.subr.bf16.mxu1 %v16653_v14  ;;  %v3828_v56 = vld [vmem:[#allocation13 + $0x6a8] sm:$0xff]  ;;  %v16765_v17 = vcombine.high %v3827_v7, %v3835_v55 }
 0x6fd   :  { %7129 = vmatprep.subr.bf16.mxu0 %v16655_v15  ;;  %v3836_v14 = vld [vmem:[#allocation13 + $0x6e8] sm:$0xff]  ;;  %v16748_v15 = vcombine.low %v3811_v1, %v3819_v2  ;;  %v16845_v2 = vcombine.high %v3907_v58, %v3915_v59 }
 0x6fe   :  { %v16767_v18 = vcombine.high %v3828_v56, %v3836_v14  ;;  %v16766_v8 = vcombine.low %v3828_v56, %v3836_v14  ;;  %v3939_v14 = vld [vmem:[#allocation13 + $0xa20] sm:$0xff] }
 0x6ff   :  { %7044 = vmatpush1.bf16.msra.mxu1 %v16652_v20  ;;  %v3851_v20 = vld [vmem:[#allocation13 + $0x760] sm:$0xff] }
 0x700   :  { %7130 = vmatpush1.bf16.msra.mxu0 %v16654_v21  ;;  %7045 = vmatprep.subr.bf16.mxu1 %v16669_v22  ;;  %v3844_v21 = vld [vmem:[#allocation13 + $0x728] sm:$0xff]  ;;  %v16781_v24 = vcombine.high %v3843_v19, %v3851_v20 }
 0x701   :  { %7131 = vmatprep.subr.bf16.mxu0 %v16671_v23  ;;  %v3852_v22 = vld [vmem:[#allocation13 + $0x768] sm:$0xff]  ;;  %v16764_v23 = vcombine.low %v3827_v7, %v3835_v55 }
 0x702   :  { %v16783_v25 = vcombine.high %v3844_v21, %v3852_v22  ;;  %v16782_v31 = vcombine.low %v3844_v21, %v3852_v22  ;;  %v3955_v22 = vld [vmem:[#allocation13 + $0xaa0] sm:$0xff] }
 0x703   :  { %7046 = vmatpush1.bf16.msra.mxu1 %v16668_v27  ;;  %v3867_v27 = vld [vmem:[#allocation13 + $0x7e0] sm:$0xff] }
 0x704   :  { %7132 = vmatpush1.bf16.msra.mxu0 %v16670_v28  ;;  %7047 = vmatprep.subr.bf16.mxu1 %v16685_v29  ;;  %v3860_v28 = vld [vmem:[#allocation13 + $0x7a8] sm:$0xff]  ;;  %v16797_v32 = vcombine.high %v3859_v26, %v3867_v27 }
 0x705   :  { %7133 = vmatprep.subr.bf16.mxu0 %v16687_v30  ;;  %v3868_v29 = vld [vmem:[#allocation13 + $0x7e8] sm:$0xff]  ;;  %v16780_v30 = vcombine.low %v3843_v19, %v3851_v20 }
 0x706   :  { %v16799_v33 = vcombine.high %v3860_v28, %v3868_v29  ;;  %v16798_v39 = vcombine.low %v3860_v28, %v3868_v29  ;;  %v3971_v29 = vld [vmem:[#allocation13 + $0xb20] sm:$0xff] }
 0x707   :  { %7048 = vmatpush1.bf16.msra.mxu1 %v16684_v35  ;;  %v3883_v35 = vld [vmem:[#allocation13 + $0x860] sm:$0xff] }
 0x708   :  { %7134 = vmatpush1.bf16.msra.mxu0 %v16686_v36  ;;  %7049 = vmatprep.subr.bf16.mxu1 %v16701_v37  ;;  %v3876_v36 = vld [vmem:[#allocation13 + $0x828] sm:$0xff]  ;;  %v16813_v40 = vcombine.high %v3875_v34, %v3883_v35 }
 0x709   :  { %7135 = vmatprep.subr.bf16.mxu0 %v16703_v38  ;;  %v3884_v37 = vld [vmem:[#allocation13 + $0x868] sm:$0xff]  ;;  %v16796_v38 = vcombine.low %v3859_v26, %v3867_v27 }
 0x70a   :  { %v16815_v41 = vcombine.high %v3876_v36, %v3884_v37  ;;  %v16814_v50 = vcombine.low %v3876_v36, %v3884_v37 }
 0x70b   :  { %7050 = vmatpush1.bf16.msra.mxu1 %v16700_v43  ;;  %v3899_v43 = vld [vmem:[#allocation13 + $0x8e0] sm:$0xff] }
 0x70c   :  { %7136 = vmatpush1.bf16.msra.mxu0 %v16702_v44  ;;  %7051 = vmatprep.subr.bf16.mxu1 %v16717_v45  ;;  %v16812_v44 = vcombine.low %v3875_v34, %v3883_v35  ;;  %v3892_v45 = vld [vmem:[#allocation13 + $0x8a8] sm:$0xff]  ;;  %v16829_v57 = vcombine.high %v3891_v42, %v3899_v43 }
 0x70d   :  { %7137 = vmatprep.subr.bf16.mxu0 %v16719_v46  ;;  %v3900_v46 = vld [vmem:[#allocation13 + $0x8e8] sm:$0xff] }
 0x70e   :  { %v16830_v1 = vcombine.low %v3892_v45, %v3900_v46 }
 0x70f   :  { %7052 = vmatpush1.bf16.msra.mxu1 %v16716_v60  ;;  %v16831_v60 = vcombine.high %v3892_v45, %v3900_v46 }
 0x710   :  { %7138 = vmatpush1.bf16.msra.mxu0 %v16718_v61  ;;  %7053 = vmatprep.subr.bf16.mxu1 %v16733_v62  ;;  %v3908_v61 = vld [vmem:[#allocation13 + $0x928] sm:$0xff] }
 0x711   :  { %7139 = vmatprep.subr.bf16.mxu0 %v16735_v63  ;;  %v3916_v62 = vld [vmem:[#allocation13 + $0x968] sm:$0xff]  ;;  %v16828_v63 = vcombine.low %v3891_v42, %v3899_v43 }
 0x712   :  { %v16847_v3 = vcombine.high %v3908_v61, %v3916_v62  ;;  %v16846_v7 = vcombine.low %v3908_v61, %v3916_v62  ;;  %v3996_v42 = vld [vmem:[#allocation13 + $0xbe8] sm:$0xff] }
 0x713   :  { %7054 = vmatpush1.bf16.msra.mxu1 %v16732_v53  ;;  %v3931_v53 = vld [vmem:[#allocation13 + $0x9e0] sm:$0xff]  ;;  %v4012_v61 = vld [vmem:[#allocation13 + $0xc68] sm:$0xff] }
 0x714   :  { %7140 = vmatpush1.bf16.msra.mxu0 %v16734_v54  ;;  %7055 = vmatprep.subr.bf16.mxu1 %v16749_v5  ;;  %v3924_v54 = vld [vmem:[#allocation13 + $0x9a8] sm:$0xff]  ;;  %v16861_v55 = vcombine.high %v3923_v4, %v3931_v53 }
 0x715   :  { %7141 = vmatprep.subr.bf16.mxu0 %v16751_v6  ;;  %v3932_v5 = vld [vmem:[#allocation13 + $0x9e8] sm:$0xff]  ;;  %v16844_v6 = vcombine.low %v3907_v58, %v3915_v59  ;;  %v4003_v58 = vld [vmem:[#allocation13 + $0xc20] sm:$0xff] }
 0x716   :  { %v16863_v56 = vcombine.high %v3924_v54, %v3932_v5  ;;  %v16862_v19 = vcombine.low %v3924_v54, %v3932_v5  ;;  %v4011_v59 = vld [vmem:[#allocation13 + $0xc60] sm:$0xff]  ;;  %v4028_v54 = vld [vmem:[#allocation13 + $0xce8] sm:$0xff] }
 0x717   :  { %7056 = vmatpush1.bf16.msra.mxu1 %v16748_v15  ;;  %v3947_v15 = vld [vmem:[#allocation13 + $0xa60] sm:$0xff]  ;;  %v16940_v5 = vcombine.low %v4003_v58, %v4011_v59 }
 0x718   :  { %7142 = vmatpush1.bf16.msra.mxu0 %v16750_v16  ;;  %7057 = vmatprep.subr.bf16.mxu1 %v16765_v17  ;;  %v3940_v16 = vld [vmem:[#allocation13 + $0xa28] sm:$0xff]  ;;  %v16877_v20 = vcombine.high %v3939_v14, %v3947_v15 }
 0x719   :  { %7143 = vmatprep.subr.bf16.mxu0 %v16767_v18  ;;  %v3948_v17 = vld [vmem:[#allocation13 + $0xa68] sm:$0xff]  ;;  %v16860_v18 = vcombine.low %v3923_v4, %v3931_v53  ;;  %v4027_v4 = vld [vmem:[#allocation13 + $0xce0] sm:$0xff] }
 0x71a   :  { %v16879_v21 = vcombine.high %v3940_v16, %v3948_v17  ;;  %v16878_v26 = vcombine.low %v3940_v16, %v3948_v17  ;;  %v4020_v53 = vld [vmem:[#allocation13 + $0xca8] sm:$0xff] }
 0x71b   :  { %7058 = vmatpush1.bf16.msra.mxu1 %v16764_v23  ;;  %v3963_v23 = vld [vmem:[#allocation13 + $0xae0] sm:$0xff]  ;;  %v4044_v16 = vld [vmem:[#allocation13 + $0xd68] sm:$0xff] }
 0x71c   :  { %7144 = vmatpush1.bf16.msra.mxu0 %v16766_v8  ;;  %7059 = vmatprep.subr.bf16.mxu1 %v16781_v24  ;;  %v3956_v8 = vld [vmem:[#allocation13 + $0xaa8] sm:$0xff]  ;;  %v16893_v27 = vcombine.high %v3955_v22, %v3963_v23 }
 0x71d   :  { %7145 = vmatprep.subr.bf16.mxu0 %v16783_v25  ;;  %v3964_v24 = vld [vmem:[#allocation13 + $0xae8] sm:$0xff]  ;;  %v16876_v25 = vcombine.low %v3939_v14, %v3947_v15  ;;  %v4043_v14 = vld [vmem:[#allocation13 + $0xd60] sm:$0xff] }
 0x71e   :  { %v16895_v28 = vcombine.high %v3956_v8, %v3964_v24  ;;  %v16894_v34 = vcombine.low %v3956_v8, %v3964_v24  ;;  %v4036_v15 = vld [vmem:[#allocation13 + $0xd28] sm:$0xff] }
 0x71f   :  { %7060 = vmatpush1.bf16.msra.mxu1 %v16780_v30  ;;  %v3979_v30 = vld [vmem:[#allocation13 + $0xb60] sm:$0xff]  ;;  %v4060_v8 = vld [vmem:[#allocation13 + $0xde8] sm:$0xff] }
 0x720   :  { %7146 = vmatpush1.bf16.msra.mxu0 %v16782_v31  ;;  %7061 = vmatprep.subr.bf16.mxu1 %v16797_v32  ;;  %v3972_v31 = vld [vmem:[#allocation13 + $0xb28] sm:$0xff]  ;;  %v16909_v35 = vcombine.high %v3971_v29, %v3979_v30 }
 0x721   :  { %7147 = vmatprep.subr.bf16.mxu0 %v16799_v33  ;;  %v3980_v32 = vld [vmem:[#allocation13 + $0xb68] sm:$0xff]  ;;  %v16892_v33 = vcombine.low %v3955_v22, %v3963_v23  ;;  %v4059_v22 = vld [vmem:[#allocation13 + $0xde0] sm:$0xff] }
 0x722   :  { %v16911_v37 = vcombine.high %v3972_v31, %v3980_v32  ;;  %v16910_v46 = vcombine.low %v3972_v31, %v3980_v32  ;;  %v4052_v23 = vld [vmem:[#allocation13 + $0xda8] sm:$0xff] }
 0x723   :  { %7062 = vmatpush1.bf16.msra.mxu1 %v16796_v38  ;;  %v3987_v38 = vld [vmem:[#allocation13 + $0xba0] sm:$0xff]  ;;  %v4076_v31 = vld [vmem:[#allocation13 + $0xe68] sm:$0xff] }
 0x724   :  { %7148 = vmatpush1.bf16.msra.mxu0 %v16798_v39  ;;  %7074 = vmatprep.subr.bf16.mxu1 %v16813_v40  ;;  %v3995_v39 = vld [vmem:[#allocation13 + $0xbe0] sm:$0xff] }
 0x725   :  { %7160 = vmatprep.subr.bf16.mxu0 %v16815_v41  ;;  %v3988_v41 = vld [vmem:[#allocation13 + $0xba8] sm:$0xff]  ;;  %v16924_v62 = vcombine.low %v3987_v38, %v3995_v39 }
 0x726   :  { %7064 = vmatmul.mubr.bf16.vlgmr.msra.gmra.mrb[92].mxu1 %v20865_v10 }
 0x727   :  { %7150 = vmatmul.mubr.bf16.vlgmr.msra.gmra.mrb[96].mxu0 %v20865_v10  ;;  %7075 = vmatpush1.bf16.msra.mxu1 %v16812_v44  ;;  %v16908_v44 = vcombine.low %v3971_v29, %v3979_v30  ;;  %v4075_v29 = vld [vmem:[#allocation13 + $0xe60] sm:$0xff]  ;;  %v4068_v30 = vld [vmem:[#allocation13 + $0xe28] sm:$0xff] }
 0x728   :  { %7106 = vmatprep.mubr.bf16.mxu1 %v20871_v13  ;;  %7161 = vmatpush1.bf16.msra.mxu0 %v16814_v50  ;;  %v16925_v50 = vcombine.high %v3987_v38, %v3995_v39  ;;  %v4091_v38 = vld [vmem:[#allocation13 + $0xee0] sm:$0xff]  ;;  %v4084_v39 = vld [vmem:[#allocation13 + $0xea8] sm:$0xff] }
 0x729   :  { %7192 = vmatprep.mubr.bf16.mxu0 %v20871_v13  ;;  %7076 = vmatprep.subr.bf16.mxu1 %v16829_v57  ;;  %v16927_v57 = vcombine.high %v3988_v41, %v3996_v42 }
 0x72a   :  { %7162 = vmatprep.subr.bf16.mxu0 %v16831_v60  ;;  %v4004_v60 = vld [vmem:[#allocation13 + $0xc28] sm:$0xff] }
 0x72b   :  { %7077 = vmatpush1.bf16.msra.mxu1 %v16828_v63  ;;  %v16926_v63 = vcombine.low %v3988_v41, %v3996_v42  ;;  %v4092_v41 = vld [vmem:[#allocation13 + $0xee8] sm:$0xff] }
 0x72c   :  { %7163 = vmatpush1.bf16.msra.mxu0 %v16830_v1  ;;  %7078 = vmatprep.subr.bf16.mxu1 %v16845_v2  ;;  %v16941_v1 = vcombine.high %v4003_v58, %v4011_v59  ;;  %v16943_v2 = vcombine.high %v4004_v60, %v4012_v61  ;;  %v4107_v58 = vld [vmem:[#allocation13 + $0xf60] sm:$0xff]  ;;  %v4100_v59 = vld [vmem:[#allocation13 + $0xf28] sm:$0xff] }
 0x72d   :  { %7164 = vmatprep.subr.bf16.mxu0 %v16847_v3  ;;  %v4019_v3 = vld [vmem:[#allocation13 + $0xca0] sm:$0xff] }
 0x72e   :  { %v16956_v17 = vcombine.low %v4019_v3, %v4027_v4 }
 0x72f   :  { %7079 = vmatpush1.bf16.msra.mxu1 %v16844_v6  ;;  %v16942_v6 = vcombine.low %v4004_v60, %v4012_v61  ;;  %v4108_v60 = vld [vmem:[#allocation13 + $0xf68] sm:$0xff] }
 0x730   :  { %7165 = vmatpush1.bf16.msra.mxu0 %v16846_v7  ;;  %7080 = vmatprep.subr.bf16.mxu1 %v16861_v55  ;;  %v16957_v7 = vcombine.high %v4019_v3, %v4027_v4  ;;  %v16959_v55 = vcombine.high %v4020_v53, %v4028_v54  ;;  %v4123_v3 = vld [vmem:[#allocation13 + $0xfe0] sm:$0xff]  ;;  %v4116_v4 = vld [vmem:[#allocation13 + $0xfa8] sm:$0xff] }
 0x731   :  { %7166 = vmatprep.subr.bf16.mxu0 %v16863_v56  ;;  %v4035_v56 = vld [vmem:[#allocation13 + $0xd20] sm:$0xff] }
 0x732   :  { %v16972_v24 = vcombine.low %v4035_v56, %v4043_v14 }
 0x733   :  { %7081 = vmatpush1.bf16.msra.mxu1 %v16860_v18  ;;  %v16958_v18 = vcombine.low %v4020_v53, %v4028_v54  ;;  %v4124_v53 = vld [vmem:[#allocation13 + $0xfe8] sm:$0xff] }
 0x734   :  { %7167 = vmatpush1.bf16.msra.mxu0 %v16862_v19  ;;  %7082 = vmatprep.subr.bf16.mxu1 %v16877_v20  ;;  %v16973_v19 = vcombine.high %v4035_v56, %v4043_v14  ;;  %v16975_v20 = vcombine.high %v4036_v15, %v4044_v16  ;;  %v3629_v56 = vld [vmem:[#allocation13 + $0x70] sm:$0xff]  ;;  %v3622_v14 = vld [vmem:[#allocation13 + $0x38] sm:$0xff] }
 0x735   :  { %7168 = vmatprep.subr.bf16.mxu0 %v16879_v21  ;;  %v4051_v21 = vld [vmem:[#allocation13 + $0xda0] sm:$0xff] }
 0x736   :  { %v16988_v32 = vcombine.low %v4051_v21, %v4059_v22 }
 0x737   :  { %7083 = vmatpush1.bf16.msra.mxu1 %v16876_v25  ;;  %v16974_v25 = vcombine.low %v4036_v15, %v4044_v16  ;;  %v3630_v15 = vld [vmem:[#allocation13 + $0x78] sm:$0xff] }
 0x738   :  { %7169 = vmatpush1.bf16.msra.mxu0 %v16878_v26  ;;  %7084 = vmatprep.subr.bf16.mxu1 %v16893_v27  ;;  %v16989_v26 = vcombine.high %v4051_v21, %v4059_v22  ;;  %v16991_v27 = vcombine.high %v4052_v23, %v4060_v8  ;;  %v3645_v21 = vld [vmem:[#allocation13 + $0xf0] sm:$0xff] }
 0x739   :  { %v20895_v36 = vpop.f32.mrb[88].mxu0  ;;  %7170 = vmatprep.subr.bf16.mxu0 %v16895_v28  ;;  %v4067_v28 = vld [vmem:[#allocation13 + $0xe20] sm:$0xff] }
 0x73a   :  { %v20897_v40 = vpop.f32.mrb[89].mxu0  ;;  %v17004_v42 = vcombine.low %v4067_v28, %v4075_v29 }
 0x73b   :  { %v20899_v43 = vpop.f32.mrb[90].mxu0  ;;  %7085 = vmatpush1.bf16.msra.mxu1 %v16892_v33  ;;  %v16990_v33 = vcombine.low %v4052_v23, %v4060_v8  ;;  %v3638_v23 = vld [vmem:[#allocation13 + $0xb8] sm:$0xff] }
 0x73c   :  { %7171 = vmatpush1.bf16.msra.mxu0 %v16894_v34  ;;  %v20901_v45 = vpop.f32.mrb[91].mxu0  ;;  %7086 = vmatprep.subr.bf16.mxu1 %v16909_v35  ;;  %v17005_v34 = vcombine.high %v4067_v28, %v4075_v29  ;;  %v17007_v35 = vcombine.high %v4068_v30, %v4076_v31  ;;  %v3646_v8 = vld [vmem:[#allocation13 + $0xf8] sm:$0xff] }
 0x73d   :  { %7172 = vmatprep.subr.bf16.mxu0 %v16911_v37  ;;  %v4083_v37 = vld [vmem:[#allocation13 + $0xea0] sm:$0xff]  ;;  %v16579_v28 = vcombine.high %v3638_v23, %v3646_v8  ;;  %v3654_v29 = vld [vmem:[#allocation13 + $0x138] sm:$0xff] }
 0x73e   :  { %v17020_v61 = vcombine.low %v4083_v37, %v4091_v38 }
 0x73f   :  { %7087 = vmatpush1.bf16.msra.mxu1 %v16908_v44  ;;  %v17006_v44 = vcombine.low %v4068_v30, %v4076_v31  ;;  %v3662_v30 = vld [vmem:[#allocation13 + $0x178] sm:$0xff] }
 0x740   :  { %7173 = vmatpush1.bf16.msra.mxu0 %v16910_v46  ;;  %7088 = vmatprep.subr.bf16.mxu1 %v16925_v50  ;;  %v17021_v46 = vcombine.high %v4083_v37, %v4091_v38  ;;  %v17023_v50 = vcombine.high %v4084_v39, %v4092_v41  ;;  %v3677_v37 = vld [vmem:[#allocation13 + $0x1f0] sm:$0xff]  ;;  %v3670_v38 = vld [vmem:[#allocation13 + $0x1b8] sm:$0xff] }
 0x741   :  { %7174 = vmatprep.subr.bf16.mxu0 %v16927_v57  ;;  %v4099_v57 = vld [vmem:[#allocation13 + $0xf20] sm:$0xff] }
 0x742   :  { %v17036_v54 = vcombine.low %v4099_v57, %v4107_v58 }
 0x743   :  { %7089 = vmatpush1.bf16.msra.mxu1 %v16924_v62  ;;  %v17022_v62 = vcombine.low %v4084_v39, %v4092_v41  ;;  %v3678_v39 = vld [vmem:[#allocation13 + $0x1f8] sm:$0xff] }
 0x744   :  { %7175 = vmatpush1.bf16.msra.mxu0 %v16926_v63  ;;  %7090 = vmatprep.subr.bf16.mxu1 %v16941_v1  ;;  %v17037_v63 = vcombine.high %v4099_v57, %v4107_v58  ;;  %v17039_v1 = vcombine.high %v4100_v59, %v4108_v60  ;;  %v3693_v57 = vld [vmem:[#allocation13 + $0x270] sm:$0xff]  ;;  %v3686_v58 = vld [vmem:[#allocation13 + $0x238] sm:$0xff] }
 0x745   :  { %7176 = vmatprep.subr.bf16.mxu0 %v16943_v2  ;;  %v4115_v2 = vld [vmem:[#allocation13 + $0xfa0] sm:$0xff] }
 0x746   :  { %v17052_v16 = vcombine.low %v4115_v2, %v4123_v3 }
 0x747   :  { %7091 = vmatpush1.bf16.msra.mxu1 %v16940_v5  ;;  %v17038_v5 = vcombine.low %v4100_v59, %v4108_v60  ;;  %v3694_v59 = vld [vmem:[#allocation13 + $0x278] sm:$0xff]  ;;  %v16610_v60 = vcombine.low %v3670_v38, %v3678_v39 }
 0x748   :  { %7177 = vmatpush1.bf16.msra.mxu0 %v16942_v6  ;;  %7092 = vmatprep.subr.bf16.mxu1 %v16957_v7  ;;  %v17053_v6 = vcombine.high %v4115_v2, %v4123_v3  ;;  %v17055_v7 = vcombine.high %v4116_v4, %v4124_v53  ;;  %v3702_v2 = vld [vmem:[#allocation13 + $0x2b8] sm:$0xff] }
 0x749   :  { %7178 = vmatprep.subr.bf16.mxu0 %v16959_v55  ;;  %v3621_v55 = vld [vmem:[#allocation13 + $0x30] sm:$0xff]  ;;  %v3710_v3 = vld [vmem:[#allocation13 + $0x2f8] sm:$0xff] }
 0x74a   :  { %v16560_v22 = vcombine.low %v3621_v55, %v3629_v56 }
 0x74b   :  { %7093 = vmatpush1.bf16.msra.mxu1 %v16956_v17  ;;  %v17054_v17 = vcombine.low %v4116_v4, %v4124_v53  ;;  %v16626_v53 = vcombine.low %v3686_v58, %v3694_v59 }
 0x74c   :  { %7179 = vmatpush1.bf16.msra.mxu0 %v16958_v18  ;;  %7094 = vmatprep.subr.bf16.mxu1 %v16973_v19  ;;  %v16561_v18 = vcombine.high %v3621_v55, %v3629_v56  ;;  %v16563_v19 = vcombine.high %v3622_v14, %v3630_v15  ;;  %v3718_v55 = vld [vmem:[#allocation13 + $0x338] sm:$0xff] }
 0x74d   :  { %7180 = vmatprep.subr.bf16.mxu0 %v16975_v20  ;;  %v3637_v20 = vld [vmem:[#allocation13 + $0xb0] sm:$0xff]  ;;  %v3726_v56 = vld [vmem:[#allocation13 + $0x378] sm:$0xff] }
 0x74e   :  { %v16576_v31 = vcombine.low %v3637_v20, %v3645_v21 }
 0x74f   :  { %7095 = vmatpush1.bf16.msra.mxu1 %v16972_v24  ;;  %v16562_v24 = vcombine.low %v3622_v14, %v3630_v15  ;;  %v16642_v15 = vcombine.low %v3702_v2, %v3710_v3 }
 0x750   :  { %7181 = vmatpush1.bf16.msra.mxu0 %v16974_v25  ;;  %7096 = vmatprep.subr.bf16.mxu1 %v16989_v26  ;;  %v16577_v25 = vcombine.high %v3637_v20, %v3645_v21  ;;  %v3653_v26 = vld [vmem:[#allocation13 + $0x130] sm:$0xff]  ;;  %v3734_v20 = vld [vmem:[#allocation13 + $0x3b8] sm:$0xff] }
 0x751   :  { %7182 = vmatprep.subr.bf16.mxu0 %v16991_v27  ;;  %v3661_v27 = vld [vmem:[#allocation13 + $0x170] sm:$0xff]  ;;  %v3742_v21 = vld [vmem:[#allocation13 + $0x3f8] sm:$0xff] }
 0x752   :  { %v16592_v41 = vcombine.low %v3653_v26, %v3661_v27 }
 0x753   :  { %7097 = vmatpush1.bf16.msra.mxu1 %v16988_v32  ;;  %v16578_v32 = vcombine.low %v3638_v23, %v3646_v8  ;;  %v16658_v23 = vcombine.low %v3718_v55, %v3726_v56 }
 0x754   :  { %7183 = vmatpush1.bf16.msra.mxu0 %v16990_v33  ;;  %7098 = vmatprep.subr.bf16.mxu1 %v17005_v34  ;;  %v16593_v33 = vcombine.high %v3653_v26, %v3661_v27  ;;  %v16595_v34 = vcombine.high %v3654_v29, %v3662_v30  ;;  %v3757_v26 = vld [vmem:[#allocation13 + $0x470] sm:$0xff]  ;;  %v3750_v27 = vld [vmem:[#allocation13 + $0x438] sm:$0xff] }
 0x755   :  { %7184 = vmatprep.subr.bf16.mxu0 %v17007_v35  ;;  %v3669_v35 = vld [vmem:[#allocation13 + $0x1b0] sm:$0xff] }
 0x757   :  { %7099 = vmatpush1.bf16.msra.mxu1 %v17004_v42  ;;  %v16594_v42 = vcombine.low %v3654_v29, %v3662_v30  ;;  %v16674_v30 = vcombine.low %v3734_v20, %v3742_v21 }
 0x758   :  { %7185 = vmatpush1.bf16.msra.mxu0 %v17006_v44  ;;  %7100 = vmatprep.subr.bf16.mxu1 %v17021_v46  ;;  %v16609_v44 = vcombine.high %v3669_v35, %v3677_v37  ;;  %v16611_v46 = vcombine.high %v3670_v38, %v3678_v39 }
 0x759   :  { %7186 = vmatprep.subr.bf16.mxu0 %v17023_v50  ;;  %v3685_v50 = vld [vmem:[#allocation13 + $0x230] sm:$0xff] }
 0x75a   :  { %v16624_v4 = vcombine.low %v3685_v50, %v3693_v57 }
 0x75b   :  { %7101 = vmatpush1.bf16.msra.mxu1 %v17020_v61  ;;  %v16625_v61 = vcombine.high %v3685_v50, %v3693_v57  ;;  %v3782_v50 = vld [vmem:[#allocation13 + $0x538] sm:$0xff] }
 0x75c   :  { %7187 = vmatpush1.bf16.msra.mxu0 %v17022_v62  ;;  %7102 = vmatprep.subr.bf16.mxu1 %v17037_v63  ;;  %v16627_v62 = vcombine.high %v3686_v58, %v3694_v59  ;;  %v3701_v63 = vld [vmem:[#allocation13 + $0x2b0] sm:$0xff]  ;;  %v3790_v57 = vld [vmem:[#allocation13 + $0x578] sm:$0xff] }
 0x75d   :  { %7188 = vmatprep.subr.bf16.mxu0 %v17039_v1  ;;  %v3709_v1 = vld [vmem:[#allocation13 + $0x2f0] sm:$0xff] }
 0x75e   :  { %v16640_v14 = vcombine.low %v3701_v63, %v3709_v1 }
 0x75f   :  { %7103 = vmatpush1.bf16.msra.mxu1 %v17036_v54  ;;  %v16641_v54 = vcombine.high %v3701_v63, %v3709_v1  ;;  %v3798_v63 = vld [vmem:[#allocation13 + $0x5b8] sm:$0xff] }
 0x760   :  { %7189 = vmatpush1.bf16.msra.mxu0 %v17038_v5  ;;  %7104 = vmatprep.subr.bf16.mxu1 %v17053_v6  ;;  %v16643_v5 = vcombine.high %v3702_v2, %v3710_v3  ;;  %v3717_v6 = vld [vmem:[#allocation13 + $0x330] sm:$0xff]  ;;  %v3806_v1 = vld [vmem:[#allocation13 + $0x5f8] sm:$0xff]  ;;  %v16722_v3 = vcombine.low %v3782_v50, %v3790_v57 }
 0x761   :  { %7190 = vmatprep.subr.bf16.mxu0 %v17055_v7  ;;  %v3725_v7 = vld [vmem:[#allocation13 + $0x370] sm:$0xff] }
 0x763   :  { %7105 = vmatpush1.bf16.msra.mxu1 %v17052_v16  ;;  %v16657_v16 = vcombine.high %v3717_v6, %v3725_v7 }
 0x764   :  { %7191 = vmatpush1.bf16.msra.mxu0 %v17054_v17  ;;  %7203 = vmatprep.subr.bf16.mxu1 %v16561_v18  ;;  %v16659_v17 = vcombine.high %v3718_v55, %v3726_v56  ;;  %v3733_v18 = vld [vmem:[#allocation13 + $0x3b0] sm:$0xff]  ;;  %v16738_v56 = vcombine.low %v3798_v63, %v3806_v1 }
 0x765   :  { %7289 = vmatprep.subr.bf16.mxu0 %v16563_v19  ;;  %v3741_v19 = vld [vmem:[#allocation13 + $0x3f0] sm:$0xff] }
 0x766   :  { %7107 = vmatmul.mubr.bf16.vlgmr.msra.gmra.mrb[92].mxu1 %v20867_v11  ;;  %v16673_v8 = vcombine.high %v3733_v18, %v3741_v19  ;;  %v16672_v29 = vcombine.low %v3733_v18, %v3741_v19  ;;  %v3830_v18 = vld [vmem:[#allocation13 + $0x6b8] sm:$0xff] }
 0x767   :  { %7193 = vmatmul.mubr.bf16.vlgmr.msra.gmra.mrb[96].mxu0 %v20867_v11  ;;  %7204 = vmatpush1.bf16.msra.mxu1 %v16560_v22  ;;  %v16656_v22 = vcombine.low %v3717_v6, %v3725_v7  ;;  %v3814_v6 = vld [vmem:[#allocation13 + $0x638] sm:$0xff] }
 0x768   :  { %7235 = vmatprep.mubr.bf16.mxu1 %v20869_v12  ;;  %7290 = vmatpush1.bf16.msra.mxu0 %v16562_v24  ;;  %v16675_v24 = vcombine.high %v3734_v20, %v3742_v21  ;;  %v3822_v7 = vld [vmem:[#allocation13 + $0x678] sm:$0xff] }
 0x769   :  { %7321 = vmatprep.mubr.bf16.mxu0 %v20869_v12  ;;  %7205 = vmatprep.subr.bf16.mxu1 %v16577_v25  ;;  %v16608_v12 = vcombine.low %v3669_v35, %v3677_v37  ;;  %v3749_v25 = vld [vmem:[#allocation13 + $0x430] sm:$0xff]  ;;  %v3766_v35 = vld [vmem:[#allocation13 + $0x4b8] sm:$0xff]  ;;  %v16754_v21 = vcombine.low %v3814_v6, %v3822_v7 }
 0x76a   :  { %7291 = vmatprep.subr.bf16.mxu0 %v16579_v28  ;;  %v3758_v28 = vld [vmem:[#allocation13 + $0x478] sm:$0xff]  ;;  %v16688_v38 = vcombine.low %v3749_v25, %v3757_v26 }
 0x76b   :  { %7206 = vmatpush1.bf16.msra.mxu1 %v16576_v31  ;;  %v16689_v31 = vcombine.high %v3749_v25, %v3757_v26  ;;  %v3774_v37 = vld [vmem:[#allocation13 + $0x4f8] sm:$0xff]  ;;  %v16690_v39 = vcombine.low %v3750_v27, %v3758_v28 }
 0x76c   :  { %7292 = vmatpush1.bf16.msra.mxu0 %v16578_v32  ;;  %7207 = vmatprep.subr.bf16.mxu1 %v16593_v33  ;;  %v16691_v32 = vcombine.high %v3750_v27, %v3758_v28  ;;  %v3765_v33 = vld [vmem:[#allocation13 + $0x4b0] sm:$0xff]  ;;  %v16706_v59 = vcombine.low %v3766_v35, %v3774_v37  ;;  %v3838_v19 = vld [vmem:[#allocation13 + $0x6f8] sm:$0xff] }
 0x76d   :  { %7293 = vmatprep.subr.bf16.mxu0 %v16595_v34  ;;  %v3773_v34 = vld [vmem:[#allocation13 + $0x4f0] sm:$0xff]  ;;  %v3846_v25 = vld [vmem:[#allocation13 + $0x738] sm:$0xff]  ;;  %v16770_v28 = vcombine.low %v3830_v18, %v3838_v19 }
 0x76e   :  { %v16704_v58 = vcombine.low %v3765_v33, %v3773_v34  ;;  %v3854_v26 = vld [vmem:[#allocation13 + $0x778] sm:$0xff] }
 0x76f   :  { %7208 = vmatpush1.bf16.msra.mxu1 %v16592_v41  ;;  %v16705_v41 = vcombine.high %v3765_v33, %v3773_v34  ;;  %v3862_v33 = vld [vmem:[#allocation13 + $0x7b8] sm:$0xff] }
 0x770   :  { %7294 = vmatpush1.bf16.msra.mxu0 %v16594_v42  ;;  %7209 = vmatprep.subr.bf16.mxu1 %v16609_v44  ;;  %v16707_v42 = vcombine.high %v3766_v35, %v3774_v37  ;;  %v3781_v44 = vld [vmem:[#allocation13 + $0x530] sm:$0xff]  ;;  %v3870_v34 = vld [vmem:[#allocation13 + $0x7f8] sm:$0xff]  ;;  %v16786_v37 = vcombine.low %v3846_v25, %v3854_v26 }
 0x771   :  { %7295 = vmatprep.subr.bf16.mxu0 %v16611_v46  ;;  %v3789_v46 = vld [vmem:[#allocation13 + $0x570] sm:$0xff] }
 0x772   :  { %v16720_v2 = vcombine.low %v3781_v44, %v3789_v46 }
 0x773   :  { %7210 = vmatpush1.bf16.msra.mxu1 %v16608_v12  ;;  %v16721_v12 = vcombine.high %v3781_v44, %v3789_v46  ;;  %v3878_v44 = vld [vmem:[#allocation13 + $0x838] sm:$0xff] }
 0x774   :  { %7296 = vmatpush1.bf16.msra.mxu0 %v16610_v60  ;;  %7211 = vmatprep.subr.bf16.mxu1 %v16625_v61  ;;  %v16723_v60 = vcombine.high %v3782_v50, %v3790_v57  ;;  %v3797_v61 = vld [vmem:[#allocation13 + $0x5b0] sm:$0xff]  ;;  %v3886_v46 = vld [vmem:[#allocation13 + $0x878] sm:$0xff]  ;;  %v16802_v57 = vcombine.low %v3862_v33, %v3870_v34 }
 0x775   :  { %7297 = vmatprep.subr.bf16.mxu0 %v16627_v62  ;;  %v3805_v62 = vld [vmem:[#allocation13 + $0x5f0] sm:$0xff] }
 0x776   :  { %v16736_v55 = vcombine.low %v3797_v61, %v3805_v62 }
 0x777   :  { %7212 = vmatpush1.bf16.msra.mxu1 %v16624_v4  ;;  %v16737_v4 = vcombine.high %v3797_v61, %v3805_v62  ;;  %v3894_v62 = vld [vmem:[#allocation13 + $0x8b8] sm:$0xff] }
 0x778   :  { %7298 = vmatpush1.bf16.msra.mxu0 %v16626_v53  ;;  %7213 = vmatprep.subr.bf16.mxu1 %v16641_v54  ;;  %v16739_v53 = vcombine.high %v3798_v63, %v3806_v1  ;;  %v3813_v54 = vld [vmem:[#allocation13 + $0x630] sm:$0xff]  ;;  %v3902_v63 = vld [vmem:[#allocation13 + $0x8f8] sm:$0xff]  ;;  %v16818_v1 = vcombine.low %v3878_v44, %v3886_v46 }
 0x779   :  { %7299 = vmatprep.subr.bf16.mxu0 %v16643_v5  ;;  %v3821_v5 = vld [vmem:[#allocation13 + $0x670] sm:$0xff] }
 0x77a   :  { %v16752_v20 = vcombine.low %v3813_v54, %v3821_v5 }
 0x77b   :  { %7214 = vmatpush1.bf16.msra.mxu1 %v16640_v14  ;;  %v16753_v14 = vcombine.high %v3813_v54, %v3821_v5  ;;  %v3910_v54 = vld [vmem:[#allocation13 + $0x938] sm:$0xff] }
 0x77c   :  { %7300 = vmatpush1.bf16.msra.mxu0 %v16642_v15  ;;  %7215 = vmatprep.subr.bf16.mxu1 %v16657_v16  ;;  %v16755_v15 = vcombine.high %v3814_v6, %v3822_v7  ;;  %v3829_v16 = vld [vmem:[#allocation13 + $0x6b0] sm:$0xff]  ;;  %v3918_v5 = vld [vmem:[#allocation13 + $0x978] sm:$0xff]  ;;  %v16834_v7 = vcombine.low %v3894_v62, %v3902_v63 }
 0x77d   :  { %7301 = vmatprep.subr.bf16.mxu0 %v16659_v17  ;;  %v3837_v17 = vld [vmem:[#allocation13 + $0x6f0] sm:$0xff] }
 0x77e   :  { %v16768_v27 = vcombine.low %v3829_v16, %v3837_v17 }
 0x77f   :  { %7216 = vmatpush1.bf16.msra.mxu1 %v16656_v22  ;;  %v16769_v22 = vcombine.high %v3829_v16, %v3837_v17  ;;  %v3926_v16 = vld [vmem:[#allocation13 + $0x9b8] sm:$0xff] }
 0x780   :  { %7302 = vmatpush1.bf16.msra.mxu0 %v16658_v23  ;;  %7217 = vmatprep.subr.bf16.mxu1 %v16673_v8  ;;  %v16771_v23 = vcombine.high %v3830_v18, %v3838_v19  ;;  %v3845_v8 = vld [vmem:[#allocation13 + $0x730] sm:$0xff]  ;;  %v3934_v17 = vld [vmem:[#allocation13 + $0x9f8] sm:$0xff] }
 0x781   :  { %7303 = vmatprep.subr.bf16.mxu0 %v16675_v24  ;;  %v3853_v24 = vld [vmem:[#allocation13 + $0x770] sm:$0xff] }
 0x782   :  { %v16784_v35 = vcombine.low %v3845_v8, %v3853_v24 }
 0x783   :  { %7218 = vmatpush1.bf16.msra.mxu1 %v16672_v29  ;;  %v16785_v29 = vcombine.high %v3845_v8, %v3853_v24  ;;  %v3950_v8 = vld [vmem:[#allocation13 + $0xa78] sm:$0xff]  ;;  %v16866_v24 = vcombine.low %v3926_v16, %v3934_v17 }
 0x784   :  { %7304 = vmatpush1.bf16.msra.mxu0 %v16674_v30  ;;  %7219 = vmatprep.subr.bf16.mxu1 %v16689_v31  ;;  %v16787_v30 = vcombine.high %v3846_v25, %v3854_v26  ;;  %v3861_v31 = vld [vmem:[#allocation13 + $0x7b0] sm:$0xff] }
 0x785   :  { %7305 = vmatprep.subr.bf16.mxu0 %v16691_v32  ;;  %v3869_v32 = vld [vmem:[#allocation13 + $0x7f0] sm:$0xff] }
 0x786   :  { %v16800_v50 = vcombine.low %v3861_v31, %v3869_v32 }
 0x787   :  { %7220 = vmatpush1.bf16.msra.mxu1 %v16688_v38  ;;  %v16801_v38 = vcombine.high %v3861_v31, %v3869_v32 }
 0x788   :  { %7306 = vmatpush1.bf16.msra.mxu0 %v16690_v39  ;;  %7221 = vmatprep.subr.bf16.mxu1 %v16705_v41  ;;  %v16803_v39 = vcombine.high %v3862_v33, %v3870_v34  ;;  %v3877_v41 = vld [vmem:[#allocation13 + $0x830] sm:$0xff] }
 0x789   :  { %7307 = vmatprep.subr.bf16.mxu0 %v16707_v42  ;;  %v3885_v42 = vld [vmem:[#allocation13 + $0x870] sm:$0xff] }
 0x78a   :  { %v16816_v61 = vcombine.low %v3877_v41, %v3885_v42 }
 0x78b   :  { %7222 = vmatpush1.bf16.msra.mxu1 %v16704_v58  ;;  %v16817_v58 = vcombine.high %v3877_v41, %v3885_v42 }
 0x78c   :  { %7308 = vmatpush1.bf16.msra.mxu0 %v16706_v59  ;;  %7223 = vmatprep.subr.bf16.mxu1 %v16721_v12  ;;  %v16819_v59 = vcombine.high %v3878_v44, %v3886_v46  ;;  %v3893_v12 = vld [vmem:[#allocation13 + $0x8b0] sm:$0xff] }
 0x78d   :  { %7309 = vmatprep.subr.bf16.mxu0 %v16723_v60  ;;  %v3901_v60 = vld [vmem:[#allocation13 + $0x8f0] sm:$0xff] }
 0x78e   :  { %v16832_v6 = vcombine.low %v3893_v12, %v3901_v60 }
 0x78f   :  { %7224 = vmatpush1.bf16.msra.mxu1 %v16720_v2  ;;  %v16833_v2 = vcombine.high %v3893_v12, %v3901_v60 }
 0x790   :  { %7310 = vmatpush1.bf16.msra.mxu0 %v16722_v3  ;;  %7225 = vmatprep.subr.bf16.mxu1 %v16737_v4  ;;  %v3909_v3 = vld [vmem:[#allocation13 + $0x930] sm:$0xff] }
 0x791   :  { %7311 = vmatprep.subr.bf16.mxu0 %v16739_v53  ;;  %v3917_v4 = vld [vmem:[#allocation13 + $0x970] sm:$0xff]  ;;  %v16835_v53 = vcombine.high %v3894_v62, %v3902_v63 }
 0x792   :  { %v16848_v18 = vcombine.low %v3909_v3, %v3917_v4  ;;  %v4005_v63 = vld [vmem:[#allocation13 + $0xc30] sm:$0xff] }
 0x793   :  { %7226 = vmatpush1.bf16.msra.mxu1 %v16736_v55  ;;  %v16849_v55 = vcombine.high %v3909_v3, %v3917_v4  ;;  %v4014_v3 = vld [vmem:[#allocation13 + $0xc78] sm:$0xff] }
 0x794   :  { %7312 = vmatpush1.bf16.msra.mxu0 %v16738_v56  ;;  %7227 = vmatprep.subr.bf16.mxu1 %v16753_v14  ;;  %v16851_v56 = vcombine.high %v3910_v54, %v3918_v5  ;;  %v3925_v14 = vld [vmem:[#allocation13 + $0x9b0] sm:$0xff] }
 0x795   :  { %7313 = vmatprep.subr.bf16.mxu0 %v16755_v15  ;;  %v3933_v15 = vld [vmem:[#allocation13 + $0x9f0] sm:$0xff] }
 0x796   :  { %v16865_v19 = vcombine.high %v3925_v14, %v3933_v15 }
 0x797   :  { %7228 = vmatpush1.bf16.msra.mxu1 %v16752_v20  ;;  %v16867_v20 = vcombine.high %v3926_v16, %v3934_v17 }
 0x798   :  { %7314 = vmatpush1.bf16.msra.mxu0 %v16754_v21  ;;  %7229 = vmatprep.subr.bf16.mxu1 %v16769_v22  ;;  %v3941_v21 = vld [vmem:[#allocation13 + $0xa30] sm:$0xff] }
 0x799   :  { %7315 = vmatprep.subr.bf16.mxu0 %v16771_v23  ;;  %v3949_v22 = vld [vmem:[#allocation13 + $0xa70] sm:$0xff]  ;;  %v3942_v23 = vld [vmem:[#allocation13 + $0xa38] sm:$0xff] }
 0x79a   :  { %v16881_v25 = vcombine.high %v3941_v21, %v3949_v22  ;;  %v16883_v26 = vcombine.high %v3942_v23, %v3950_v8  ;;  %v16880_v31 = vcombine.low %v3941_v21, %v3949_v22  ;;  %v16882_v32 = vcombine.low %v3942_v23, %v3950_v8 }
 0x79b   :  { %7230 = vmatpush1.bf16.msra.mxu1 %v16768_v27  ;;  %v3957_v27 = vld [vmem:[#allocation13 + $0xab0] sm:$0xff] }
 0x79c   :  { %7316 = vmatpush1.bf16.msra.mxu0 %v16770_v28  ;;  %7231 = vmatprep.subr.bf16.mxu1 %v16785_v29  ;;  %v3965_v28 = vld [vmem:[#allocation13 + $0xaf0] sm:$0xff]  ;;  %v3958_v29 = vld [vmem:[#allocation13 + $0xab8] sm:$0xff] }
 0x79d   :  { %7317 = vmatprep.subr.bf16.mxu0 %v16787_v30  ;;  %v3966_v30 = vld [vmem:[#allocation13 + $0xaf8] sm:$0xff]  ;;  %v16897_v33 = vcombine.high %v3957_v27, %v3965_v28  ;;  %v16896_v41 = vcombine.low %v3957_v27, %v3965_v28 }
 0x79e   :  { %v16899_v34 = vcombine.high %v3958_v29, %v3966_v30  ;;  %v16898_v42 = vcombine.low %v3958_v29, %v3966_v30 }
 0x79f   :  { %7232 = vmatpush1.bf16.msra.mxu1 %v16784_v35  ;;  %v3973_v35 = vld [vmem:[#allocation13 + $0xb30] sm:$0xff] }
 0x7a0   :  { %7318 = vmatpush1.bf16.msra.mxu0 %v16786_v37  ;;  %7233 = vmatprep.subr.bf16.mxu1 %v16801_v38  ;;  %v3981_v37 = vld [vmem:[#allocation13 + $0xb70] sm:$0xff]  ;;  %v3974_v38 = vld [vmem:[#allocation13 + $0xb38] sm:$0xff] }
 0x7a1   :  { %7319 = vmatprep.subr.bf16.mxu0 %v16803_v39  ;;  %v3982_v39 = vld [vmem:[#allocation13 + $0xb78] sm:$0xff]  ;;  %v16913_v44 = vcombine.high %v3973_v35, %v3981_v37  ;;  %v16912_v12 = vcombine.low %v3973_v35, %v3981_v37 }
 0x7a2   :  { %v16915_v46 = vcombine.high %v3974_v38, %v3982_v39  ;;  %v16914_v60 = vcombine.low %v3974_v38, %v3982_v39 }
 0x7a3   :  { %7234 = vmatpush1.bf16.msra.mxu1 %v16800_v50  ;;  %v3989_v50 = vld [vmem:[#allocation13 + $0xbb0] sm:$0xff] }
 0x7a4   :  { %7320 = vmatpush1.bf16.msra.mxu0 %v16802_v57  ;;  %7246 = vmatprep.subr.bf16.mxu1 %v16817_v58  ;;  %v3997_v57 = vld [vmem:[#allocation13 + $0xbf0] sm:$0xff]  ;;  %v3990_v58 = vld [vmem:[#allocation13 + $0xbb8] sm:$0xff] }
 0x7a5   :  { %7332 = vmatprep.subr.bf16.mxu0 %v16819_v59  ;;  %v3998_v59 = vld [vmem:[#allocation13 + $0xbf8] sm:$0xff]  ;;  %v16928_v4 = vcombine.low %v3989_v50, %v3997_v57 }
 0x7a6   :  { %7236 = vmatmul.mubr.bf16.vlgmr.msra.gmra.mrb[96].mxu1 %v20865_v10  ;;  %v16931_v62 = vcombine.high %v3990_v58, %v3998_v59 }
 0x7a7   :  { %7322 = vmatmul.mubr.bf16.vlgmr.msra.gmra.mrb[100].mxu0 %v20865_v10  ;;  %7247 = vmatpush1.bf16.msra.mxu1 %v16816_v61  ;;  %v16850_v10 = vcombine.low %v3910_v54, %v3918_v5  ;;  %v16929_v61 = vcombine.high %v3989_v50, %v3997_v57 }
 0x7a8   :  { %7278 = vmatprep.mubr.bf16.mxu1 %v20871_v13  ;;  %7333 = vmatpush1.bf16.msra.mxu0 %v16818_v1  ;;  %v4013_v1 = vld [vmem:[#allocation13 + $0xc70] sm:$0xff] }
 0x7a9   :  { %7364 = vmatprep.mubr.bf16.mxu0 %v20871_v13  ;;  %7248 = vmatprep.subr.bf16.mxu1 %v16833_v2  ;;  %v16864_v13 = vcombine.low %v3925_v14, %v3933_v15  ;;  %v4006_v2 = vld [vmem:[#allocation13 + $0xc38] sm:$0xff]  ;;  %v16945_v54 = vcombine.high %v4005_v63, %v4013_v1  ;;  %v16944_v14 = vcombine.low %v4005_v63, %v4013_v1 }
 0x7aa   :  { %7334 = vmatprep.subr.bf16.mxu0 %v16835_v53  ;;  %v16930_v53 = vcombine.low %v3990_v58, %v3998_v59  ;;  %v16947_v5 = vcombine.high %v4006_v2, %v4014_v3  ;;  %v16946_v15 = vcombine.low %v4006_v2, %v4014_v3 }
 0x7ab   :  { %7249 = vmatpush1.bf16.msra.mxu1 %v16832_v6  ;;  %v4021_v6 = vld [vmem:[#allocation13 + $0xcb0] sm:$0xff] }
 0x7ac   :  { %7335 = vmatpush1.bf16.msra.mxu0 %v16834_v7  ;;  %7250 = vmatprep.subr.bf16.mxu1 %v16849_v55  ;;  %v4029_v7 = vld [vmem:[#allocation13 + $0xcf0] sm:$0xff]  ;;  %v4022_v55 = vld [vmem:[#allocation13 + $0xcb8] sm:$0xff] }
 0x7ad   :  { %7336 = vmatprep.subr.bf16.mxu0 %v16851_v56  ;;  %v4030_v56 = vld [vmem:[#allocation13 + $0xcf8] sm:$0xff]  ;;  %v16961_v16 = vcombine.high %v4021_v6, %v4029_v7  ;;  %v16960_v21 = vcombine.low %v4021_v6, %v4029_v7 }
 0x7ae   :  { %v16963_v17 = vcombine.high %v4022_v55, %v4030_v56  ;;  %v16962_v22 = vcombine.low %v4022_v55, %v4030_v56 }
 0x7af   :  { %7251 = vmatpush1.bf16.msra.mxu1 %v16848_v18  ;;  %v4037_v18 = vld [vmem:[#allocation13 + $0xd30] sm:$0xff] }
 0x7b0   :  { %7337 = vmatpush1.bf16.msra.mxu0 %v16850_v10  ;;  %7252 = vmatprep.subr.bf16.mxu1 %v16865_v19  ;;  %v4045_v10 = vld [vmem:[#allocation13 + $0xd70] sm:$0xff]  ;;  %v4038_v19 = vld [vmem:[#allocation13 + $0xd38] sm:$0xff] }
 0x7b1   :  { %7338 = vmatprep.subr.bf16.mxu0 %v16867_v20  ;;  %v4046_v20 = vld [vmem:[#allocation13 + $0xd78] sm:$0xff]  ;;  %v16977_v23 = vcombine.high %v4037_v18, %v4045_v10  ;;  %v16976_v27 = vcombine.low %v4037_v18, %v4045_v10 }
 0x7b2   :  { %v16979_v8 = vcombine.high %v4038_v19, %v4046_v20  ;;  %v16978_v28 = vcombine.low %v4038_v19, %v4046_v20 }
 0x7b3   :  { %7253 = vmatpush1.bf16.msra.mxu1 %v16864_v13  ;;  %v4053_v13 = vld [vmem:[#allocation13 + $0xdb0] sm:$0xff] }
 0x7b4   :  { %7339 = vmatpush1.bf16.msra.mxu0 %v16866_v24  ;;  %7254 = vmatprep.subr.bf16.mxu1 %v16881_v25  ;;  %v4061_v24 = vld [vmem:[#allocation13 + $0xdf0] sm:$0xff]  ;;  %v4054_v25 = vld [vmem:[#allocation13 + $0xdb8] sm:$0xff] }
 0x7b5   :  { %7340 = vmatprep.subr.bf16.mxu0 %v16883_v26  ;;  %v4062_v26 = vld [vmem:[#allocation13 + $0xdf8] sm:$0xff]  ;;  %v16993_v29 = vcombine.high %v4053_v13, %v4061_v24  ;;  %v16992_v35 = vcombine.low %v4053_v13, %v4061_v24 }
 0x7b6   :  { %v16995_v30 = vcombine.high %v4054_v25, %v4062_v26  ;;  %v16994_v37 = vcombine.low %v4054_v25, %v4062_v26 }
 0x7b7   :  { %7255 = vmatpush1.bf16.msra.mxu1 %v16880_v31  ;;  %v4069_v31 = vld [vmem:[#allocation13 + $0xe30] sm:$0xff] }
 0x7b8   :  { %7341 = vmatpush1.bf16.msra.mxu0 %v16882_v32  ;;  %7256 = vmatprep.subr.bf16.mxu1 %v16897_v33  ;;  %v4077_v32 = vld [vmem:[#allocation13 + $0xe70] sm:$0xff]  ;;  %v4070_v33 = vld [vmem:[#allocation13 + $0xe38] sm:$0xff] }
 0x7b9   :  { %7342 = vmatprep.subr.bf16.mxu0 %v16899_v34  ;;  %v4078_v34 = vld [vmem:[#allocation13 + $0xe78] sm:$0xff]  ;;  %v17009_v38 = vcombine.high %v4069_v31, %v4077_v32  ;;  %v17008_v50 = vcombine.low %v4069_v31, %v4077_v32 }
 0x7ba   :  { %v17011_v39 = vcombine.high %v4070_v33, %v4078_v34  ;;  %v17010_v57 = vcombine.low %v4070_v33, %v4078_v34 }
 0x7bb   :  { %7257 = vmatpush1.bf16.msra.mxu1 %v16896_v41  ;;  %v4085_v41 = vld [vmem:[#allocation13 + $0xeb0] sm:$0xff] }
 0x7bc   :  { %7343 = vmatpush1.bf16.msra.mxu0 %v16898_v42  ;;  %7258 = vmatprep.subr.bf16.mxu1 %v16913_v44  ;;  %v4093_v42 = vld [vmem:[#allocation13 + $0xef0] sm:$0xff]  ;;  %v4086_v44 = vld [vmem:[#allocation13 + $0xeb8] sm:$0xff] }
 0x7bd   :  { %7344 = vmatprep.subr.bf16.mxu0 %v16915_v46  ;;  %v4094_v46 = vld [vmem:[#allocation13 + $0xef8] sm:$0xff]  ;;  %v17025_v58 = vcombine.high %v4085_v41, %v4093_v42  ;;  %v17024_v63 = vcombine.low %v4085_v41, %v4093_v42 }
 0x7be   :  { %v17027_v59 = vcombine.high %v4086_v44, %v4094_v46  ;;  %v17026_v1 = vcombine.low %v4086_v44, %v4094_v46  ;;  %v3581_v46 = vld [vmem:[#allocation12 + $0x10] sm:$0xff] }
 0x7bf   :  { %7259 = vmatpush1.bf16.msra.mxu1 %v16912_v12  ;;  %v4101_v12 = vld [vmem:[#allocation13 + $0xf30] sm:$0xff] }
 0x7c0   :  { %7345 = vmatpush1.bf16.msra.mxu0 %v16914_v60  ;;  %7260 = vmatprep.subr.bf16.mxu1 %v16929_v61  ;;  %v4109_v60 = vld [vmem:[#allocation13 + $0xf70] sm:$0xff]  ;;  %v4102_v61 = vld [vmem:[#allocation13 + $0xf38] sm:$0xff] }
 0x7c1   :  { %7346 = vmatprep.subr.bf16.mxu0 %v16931_v62  ;;  %v4110_v62 = vld [vmem:[#allocation13 + $0xf78] sm:$0xff]  ;;  %v17041_v2 = vcombine.high %v4101_v12, %v4109_v60  ;;  %v17040_v6 = vcombine.low %v4101_v12, %v4109_v60 }
 0x7c2   :  { %v17043_v3 = vcombine.high %v4102_v61, %v4110_v62  ;;  %v17042_v7 = vcombine.low %v4102_v61, %v4110_v62  ;;  %v3597_v62 = vld [vmem:[#allocation12 + $0x90] sm:$0xff] }
 0x7c3   :  { %7261 = vmatpush1.bf16.msra.mxu1 %v16928_v4  ;;  %v4117_v4 = vld [vmem:[#allocation13 + $0xfb0] sm:$0xff] }
 0x7c4   :  { %7347 = vmatpush1.bf16.msra.mxu0 %v16930_v53  ;;  %7262 = vmatprep.subr.bf16.mxu1 %v16945_v54  ;;  %v4125_v53 = vld [vmem:[#allocation13 + $0xff0] sm:$0xff]  ;;  %v4118_v54 = vld [vmem:[#allocation13 + $0xfb8] sm:$0xff] }
 0x7c5   :  { %7348 = vmatprep.subr.bf16.mxu0 %v16947_v5  ;;  %v4126_v5 = vld [vmem:[#allocation13 + $0xff8] sm:$0xff]  ;;  %v17057_v55 = vcombine.high %v4117_v4, %v4125_v53  ;;  %v17056_v18 = vcombine.low %v4117_v4, %v4125_v53 }
 0x7c6   :  { %v17059_v56 = vcombine.high %v4118_v54, %v4126_v5  ;;  %v17058_v10 = vcombine.low %v4118_v54, %v4126_v5  ;;  %v3583_v5 = vld [vmem:[#allocation12 + $0x20] sm:$0xff] }
 0x7c7   :  { %7263 = vmatpush1.bf16.msra.mxu1 %v16944_v14  ;;  %v3579_v14 = vld [vmem:[#allocation12] sm:$0xff] }
 0x7c8   :  { %7349 = vmatpush1.bf16.msra.mxu0 %v16946_v15  ;;  %7264 = vmatprep.subr.bf16.mxu1 %v16961_v16  ;;  %v3587_v15 = vld [vmem:[#allocation12 + $0x40] sm:$0xff]  ;;  %v3582_v16 = vld [vmem:[#allocation12 + $0x18] sm:$0xff] }
 0x7c9   :  { %7350 = vmatprep.subr.bf16.mxu0 %v16963_v17  ;;  %v3590_v17 = vld [vmem:[#allocation12 + $0x58] sm:$0xff]  ;;  %v17061_v19 = vcombine.high %v3579_v14, %v3587_v15  ;;  %v17060_v13 = vcombine.low %v3579_v14, %v3587_v15 }
 0x7ca   :  { %v17067_v20 = vcombine.high %v3582_v16, %v3590_v17  ;;  %v17066_v24 = vcombine.low %v3582_v16, %v3590_v17  ;;  %v3599_v16 = vld [vmem:[#allocation12 + $0xa0] sm:$0xff] }
 0x7cb   :  { %7265 = vmatpush1.bf16.msra.mxu1 %v16960_v21  ;;  %v3595_v21 = vld [vmem:[#allocation12 + $0x80] sm:$0xff] }
 0x7cc   :  { %7351 = vmatpush1.bf16.msra.mxu0 %v16962_v22  ;;  %7266 = vmatprep.subr.bf16.mxu1 %v16977_v23  ;;  %v3603_v22 = vld [vmem:[#allocation12 + $0xc0] sm:$0xff]  ;;  %v3598_v23 = vld [vmem:[#allocation12 + $0x98] sm:$0xff] }
 0x7cd   :  { %7352 = vmatprep.subr.bf16.mxu0 %v16979_v8  ;;  %v3606_v8 = vld [vmem:[#allocation12 + $0xd8] sm:$0xff]  ;;  %v17077_v25 = vcombine.high %v3595_v21, %v3603_v22  ;;  %v17076_v31 = vcombine.low %v3595_v21, %v3603_v22  ;;  %v3607_v17 = vld [vmem:[#allocation12 + $0xe0] sm:$0xff]  ;;  %v3585_v22 = vld [vmem:[#allocation12 + $0x30] sm:$0xff] }
 0x7ce   :  { %v17083_v26 = vcombine.high %v3598_v23, %v3606_v8  ;;  %v17082_v32 = vcombine.low %v3598_v23, %v3606_v8  ;;  %v17085_v21 = vcombine.high %v3599_v16, %v3607_v17  ;;  %v3593_v23 = vld [vmem:[#allocation12 + $0x70] sm:$0xff] }
 0x7cf   :  { %7267 = vmatpush1.bf16.msra.mxu1 %v16976_v27  ;;  %v3580_v27 = vld [vmem:[#allocation12 + $0x8] sm:$0xff] }
 0x7d0   :  { %7353 = vmatpush1.bf16.msra.mxu0 %v16978_v28  ;;  %7268 = vmatprep.subr.bf16.mxu1 %v16993_v29  ;;  %v3588_v28 = vld [vmem:[#allocation12 + $0x48] sm:$0xff] }
 0x7d1   :  { %7354 = vmatprep.subr.bf16.mxu0 %v16995_v30  ;;  %v3584_v29 = vld [vmem:[#allocation12 + $0x28] sm:$0xff]  ;;  %v17063_v33 = vcombine.high %v3580_v27, %v3588_v28  ;;  %v17062_v41 = vcombine.low %v3580_v27, %v3588_v28  ;;  %v17073_v27 = vcombine.high %v3585_v22, %v3593_v23  ;;  %v3601_v28 = vld [vmem:[#allocation12 + $0xb0] sm:$0xff] }
 0x7d2   :  { %v3592_v30 = vld [vmem:[#allocation12 + $0x68] sm:$0xff] }
 0x7d3   :  { %7269 = vmatpush1.bf16.msra.mxu1 %v16992_v35  ;;  %v17071_v34 = vcombine.high %v3584_v29, %v3592_v30  ;;  %v3596_v35 = vld [vmem:[#allocation12 + $0x88] sm:$0xff] }
 0x7d4   :  { %7355 = vmatpush1.bf16.msra.mxu0 %v16994_v37  ;;  %7270 = vmatprep.subr.bf16.mxu1 %v17009_v38  ;;  %v3604_v37 = vld [vmem:[#allocation12 + $0xc8] sm:$0xff] }
 0x7d5   :  { %7356 = vmatprep.subr.bf16.mxu0 %v17011_v39  ;;  %v3600_v38 = vld [vmem:[#allocation12 + $0xa8] sm:$0xff]  ;;  %v17079_v42 = vcombine.high %v3596_v35, %v3604_v37 }
 0x7d6   :  { %v3608_v39 = vld [vmem:[#allocation12 + $0xe8] sm:$0xff] }
 0x7d7   :  { %7271 = vmatpush1.bf16.msra.mxu1 %v17008_v50  ;;  %v17087_v44 = vcombine.high %v3600_v38, %v3608_v39  ;;  %v3589_v50 = vld [vmem:[#allocation12 + $0x50] sm:$0xff]  ;;  %v17086_v12 = vcombine.low %v3600_v38, %v3608_v39 }
 0x7d8   :  { %7357 = vmatpush1.bf16.msra.mxu0 %v17010_v57  ;;  %7272 = vmatprep.subr.bf16.mxu1 %v17025_v58  ;;  %v3586_v57 = vld [vmem:[#allocation12 + $0x38] sm:$0xff]  ;;  %v17065_v60 = vcombine.high %v3581_v46, %v3589_v50  ;;  %v8051_v38 = vld [vmem:[#allocation16 + $0x20] sm:$0xff] }
 0x7d9   :  { %7358 = vmatprep.subr.bf16.mxu0 %v17027_v59  ;;  %v3594_v58 = vld [vmem:[#allocation12 + $0x78] sm:$0xff]  ;;  %v17078_v59 = vcombine.low %v3596_v35, %v3604_v37  ;;  %v8047_v37 = vld [vmem:[#allocation16] sm:$0xff] }
 0x7da   :  { %v17075_v61 = vcombine.high %v3586_v57, %v3594_v58  ;;  %v17074_v4 = vcombine.low %v3586_v57, %v3594_v58  ;;  %v8059_v57 = vld [vmem:[#allocation16 + $0x60] sm:$0xff] }
 0x7db   :  { %7273 = vmatpush1.bf16.msra.mxu1 %v17024_v63  ;;  %v3605_v63 = vld [vmem:[#allocation12 + $0xd0] sm:$0xff] }
 0x7dc   :  { %7359 = vmatpush1.bf16.msra.mxu0 %v17026_v1  ;;  %7274 = vmatprep.subr.bf16.mxu1 %v17041_v2  ;;  %v3602_v1 = vld [vmem:[#allocation12 + $0xb8] sm:$0xff]  ;;  %v17081_v53 = vcombine.high %v3597_v62, %v3605_v63 }
 0x7dd   :  { %7360 = vmatprep.subr.bf16.mxu0 %v17043_v3  ;;  %v3610_v2 = vld [vmem:[#allocation12 + $0xf8] sm:$0xff]  ;;  %v17064_v3 = vcombine.low %v3581_v46, %v3589_v50  ;;  %v17101_v46 = vcombine.high %v8047_v37, %v8051_v38  ;;  %v8055_v50 = vld [vmem:[#allocation16 + $0x40] sm:$0xff] }
 0x7de   :  { %v17091_v54 = vcombine.high %v3602_v1, %v3610_v2  ;;  %v17090_v14 = vcombine.low %v3602_v1, %v3610_v2  ;;  %v8067_v1 = vld [vmem:[#allocation16 + $0xa0] sm:$0xff] }
 0x7df   :  { %7275 = vmatpush1.bf16.msra.mxu1 %v17040_v6  ;;  %v3591_v6 = vld [vmem:[#allocation12 + $0x60] sm:$0xff] }
 0x7e0   :  { %7361 = vmatpush1.bf16.msra.mxu0 %v17042_v7  ;;  %7276 = vmatprep.subr.bf16.mxu1 %v17057_v55  ;;  %v8048_v7 = vld [vmem:[#allocation16 + $0x8] sm:$0xff]  ;;  %v17069_v15 = vcombine.high %v3583_v5, %v3591_v6 }
 0x7e1   :  { %7362 = vmatprep.subr.bf16.mxu0 %v17059_v56  ;;  %v8052_v55 = vld [vmem:[#allocation16 + $0x28] sm:$0xff]  ;;  %v17080_v56 = vcombine.low %v3597_v62, %v3605_v63  ;;  %v17109_v62 = vcombine.high %v8055_v50, %v8059_v57  ;;  %v8063_v63 = vld [vmem:[#allocation16 + $0x80] sm:$0xff] }
 0x7e2   :  { %v17102_v8 = vcombine.low %v8048_v7, %v8052_v55 }
 0x7e3   :  { %7277 = vmatpush1.bf16.msra.mxu1 %v17056_v18  ;;  %v17103_v18 = vcombine.high %v8048_v7, %v8052_v55 }
 0x7e4   :  { %7363 = vmatpush1.bf16.msra.mxu0 %v17058_v10  ;;  %7539 = vmatprep.subr.bf16.mxu1 %v17061_v19  ;;  %v17068_v10 = vcombine.low %v3583_v5, %v3591_v6  ;;  %v8056_v19 = vld [vmem:[#allocation16 + $0x48] sm:$0xff]  ;;  %v8071_v5 = vld [vmem:[#allocation16 + $0xc0] sm:$0xff] }
 0x7e5   :  { %7668 = vmatprep.subr.bf16.mxu0 %v17067_v20  ;;  %v8060_v20 = vld [vmem:[#allocation16 + $0x68] sm:$0xff]  ;;  %v8075_v6 = vld [vmem:[#allocation16 + $0xe0] sm:$0xff] }
 0x7e6   :  { %7279 = vmatmul.mubr.bf16.vlgmr.msra.gmra.mrb[96].mxu1 %v20867_v11 }
 0x7e7   :  { %7365 = vmatmul.mubr.bf16.vlgmr.msra.gmra.mrb[100].mxu0 %v20867_v11  ;;  %7540 = vmatpush1.bf16.msra.mxu1 %v17060_v13  ;;  %v17070_v11 = vcombine.low %v3584_v29, %v3592_v30  ;;  %v17111_v13 = vcombine.high %v8056_v19, %v8060_v20  ;;  %v3609_v29 = vld [vmem:[#allocation12 + $0xf0] sm:$0xff]  ;;  %v17110_v30 = vcombine.low %v8056_v19, %v8060_v20  ;;  %v8112_v20 = vld [vmem:[#allocation16 + $0x208] sm:$0xff] }
 0x7e8   :  { %7669 = vmatpush1.bf16.msra.mxu0 %v17066_v24  ;;  %7541 = vmatprep.subr.bf16.mxu1 %v17077_v25  ;;  %v17084_v24 = vcombine.low %v3599_v16, %v3607_v17  ;;  %v8064_v25 = vld [vmem:[#allocation16 + $0x88] sm:$0xff]  ;;  %v17089_v35 = vcombine.high %v3601_v28, %v3609_v29  ;;  %v8079_v16 = vld [vmem:[#allocation16 + $0x100] sm:$0xff]  ;;  %v17124_v19 = vcombine.low %v8071_v5, %v8075_v6 }
 0x7e9   :  { %7670 = vmatprep.subr.bf16.mxu0 %v17083_v26  ;;  %7571 = vmatprep.mubr.bf16.mxu1 %v19611_v0  ;;  %v8068_v26 = vld [vmem:[#allocation16 + $0xa8] sm:$0xff]  ;;  %v8083_v17 = vld [vmem:[#allocation16 + $0x120] sm:$0xff] }
 0x7ea   :  { %7700 = vmatprep.mubr.bf16.mxu0 %v19611_v0  ;;  %v17118_v39 = vcombine.low %v8064_v25, %v8068_v26 }
 0x7eb   :  { %7542 = vmatpush1.bf16.msra.mxu1 %v17076_v31  ;;  %v17119_v31 = vcombine.high %v8064_v25, %v8068_v26  ;;  %v17132_v25 = vcombine.low %v8079_v16, %v8083_v17  ;;  %v8120_v26 = vld [vmem:[#allocation16 + $0x248] sm:$0xff] }
 0x7ec   :  { %7671 = vmatpush1.bf16.msra.mxu0 %v17082_v32  ;;  %7582 = vmatprep.subr.bf16.mxu1 %v17063_v33  ;;  %v17072_v32 = vcombine.low %v3585_v22, %v3593_v23  ;;  %v8072_v33 = vld [vmem:[#allocation16 + $0xc8] sm:$0xff]  ;;  %v17133_v22 = vcombine.high %v8079_v16, %v8083_v17  ;;  %v8087_v23 = vld [vmem:[#allocation16 + $0x140] sm:$0xff] }
 0x7ed   :  { %7754 = vmatprep.subr.bf16.mxu0 %v17071_v34  ;;  %v8076_v34 = vld [vmem:[#allocation16 + $0xe8] sm:$0xff]  ;;  %v8139_v16 = vld [vmem:[#allocation16 + $0x2e0] sm:$0xff] }
 0x7ee   :  { %17092 = vmatmul.mubr.msk.bf16.vlgmr.msra.gmra.mrb[84].mxu1 %vm7535_vm8, %v20859_v9  ;;  %v17126_v58 = vcombine.low %v8072_v33, %v8076_v34 }
 0x7ef   :  { %17095 = vmatmul.mubr.msk.bf16.vlgmr.msra.gmra.mrb[92].mxu0 %vm7535_vm8, %v20859_v9  ;;  %7583 = vmatpush1.bf16.msra.mxu1 %v17062_v41  ;;  %v17127_v41 = vcombine.high %v8072_v33, %v8076_v34  ;;  %v8128_v34 = vld [vmem:[#allocation16 + $0x288] sm:$0xff] }
 0x7f0   :  { %7755 = vmatpush1.bf16.msra.mxu0 %v17070_v11  ;;  %7584 = vmatprep.subr.bf16.mxu1 %v17079_v42  ;;  %v17088_v11 = vcombine.low %v3601_v28, %v3609_v29  ;;  %v8080_v42 = vld [vmem:[#allocation16 + $0x108] sm:$0xff]  ;;  %v8095_v29 = vld [vmem:[#allocation16 + $0x180] sm:$0xff] }
 0x7f1   :  { %7756 = vmatprep.subr.bf16.mxu0 %v17087_v44  ;;  %7614 = vmatprep.mubr.bf16.mxu1 %v19611_v0  ;;  %v8084_v44 = vld [vmem:[#allocation16 + $0x128] sm:$0xff] }
 0x7f2   :  { %7786 = vmatprep.mubr.bf16.mxu0 %v19611_v0 }
 0x7f3   :  { %7585 = vmatpush1.bf16.msra.mxu1 %v17078_v59  ;;  %v17135_v59 = vcombine.high %v8080_v42, %v8084_v44 }
 0x7f4   :  { %7757 = vmatpush1.bf16.msra.mxu0 %v17086_v12  ;;  %7625 = vmatprep.subr.bf16.mxu1 %v17065_v60  ;;  %v17100_v12 = vcombine.low %v8047_v37, %v8051_v38  ;;  %v8088_v60 = vld [vmem:[#allocation16 + $0x148] sm:$0xff]  ;;  %v8103_v38 = vld [vmem:[#allocation16 + $0x1c0] sm:$0xff] }
 0x7f5   :  { %7840 = vmatprep.subr.bf16.mxu0 %v17075_v61  ;;  %v8092_v61 = vld [vmem:[#allocation16 + $0x168] sm:$0xff] }
 0x7f6   :  { %17093 = vmatmul.mubr.msk.bf16.vlgmr.msra.gmra.mrb[100].mxu1 %vm7535_vm8, %v20859_v9  ;;  %v17143_v2 = vcombine.high %v8088_v60, %v8092_v61  ;;  %v17142_v7 = vcombine.low %v8088_v60, %v8092_v61  ;;  %v8144_v61 = vld [vmem:[#allocation16 + $0x308] sm:$0xff] }
 0x7f7   :  { %17097 = vmatmul.mubr.msk.bf16.vlgmr.msra.gmra.mrb[96].mxu0 %vm7535_vm8, %v20859_v9  ;;  %7626 = vmatpush1.bf16.msra.mxu1 %v17064_v3  ;;  %v17108_v3 = vcombine.low %v8055_v50, %v8059_v57  ;;  %v8111_v57 = vld [vmem:[#allocation16 + $0x200] sm:$0xff] }
 0x7f8   :  { %7841 = vmatpush1.bf16.msra.mxu0 %v17074_v4  ;;  %7627 = vmatprep.subr.bf16.mxu1 %v17081_v53  ;;  %v8096_v4 = vld [vmem:[#allocation16 + $0x188] sm:$0xff] }
 0x7f9   :  { %7842 = vmatprep.subr.bf16.mxu0 %v17091_v54  ;;  %7657 = vmatprep.mubr.bf16.mxu1 %v19611_v0  ;;  %v8100_v53 = vld [vmem:[#allocation16 + $0x1a8] sm:$0xff]  ;;  %v17117_v54 = vcombine.high %v8063_v63, %v8067_v1 }
 0x7fa   :  { %7872 = vmatprep.mubr.bf16.mxu0 %v19611_v0  ;;  %v17151_v55 = vcombine.high %v8096_v4, %v8100_v53 }
 0x7fb   :  { %7628 = vmatpush1.bf16.msra.mxu1 %v17080_v56  ;;  %v17116_v56 = vcombine.low %v8063_v63, %v8067_v1  ;;  %v8119_v1 = vld [vmem:[#allocation16 + $0x240] sm:$0xff] }
 0x7fc   :  { %7843 = vmatpush1.bf16.msra.mxu0 %v17090_v14  ;;  %7711 = vmatprep.subr.bf16.mxu1 %v17069_v15  ;;  %v8104_v14 = vld [vmem:[#allocation16 + $0x1c8] sm:$0xff] }
 0x7fd   :  { %14577 = vmatprep.subr.bf16.mxu0 %v17103_v18  ;;  %v8108_v15 = vld [vmem:[#allocation16 + $0x1e8] sm:$0xff]  ;;  %v17150_v18 = vcombine.low %v8096_v4, %v8100_v53 }
 0x7fe   :  { %17094 = vmatmul.mubr.msk.bf16.vlgmr.msra.gmra.mrb[88].mxu1 %vm7535_vm8, %v20859_v9  ;;  %v8152_v53 = vld [vmem:[#allocation16 + $0x348] sm:$0xff] }
 0x7ff   :  { %17099 = vmatmul.mubr.msk.bf16.vlgmr.msra.gmra.mrb[100].mxu0 %vm7535_vm8, %v20859_v9  ;;  %7712 = vmatpush1.bf16.msra.mxu1 %v17068_v10  ;;  %v17159_v10 = vcombine.high %v8104_v14, %v8108_v15 }
 0x800   :  { %7713 = vmatprep.subr.bf16.mxu1 %v17085_v21  ;;  %7743 = vmatprep.mubr.bf16.mxu1 %v19611_v0  ;;  %v8116_v21 = vld [vmem:[#allocation16 + $0x228] sm:$0xff] }
 0x801   :  { %14578 = vmatpush1.bf16.msra.mxu0 %v17102_v8  ;;  %v8091_v8 = vld [vmem:[#allocation16 + $0x160] sm:$0xff] }
 0x802   :  { %14579 = vmatprep.subr.bf16.mxu0 %v17111_v13  ;;  %v17158_v13 = vcombine.low %v8104_v14, %v8108_v15  ;;  %v17141_v28 = vcombine.high %v8087_v23, %v8091_v8  ;;  %v17140_v33 = vcombine.low %v8087_v23, %v8091_v8  ;;  %v8151_v23 = vld [vmem:[#allocation16 + $0x340] sm:$0xff] }
 0x803   :  { %7714 = vmatpush1.bf16.msra.mxu1 %v17084_v24  ;;  %v17167_v24 = vcombine.high %v8112_v20, %v8116_v21  ;;  %v8155_v8 = vld [vmem:[#allocation16 + $0x360] sm:$0xff] }
 0x804   :  { %7797 = vmatprep.subr.bf16.mxu1 %v17073_v27  ;;  %v8124_v27 = vld [vmem:[#allocation16 + $0x268] sm:$0xff] }
 0x805   :  { %14580 = vmatpush1.bf16.msra.mxu0 %v17110_v30  ;;  %v8099_v30 = vld [vmem:[#allocation16 + $0x1a0] sm:$0xff] }
 0x806   :  { %17096 = vmatmul.mubr.msk.bf16.vlgmr.msra.gmra.mrb[92].mxu1 %vm7535_vm8, %v20859_v9  ;;  %14581 = vmatprep.subr.bf16.mxu0 %v17119_v31  ;;  %v17166_v31 = vcombine.low %v8112_v20, %v8116_v21  ;;  %v17149_v37 = vcombine.high %v8095_v29, %v8099_v30  ;;  %v8147_v20 = vld [vmem:[#allocation16 + $0x320] sm:$0xff] }
 0x807   :  { %7798 = vmatpush1.bf16.msra.mxu1 %v17072_v32  ;;  %7829 = vmatprep.mubr.bf16.mxu1 %v19611_v0  ;;  %v17134_v0 = vcombine.low %v8080_v42, %v8084_v44  ;;  %v17175_v32 = vcombine.high %v8120_v26, %v8124_v27  ;;  %v17148_v42 = vcombine.low %v8095_v29, %v8099_v30  ;;  %v8136_v44 = vld [vmem:[#allocation16 + $0x2c8] sm:$0xff] }
 0x808   :  { %7799 = vmatprep.subr.bf16.mxu1 %v17089_v35  ;;  %v8132_v35 = vld [vmem:[#allocation16 + $0x2a8] sm:$0xff] }
 0x809   :  { %14582 = vmatpush1.bf16.msra.mxu0 %v17118_v39  ;;  %v8107_v39 = vld [vmem:[#allocation16 + $0x1e0] sm:$0xff]  ;;  %v8164_v30 = vld [vmem:[#allocation16 + $0x3a8] sm:$0xff] }
 0x80a   :  { %14583 = vmatprep.subr.bf16.mxu0 %v17127_v41  ;;  %v17174_v41 = vcombine.low %v8120_v26, %v8124_v27  ;;  %v17157_v50 = vcombine.high %v8103_v38, %v8107_v39  ;;  %v17156_v60 = vcombine.low %v8103_v38, %v8107_v39  ;;  %v8159_v26 = vld [vmem:[#allocation16 + $0x380] sm:$0xff]  ;;  %v8172_v39 = vld [vmem:[#allocation16 + $0x3e8] sm:$0xff] }
 0x80b   :  { %7800 = vmatpush1.bf16.msra.mxu1 %v17088_v11  ;;  %v17183_v11 = vcombine.high %v8128_v34, %v8132_v35  ;;  %v8163_v27 = vld [vmem:[#allocation16 + $0x3a0] sm:$0xff] }
 0x80c   :  { %14233 = vmatprep.subr.bf16.mxu1 %v17101_v46  ;;  %v8140_v46 = vld [vmem:[#allocation16 + $0x2e8] sm:$0xff]  ;;  %v17213_v29 = vcombine.high %v8159_v26, %v8163_v27 }
 0x80d   :  { %14584 = vmatpush1.bf16.msra.mxu0 %v17126_v58  ;;  %v8115_v58 = vld [vmem:[#allocation16 + $0x220] sm:$0xff] }
 0x80e   :  { %17098 = vmatmul.mubr.msk.bf16.vlgmr.msra.gmra.mrb[96].mxu1 %vm7535_vm8, %v20859_v9  ;;  %14585 = vmatprep.subr.bf16.mxu0 %v17135_v59  ;;  %v17125_v9 = vcombine.high %v8071_v5, %v8075_v6  ;;  %v17182_v59 = vcombine.low %v8128_v34, %v8132_v35  ;;  %v17165_v63 = vcombine.high %v8111_v57, %v8115_v58  ;;  %v8127_v6 = vld [vmem:[#allocation16 + $0x280] sm:$0xff] }
 0x80f   :  { %14234 = vmatpush1.bf16.msra.mxu1 %v17100_v12  ;;  %v17191_v12 = vcombine.high %v8136_v44, %v8140_v46  ;;  %v17164_v4 = vcombine.low %v8111_v57, %v8115_v58  ;;  %v8167_v34 = vld [vmem:[#allocation16 + $0x3c0] sm:$0xff]  ;;  %v20945_v58 = vld [vmem:[#allocation16 + $0x428] sm:$0xff] }
 0x810   :  { %14235 = vmatprep.subr.bf16.mxu1 %v17109_v62  ;;  %v8148_v62 = vld [vmem:[#allocation16 + $0x328] sm:$0xff]  ;;  %v8171_v35 = vld [vmem:[#allocation16 + $0x3e0] sm:$0xff] }
 0x811   :  { %14586 = vmatpush1.bf16.msra.mxu0 %v17134_v0  ;;  %v8123_v0 = vld [vmem:[#allocation16 + $0x260] sm:$0xff]  ;;  %v17221_v38 = vcombine.high %v8167_v34, %v8171_v35 }
 0x812   :  { %14587 = vmatprep.subr.bf16.mxu0 %v17143_v2  ;;  %v17190_v2 = vcombine.low %v8136_v44, %v8140_v46  ;;  %v17173_v5 = vcombine.high %v8119_v1, %v8123_v0  ;;  %v17172_v14 = vcombine.low %v8119_v1, %v8123_v0  ;;  %v20937_v44 = vld [vmem:[#allocation16 + $0x400] sm:$0xff]  ;;  %v20960_v0 = vld [vmem:[#allocation15 + $0x8] sm:$0xff] }
 0x813   :  { %14236 = vmatpush1.bf16.msra.mxu1 %v17108_v3  ;;  %v17199_v3 = vcombine.high %v8144_v61, %v8148_v62  ;;  %v20939_v46 = vld [vmem:[#allocation16 + $0x420] sm:$0xff] }
 0x814   :  { %14237 = vmatprep.subr.bf16.mxu1 %v17117_v54  ;;  %v8156_v54 = vld [vmem:[#allocation16 + $0x368] sm:$0xff]  ;;  %v17229_v57 = vcombine.high %v20937_v44, %v20939_v46 }
 0x815   :  { %14588 = vmatpush1.bf16.msra.mxu0 %v17142_v7  ;;  %v8131_v7 = vld [vmem:[#allocation16 + $0x2a0] sm:$0xff]  ;;  %v17206_v17 = vcombine.low %v8152_v53, %v8156_v54 }
 0x816   :  { %14589 = vmatprep.subr.bf16.mxu0 %v17151_v55  ;;  %v17198_v55 = vcombine.low %v8144_v61, %v8148_v62  ;;  %v17181_v15 = vcombine.high %v8127_v6, %v8131_v7  ;;  %v7883_v61 = vld [vmem:[#allocation15] sm:$0xff]  ;;  %v20954_v62 = vsub.s32 6, %v20445_v47 }
 0x817   :  { %14238 = vmatpush1.bf16.msra.mxu1 %v17116_v56  ;;  %v17207_v56 = vcombine.high %v8152_v53, %v8156_v54  ;;  %v7890_v1 = vrot.slane %v7883_v61, %v20448_v48  ;;  %v20965_v53 = vld [vmem:[#allocation16 + $0x440] sm:$0xff] }
 0x818   :  { %14239 = vmatprep.subr.bf16.mxu1 %v17125_v9  ;;  %v8135_v9 = vld [vmem:[#allocation16 + $0x2c0] sm:$0xff] }
 0x819   :  { %14590 = vmatpush1.bf16.msra.mxu0 %v17150_v18  ;;  %v17180_v18 = vcombine.low %v8127_v6, %v8131_v7  ;;  %v17188_v21 = vcombine.low %v8135_v9, %v8139_v16  ;;  %v20967_v54 = vld [vmem:[#allocation16 + $0x460] sm:$0xff]  ;;  %v20970_v6 = vrot.slane %v7883_v61, %v20451_v49  ;;  %v20974_v7 = vrot.slane %v20960_v0, %v20451_v49 }
 0x81a   :  { %14591 = vmatprep.subr.bf16.mxu0 %v17159_v10  ;;  %v17189_v10 = vcombine.high %v8135_v9, %v8139_v16 }
 0x81b   :  { %14240 = vmatpush1.bf16.msra.mxu1 %v17124_v19  ;;  %v8143_v19 = vld [vmem:[#allocation16 + $0x300] sm:$0xff] }
 0x81c   :  { %14241 = vmatprep.subr.bf16.mxu1 %v17133_v22  ;;  %v17197_v22 = vcombine.high %v8143_v19, %v8147_v20 }
 0x81d   :  { %14592 = vmatpush1.bf16.msra.mxu0 %v17158_v13  ;;  %v17196_v13 = vcombine.low %v8143_v19, %v8147_v20 }
 0x81e   :  { %14593 = vmatprep.subr.bf16.mxu0 %v17167_v24  ;;  %v17205_v24 = vcombine.high %v8151_v23, %v8155_v8 }
 0x81f   :  { %14242 = vmatpush1.bf16.msra.mxu1 %v17132_v25  ;;  %v17204_v25 = vcombine.low %v8151_v23, %v8155_v8  ;;  %v17236_v23 = vcombine.low %v20965_v53, %v20967_v54  ;;  %v17237_v8 = vcombine.high %v20965_v53, %v20967_v54 }
 0x820   :  { %14243 = vmatprep.subr.bf16.mxu1 %v17141_v28  ;;  %v8160_v28 = vld [vmem:[#allocation16 + $0x388] sm:$0xff] }
 0x821   :  { %14594 = vmatpush1.bf16.msra.mxu0 %v17166_v31  ;;  %v17212_v31 = vcombine.low %v8159_v26, %v8163_v27 }
 0x822   :  { %14595 = vmatprep.subr.bf16.mxu0 %v17175_v32  ;;  %v17214_v32 = vcombine.low %v8160_v28, %v8164_v30 }
 0x823   :  { %14244 = vmatpush1.bf16.msra.mxu1 %v17140_v33  ;;  %v17215_v33 = vcombine.high %v8160_v28, %v8164_v30 }
 0x824   :  { %14245 = vmatprep.subr.bf16.mxu1 %v17149_v37  ;;  %v8168_v37 = vld [vmem:[#allocation16 + $0x3c8] sm:$0xff] }
 0x825   :  { %14596 = vmatpush1.bf16.msra.mxu0 %v17174_v41  ;;  %v17220_v41 = vcombine.low %v8167_v34, %v8171_v35 }
 0x826   :  { %14597 = vmatprep.subr.bf16.mxu0 %v17183_v11  ;;  %v17222_v11 = vcombine.low %v8168_v37, %v8172_v39 }
 0x827   :  { %14246 = vmatpush1.bf16.msra.mxu1 %v17148_v42  ;;  %v17223_v42 = vcombine.high %v8168_v37, %v8172_v39  ;;  %v21013_v39 = vld [vmem:[#allocation16 + $0x4a0] sm:$0xff] }
 0x828   :  { %14247 = vmatprep.subr.bf16.mxu1 %v17157_v50  ;;  %v20941_v50 = vld [vmem:[#allocation16 + $0x408] sm:$0xff] }
 0x829   :  { %14598 = vmatpush1.bf16.msra.mxu0 %v17182_v59  ;;  %v17228_v59 = vcombine.low %v20937_v44, %v20939_v46 }
 0x82a   :  { %14599 = vmatprep.subr.bf16.mxu0 %v17191_v12  ;;  %v17230_v12 = vcombine.low %v20941_v50, %v20945_v58 }
 0x82b   :  { %14248 = vmatpush1.bf16.msra.mxu1 %v17156_v60  ;;  %v17231_v60 = vcombine.high %v20941_v50, %v20945_v58 }
 0x82c   :  { %14249 = vmatprep.subr.bf16.mxu1 %v17165_v63  ;;  %v20957_v63 = vsub.s32 7, %v20445_v47 }
 0x82d   :  { %14600 = vmatpush1.bf16.msra.mxu0 %v17190_v2  ;;  %v7914_v2 = vrot.slane %v7883_v61, %v20954_v62 }
 0x82e   :  { %14601 = vmatprep.subr.bf16.mxu0 %v17199_v3  ;;  %v7894_v3 = vrot.slane %v7883_v61, %v20454_v51 }
 0x82f   :  { %14250 = vmatpush1.bf16.msra.mxu1 %v17164_v4  ;;  %v7918_v4 = vrot.slane %v7883_v61, %v20957_v63 }
 0x830   :  { %14251 = vmatprep.subr.bf16.mxu1 %v17173_v5 }
 0x831   :  { %14602 = vmatpush1.bf16.msra.mxu0 %v17198_v55  ;;  %v20976_v55 = vld [vmem:[#allocation16 + $0x448] sm:$0xff] }
 0x832   :  { %14603 = vmatprep.subr.bf16.mxu0 %v17207_v56  ;;  %v20978_v56 = vld [vmem:[#allocation16 + $0x468] sm:$0xff] }
 0x833   :  { %14252 = vmatpush1.bf16.msra.mxu1 %v17172_v14  ;;  %v20981_v14 = vsub.s32 4, %v20445_v47  ;;  %v17238_v27 = vcombine.low %v20976_v55, %v20978_v56 }
 0x834   :  { %14253 = vmatprep.subr.bf16.mxu1 %v17181_v15 }
 0x835   :  { %14604 = vmatpush1.bf16.msra.mxu0 %v17206_v17  ;;  %v20984_v17 = vrot.slane %v7883_v61, %v20457_v52 }
 0x836   :  { %14605 = vmatprep.subr.bf16.mxu0 %v17215_v33 }
 0x837   :  { %14254 = vmatpush1.bf16.msra.mxu1 %v17180_v18  ;;  %v20988_v18 = vrot.slane %v20960_v0, %v20457_v52 }
 0x838   :  { %14255 = vmatprep.subr.bf16.mxu1 %v17189_v10  ;;  %v20991_v10 = vsub.s32 5, %v20445_v47  ;;  %v17239_v47 = vcombine.high %v20976_v55, %v20978_v56 }
 0x839   :  { %14606 = vmatpush1.bf16.msra.mxu0 %v17214_v32  ;;  %v21006_v32 = vrot.slane %v20960_v0, %v20954_v62 }
 0x83a   :  { %14607 = vmatprep.subr.bf16.mxu0 %v17223_v42  ;;  %v21009_v37 = vrot.slane %v7883_v61, %v20991_v10 }
 0x83b   :  { %14256 = vmatpush1.bf16.msra.mxu1 %v17188_v21 }
 0x83c   :  { %14257 = vmatprep.subr.bf16.mxu1 %v17197_v22 }
 0x83d   :  { %14608 = vmatpush1.bf16.msra.mxu0 %v17222_v11 }
 0x83e   :  { %14620 = vmatprep.subr.bf16.mxu0 %v17231_v60  ;;  %v21015_v60 = vld [vmem:[#allocation16 + $0x488] sm:$0xff] }
 0x83f   :  { %14258 = vmatpush1.bf16.msra.mxu1 %v17196_v13 }
 0x840   :  { %14259 = vmatprep.subr.bf16.mxu1 %v17205_v24 }
 0x843   :  { %14260 = vmatpush1.bf16.msra.mxu1 %v17204_v25 }
 0x844   :  { %14261 = vmatprep.subr.bf16.mxu1 %v17213_v29 }
 0x847   :  { %14262 = vmatpush1.bf16.msra.mxu1 %v17212_v31  ;;  %v21002_v31 = vrot.slane %v7883_v61, %v20981_v14  ;;  %v21023_v61 = vrot.slane %v20960_v0, %v20957_v63 }
 0x848   :  { %14263 = vmatprep.subr.bf16.mxu1 %v17221_v38  ;;  %v21011_v38 = vld [vmem:[#allocation16 + $0x480] sm:$0xff] }
 0x84b   :  { %14264 = vmatpush1.bf16.msra.mxu1 %v17220_v41 }
 0x84c   :  { %14276 = vmatprep.subr.bf16.mxu1 %v17229_v57 }
 0x8c1   :  { %v7573_v5 = vpop.f32.mrb[84].mxu1 }
 0x8c2   :  { %v7967_v15 = vadd.f32 %v7890_v1, %v7573_v5  ;;  %v7702_v9 = vpop.f32.mrb[92].mxu0  ;;  %v7575_v16 = vpop.f32.mrb[85].mxu1 }
 0x8c3   :  { %v7973_v19 = vadd.f32 %v7914_v2, %v7702_v9  ;;  %v7968_v20 = vadd.f32 %v7894_v3, %v7575_v16  ;;  %v7704_v21 = vpop.f32.mrb[93].mxu0  ;;  %v7577_v22 = vpop.f32.mrb[86].mxu1 }
 0x8c4   :  { %v7974_v13 = vadd.f32 %v7918_v4, %v7704_v21  ;;  %v7983_v24 = vadd.f32 %v7890_v1, %v7577_v22  ;;  %v7706_v25 = vpop.f32.mrb[94].mxu0  ;;  %v7579_v26 = vpop.f32.mrb[87].mxu1  ;;  %v7999_v33 = vmax.f32 %v7967_v15, 0.0  ;;  %v21017_v1 = vld [vmem:[#allocation16 + $0x4a8] sm:$0xff]  ;;  %v21027_v15 = vld [vmem:[#allocation16 + $0x4e0] sm:$0xff]  ;;  %v17245_v21 = vcombine.high %v21011_v38, %v21013_v39 }
 0x8c5   :  { %v7989_v28 = vadd.f32 %v7914_v2, %v7706_v25  ;;  %v7984_v29 = vadd.f32 %v7894_v3, %v7579_v26  ;;  %v7708_v30 = vpop.f32.mrb[95].mxu0  ;;  %v8005_v41 = vmax.f32 %v7973_v19, 0.0  ;;  %v8000_v11 = vmax.f32 %v7968_v20, 0.0 }
 0x8c6   :  { %v8015_v34 = vmax.f32 %v7983_v24, 0.0  ;;  %v7990_v35 = vadd.f32 %v7918_v4, %v7708_v30  ;;  %v8006_v2 = vmax.f32 %v7974_v13, 0.0  ;;  %v21025_v4 = vld [vmem:[#allocation16 + $0x4c0] sm:$0xff]  ;;  %v17244_v20 = vcombine.low %v21011_v38, %v21013_v39 }
 0x8c7   :  { %v8021_v42 = vmax.f32 %v7989_v28, 0.0  ;;  %v8016_v57 = vmax.f32 %v7984_v29, 0.0  ;;  %v17246_v26 = vcombine.low %v21015_v60, %v21017_v1  ;;  %v17247_v28 = vcombine.high %v21015_v60, %v21017_v1  ;;  %v8216_v60 = vld [vmem:[#allocation16 + $0x548] sm:$0xff] }
 0x8c8   :  { %v21019_v3 = vpack.c.bf16 %v8015_v34, %v7999_v33  ;;  %v8022_v5 = vmax.f32 %v7990_v35, 0.0  ;;  %v8220_v1 = vld [vmem:[#allocation16 + $0x568] sm:$0xff] }
 0x8c9   :  { %v21029_v9 = vpack.c.bf16 %v8021_v42, %v8005_v41  ;;  %v21031_v16 = vpack.c.bf16 %v8016_v57, %v8000_v11  ;;  %v7616_v19 = vpop.f32.mrb[100].mxu1 }
 0x8ca   :  { %v21037_v22 = vpack.c.bf16 %v8022_v5, %v8006_v2  ;;  %v18579_v13 = vadd.f32 %v7616_v19, %v20895_v36  ;;  %v7788_v24 = vpop.f32.mrb[96].mxu0  ;;  %v7618_v25 = vpop.f32.mrb[101].mxu1  ;;  %v17253_v36 = vcombine.high %v21025_v4, %v21027_v15  ;;  %v21057_v2 = vld [vmem:[#allocation16 + $0x4e8] sm:$0xff] }
 0x8cb   :  { %v7977_v29 = vadd.f32 %v20974_v7, %v7788_v24  ;;  %v18580_v30 = vadd.f32 %v7618_v25, %v20897_v40  ;;  %v7790_v33 = vpop.f32.mrb[97].mxu0  ;;  %v7620_v34 = vpop.f32.mrb[102].mxu1  ;;  %14265 = vmatprep.mubr.bf16.mxu1 %v21031_v16  ;;  %14609 = vmatprep.mubr.bf16.mxu0 %v21031_v16  ;;  %v21055_v40 = vld [vmem:[#allocation16 + $0x4c8] sm:$0xff] }
 0x8cc   :  { %v7969_v35 = vadd.f32 %v18579_v13, %v20970_v6  ;;  %v7978_v41 = vadd.f32 %v20988_v18, %v7790_v33  ;;  %v18581_v11 = vadd.f32 %v7620_v34, %v20899_v43  ;;  %v7792_v42 = vpop.f32.mrb[98].mxu0  ;;  %v7622_v57 = vpop.f32.mrb[103].mxu1  ;;  %14266 = vmatmul.mubr.bf16.vlgmr.msra.gmra.mrb[104].mxu1 %v21019_v3  ;;  %14610 = vmatmul.mubr.bf16.vlgmr.msra.gmra.mrb[104].mxu0 %v21019_v3 }
 0x8cd   :  { %v7970_v5 = vadd.f32 %v18580_v30, %v20984_v17  ;;  %v7993_v19 = vadd.f32 %v20974_v7, %v7792_v42  ;;  %v18582_v13 = vadd.f32 %v7622_v57, %v20901_v45  ;;  %v7794_v24 = vpop.f32.mrb[99].mxu0  ;;  %14277 = vmatpush1.bf16.msra.mxu1 %v17228_v59  ;;  %14621 = vmatpush1.bf16.msra.mxu0 %v17230_v12  ;;  %v8009_v7 = vmax.f32 %v7977_v29, 0.0  ;;  %v21090_v29 = vld [vmem:[#allocation16 + $0x520] sm:$0xff]  ;;  %v8208_v57 = vld [vmem:[#allocation16 + $0x508] sm:$0xff] }
 0x8ce   :  { %v7985_v43 = vadd.f32 %v18581_v11, %v20970_v6  ;;  %v7994_v25 = vadd.f32 %v20988_v18, %v7794_v24  ;;  %14278 = vmatprep.subr.bf16.mxu1 %v17237_v8  ;;  %14622 = vmatprep.subr.bf16.mxu0 %v17239_v47  ;;  %v17252_v45 = vcombine.low %v21025_v4, %v21027_v15  ;;  %v8001_v50 = vmax.f32 %v7969_v35, 0.0  ;;  %v21088_v47 = vld [vmem:[#allocation16 + $0x500] sm:$0xff]  ;;  %v8228_v4 = vld [vmem:[#allocation16 + $0x5a8] sm:$0xff] }
 0x8cf   :  { %v8025_v30 = vmax.f32 %v7993_v19, 0.0  ;;  %v7986_v44 = vadd.f32 %v18582_v13, %v20984_v17  ;;  %v17254_v46 = vcombine.low %v21055_v40, %v21057_v2  ;;  %v8010_v58 = vmax.f32 %v7978_v41, 0.0 }
 0x8d0   :  { %v8017_v59 = vmax.f32 %v7985_v43, 0.0  ;;  %v8026_v12 = vmax.f32 %v7994_v25, 0.0  ;;  %v8002_v6 = vmax.f32 %v7970_v5, 0.0  ;;  %v17255_v8 = vcombine.high %v21055_v40, %v21057_v2  ;;  %v8212_v5 = vld [vmem:[#allocation16 + $0x528] sm:$0xff] }
 0x8d1   :  { %v21078_v18 = vpack.c.bf16 %v8025_v30, %v8009_v7  ;;  %v8018_v33 = vmax.f32 %v7986_v44, 0.0  ;;  %14279 = vmatpush1.bf16.msra.mxu1 %v17236_v23  ;;  %14623 = vmatpush1.bf16.msra.mxu0 %v17238_v27  ;;  %v7659_v17 = vpop.f32.mrb[88].mxu1  ;;  %v7922_v42 = vrot.slane %v20960_v0, %v20448_v48  ;;  %v17261_v43 = vcombine.high %v21088_v47, %v21090_v29 }
 0x8d2   :  { %v21092_v34 = vpack.c.bf16 %v8017_v59, %v8001_v50  ;;  %v21094_v35 = vpack.c.bf16 %v8026_v12, %v8010_v58  ;;  %v7971_v41 = vadd.f32 %v21002_v31, %v7659_v17  ;;  %v7874_v53 = vpop.f32.mrb[100].mxu0  ;;  %v7661_v54 = vpop.f32.mrb[89].mxu1  ;;  %14280 = vmatprep.subr.bf16.mxu1 %v17245_v21  ;;  %14624 = vmatprep.subr.bf16.mxu0 %v17247_v28  ;;  %v8219_v59 = vld [vmem:[#allocation16 + $0x560] sm:$0xff] }
 0x8d3   :  { %v21097_v55 = vpack.c.bf16 %v8018_v33, %v8002_v6  ;;  %v7981_v56 = vadd.f32 %v21006_v32, %v7874_v53  ;;  %v7972_v23 = vadd.f32 %v21009_v37, %v7661_v54  ;;  %v7876_v27 = vpop.f32.mrb[101].mxu0  ;;  %v7663_v11 = vpop.f32.mrb[90].mxu1  ;;  %v7926_v28 = vrot.slane %v20960_v0, %v20454_v51 }
 0x8d4   :  { %v7982_v19 = vadd.f32 %v21023_v61, %v7876_v27  ;;  %v7987_v13 = vadd.f32 %v21002_v31, %v7663_v11  ;;  %v7878_v24 = vpop.f32.mrb[102].mxu0  ;;  %v7665_v21 = vpop.f32.mrb[91].mxu1  ;;  %v17260_v31 = vcombine.low %v21088_v47, %v21090_v29  ;;  %v8003_v44 = vmax.f32 %v7971_v41, 0.0  ;;  %v8227_v11 = vld [vmem:[#allocation16 + $0x5a0] sm:$0xff] }
 0x8d5   :  { %v7997_v25 = vadd.f32 %v21006_v32, %v7878_v24  ;;  %v7988_v7 = vadd.f32 %v21009_v37, %v7665_v21  ;;  %v7880_v30 = vpop.f32.mrb[103].mxu0  ;;  %14281 = vmatpush1.bf16.msra.mxu1 %v17244_v20  ;;  %14625 = vmatpush1.bf16.msra.mxu0 %v17246_v26  ;;  %v17263_v32 = vcombine.high %v8208_v57, %v8212_v5  ;;  %v8215_v37 = vld [vmem:[#allocation16 + $0x540] sm:$0xff]  ;;  %v8013_v38 = vmax.f32 %v7981_v56, 0.0 }
 0x8d6   :  { %v8019_v50 = vmax.f32 %v7987_v13, 0.0  ;;  %v7998_v58 = vadd.f32 %v21023_v61, %v7880_v30  ;;  %14308 = vmatprep.mubr.bf16.mxu1 %v21097_v55  ;;  %14652 = vmatprep.mubr.bf16.mxu0 %v21097_v55  ;;  %v8004_v39 = vmax.f32 %v7972_v23, 0.0  ;;  %v8014_v26 = vmax.f32 %v7982_v19, 0.0  ;;  %v8223_v56 = vld [vmem:[#allocation16 + $0x580] sm:$0xff] }
 0x8d7   :  { %v8029_v20 = vmax.f32 %v7997_v25, 0.0  ;;  %v8020_v12 = vmax.f32 %v7988_v7, 0.0  ;;  %14282 = vmatprep.subr.bf16.mxu1 %v17253_v36  ;;  %14626 = vmatprep.subr.bf16.mxu0 %v17255_v8  ;;  %v17262_v33 = vcombine.low %v8208_v57, %v8212_v5  ;;  %v17269_v8 = vcombine.high %v8215_v37, %v8219_v59  ;;  %v8224_v57 = vld [vmem:[#allocation16 + $0x588] sm:$0xff]  ;;  %v8235_v30 = vld [vmem:[#allocation16 + $0x5e0] sm:$0xff] }
 0x8d8   :  { %v21125_v61 = vpack.c.bf16 %v8019_v50, %v8003_v44  ;;  %v8030_v6 = vmax.f32 %v7998_v58, 0.0  ;;  %v17271_v54 = vcombine.high %v8216_v60, %v8220_v1  ;;  %v17268_v5 = vcombine.low %v8215_v37, %v8219_v59 }
 0x8d9   :  { %v21127_v17 = vpack.c.bf16 %v8029_v20, %v8013_v38  ;;  %v21129_v47 = vpack.c.bf16 %v8020_v12, %v8004_v39  ;;  %14283 = vmatpush1.bf16.msra.mxu1 %v17252_v45  ;;  %14627 = vmatpush1.bf16.msra.mxu0 %v17254_v46  ;;  %v7745_v36 = vpop.f32.mrb[92].mxu1  ;;  %v17270_v2 = vcombine.low %v8216_v60, %v8220_v1  ;;  %v8239_v12 = vld [vmem:[#allocation16 + $0x600] sm:$0xff] }
 0x8da   :  { %v21137_v29 = vpack.c.bf16 %v8030_v6, %v8014_v26  ;;  %v7975_v41 = vadd.f32 %v7922_v42, %v7745_v36  ;;  %v7747_v53 = vpop.f32.mrb[93].mxu1  ;;  %14284 = vmatprep.subr.bf16.mxu1 %v17261_v43  ;;  %14628 = vmatprep.subr.bf16.mxu0 %v17263_v32  ;;  %v7938_v46 = vrot.slane %v20960_v0, %v20981_v14  ;;  %v8231_v43 = vld [vmem:[#allocation16 + $0x5c0] sm:$0xff]  ;;  %v8240_v26 = vld [vmem:[#allocation16 + $0x608] sm:$0xff] }
 0x8db   :  { %v7976_v23 = vadd.f32 %v7926_v28, %v7747_v53  ;;  %v7749_v27 = vpop.f32.mrb[94].mxu1  ;;  %v17277_v24 = vcombine.high %v8223_v56, %v8227_v11  ;;  %v17279_v21 = vcombine.high %v8224_v57, %v8228_v4  ;;  %v17276_v32 = vcombine.low %v8223_v56, %v8227_v11  ;;  %v8243_v1 = vld [vmem:[#allocation16 + $0x620] sm:$0xff]  ;;  %v8244_v6 = vld [vmem:[#allocation16 + $0x628] sm:$0xff] }
 0x8dc   :  { %v7991_v15 = vadd.f32 %v7922_v42, %v7749_v27  ;;  %v7751_v45 = vpop.f32.mrb[95].mxu1  ;;  %v8007_v19 = vmax.f32 %v7975_v41, 0.0  ;;  %v7942_v42 = vrot.slane %v20960_v0, %v20991_v10  ;;  %v17278_v37 = vcombine.low %v8224_v57, %v8228_v4  ;;  %v8247_v11 = vld [vmem:[#allocation16 + $0x640] sm:$0xff] }
 0x8dd   :  { %v7992_v40 = vadd.f32 %v7926_v28, %v7751_v45  ;;  %14285 = vmatpush1.bf16.msra.mxu1 %v17260_v31  ;;  %14629 = vmatpush1.bf16.msra.mxu0 %v17262_v33  ;;  %v8008_v25 = vmax.f32 %v7976_v23, 0.0  ;;  %v8232_v28 = vld [vmem:[#allocation16 + $0x5c8] sm:$0xff]  ;;  %v17285_v39 = vcombine.high %v8231_v43, %v8235_v30  ;;  %v17284_v41 = vcombine.low %v8231_v43, %v8235_v30  ;;  %v8259_v43 = vld [vmem:[#allocation16 + $0x6a0] sm:$0xff] }
 0x8de   :  { %v8023_v13 = vmax.f32 %v7991_v15, 0.0  ;;  %14286 = vmatprep.subr.bf16.mxu1 %v17269_v8  ;;  %14630 = vmatprep.subr.bf16.mxu0 %v17271_v54  ;;  %v8236_v31 = vld [vmem:[#allocation16 + $0x5e8] sm:$0xff]  ;;  %v17293_v23 = vcombine.high %v8239_v12, %v8243_v1  ;;  %v17295_v27 = vcombine.high %v8240_v26, %v8244_v6  ;;  %v8251_v15 = vld [vmem:[#allocation16 + $0x660] sm:$0xff] }
 0x8df   :  { %v8024_v7 = vmax.f32 %v7992_v40, 0.0  ;;  %v17287_v20 = vcombine.high %v8232_v28, %v8236_v31  ;;  %v17286_v53 = vcombine.low %v8232_v28, %v8236_v31  ;;  %v8248_v45 = vld [vmem:[#allocation16 + $0x648] sm:$0xff] }
 0x8e0   :  { %v21143_v44 = vpack.c.bf16 %v8023_v13, %v8007_v19  ;;  %v17294_v19 = vcombine.low %v8240_v26, %v8244_v6  ;;  %v17301_v13 = vcombine.high %v8247_v11, %v8251_v15  ;;  %v8276_v26 = vld [vmem:[#allocation16 + $0x728] sm:$0xff] }
 0x8e1   :  { %v21145_v50 = vpack.c.bf16 %v8024_v7, %v8008_v25  ;;  %14287 = vmatpush1.bf16.msra.mxu1 %v17268_v5  ;;  %14631 = vmatpush1.bf16.msra.mxu0 %v17270_v2  ;;  %v7831_v58 = vpop.f32.mrb[96].mxu1  ;;  %v8252_v5 = vld [vmem:[#allocation16 + $0x668] sm:$0xff] }
 0x8e2   :  { %v7979_v59 = vadd.f32 %v7938_v46, %v7831_v58  ;;  %v7833_v38 = vpop.f32.mrb[97].mxu1  ;;  %14288 = vmatprep.subr.bf16.mxu1 %v17277_v24  ;;  %14632 = vmatprep.subr.bf16.mxu0 %v17279_v21  ;;  %v17303_v24 = vcombine.high %v8248_v45, %v8252_v5  ;;  %v8255_v21 = vld [vmem:[#allocation16 + $0x680] sm:$0xff]  ;;  %v8256_v25 = vld [vmem:[#allocation16 + $0x688] sm:$0xff]  ;;  %v17302_v30 = vcombine.low %v8248_v45, %v8252_v5 }
 0x8e3   :  { %v7980_v0 = vadd.f32 %v7942_v42, %v7833_v38  ;;  %v7835_v60 = vpop.f32.mrb[98].mxu1  ;;  %v8260_v7 = vld [vmem:[#allocation16 + $0x6a8] sm:$0xff]  ;;  %v17309_v28 = vcombine.high %v8255_v21, %v8259_v43  ;;  %v8263_v58 = vld [vmem:[#allocation16 + $0x6c0] sm:$0xff]  ;;  %v17308_v38 = vcombine.low %v8255_v21, %v8259_v43 }
 0x8e4   :  { %v7995_v33 = vadd.f32 %v7938_v46, %v7835_v60  ;;  %v7837_v36 = vpop.f32.mrb[99].mxu1  ;;  %v8011_v54 = vmax.f32 %v7979_v59, 0.0  ;;  %v17292_v46 = vcombine.low %v8239_v12, %v8243_v1  ;;  %v17311_v31 = vcombine.high %v8256_v25, %v8260_v7  ;;  %v8268_v59 = vld [vmem:[#allocation16 + $0x6e8] sm:$0xff]  ;;  %v8275_v60 = vld [vmem:[#allocation16 + $0x720] sm:$0xff] }
 0x8e5   :  { %v7996_v8 = vadd.f32 %v7942_v42, %v7837_v36  ;;  %14289 = vmatpush1.bf16.msra.mxu1 %v17276_v32  ;;  %14633 = vmatpush1.bf16.msra.mxu0 %v17278_v37  ;;  %v8012_v57 = vmax.f32 %v7980_v0, 0.0  ;;  %v17300_v42 = vcombine.low %v8247_v11, %v8251_v15  ;;  %v8267_v32 = vld [vmem:[#allocation16 + $0x6e0] sm:$0xff]  ;;  %v8264_v37 = vld [vmem:[#allocation16 + $0x6c8] sm:$0xff] }
 0x8e6   :  { %v8027_v56 = vmax.f32 %v7995_v33, 0.0  ;;  %14290 = vmatprep.subr.bf16.mxu1 %v17285_v39  ;;  %14634 = vmatprep.subr.bf16.mxu0 %v17287_v20  ;;  %v17310_v39 = vcombine.low %v8256_v25, %v8260_v7  ;;  %v17317_v20 = vcombine.high %v8263_v58, %v8267_v32  ;;  %v17319_v12 = vcombine.high %v8264_v37, %v8268_v59  ;;  %v8271_v0 = vld [vmem:[#allocation16 + $0x700] sm:$0xff]  ;;  %v8272_v1 = vld [vmem:[#allocation16 + $0x708] sm:$0xff] }
 0x8e7   :  { %v8028_v4 = vmax.f32 %v7996_v8, 0.0  ;;  %v17316_v6 = vcombine.low %v8263_v58, %v8267_v32  ;;  %v17318_v33 = vcombine.low %v8264_v37, %v8268_v59  ;;  %v17325_v36 = vcombine.high %v8271_v0, %v8275_v60  ;;  %v8291_v15 = vld [vmem:[#allocation16 + $0x7a0] sm:$0xff]  ;;  %v8288_v45 = vld [vmem:[#allocation16 + $0x788] sm:$0xff] }
 0x8e8   :  { %v21147_v40 = vpack.c.bf16 %v8027_v56, %v8011_v54  ;;  %v17327_v8 = vcombine.high %v8272_v1, %v8276_v26  ;;  %v8280_v54 = vld [vmem:[#allocation16 + $0x748] sm:$0xff]  ;;  %v8295_v21 = vld [vmem:[#allocation16 + $0x7c0] sm:$0xff] }
 0x8e9   :  { %v21149_v2 = vpack.c.bf16 %v8028_v4, %v8012_v57  ;;  %14291 = vmatpush1.bf16.msra.mxu1 %v17284_v41  ;;  %14635 = vmatpush1.bf16.msra.mxu0 %v17286_v53  ;;  %v8279_v41 = vld [vmem:[#allocation16 + $0x740] sm:$0xff]  ;;  %v8284_v56 = vld [vmem:[#allocation16 + $0x768] sm:$0xff] }
 0x8ea   :  { %14292 = vmatprep.subr.bf16.mxu1 %v17293_v23  ;;  %14636 = vmatprep.subr.bf16.mxu0 %v17295_v27  ;;  %v8283_v53 = vld [vmem:[#allocation16 + $0x760] sm:$0xff]  ;;  %v17324_v23 = vcombine.low %v8271_v0, %v8275_v60  ;;  %v17326_v27 = vcombine.low %v8272_v1, %v8276_v26  ;;  %v17335_v57 = vcombine.high %v8280_v54, %v8284_v56  ;;  %v8292_v5 = vld [vmem:[#allocation16 + $0x7a8] sm:$0xff] }
 0x8eb   :  { %v17333_v11 = vcombine.high %v8279_v41, %v8283_v53  ;;  %v8287_v4 = vld [vmem:[#allocation16 + $0x780] sm:$0xff]  ;;  %v8296_v25 = vld [vmem:[#allocation16 + $0x7c8] sm:$0xff] }
 0x8ec   :  { %v8299_v43 = vld [vmem:[#allocation16 + $0x7e0] sm:$0xff]  ;;  %v8300_v7 = vld [vmem:[#allocation16 + $0x7e8] sm:$0xff] }
 0x8ed   :  { %14293 = vmatpush1.bf16.msra.mxu1 %v17292_v46  ;;  %14637 = vmatpush1.bf16.msra.mxu0 %v17294_v19  ;;  %v17332_v46 = vcombine.low %v8279_v41, %v8283_v53  ;;  %v17334_v19 = vcombine.low %v8280_v54, %v8284_v56  ;;  %v8303_v58 = vld [vmem:[#allocation16 + $0x800] sm:$0xff]  ;;  %v8304_v37 = vld [vmem:[#allocation16 + $0x808] sm:$0xff] }
 0x8ee   :  { %14294 = vmatprep.subr.bf16.mxu1 %v17301_v13  ;;  %14638 = vmatprep.subr.bf16.mxu0 %v17303_v24  ;;  %v17341_v13 = vcombine.high %v8287_v4, %v8291_v15  ;;  %v17343_v24 = vcombine.high %v8288_v45, %v8292_v5  ;;  %v8307_v32 = vld [vmem:[#allocation16 + $0x820] sm:$0xff]  ;;  %v8308_v59 = vld [vmem:[#allocation16 + $0x828] sm:$0xff] }
 0x8ef   :  { %v8311_v0 = vld [vmem:[#allocation16 + $0x840] sm:$0xff]  ;;  %v8312_v1 = vld [vmem:[#allocation16 + $0x848] sm:$0xff] }
 0x8f0   :  { %v8315_v60 = vld [vmem:[#allocation16 + $0x860] sm:$0xff]  ;;  %v8316_v26 = vld [vmem:[#allocation16 + $0x868] sm:$0xff] }
 0x8f1   :  { %14295 = vmatpush1.bf16.msra.mxu1 %v17300_v42  ;;  %14639 = vmatpush1.bf16.msra.mxu0 %v17302_v30  ;;  %v17340_v42 = vcombine.low %v8287_v4, %v8291_v15  ;;  %v17342_v30 = vcombine.low %v8288_v45, %v8292_v5  ;;  %v8319_v41 = vld [vmem:[#allocation16 + $0x880] sm:$0xff]  ;;  %v8320_v54 = vld [vmem:[#allocation16 + $0x888] sm:$0xff] }
 0x8f2   :  { %14296 = vmatprep.subr.bf16.mxu1 %v17309_v28  ;;  %14640 = vmatprep.subr.bf16.mxu0 %v17311_v31  ;;  %v17349_v28 = vcombine.high %v8295_v21, %v8299_v43  ;;  %v17351_v31 = vcombine.high %v8296_v25, %v8300_v7  ;;  %v8323_v53 = vld [vmem:[#allocation16 + $0x8a0] sm:$0xff]  ;;  %v8324_v56 = vld [vmem:[#allocation16 + $0x8a8] sm:$0xff] }
 0x8f3   :  { %v8327_v4 = vld [vmem:[#allocation16 + $0x8c0] sm:$0xff]  ;;  %v8328_v45 = vld [vmem:[#allocation16 + $0x8c8] sm:$0xff] }
 0x8f4   :  { %v8331_v15 = vld [vmem:[#allocation16 + $0x8e0] sm:$0xff]  ;;  %v8332_v5 = vld [vmem:[#allocation16 + $0x8e8] sm:$0xff] }
 0x8f5   :  { %14297 = vmatpush1.bf16.msra.mxu1 %v17308_v38  ;;  %14641 = vmatpush1.bf16.msra.mxu0 %v17310_v39  ;;  %v17348_v38 = vcombine.low %v8295_v21, %v8299_v43  ;;  %v17350_v39 = vcombine.low %v8296_v25, %v8300_v7  ;;  %v8335_v21 = vld [vmem:[#allocation16 + $0x900] sm:$0xff]  ;;  %v8336_v25 = vld [vmem:[#allocation16 + $0x908] sm:$0xff] }
 0x8f6   :  { %14298 = vmatprep.subr.bf16.mxu1 %v17317_v20  ;;  %14642 = vmatprep.subr.bf16.mxu0 %v17319_v12  ;;  %v17357_v20 = vcombine.high %v8303_v58, %v8307_v32  ;;  %v17359_v12 = vcombine.high %v8304_v37, %v8308_v59  ;;  %v8339_v43 = vld [vmem:[#allocation16 + $0x920] sm:$0xff]  ;;  %v8340_v7 = vld [vmem:[#allocation16 + $0x928] sm:$0xff] }
 0x8f9   :  { %14299 = vmatpush1.bf16.msra.mxu1 %v17316_v6  ;;  %14643 = vmatpush1.bf16.msra.mxu0 %v17318_v33  ;;  %v17356_v6 = vcombine.low %v8303_v58, %v8307_v32  ;;  %v17358_v33 = vcombine.low %v8304_v37, %v8308_v59  ;;  %v8343_v58 = vld [vmem:[#allocation16 + $0x940] sm:$0xff]  ;;  %v8344_v37 = vld [vmem:[#allocation16 + $0x948] sm:$0xff] }
 0x8fa   :  { %14300 = vmatprep.subr.bf16.mxu1 %v17325_v36  ;;  %14644 = vmatprep.subr.bf16.mxu0 %v17327_v8  ;;  %v17365_v36 = vcombine.high %v8311_v0, %v8315_v60  ;;  %v17367_v8 = vcombine.high %v8312_v1, %v8316_v26  ;;  %v8347_v32 = vld [vmem:[#allocation16 + $0x960] sm:$0xff]  ;;  %v8348_v59 = vld [vmem:[#allocation16 + $0x968] sm:$0xff] }
 0x8fd   :  { %14301 = vmatpush1.bf16.msra.mxu1 %v17324_v23  ;;  %14645 = vmatpush1.bf16.msra.mxu0 %v17326_v27  ;;  %v17364_v23 = vcombine.low %v8311_v0, %v8315_v60  ;;  %v17366_v27 = vcombine.low %v8312_v1, %v8316_v26  ;;  %v8351_v0 = vld [vmem:[#allocation16 + $0x980] sm:$0xff]  ;;  %v8352_v1 = vld [vmem:[#allocation16 + $0x988] sm:$0xff] }
 0x8fe   :  { %14302 = vmatprep.subr.bf16.mxu1 %v17333_v11  ;;  %14646 = vmatprep.subr.bf16.mxu0 %v17335_v57  ;;  %v17373_v11 = vcombine.high %v8319_v41, %v8323_v53  ;;  %v17375_v57 = vcombine.high %v8320_v54, %v8324_v56  ;;  %v8355_v60 = vld [vmem:[#allocation16 + $0x9a0] sm:$0xff]  ;;  %v8356_v26 = vld [vmem:[#allocation16 + $0x9a8] sm:$0xff] }
 0x901   :  { %14303 = vmatpush1.bf16.msra.mxu1 %v17332_v46  ;;  %14647 = vmatpush1.bf16.msra.mxu0 %v17334_v19  ;;  %v17372_v46 = vcombine.low %v8319_v41, %v8323_v53  ;;  %v17374_v19 = vcombine.low %v8320_v54, %v8324_v56  ;;  %v8359_v41 = vld [vmem:[#allocation16 + $0x9c0] sm:$0xff]  ;;  %v8360_v54 = vld [vmem:[#allocation16 + $0x9c8] sm:$0xff] }
 0x902   :  { %14304 = vmatprep.subr.bf16.mxu1 %v17341_v13  ;;  %14648 = vmatprep.subr.bf16.mxu0 %v17343_v24  ;;  %v17381_v13 = vcombine.high %v8327_v4, %v8331_v15  ;;  %v17383_v24 = vcombine.high %v8328_v45, %v8332_v5  ;;  %v8363_v53 = vld [vmem:[#allocation16 + $0x9e0] sm:$0xff]  ;;  %v8364_v56 = vld [vmem:[#allocation16 + $0x9e8] sm:$0xff] }
 0x905   :  { %14305 = vmatpush1.bf16.msra.mxu1 %v17340_v42  ;;  %14649 = vmatpush1.bf16.msra.mxu0 %v17342_v30  ;;  %v17380_v42 = vcombine.low %v8327_v4, %v8331_v15  ;;  %v17382_v30 = vcombine.low %v8328_v45, %v8332_v5  ;;  %v8367_v4 = vld [vmem:[#allocation16 + $0xa00] sm:$0xff]  ;;  %v8368_v45 = vld [vmem:[#allocation16 + $0xa08] sm:$0xff] }
 0x906   :  { %14306 = vmatprep.subr.bf16.mxu1 %v17349_v28  ;;  %14650 = vmatprep.subr.bf16.mxu0 %v17351_v31  ;;  %v17389_v28 = vcombine.high %v8335_v21, %v8339_v43  ;;  %v17391_v31 = vcombine.high %v8336_v25, %v8340_v7  ;;  %v8371_v15 = vld [vmem:[#allocation16 + $0xa20] sm:$0xff]  ;;  %v8372_v5 = vld [vmem:[#allocation16 + $0xa28] sm:$0xff] }
 0x909   :  { %14307 = vmatpush1.bf16.msra.mxu1 %v17348_v38  ;;  %14651 = vmatpush1.bf16.msra.mxu0 %v17350_v39  ;;  %v17388_v38 = vcombine.low %v8335_v21, %v8339_v43  ;;  %v17390_v39 = vcombine.low %v8336_v25, %v8340_v7  ;;  %v8375_v21 = vld [vmem:[#allocation16 + $0xa40] sm:$0xff]  ;;  %v8376_v25 = vld [vmem:[#allocation16 + $0xa48] sm:$0xff] }
 0x90a   :  { %14319 = vmatprep.subr.bf16.mxu1 %v17357_v20  ;;  %14663 = vmatprep.subr.bf16.mxu0 %v17359_v12  ;;  %v17397_v20 = vcombine.high %v8343_v58, %v8347_v32  ;;  %v17399_v12 = vcombine.high %v8344_v37, %v8348_v59  ;;  %v8379_v43 = vld [vmem:[#allocation16 + $0xa60] sm:$0xff]  ;;  %v8380_v7 = vld [vmem:[#allocation16 + $0xa68] sm:$0xff] }
 0x90c   :  { %14309 = vmatmul.mubr.bf16.vlgmr.msra.gmra.mrb[104].mxu1 %v21092_v34  ;;  %14653 = vmatmul.mubr.bf16.vlgmr.msra.gmra.mrb[104].mxu0 %v21092_v34 }
 0x90d   :  { %14320 = vmatpush1.bf16.msra.mxu1 %v17356_v6  ;;  %14351 = vmatprep.mubr.bf16.mxu1 %v21129_v47  ;;  %v17396_v6 = vcombine.low %v8343_v58, %v8347_v32  ;;  %v8383_v58 = vld [vmem:[#allocation16 + $0xa80] sm:$0xff] }
 0x90e   :  { %14664 = vmatpush1.bf16.msra.mxu0 %v17358_v33  ;;  %14695 = vmatprep.mubr.bf16.mxu0 %v21129_v47  ;;  %v17398_v33 = vcombine.low %v8344_v37, %v8348_v59  ;;  %v8387_v32 = vld [vmem:[#allocation16 + $0xaa0] sm:$0xff]  ;;  %v8384_v37 = vld [vmem:[#allocation16 + $0xa88] sm:$0xff] }
 0x90f   :  { %14321 = vmatprep.subr.bf16.mxu1 %v17365_v36  ;;  %14665 = vmatprep.subr.bf16.mxu0 %v17367_v8  ;;  %v17405_v36 = vcombine.high %v8351_v0, %v8355_v60  ;;  %v17407_v8 = vcombine.high %v8352_v1, %v8356_v26  ;;  %v8388_v59 = vld [vmem:[#allocation16 + $0xaa8] sm:$0xff] }
 0x911   :  { %14322 = vmatpush1.bf16.msra.mxu1 %v17364_v23  ;;  %v17404_v23 = vcombine.low %v8351_v0, %v8355_v60  ;;  %v8391_v0 = vld [vmem:[#allocation16 + $0xac0] sm:$0xff] }
 0x912   :  { %14666 = vmatpush1.bf16.msra.mxu0 %v17366_v27  ;;  %14323 = vmatprep.subr.bf16.mxu1 %v17373_v11  ;;  %v17406_v27 = vcombine.low %v8352_v1, %v8356_v26  ;;  %v17413_v11 = vcombine.high %v8359_v41, %v8363_v53  ;;  %v8395_v60 = vld [vmem:[#allocation16 + $0xae0] sm:$0xff]  ;;  %v8392_v1 = vld [vmem:[#allocation16 + $0xac8] sm:$0xff] }
 0x913   :  { %14667 = vmatprep.subr.bf16.mxu0 %v17375_v57  ;;  %v17415_v57 = vcombine.high %v8360_v54, %v8364_v56  ;;  %v8396_v26 = vld [vmem:[#allocation16 + $0xae8] sm:$0xff] }
 0x915   :  { %14324 = vmatpush1.bf16.msra.mxu1 %v17372_v46  ;;  %v17412_v46 = vcombine.low %v8359_v41, %v8363_v53  ;;  %v8399_v41 = vld [vmem:[#allocation16 + $0xb00] sm:$0xff] }
 0x916   :  { %14668 = vmatpush1.bf16.msra.mxu0 %v17374_v19  ;;  %14325 = vmatprep.subr.bf16.mxu1 %v17381_v13  ;;  %v17414_v19 = vcombine.low %v8360_v54, %v8364_v56  ;;  %v17421_v13 = vcombine.high %v8367_v4, %v8371_v15  ;;  %v8403_v53 = vld [vmem:[#allocation16 + $0xb20] sm:$0xff]  ;;  %v8400_v54 = vld [vmem:[#allocation16 + $0xb08] sm:$0xff] }
 0x917   :  { %14669 = vmatprep.subr.bf16.mxu0 %v17383_v24  ;;  %v17423_v24 = vcombine.high %v8368_v45, %v8372_v5  ;;  %v8404_v56 = vld [vmem:[#allocation16 + $0xb28] sm:$0xff] }
 0x919   :  { %14326 = vmatpush1.bf16.msra.mxu1 %v17380_v42  ;;  %v17420_v42 = vcombine.low %v8367_v4, %v8371_v15  ;;  %v8407_v4 = vld [vmem:[#allocation16 + $0xb40] sm:$0xff] }
 0x91a   :  { %14670 = vmatpush1.bf16.msra.mxu0 %v17382_v30  ;;  %14327 = vmatprep.subr.bf16.mxu1 %v17389_v28  ;;  %v17422_v30 = vcombine.low %v8368_v45, %v8372_v5  ;;  %v17429_v28 = vcombine.high %v8375_v21, %v8379_v43  ;;  %v8411_v15 = vld [vmem:[#allocation16 + $0xb60] sm:$0xff]  ;;  %v8408_v45 = vld [vmem:[#allocation16 + $0xb48] sm:$0xff] }
 0x91b   :  { %14671 = vmatprep.subr.bf16.mxu0 %v17391_v31  ;;  %v17431_v31 = vcombine.high %v8376_v25, %v8380_v7  ;;  %v8412_v5 = vld [vmem:[#allocation16 + $0xb68] sm:$0xff] }
 0x91d   :  { %14328 = vmatpush1.bf16.msra.mxu1 %v17388_v38  ;;  %v17428_v38 = vcombine.low %v8375_v21, %v8379_v43  ;;  %v8415_v21 = vld [vmem:[#allocation16 + $0xb80] sm:$0xff] }
 0x91e   :  { %14672 = vmatpush1.bf16.msra.mxu0 %v17390_v39  ;;  %14329 = vmatprep.subr.bf16.mxu1 %v17397_v20  ;;  %v17430_v39 = vcombine.low %v8376_v25, %v8380_v7  ;;  %v17437_v20 = vcombine.high %v8383_v58, %v8387_v32  ;;  %v8419_v43 = vld [vmem:[#allocation16 + $0xba0] sm:$0xff]  ;;  %v8416_v25 = vld [vmem:[#allocation16 + $0xb88] sm:$0xff] }
 0x91f   :  { %14673 = vmatprep.subr.bf16.mxu0 %v17399_v12  ;;  %v17439_v12 = vcombine.high %v8384_v37, %v8388_v59  ;;  %v8420_v7 = vld [vmem:[#allocation16 + $0xba8] sm:$0xff] }
 0x921   :  { %14330 = vmatpush1.bf16.msra.mxu1 %v17396_v6  ;;  %v17436_v6 = vcombine.low %v8383_v58, %v8387_v32  ;;  %v8423_v58 = vld [vmem:[#allocation16 + $0xbc0] sm:$0xff] }
 0x922   :  { %14674 = vmatpush1.bf16.msra.mxu0 %v17398_v33  ;;  %14331 = vmatprep.subr.bf16.mxu1 %v17405_v36  ;;  %v17438_v33 = vcombine.low %v8384_v37, %v8388_v59  ;;  %v17445_v36 = vcombine.high %v8391_v0, %v8395_v60  ;;  %v8427_v32 = vld [vmem:[#allocation16 + $0xbe0] sm:$0xff]  ;;  %v8424_v37 = vld [vmem:[#allocation16 + $0xbc8] sm:$0xff] }
 0x923   :  { %14675 = vmatprep.subr.bf16.mxu0 %v17407_v8  ;;  %v17447_v8 = vcombine.high %v8392_v1, %v8396_v26  ;;  %v8428_v59 = vld [vmem:[#allocation16 + $0xbe8] sm:$0xff] }
 0x925   :  { %14332 = vmatpush1.bf16.msra.mxu1 %v17404_v23  ;;  %v17444_v23 = vcombine.low %v8391_v0, %v8395_v60  ;;  %v8431_v0 = vld [vmem:[#allocation16 + $0xc00] sm:$0xff] }
 0x926   :  { %14676 = vmatpush1.bf16.msra.mxu0 %v17406_v27  ;;  %14333 = vmatprep.subr.bf16.mxu1 %v17413_v11  ;;  %v17446_v27 = vcombine.low %v8392_v1, %v8396_v26  ;;  %v17453_v11 = vcombine.high %v8399_v41, %v8403_v53  ;;  %v8435_v60 = vld [vmem:[#allocation16 + $0xc20] sm:$0xff]  ;;  %v8432_v1 = vld [vmem:[#allocation16 + $0xc08] sm:$0xff] }
 0x927   :  { %14677 = vmatprep.subr.bf16.mxu0 %v17415_v57  ;;  %v17455_v57 = vcombine.high %v8400_v54, %v8404_v56  ;;  %v8436_v26 = vld [vmem:[#allocation16 + $0xc28] sm:$0xff] }
 0x929   :  { %14334 = vmatpush1.bf16.msra.mxu1 %v17412_v46  ;;  %v17452_v46 = vcombine.low %v8399_v41, %v8403_v53  ;;  %v8439_v41 = vld [vmem:[#allocation16 + $0xc40] sm:$0xff] }
 0x92a   :  { %14678 = vmatpush1.bf16.msra.mxu0 %v17414_v19  ;;  %14335 = vmatprep.subr.bf16.mxu1 %v17421_v13  ;;  %v17454_v19 = vcombine.low %v8400_v54, %v8404_v56  ;;  %v17461_v13 = vcombine.high %v8407_v4, %v8411_v15  ;;  %v8443_v53 = vld [vmem:[#allocation16 + $0xc60] sm:$0xff]  ;;  %v17484_v54 = vcombine.low %v8431_v0, %v8435_v60  ;;  %v8440_v56 = vld [vmem:[#allocation16 + $0xc48] sm:$0xff] }
 0x92b   :  { %14679 = vmatprep.subr.bf16.mxu0 %v17423_v24  ;;  %v17463_v24 = vcombine.high %v8408_v45, %v8412_v5 }
 0x92d   :  { %14336 = vmatpush1.bf16.msra.mxu1 %v17420_v42  ;;  %v17460_v42 = vcombine.low %v8407_v4, %v8411_v15  ;;  %v8451_v4 = vld [vmem:[#allocation16 + $0xca0] sm:$0xff] }
 0x92e   :  { %14680 = vmatpush1.bf16.msra.mxu0 %v17422_v30  ;;  %14337 = vmatprep.subr.bf16.mxu1 %v17429_v28  ;;  %v17462_v30 = vcombine.low %v8408_v45, %v8412_v5  ;;  %v17469_v28 = vcombine.high %v8415_v21, %v8419_v43  ;;  %v8448_v45 = vld [vmem:[#allocation16 + $0xc88] sm:$0xff] }
 0x92f   :  { %14681 = vmatprep.subr.bf16.mxu0 %v17431_v31  ;;  %v17471_v31 = vcombine.high %v8416_v25, %v8420_v7  ;;  %v8452_v5 = vld [vmem:[#allocation16 + $0xca8] sm:$0xff] }
 0x931   :  { %14338 = vmatpush1.bf16.msra.mxu1 %v17428_v38  ;;  %v17468_v38 = vcombine.low %v8415_v21, %v8419_v43  ;;  %v8455_v21 = vld [vmem:[#allocation16 + $0xcc0] sm:$0xff] }
 0x932   :  { %14682 = vmatpush1.bf16.msra.mxu0 %v17430_v39  ;;  %14339 = vmatprep.subr.bf16.mxu1 %v17437_v20  ;;  %v17470_v39 = vcombine.low %v8416_v25, %v8420_v7  ;;  %v17477_v20 = vcombine.high %v8423_v58, %v8427_v32  ;;  %v8459_v43 = vld [vmem:[#allocation16 + $0xce0] sm:$0xff]  ;;  %v8456_v25 = vld [vmem:[#allocation16 + $0xcc8] sm:$0xff] }
 0x933   :  { %14683 = vmatprep.subr.bf16.mxu0 %v17439_v12  ;;  %v17479_v12 = vcombine.high %v8424_v37, %v8428_v59  ;;  %v8460_v7 = vld [vmem:[#allocation16 + $0xce8] sm:$0xff] }
 0x935   :  { %14340 = vmatpush1.bf16.msra.mxu1 %v17436_v6  ;;  %v17476_v6 = vcombine.low %v8423_v58, %v8427_v32  ;;  %v8463_v58 = vld [vmem:[#allocation16 + $0xd00] sm:$0xff] }
 0x936   :  { %14684 = vmatpush1.bf16.msra.mxu0 %v17438_v33  ;;  %14341 = vmatprep.subr.bf16.mxu1 %v17445_v36  ;;  %v17478_v33 = vcombine.low %v8424_v37, %v8428_v59  ;;  %v17485_v36 = vcombine.high %v8431_v0, %v8435_v60  ;;  %v8467_v32 = vld [vmem:[#allocation16 + $0xd20] sm:$0xff]  ;;  %v8464_v37 = vld [vmem:[#allocation16 + $0xd08] sm:$0xff] }
 0x937   :  { %14685 = vmatprep.subr.bf16.mxu0 %v17447_v8  ;;  %v17487_v8 = vcombine.high %v8432_v1, %v8436_v26  ;;  %v8468_v59 = vld [vmem:[#allocation16 + $0xd28] sm:$0xff]  ;;  %v8471_v0 = vld [vmem:[#allocation16 + $0xd40] sm:$0xff] }
 0x938   :  { %v8475_v60 = vld [vmem:[#allocation16 + $0xd60] sm:$0xff] }
 0x939   :  { %14342 = vmatpush1.bf16.msra.mxu1 %v17444_v23  ;;  %v8444_v23 = vld [vmem:[#allocation16 + $0xc68] sm:$0xff] }
 0x93a   :  { %14686 = vmatpush1.bf16.msra.mxu0 %v17446_v27  ;;  %14343 = vmatprep.subr.bf16.mxu1 %v17453_v11  ;;  %v17486_v27 = vcombine.low %v8432_v1, %v8436_v26  ;;  %v17493_v11 = vcombine.high %v8439_v41, %v8443_v53  ;;  %v17495_v15 = vcombine.high %v8440_v56, %v8444_v23  ;;  %v8472_v1 = vld [vmem:[#allocation16 + $0xd48] sm:$0xff] }
 0x93b   :  { %14687 = vmatprep.subr.bf16.mxu0 %v17455_v57  ;;  %v8447_v57 = vld [vmem:[#allocation16 + $0xc80] sm:$0xff]  ;;  %v8476_v26 = vld [vmem:[#allocation16 + $0xd68] sm:$0xff] }
 0x93d   :  { %14344 = vmatpush1.bf16.msra.mxu1 %v17452_v46  ;;  %v17492_v46 = vcombine.low %v8439_v41, %v8443_v53  ;;  %v8479_v41 = vld [vmem:[#allocation16 + $0xd80] sm:$0xff] }
 0x93e   :  { %14688 = vmatpush1.bf16.msra.mxu0 %v17454_v19  ;;  %14345 = vmatprep.subr.bf16.mxu1 %v17461_v13  ;;  %v17494_v19 = vcombine.low %v8440_v56, %v8444_v23  ;;  %v17501_v13 = vcombine.high %v8447_v57, %v8451_v4  ;;  %v8483_v53 = vld [vmem:[#allocation16 + $0xda0] sm:$0xff]  ;;  %v8484_v56 = vld [vmem:[#allocation16 + $0xda8] sm:$0xff]  ;;  %v17524_v23 = vcombine.low %v8471_v0, %v8475_v60 }
 0x93f   :  { %14689 = vmatprep.subr.bf16.mxu0 %v17463_v24  ;;  %v17503_v24 = vcombine.high %v8448_v45, %v8452_v5 }
 0x941   :  { %14346 = vmatpush1.bf16.msra.mxu1 %v17460_v42  ;;  %v17500_v42 = vcombine.low %v8447_v57, %v8451_v4  ;;  %v8487_v4 = vld [vmem:[#allocation16 + $0xdc0] sm:$0xff] }
 0x942   :  { %14690 = vmatpush1.bf16.msra.mxu0 %v17462_v30  ;;  %14347 = vmatprep.subr.bf16.mxu1 %v17469_v28  ;;  %v17502_v30 = vcombine.low %v8448_v45, %v8452_v5  ;;  %v17509_v28 = vcombine.high %v8455_v21, %v8459_v43  ;;  %v8488_v45 = vld [vmem:[#allocation16 + $0xdc8] sm:$0xff] }
 0x943   :  { %14691 = vmatprep.subr.bf16.mxu0 %v17471_v31  ;;  %v17511_v31 = vcombine.high %v8456_v25, %v8460_v7  ;;  %v8492_v5 = vld [vmem:[#allocation16 + $0xde8] sm:$0xff] }
 0x945   :  { %14348 = vmatpush1.bf16.msra.mxu1 %v17468_v38  ;;  %v17508_v38 = vcombine.low %v8455_v21, %v8459_v43  ;;  %v8495_v21 = vld [vmem:[#allocation16 + $0xe00] sm:$0xff] }
 0x946   :  { %14692 = vmatpush1.bf16.msra.mxu0 %v17470_v39  ;;  %14349 = vmatprep.subr.bf16.mxu1 %v17477_v20  ;;  %v17510_v39 = vcombine.low %v8456_v25, %v8460_v7  ;;  %v17517_v20 = vcombine.high %v8463_v58, %v8467_v32  ;;  %v8499_v43 = vld [vmem:[#allocation16 + $0xe20] sm:$0xff]  ;;  %v8496_v25 = vld [vmem:[#allocation16 + $0xe08] sm:$0xff] }
 0x947   :  { %14693 = vmatprep.subr.bf16.mxu0 %v17479_v12  ;;  %v17519_v12 = vcombine.high %v8464_v37, %v8468_v59  ;;  %v8500_v7 = vld [vmem:[#allocation16 + $0xe28] sm:$0xff] }
 0x949   :  { %14350 = vmatpush1.bf16.msra.mxu1 %v17476_v6  ;;  %v17516_v6 = vcombine.low %v8463_v58, %v8467_v32  ;;  %v8503_v58 = vld [vmem:[#allocation16 + $0xe40] sm:$0xff] }
 0x94a   :  { %14694 = vmatpush1.bf16.msra.mxu0 %v17478_v33  ;;  %14362 = vmatprep.subr.bf16.mxu1 %v17485_v36  ;;  %v17518_v33 = vcombine.low %v8464_v37, %v8468_v59  ;;  %v17525_v36 = vcombine.high %v8471_v0, %v8475_v60  ;;  %v8507_v32 = vld [vmem:[#allocation16 + $0xe60] sm:$0xff]  ;;  %v8504_v37 = vld [vmem:[#allocation16 + $0xe48] sm:$0xff] }
 0x94b   :  { %14706 = vmatprep.subr.bf16.mxu0 %v17487_v8  ;;  %v17527_v8 = vcombine.high %v8472_v1, %v8476_v26  ;;  %v8508_v59 = vld [vmem:[#allocation16 + $0xe68] sm:$0xff]  ;;  %v8511_v0 = vld [vmem:[#allocation16 + $0xe80] sm:$0xff] }
 0x94c   :  { %14352 = vmatmul.mubr.bf16.vlgmr.msra.gmra.mrb[104].mxu1 %v21125_v61  ;;  %v8515_v60 = vld [vmem:[#allocation16 + $0xea0] sm:$0xff] }
 0x94d   :  { %14696 = vmatmul.mubr.bf16.vlgmr.msra.gmra.mrb[104].mxu0 %v21125_v61  ;;  %14363 = vmatpush1.bf16.msra.mxu1 %v17484_v54  ;;  %v8480_v54 = vld [vmem:[#allocation16 + $0xd88] sm:$0xff] }
 0x94e   :  { %14394 = vmatprep.mubr.bf16.mxu1 %v21037_v22  ;;  %14707 = vmatpush1.bf16.msra.mxu0 %v17486_v27  ;;  %v17526_v27 = vcombine.low %v8472_v1, %v8476_v26  ;;  %v17535_v57 = vcombine.high %v8480_v54, %v8484_v56  ;;  %v8512_v1 = vld [vmem:[#allocation16 + $0xe88] sm:$0xff] }
 0x94f   :  { %14738 = vmatprep.mubr.bf16.mxu0 %v21037_v22  ;;  %14364 = vmatprep.subr.bf16.mxu1 %v17493_v11  ;;  %v17533_v11 = vcombine.high %v8479_v41, %v8483_v53  ;;  %v8516_v26 = vld [vmem:[#allocation16 + $0xea8] sm:$0xff] }
 0x950   :  { %14708 = vmatprep.subr.bf16.mxu0 %v17495_v15  ;;  %v8491_v15 = vld [vmem:[#allocation16 + $0xde0] sm:$0xff] }
 0x951   :  { %14365 = vmatpush1.bf16.msra.mxu1 %v17492_v46  ;;  %v17532_v46 = vcombine.low %v8479_v41, %v8483_v53  ;;  %v8519_v41 = vld [vmem:[#allocation16 + $0xec0] sm:$0xff] }
 0x952   :  { %14709 = vmatpush1.bf16.msra.mxu0 %v17494_v19  ;;  %14366 = vmatprep.subr.bf16.mxu1 %v17501_v13  ;;  %v17534_v19 = vcombine.low %v8480_v54, %v8484_v56  ;;  %v17541_v13 = vcombine.high %v8487_v4, %v8491_v15  ;;  %v8523_v53 = vld [vmem:[#allocation16 + $0xee0] sm:$0xff]  ;;  %v8520_v54 = vld [vmem:[#allocation16 + $0xec8] sm:$0xff] }
 0x953   :  { %14710 = vmatprep.subr.bf16.mxu0 %v17503_v24  ;;  %v17543_v24 = vcombine.high %v8488_v45, %v8492_v5  ;;  %v8524_v56 = vld [vmem:[#allocation16 + $0xee8] sm:$0xff] }
 0x955   :  { %14367 = vmatpush1.bf16.msra.mxu1 %v17500_v42  ;;  %v17540_v42 = vcombine.low %v8487_v4, %v8491_v15  ;;  %v8527_v4 = vld [vmem:[#allocation16 + $0xf00] sm:$0xff] }
 0x956   :  { %14711 = vmatpush1.bf16.msra.mxu0 %v17502_v30  ;;  %14368 = vmatprep.subr.bf16.mxu1 %v17509_v28  ;;  %v17542_v30 = vcombine.low %v8488_v45, %v8492_v5  ;;  %v17549_v28 = vcombine.high %v8495_v21, %v8499_v43  ;;  %v8531_v15 = vld [vmem:[#allocation16 + $0xf20] sm:$0xff]  ;;  %v8528_v45 = vld [vmem:[#allocation16 + $0xf08] sm:$0xff] }
 0x957   :  { %14712 = vmatprep.subr.bf16.mxu0 %v17511_v31  ;;  %v17551_v31 = vcombine.high %v8496_v25, %v8500_v7  ;;  %v8532_v5 = vld [vmem:[#allocation16 + $0xf28] sm:$0xff] }
 0x959   :  { %14369 = vmatpush1.bf16.msra.mxu1 %v17508_v38  ;;  %v17548_v38 = vcombine.low %v8495_v21, %v8499_v43  ;;  %v8535_v21 = vld [vmem:[#allocation16 + $0xf40] sm:$0xff] }
 0x95a   :  { %14713 = vmatpush1.bf16.msra.mxu0 %v17510_v39  ;;  %14370 = vmatprep.subr.bf16.mxu1 %v17517_v20  ;;  %v17550_v39 = vcombine.low %v8496_v25, %v8500_v7  ;;  %v17557_v20 = vcombine.high %v8503_v58, %v8507_v32  ;;  %v8539_v43 = vld [vmem:[#allocation16 + $0xf60] sm:$0xff]  ;;  %v8536_v25 = vld [vmem:[#allocation16 + $0xf48] sm:$0xff] }
 0x95b   :  { %14714 = vmatprep.subr.bf16.mxu0 %v17519_v12  ;;  %v17559_v12 = vcombine.high %v8504_v37, %v8508_v59  ;;  %v8540_v7 = vld [vmem:[#allocation16 + $0xf68] sm:$0xff] }
 0x95d   :  { %14371 = vmatpush1.bf16.msra.mxu1 %v17516_v6  ;;  %v17556_v6 = vcombine.low %v8503_v58, %v8507_v32  ;;  %v8543_v58 = vld [vmem:[#allocation16 + $0xf80] sm:$0xff] }
 0x95e   :  { %14715 = vmatpush1.bf16.msra.mxu0 %v17518_v33  ;;  %14372 = vmatprep.subr.bf16.mxu1 %v17525_v36  ;;  %v17558_v33 = vcombine.low %v8504_v37, %v8508_v59  ;;  %v17565_v36 = vcombine.high %v8511_v0, %v8515_v60  ;;  %v8547_v32 = vld [vmem:[#allocation16 + $0xfa0] sm:$0xff]  ;;  %v8544_v37 = vld [vmem:[#allocation16 + $0xf88] sm:$0xff] }
 0x95f   :  { %14716 = vmatprep.subr.bf16.mxu0 %v17527_v8  ;;  %v17567_v8 = vcombine.high %v8512_v1, %v8516_v26  ;;  %v8548_v59 = vld [vmem:[#allocation16 + $0xfa8] sm:$0xff] }
 0x961   :  { %14373 = vmatpush1.bf16.msra.mxu1 %v17524_v23  ;;  %v17564_v23 = vcombine.low %v8511_v0, %v8515_v60  ;;  %v8551_v0 = vld [vmem:[#allocation16 + $0xfc0] sm:$0xff] }
 0x962   :  { %14717 = vmatpush1.bf16.msra.mxu0 %v17526_v27  ;;  %14374 = vmatprep.subr.bf16.mxu1 %v17533_v11  ;;  %v17566_v27 = vcombine.low %v8512_v1, %v8516_v26  ;;  %v17573_v11 = vcombine.high %v8519_v41, %v8523_v53  ;;  %v8555_v60 = vld [vmem:[#allocation16 + $0xfe0] sm:$0xff]  ;;  %v8552_v1 = vld [vmem:[#allocation16 + $0xfc8] sm:$0xff] }
 0x963   :  { %14718 = vmatprep.subr.bf16.mxu0 %v17535_v57  ;;  %v17575_v57 = vcombine.high %v8520_v54, %v8524_v56  ;;  %v8556_v26 = vld [vmem:[#allocation16 + $0xfe8] sm:$0xff] }
 0x965   :  { %14375 = vmatpush1.bf16.msra.mxu1 %v17532_v46  ;;  %v17572_v46 = vcombine.low %v8519_v41, %v8523_v53  ;;  %v8559_v41 = vld [vmem:[#allocation16 + $0x1000] sm:$0xff] }
 0x966   :  { %14719 = vmatpush1.bf16.msra.mxu0 %v17534_v19  ;;  %14376 = vmatprep.subr.bf16.mxu1 %v17541_v13  ;;  %v17574_v19 = vcombine.low %v8520_v54, %v8524_v56  ;;  %v17581_v13 = vcombine.high %v8527_v4, %v8531_v15  ;;  %v8563_v53 = vld [vmem:[#allocation16 + $0x1020] sm:$0xff]  ;;  %v8560_v54 = vld [vmem:[#allocation16 + $0x1008] sm:$0xff] }
 0x967   :  { %14720 = vmatprep.subr.bf16.mxu0 %v17543_v24  ;;  %v17583_v24 = vcombine.high %v8528_v45, %v8532_v5  ;;  %v8564_v56 = vld [vmem:[#allocation16 + $0x1028] sm:$0xff] }
 0x969   :  { %14377 = vmatpush1.bf16.msra.mxu1 %v17540_v42  ;;  %v17580_v42 = vcombine.low %v8527_v4, %v8531_v15  ;;  %v8567_v4 = vld [vmem:[#allocation16 + $0x1040] sm:$0xff] }
 0x96a   :  { %14721 = vmatpush1.bf16.msra.mxu0 %v17542_v30  ;;  %14378 = vmatprep.subr.bf16.mxu1 %v17549_v28  ;;  %v17582_v30 = vcombine.low %v8528_v45, %v8532_v5  ;;  %v17589_v28 = vcombine.high %v8535_v21, %v8539_v43  ;;  %v8571_v15 = vld [vmem:[#allocation16 + $0x1060] sm:$0xff]  ;;  %v17612_v45 = vcombine.low %v8559_v41, %v8563_v53  ;;  %v8568_v5 = vld [vmem:[#allocation16 + $0x1048] sm:$0xff] }
 0x96b   :  { %14722 = vmatprep.subr.bf16.mxu0 %v17551_v31  ;;  %v17591_v31 = vcombine.high %v8536_v25, %v8540_v7 }
 0x96d   :  { %14379 = vmatpush1.bf16.msra.mxu1 %v17548_v38  ;;  %v17588_v38 = vcombine.low %v8535_v21, %v8539_v43  ;;  %v8579_v21 = vld [vmem:[#allocation16 + $0x10a0] sm:$0xff] }
 0x96e   :  { %14723 = vmatpush1.bf16.msra.mxu0 %v17550_v39  ;;  %14380 = vmatprep.subr.bf16.mxu1 %v17557_v20  ;;  %v17590_v39 = vcombine.low %v8536_v25, %v8540_v7  ;;  %v17597_v20 = vcombine.high %v8543_v58, %v8547_v32  ;;  %v8576_v25 = vld [vmem:[#allocation16 + $0x1088] sm:$0xff] }
 0x96f   :  { %14724 = vmatprep.subr.bf16.mxu0 %v17559_v12  ;;  %v17599_v12 = vcombine.high %v8544_v37, %v8548_v59  ;;  %v8580_v7 = vld [vmem:[#allocation16 + $0x10a8] sm:$0xff] }
 0x971   :  { %14381 = vmatpush1.bf16.msra.mxu1 %v17556_v6  ;;  %v17596_v6 = vcombine.low %v8543_v58, %v8547_v32  ;;  %v8583_v58 = vld [vmem:[#allocation16 + $0x10c0] sm:$0xff] }
 0x972   :  { %14725 = vmatpush1.bf16.msra.mxu0 %v17558_v33  ;;  %14382 = vmatprep.subr.bf16.mxu1 %v17565_v36  ;;  %v17598_v33 = vcombine.low %v8544_v37, %v8548_v59  ;;  %v17605_v36 = vcombine.high %v8551_v0, %v8555_v60  ;;  %v8587_v32 = vld [vmem:[#allocation16 + $0x10e0] sm:$0xff]  ;;  %v8584_v37 = vld [vmem:[#allocation16 + $0x10c8] sm:$0xff] }
 0x973   :  { %14726 = vmatprep.subr.bf16.mxu0 %v17567_v8  ;;  %v17607_v8 = vcombine.high %v8552_v1, %v8556_v26  ;;  %v8588_v59 = vld [vmem:[#allocation16 + $0x10e8] sm:$0xff] }
 0x975   :  { %14383 = vmatpush1.bf16.msra.mxu1 %v17564_v23  ;;  %v17604_v23 = vcombine.low %v8551_v0, %v8555_v60  ;;  %v8591_v0 = vld [vmem:[#allocation16 + $0x1100] sm:$0xff] }
 0x976   :  { %14727 = vmatpush1.bf16.msra.mxu0 %v17566_v27  ;;  %14384 = vmatprep.subr.bf16.mxu1 %v17573_v11  ;;  %v17606_v27 = vcombine.low %v8552_v1, %v8556_v26  ;;  %v17613_v11 = vcombine.high %v8559_v41, %v8563_v53  ;;  %v8595_v60 = vld [vmem:[#allocation16 + $0x1120] sm:$0xff]  ;;  %v8592_v1 = vld [vmem:[#allocation16 + $0x1108] sm:$0xff] }
 0x977   :  { %14728 = vmatprep.subr.bf16.mxu0 %v17575_v57  ;;  %v17615_v57 = vcombine.high %v8560_v54, %v8564_v56  ;;  %v8596_v26 = vld [vmem:[#allocation16 + $0x1128] sm:$0xff]  ;;  %v8599_v41 = vld [vmem:[#allocation16 + $0x1140] sm:$0xff] }
 0x978   :  { %v8603_v53 = vld [vmem:[#allocation16 + $0x1160] sm:$0xff] }
 0x979   :  { %14385 = vmatpush1.bf16.msra.mxu1 %v17572_v46  ;;  %v8572_v46 = vld [vmem:[#allocation16 + $0x1068] sm:$0xff] }
 0x97a   :  { %14729 = vmatpush1.bf16.msra.mxu0 %v17574_v19  ;;  %14386 = vmatprep.subr.bf16.mxu1 %v17581_v13  ;;  %v17614_v19 = vcombine.low %v8560_v54, %v8564_v56  ;;  %v17621_v13 = vcombine.high %v8567_v4, %v8571_v15  ;;  %v17623_v43 = vcombine.high %v8568_v5, %v8572_v46  ;;  %v8600_v54 = vld [vmem:[#allocation16 + $0x1148] sm:$0xff] }
 0x97b   :  { %14730 = vmatprep.subr.bf16.mxu0 %v17583_v24  ;;  %v8575_v24 = vld [vmem:[#allocation16 + $0x1080] sm:$0xff]  ;;  %v8604_v56 = vld [vmem:[#allocation16 + $0x1168] sm:$0xff] }
 0x97d   :  { %14387 = vmatpush1.bf16.msra.mxu1 %v17580_v42  ;;  %v17620_v42 = vcombine.low %v8567_v4, %v8571_v15  ;;  %v8607_v4 = vld [vmem:[#allocation16 + $0x1180] sm:$0xff] }
 0x97e   :  { %14731 = vmatpush1.bf16.msra.mxu0 %v17582_v30  ;;  %14388 = vmatprep.subr.bf16.mxu1 %v17589_v28  ;;  %v17622_v30 = vcombine.low %v8568_v5, %v8572_v46  ;;  %v17629_v28 = vcombine.high %v8575_v24, %v8579_v21  ;;  %v8611_v15 = vld [vmem:[#allocation16 + $0x11a0] sm:$0xff]  ;;  %v8612_v5 = vld [vmem:[#allocation16 + $0x11a8] sm:$0xff]  ;;  %v17652_v46 = vcombine.low %v8599_v41, %v8603_v53 }
 0x97f   :  { %14732 = vmatprep.subr.bf16.mxu0 %v17591_v31  ;;  %v17631_v31 = vcombine.high %v8576_v25, %v8580_v7 }
 0x981   :  { %14389 = vmatpush1.bf16.msra.mxu1 %v17588_v38  ;;  %v17628_v38 = vcombine.low %v8575_v24, %v8579_v21  ;;  %v8615_v21 = vld [vmem:[#allocation16 + $0x11c0] sm:$0xff] }
 0x982   :  { %14733 = vmatpush1.bf16.msra.mxu0 %v17590_v39  ;;  %14390 = vmatprep.subr.bf16.mxu1 %v17597_v20  ;;  %v17630_v39 = vcombine.low %v8576_v25, %v8580_v7  ;;  %v17637_v20 = vcombine.high %v8583_v58, %v8587_v32  ;;  %v8616_v25 = vld [vmem:[#allocation16 + $0x11c8] sm:$0xff] }
 0x983   :  { %14734 = vmatprep.subr.bf16.mxu0 %v17599_v12  ;;  %v17639_v12 = vcombine.high %v8584_v37, %v8588_v59  ;;  %v8620_v7 = vld [vmem:[#allocation16 + $0x11e8] sm:$0xff] }
 0x985   :  { %14391 = vmatpush1.bf16.msra.mxu1 %v17596_v6  ;;  %v17636_v6 = vcombine.low %v8583_v58, %v8587_v32  ;;  %v8623_v58 = vld [vmem:[#allocation16 + $0x1200] sm:$0xff] }
 0x986   :  { %14735 = vmatpush1.bf16.msra.mxu0 %v17598_v33  ;;  %14392 = vmatprep.subr.bf16.mxu1 %v17605_v36  ;;  %v17638_v33 = vcombine.low %v8584_v37, %v8588_v59  ;;  %v17645_v36 = vcombine.high %v8591_v0, %v8595_v60  ;;  %v8627_v32 = vld [vmem:[#allocation16 + $0x1220] sm:$0xff]  ;;  %v8624_v37 = vld [vmem:[#allocation16 + $0x1208] sm:$0xff] }
 0x987   :  { %14736 = vmatprep.subr.bf16.mxu0 %v17607_v8  ;;  %v17647_v8 = vcombine.high %v8592_v1, %v8596_v26  ;;  %v8628_v59 = vld [vmem:[#allocation16 + $0x1228] sm:$0xff] }
 0x989   :  { %14393 = vmatpush1.bf16.msra.mxu1 %v17604_v23  ;;  %v17644_v23 = vcombine.low %v8591_v0, %v8595_v60  ;;  %v8631_v0 = vld [vmem:[#allocation16 + $0x1240] sm:$0xff] }
 0x98a   :  { %14737 = vmatpush1.bf16.msra.mxu0 %v17606_v27  ;;  %14405 = vmatprep.subr.bf16.mxu1 %v17613_v11  ;;  %v17646_v27 = vcombine.low %v8592_v1, %v8596_v26  ;;  %v17653_v11 = vcombine.high %v8599_v41, %v8603_v53  ;;  %v8635_v60 = vld [vmem:[#allocation16 + $0x1260] sm:$0xff]  ;;  %v8632_v1 = vld [vmem:[#allocation16 + $0x1248] sm:$0xff] }
 0x98b   :  { %14749 = vmatprep.subr.bf16.mxu0 %v17615_v57  ;;  %v17655_v57 = vcombine.high %v8600_v54, %v8604_v56  ;;  %v8636_v26 = vld [vmem:[#allocation16 + $0x1268] sm:$0xff]  ;;  %v8639_v41 = vld [vmem:[#allocation16 + $0x1280] sm:$0xff] }
 0x98c   :  { %14395 = vmatmul.mubr.bf16.vlgmr.msra.gmra.mrb[104].mxu1 %v21029_v9  ;;  %v8643_v53 = vld [vmem:[#allocation16 + $0x12a0] sm:$0xff] }
 0x98d   :  { %14739 = vmatmul.mubr.bf16.vlgmr.msra.gmra.mrb[104].mxu0 %v21029_v9  ;;  %14406 = vmatpush1.bf16.msra.mxu1 %v17612_v45  ;;  %v8608_v45 = vld [vmem:[#allocation16 + $0x1188] sm:$0xff] }
 0x98e   :  { %14437 = vmatprep.mubr.bf16.mxu1 %v21145_v50  ;;  %14750 = vmatpush1.bf16.msra.mxu0 %v17614_v19  ;;  %v17654_v19 = vcombine.low %v8600_v54, %v8604_v56  ;;  %v17663_v24 = vcombine.high %v8608_v45, %v8612_v5  ;;  %v8640_v54 = vld [vmem:[#allocation16 + $0x1288] sm:$0xff] }
 0x98f   :  { %14781 = vmatprep.mubr.bf16.mxu0 %v21145_v50  ;;  %14407 = vmatprep.subr.bf16.mxu1 %v17621_v13  ;;  %v17661_v13 = vcombine.high %v8607_v4, %v8611_v15  ;;  %v8644_v56 = vld [vmem:[#allocation16 + $0x12a8] sm:$0xff] }
 0x990   :  { %14751 = vmatprep.subr.bf16.mxu0 %v17623_v43  ;;  %v8619_v43 = vld [vmem:[#allocation16 + $0x11e0] sm:$0xff] }
 0x991   :  { %14408 = vmatpush1.bf16.msra.mxu1 %v17620_v42  ;;  %v17660_v42 = vcombine.low %v8607_v4, %v8611_v15  ;;  %v8647_v4 = vld [vmem:[#allocation16 + $0x12c0] sm:$0xff] }
 0x992   :  { %14752 = vmatpush1.bf16.msra.mxu0 %v17622_v30  ;;  %14409 = vmatprep.subr.bf16.mxu1 %v17629_v28  ;;  %v17662_v30 = vcombine.low %v8608_v45, %v8612_v5  ;;  %v17669_v28 = vcombine.high %v8615_v21, %v8619_v43  ;;  %v8651_v15 = vld [vmem:[#allocation16 + $0x12e0] sm:$0xff]  ;;  %v8648_v45 = vld [vmem:[#allocation16 + $0x12c8] sm:$0xff] }
 0x993   :  { %14753 = vmatprep.subr.bf16.mxu0 %v17631_v31  ;;  %v17671_v31 = vcombine.high %v8616_v25, %v8620_v7  ;;  %v8652_v5 = vld [vmem:[#allocation16 + $0x12e8] sm:$0xff] }
 0x995   :  { %14410 = vmatpush1.bf16.msra.mxu1 %v17628_v38  ;;  %v17668_v38 = vcombine.low %v8615_v21, %v8619_v43  ;;  %v8655_v21 = vld [vmem:[#allocation16 + $0x1300] sm:$0xff] }
 0x996   :  { %14754 = vmatpush1.bf16.msra.mxu0 %v17630_v39  ;;  %14411 = vmatprep.subr.bf16.mxu1 %v17637_v20  ;;  %v17670_v39 = vcombine.low %v8616_v25, %v8620_v7  ;;  %v17677_v20 = vcombine.high %v8623_v58, %v8627_v32  ;;  %v8659_v43 = vld [vmem:[#allocation16 + $0x1320] sm:$0xff]  ;;  %v8656_v25 = vld [vmem:[#allocation16 + $0x1308] sm:$0xff] }
 0x997   :  { %14755 = vmatprep.subr.bf16.mxu0 %v17639_v12  ;;  %v17679_v12 = vcombine.high %v8624_v37, %v8628_v59  ;;  %v8660_v7 = vld [vmem:[#allocation16 + $0x1328] sm:$0xff] }
 0x999   :  { %14412 = vmatpush1.bf16.msra.mxu1 %v17636_v6  ;;  %v17676_v6 = vcombine.low %v8623_v58, %v8627_v32  ;;  %v8663_v58 = vld [vmem:[#allocation16 + $0x1340] sm:$0xff] }
 0x99a   :  { %14756 = vmatpush1.bf16.msra.mxu0 %v17638_v33  ;;  %14413 = vmatprep.subr.bf16.mxu1 %v17645_v36  ;;  %v17678_v33 = vcombine.low %v8624_v37, %v8628_v59  ;;  %v17685_v36 = vcombine.high %v8631_v0, %v8635_v60  ;;  %v8667_v32 = vld [vmem:[#allocation16 + $0x1360] sm:$0xff]  ;;  %v8664_v37 = vld [vmem:[#allocation16 + $0x1348] sm:$0xff] }
 0x99b   :  { %14757 = vmatprep.subr.bf16.mxu0 %v17647_v8  ;;  %v17687_v8 = vcombine.high %v8632_v1, %v8636_v26  ;;  %v8668_v59 = vld [vmem:[#allocation16 + $0x1368] sm:$0xff] }
 0x99d   :  { %14414 = vmatpush1.bf16.msra.mxu1 %v17644_v23  ;;  %v17684_v23 = vcombine.low %v8631_v0, %v8635_v60  ;;  %v8671_v0 = vld [vmem:[#allocation16 + $0x1380] sm:$0xff] }
 0x99e   :  { %14758 = vmatpush1.bf16.msra.mxu0 %v17646_v27  ;;  %14415 = vmatprep.subr.bf16.mxu1 %v17653_v11  ;;  %v17686_v27 = vcombine.low %v8632_v1, %v8636_v26  ;;  %v17693_v11 = vcombine.high %v8639_v41, %v8643_v53  ;;  %v8675_v60 = vld [vmem:[#allocation16 + $0x13a0] sm:$0xff]  ;;  %v8672_v1 = vld [vmem:[#allocation16 + $0x1388] sm:$0xff] }
 0x99f   :  { %14759 = vmatprep.subr.bf16.mxu0 %v17655_v57  ;;  %v17695_v57 = vcombine.high %v8640_v54, %v8644_v56  ;;  %v8676_v26 = vld [vmem:[#allocation16 + $0x13a8] sm:$0xff] }
 0x9a1   :  { %14416 = vmatpush1.bf16.msra.mxu1 %v17652_v46  ;;  %v17692_v46 = vcombine.low %v8639_v41, %v8643_v53  ;;  %v8679_v41 = vld [vmem:[#allocation16 + $0x13c0] sm:$0xff] }
 0x9a2   :  { %14760 = vmatpush1.bf16.msra.mxu0 %v17654_v19  ;;  %14417 = vmatprep.subr.bf16.mxu1 %v17661_v13  ;;  %v17694_v19 = vcombine.low %v8640_v54, %v8644_v56  ;;  %v17701_v13 = vcombine.high %v8647_v4, %v8651_v15  ;;  %v8683_v53 = vld [vmem:[#allocation16 + $0x13e0] sm:$0xff]  ;;  %v8680_v54 = vld [vmem:[#allocation16 + $0x13c8] sm:$0xff] }
 0x9a3   :  { %14761 = vmatprep.subr.bf16.mxu0 %v17663_v24  ;;  %v17703_v24 = vcombine.high %v8648_v45, %v8652_v5  ;;  %v8684_v56 = vld [vmem:[#allocation16 + $0x13e8] sm:$0xff] }
 0x9a5   :  { %14418 = vmatpush1.bf16.msra.mxu1 %v17660_v42  ;;  %v17700_v42 = vcombine.low %v8647_v4, %v8651_v15  ;;  %v8687_v4 = vld [vmem:[#allocation16 + $0x1400] sm:$0xff] }
 0x9a6   :  { %14762 = vmatpush1.bf16.msra.mxu0 %v17662_v30  ;;  %14419 = vmatprep.subr.bf16.mxu1 %v17669_v28  ;;  %v17702_v30 = vcombine.low %v8648_v45, %v8652_v5  ;;  %v17709_v28 = vcombine.high %v8655_v21, %v8659_v43  ;;  %v8691_v15 = vld [vmem:[#allocation16 + $0x1420] sm:$0xff]  ;;  %v8688_v45 = vld [vmem:[#allocation16 + $0x1408] sm:$0xff] }
 0x9a7   :  { %14763 = vmatprep.subr.bf16.mxu0 %v17671_v31  ;;  %v17711_v31 = vcombine.high %v8656_v25, %v8660_v7  ;;  %v8692_v5 = vld [vmem:[#allocation16 + $0x1428] sm:$0xff] }
 0x9a9   :  { %14420 = vmatpush1.bf16.msra.mxu1 %v17668_v38  ;;  %v17708_v38 = vcombine.low %v8655_v21, %v8659_v43  ;;  %v8695_v21 = vld [vmem:[#allocation16 + $0x1440] sm:$0xff] }
 0x9aa   :  { %14764 = vmatpush1.bf16.msra.mxu0 %v17670_v39  ;;  %14421 = vmatprep.subr.bf16.mxu1 %v17677_v20  ;;  %v17710_v39 = vcombine.low %v8656_v25, %v8660_v7  ;;  %v17717_v20 = vcombine.high %v8663_v58, %v8667_v32  ;;  %v8699_v43 = vld [vmem:[#allocation16 + $0x1460] sm:$0xff]  ;;  %v17740_v25 = vcombine.low %v8687_v4, %v8691_v15  ;;  %v8696_v7 = vld [vmem:[#allocation16 + $0x1448] sm:$0xff] }
 0x9ab   :  { %14765 = vmatprep.subr.bf16.mxu0 %v17679_v12  ;;  %v17719_v12 = vcombine.high %v8664_v37, %v8668_v59 }
 0x9ad   :  { %14422 = vmatpush1.bf16.msra.mxu1 %v17676_v6  ;;  %v17716_v6 = vcombine.low %v8663_v58, %v8667_v32  ;;  %v8707_v58 = vld [vmem:[#allocation16 + $0x14a0] sm:$0xff] }
 0x9ae   :  { %14766 = vmatpush1.bf16.msra.mxu0 %v17678_v33  ;;  %14423 = vmatprep.subr.bf16.mxu1 %v17685_v36  ;;  %v17718_v33 = vcombine.low %v8664_v37, %v8668_v59  ;;  %v17725_v36 = vcombine.high %v8671_v0, %v8675_v60  ;;  %v8704_v37 = vld [vmem:[#allocation16 + $0x1488] sm:$0xff] }
 0x9af   :  { %14767 = vmatprep.subr.bf16.mxu0 %v17687_v8  ;;  %v17727_v8 = vcombine.high %v8672_v1, %v8676_v26  ;;  %v8708_v59 = vld [vmem:[#allocation16 + $0x14a8] sm:$0xff] }
 0x9b1   :  { %14424 = vmatpush1.bf16.msra.mxu1 %v17684_v23  ;;  %v17724_v23 = vcombine.low %v8671_v0, %v8675_v60  ;;  %v8711_v0 = vld [vmem:[#allocation16 + $0x14c0] sm:$0xff] }
 0x9b2   :  { %14768 = vmatpush1.bf16.msra.mxu0 %v17686_v27  ;;  %14425 = vmatprep.subr.bf16.mxu1 %v17693_v11  ;;  %v17726_v27 = vcombine.low %v8672_v1, %v8676_v26  ;;  %v17733_v11 = vcombine.high %v8679_v41, %v8683_v53  ;;  %v8715_v60 = vld [vmem:[#allocation16 + $0x14e0] sm:$0xff]  ;;  %v8712_v1 = vld [vmem:[#allocation16 + $0x14c8] sm:$0xff] }
 0x9b3   :  { %14769 = vmatprep.subr.bf16.mxu0 %v17695_v57  ;;  %v17735_v57 = vcombine.high %v8680_v54, %v8684_v56  ;;  %v8716_v26 = vld [vmem:[#allocation16 + $0x14e8] sm:$0xff] }
 0x9b5   :  { %14426 = vmatpush1.bf16.msra.mxu1 %v17692_v46  ;;  %v17732_v46 = vcombine.low %v8679_v41, %v8683_v53  ;;  %v8719_v41 = vld [vmem:[#allocation16 + $0x1500] sm:$0xff] }
 0x9b6   :  { %14770 = vmatpush1.bf16.msra.mxu0 %v17694_v19  ;;  %14427 = vmatprep.subr.bf16.mxu1 %v17701_v13  ;;  %v17734_v19 = vcombine.low %v8680_v54, %v8684_v56  ;;  %v17741_v13 = vcombine.high %v8687_v4, %v8691_v15  ;;  %v8723_v53 = vld [vmem:[#allocation16 + $0x1520] sm:$0xff]  ;;  %v8720_v54 = vld [vmem:[#allocation16 + $0x1508] sm:$0xff] }
 0x9b7   :  { %14771 = vmatprep.subr.bf16.mxu0 %v17703_v24  ;;  %v17743_v24 = vcombine.high %v8688_v45, %v8692_v5  ;;  %v8724_v56 = vld [vmem:[#allocation16 + $0x1528] sm:$0xff]  ;;  %v8727_v4 = vld [vmem:[#allocation16 + $0x1540] sm:$0xff] }
 0x9b8   :  { %v8731_v15 = vld [vmem:[#allocation16 + $0x1560] sm:$0xff] }
 0x9b9   :  { %14428 = vmatpush1.bf16.msra.mxu1 %v17700_v42  ;;  %v8700_v42 = vld [vmem:[#allocation16 + $0x1468] sm:$0xff] }
 0x9ba   :  { %14772 = vmatpush1.bf16.msra.mxu0 %v17702_v30  ;;  %14429 = vmatprep.subr.bf16.mxu1 %v17709_v28  ;;  %v17742_v30 = vcombine.low %v8688_v45, %v8692_v5  ;;  %v17749_v28 = vcombine.high %v8695_v21, %v8699_v43  ;;  %v17751_v32 = vcombine.high %v8696_v7, %v8700_v42  ;;  %v8728_v45 = vld [vmem:[#allocation16 + $0x1548] sm:$0xff] }
 0x9bb   :  { %14773 = vmatprep.subr.bf16.mxu0 %v17711_v31  ;;  %v8703_v31 = vld [vmem:[#allocation16 + $0x1480] sm:$0xff]  ;;  %v8732_v5 = vld [vmem:[#allocation16 + $0x1568] sm:$0xff] }
 0x9bd   :  { %14430 = vmatpush1.bf16.msra.mxu1 %v17708_v38  ;;  %v17748_v38 = vcombine.low %v8695_v21, %v8699_v43  ;;  %v8735_v21 = vld [vmem:[#allocation16 + $0x1580] sm:$0xff] }
 0x9be   :  { %14774 = vmatpush1.bf16.msra.mxu0 %v17710_v39  ;;  %14431 = vmatprep.subr.bf16.mxu1 %v17717_v20  ;;  %v17750_v39 = vcombine.low %v8696_v7, %v8700_v42  ;;  %v17757_v20 = vcombine.high %v8703_v31, %v8707_v58  ;;  %v8739_v43 = vld [vmem:[#allocation16 + $0x15a0] sm:$0xff]  ;;  %v8740_v7 = vld [vmem:[#allocation16 + $0x15a8] sm:$0xff]  ;;  %v17780_v42 = vcombine.low %v8727_v4, %v8731_v15 }
 0x9bf   :  { %14775 = vmatprep.subr.bf16.mxu0 %v17719_v12  ;;  %v17759_v12 = vcombine.high %v8704_v37, %v8708_v59 }
 0x9c1   :  { %14432 = vmatpush1.bf16.msra.mxu1 %v17716_v6  ;;  %v17756_v6 = vcombine.low %v8703_v31, %v8707_v58  ;;  %v8743_v58 = vld [vmem:[#allocation16 + $0x15c0] sm:$0xff] }
 0x9c2   :  { %14776 = vmatpush1.bf16.msra.mxu0 %v17718_v33  ;;  %14433 = vmatprep.subr.bf16.mxu1 %v17725_v36  ;;  %v17758_v33 = vcombine.low %v8704_v37, %v8708_v59  ;;  %v17765_v36 = vcombine.high %v8711_v0, %v8715_v60  ;;  %v8744_v37 = vld [vmem:[#allocation16 + $0x15c8] sm:$0xff] }
 0x9c3   :  { %14777 = vmatprep.subr.bf16.mxu0 %v17727_v8  ;;  %v17767_v8 = vcombine.high %v8712_v1, %v8716_v26  ;;  %v8748_v59 = vld [vmem:[#allocation16 + $0x15e8] sm:$0xff] }
 0x9c5   :  { %14434 = vmatpush1.bf16.msra.mxu1 %v17724_v23  ;;  %v17764_v23 = vcombine.low %v8711_v0, %v8715_v60  ;;  %v8751_v0 = vld [vmem:[#allocation16 + $0x1600] sm:$0xff] }
 0x9c6   :  { %14778 = vmatpush1.bf16.msra.mxu0 %v17726_v27  ;;  %14435 = vmatprep.subr.bf16.mxu1 %v17733_v11  ;;  %v17766_v27 = vcombine.low %v8712_v1, %v8716_v26  ;;  %v17773_v11 = vcombine.high %v8719_v41, %v8723_v53  ;;  %v8755_v60 = vld [vmem:[#allocation16 + $0x1620] sm:$0xff]  ;;  %v8752_v1 = vld [vmem:[#allocation16 + $0x1608] sm:$0xff] }
 0x9c7   :  { %14779 = vmatprep.subr.bf16.mxu0 %v17735_v57  ;;  %v17775_v57 = vcombine.high %v8720_v54, %v8724_v56  ;;  %v8756_v26 = vld [vmem:[#allocation16 + $0x1628] sm:$0xff] }
 0x9c9   :  { %14436 = vmatpush1.bf16.msra.mxu1 %v17732_v46  ;;  %v17772_v46 = vcombine.low %v8719_v41, %v8723_v53  ;;  %v8759_v41 = vld [vmem:[#allocation16 + $0x1640] sm:$0xff] }
 0x9ca   :  { %14780 = vmatpush1.bf16.msra.mxu0 %v17734_v19  ;;  %14448 = vmatprep.subr.bf16.mxu1 %v17741_v13  ;;  %v17774_v19 = vcombine.low %v8720_v54, %v8724_v56  ;;  %v17781_v13 = vcombine.high %v8727_v4, %v8731_v15  ;;  %v8763_v53 = vld [vmem:[#allocation16 + $0x1660] sm:$0xff]  ;;  %v8760_v54 = vld [vmem:[#allocation16 + $0x1648] sm:$0xff] }
 0x9cb   :  { %14792 = vmatprep.subr.bf16.mxu0 %v17743_v24  ;;  %v17783_v24 = vcombine.high %v8728_v45, %v8732_v5  ;;  %v8764_v56 = vld [vmem:[#allocation16 + $0x1668] sm:$0xff]  ;;  %v8767_v4 = vld [vmem:[#allocation16 + $0x1680] sm:$0xff] }
 0x9cc   :  { %14438 = vmatmul.mubr.bf16.vlgmr.msra.gmra.mrb[104].mxu1 %v21143_v44  ;;  %v8771_v15 = vld [vmem:[#allocation16 + $0x16a0] sm:$0xff] }
 0x9cd   :  { %14782 = vmatmul.mubr.bf16.vlgmr.msra.gmra.mrb[104].mxu0 %v21143_v44  ;;  %14449 = vmatpush1.bf16.msra.mxu1 %v17740_v25  ;;  %v8736_v25 = vld [vmem:[#allocation16 + $0x1588] sm:$0xff] }
 0x9ce   :  { %14480 = vmatprep.mubr.bf16.mxu1 %v21094_v35  ;;  %14793 = vmatpush1.bf16.msra.mxu0 %v17742_v30  ;;  %v17782_v30 = vcombine.low %v8728_v45, %v8732_v5  ;;  %v17791_v31 = vcombine.high %v8736_v25, %v8740_v7  ;;  %v8768_v45 = vld [vmem:[#allocation16 + $0x1688] sm:$0xff] }
 0x9cf   :  { %14824 = vmatprep.mubr.bf16.mxu0 %v21094_v35  ;;  %14450 = vmatprep.subr.bf16.mxu1 %v17749_v28  ;;  %v17789_v28 = vcombine.high %v8735_v21, %v8739_v43  ;;  %v8772_v5 = vld [vmem:[#allocation16 + $0x16a8] sm:$0xff] }
 0x9d0   :  { %14794 = vmatprep.subr.bf16.mxu0 %v17751_v32  ;;  %v8747_v32 = vld [vmem:[#allocation16 + $0x15e0] sm:$0xff] }
 0x9d1   :  { %14451 = vmatpush1.bf16.msra.mxu1 %v17748_v38  ;;  %v17788_v38 = vcombine.low %v8735_v21, %v8739_v43  ;;  %v8775_v21 = vld [vmem:[#allocation16 + $0x16c0] sm:$0xff] }
 0x9d2   :  { %14795 = vmatpush1.bf16.msra.mxu0 %v17750_v39  ;;  %14452 = vmatprep.subr.bf16.mxu1 %v17757_v20  ;;  %v17790_v39 = vcombine.low %v8736_v25, %v8740_v7  ;;  %v17797_v20 = vcombine.high %v8743_v58, %v8747_v32  ;;  %v8779_v43 = vld [vmem:[#allocation16 + $0x16e0] sm:$0xff]  ;;  %v8776_v25 = vld [vmem:[#allocation16 + $0x16c8] sm:$0xff] }
 0x9d3   :  { %14796 = vmatprep.subr.bf16.mxu0 %v17759_v12  ;;  %v17799_v12 = vcombine.high %v8744_v37, %v8748_v59  ;;  %v8780_v7 = vld [vmem:[#allocation16 + $0x16e8] sm:$0xff] }
 0x9d5   :  { %14453 = vmatpush1.bf16.msra.mxu1 %v17756_v6  ;;  %v17796_v6 = vcombine.low %v8743_v58, %v8747_v32  ;;  %v8783_v58 = vld [vmem:[#allocation16 + $0x1700] sm:$0xff] }
 0x9d6   :  { %14797 = vmatpush1.bf16.msra.mxu0 %v17758_v33  ;;  %14454 = vmatprep.subr.bf16.mxu1 %v17765_v36  ;;  %v17798_v33 = vcombine.low %v8744_v37, %v8748_v59  ;;  %v17805_v36 = vcombine.high %v8751_v0, %v8755_v60  ;;  %v8787_v32 = vld [vmem:[#allocation16 + $0x1720] sm:$0xff]  ;;  %v8784_v37 = vld [vmem:[#allocation16 + $0x1708] sm:$0xff] }
 0x9d7   :  { %14798 = vmatprep.subr.bf16.mxu0 %v17767_v8  ;;  %v17807_v8 = vcombine.high %v8752_v1, %v8756_v26  ;;  %v8788_v59 = vld [vmem:[#allocation16 + $0x1728] sm:$0xff] }
 0x9d9   :  { %14455 = vmatpush1.bf16.msra.mxu1 %v17764_v23  ;;  %v17804_v23 = vcombine.low %v8751_v0, %v8755_v60  ;;  %v8791_v0 = vld [vmem:[#allocation16 + $0x1740] sm:$0xff] }
 0x9da   :  { %14799 = vmatpush1.bf16.msra.mxu0 %v17766_v27  ;;  %14456 = vmatprep.subr.bf16.mxu1 %v17773_v11  ;;  %v17806_v27 = vcombine.low %v8752_v1, %v8756_v26  ;;  %v17813_v11 = vcombine.high %v8759_v41, %v8763_v53  ;;  %v8795_v60 = vld [vmem:[#allocation16 + $0x1760] sm:$0xff]  ;;  %v8792_v1 = vld [vmem:[#allocation16 + $0x1748] sm:$0xff] }
 0x9db   :  { %14800 = vmatprep.subr.bf16.mxu0 %v17775_v57  ;;  %v17815_v57 = vcombine.high %v8760_v54, %v8764_v56  ;;  %v8796_v26 = vld [vmem:[#allocation16 + $0x1768] sm:$0xff] }
 0x9dd   :  { %14457 = vmatpush1.bf16.msra.mxu1 %v17772_v46  ;;  %v17812_v46 = vcombine.low %v8759_v41, %v8763_v53  ;;  %v8799_v41 = vld [vmem:[#allocation16 + $0x1780] sm:$0xff] }
 0x9de   :  { %14801 = vmatpush1.bf16.msra.mxu0 %v17774_v19  ;;  %14458 = vmatprep.subr.bf16.mxu1 %v17781_v13  ;;  %v17814_v19 = vcombine.low %v8760_v54, %v8764_v56  ;;  %v17821_v13 = vcombine.high %v8767_v4, %v8771_v15  ;;  %v8803_v53 = vld [vmem:[#allocation16 + $0x17a0] sm:$0xff]  ;;  %v8800_v54 = vld [vmem:[#allocation16 + $0x1788] sm:$0xff] }
 0x9df   :  { %14802 = vmatprep.subr.bf16.mxu0 %v17783_v24  ;;  %v17823_v24 = vcombine.high %v8768_v45, %v8772_v5  ;;  %v8804_v56 = vld [vmem:[#allocation16 + $0x17a8] sm:$0xff] }
 0x9e1   :  { %14459 = vmatpush1.bf16.msra.mxu1 %v17780_v42  ;;  %v17820_v42 = vcombine.low %v8767_v4, %v8771_v15  ;;  %v8807_v4 = vld [vmem:[#allocation16 + $0x17c0] sm:$0xff] }
 0x9e2   :  { %14803 = vmatpush1.bf16.msra.mxu0 %v17782_v30  ;;  %14460 = vmatprep.subr.bf16.mxu1 %v17789_v28  ;;  %v17822_v30 = vcombine.low %v8768_v45, %v8772_v5  ;;  %v17829_v28 = vcombine.high %v8775_v21, %v8779_v43  ;;  %v8811_v15 = vld [vmem:[#allocation16 + $0x17e0] sm:$0xff]  ;;  %v8808_v45 = vld [vmem:[#allocation16 + $0x17c8] sm:$0xff] }
 0x9e3   :  { %14804 = vmatprep.subr.bf16.mxu0 %v17791_v31  ;;  %v17831_v31 = vcombine.high %v8776_v25, %v8780_v7  ;;  %v8812_v5 = vld [vmem:[#allocation16 + $0x17e8] sm:$0xff] }
 0x9e5   :  { %14461 = vmatpush1.bf16.msra.mxu1 %v17788_v38  ;;  %v17828_v38 = vcombine.low %v8775_v21, %v8779_v43  ;;  %v8815_v21 = vld [vmem:[#allocation16 + $0x1800] sm:$0xff] }
 0x9e6   :  { %14805 = vmatpush1.bf16.msra.mxu0 %v17790_v39  ;;  %14462 = vmatprep.subr.bf16.mxu1 %v17797_v20  ;;  %v17830_v39 = vcombine.low %v8776_v25, %v8780_v7  ;;  %v17837_v20 = vcombine.high %v8783_v58, %v8787_v32  ;;  %v8819_v43 = vld [vmem:[#allocation16 + $0x1820] sm:$0xff]  ;;  %v8816_v25 = vld [vmem:[#allocation16 + $0x1808] sm:$0xff] }
 0x9e7   :  { %14806 = vmatprep.subr.bf16.mxu0 %v17799_v12  ;;  %v17839_v12 = vcombine.high %v8784_v37, %v8788_v59  ;;  %v8820_v7 = vld [vmem:[#allocation16 + $0x1828] sm:$0xff] }
 0x9e9   :  { %14463 = vmatpush1.bf16.msra.mxu1 %v17796_v6  ;;  %v17836_v6 = vcombine.low %v8783_v58, %v8787_v32  ;;  %v8823_v58 = vld [vmem:[#allocation16 + $0x1840] sm:$0xff] }
 0x9ea   :  { %14807 = vmatpush1.bf16.msra.mxu0 %v17798_v33  ;;  %14464 = vmatprep.subr.bf16.mxu1 %v17805_v36  ;;  %v17838_v33 = vcombine.low %v8784_v37, %v8788_v59  ;;  %v17845_v36 = vcombine.high %v8791_v0, %v8795_v60  ;;  %v8827_v32 = vld [vmem:[#allocation16 + $0x1860] sm:$0xff]  ;;  %v17868_v37 = vcombine.low %v8815_v21, %v8819_v43  ;;  %v8824_v59 = vld [vmem:[#allocation16 + $0x1848] sm:$0xff] }
 0x9eb   :  { %14808 = vmatprep.subr.bf16.mxu0 %v17807_v8  ;;  %v17847_v8 = vcombine.high %v8792_v1, %v8796_v26 }
 0x9ed   :  { %14465 = vmatpush1.bf16.msra.mxu1 %v17804_v23  ;;  %v17844_v23 = vcombine.low %v8791_v0, %v8795_v60  ;;  %v8835_v0 = vld [vmem:[#allocation16 + $0x18a0] sm:$0xff] }
 0x9ee   :  { %14809 = vmatpush1.bf16.msra.mxu0 %v17806_v27  ;;  %14466 = vmatprep.subr.bf16.mxu1 %v17813_v11  ;;  %v17846_v27 = vcombine.low %v8792_v1, %v8796_v26  ;;  %v17853_v11 = vcombine.high %v8799_v41, %v8803_v53  ;;  %v8832_v1 = vld [vmem:[#allocation16 + $0x1888] sm:$0xff] }
 0x9ef   :  { %14810 = vmatprep.subr.bf16.mxu0 %v17815_v57  ;;  %v17855_v57 = vcombine.high %v8800_v54, %v8804_v56  ;;  %v8836_v26 = vld [vmem:[#allocation16 + $0x18a8] sm:$0xff] }
 0x9f1   :  { %14467 = vmatpush1.bf16.msra.mxu1 %v17812_v46  ;;  %v17852_v46 = vcombine.low %v8799_v41, %v8803_v53  ;;  %v8839_v41 = vld [vmem:[#allocation16 + $0x18c0] sm:$0xff] }
 0x9f2   :  { %14811 = vmatpush1.bf16.msra.mxu0 %v17814_v19  ;;  %14468 = vmatprep.subr.bf16.mxu1 %v17821_v13  ;;  %v17854_v19 = vcombine.low %v8800_v54, %v8804_v56  ;;  %v17861_v13 = vcombine.high %v8807_v4, %v8811_v15  ;;  %v8843_v53 = vld [vmem:[#allocation16 + $0x18e0] sm:$0xff]  ;;  %v8840_v54 = vld [vmem:[#allocation16 + $0x18c8] sm:$0xff] }
 0x9f3   :  { %14812 = vmatprep.subr.bf16.mxu0 %v17823_v24  ;;  %v17863_v24 = vcombine.high %v8808_v45, %v8812_v5  ;;  %v8844_v56 = vld [vmem:[#allocation16 + $0x18e8] sm:$0xff] }
 0x9f5   :  { %14469 = vmatpush1.bf16.msra.mxu1 %v17820_v42  ;;  %v17860_v42 = vcombine.low %v8807_v4, %v8811_v15  ;;  %v8847_v4 = vld [vmem:[#allocation16 + $0x1900] sm:$0xff] }
 0x9f6   :  { %14813 = vmatpush1.bf16.msra.mxu0 %v17822_v30  ;;  %14470 = vmatprep.subr.bf16.mxu1 %v17829_v28  ;;  %v17862_v30 = vcombine.low %v8808_v45, %v8812_v5  ;;  %v17869_v28 = vcombine.high %v8815_v21, %v8819_v43  ;;  %v8851_v15 = vld [vmem:[#allocation16 + $0x1920] sm:$0xff]  ;;  %v8848_v45 = vld [vmem:[#allocation16 + $0x1908] sm:$0xff] }
 0x9f7   :  { %14814 = vmatprep.subr.bf16.mxu0 %v17831_v31  ;;  %v17871_v31 = vcombine.high %v8816_v25, %v8820_v7  ;;  %v8852_v5 = vld [vmem:[#allocation16 + $0x1928] sm:$0xff]  ;;  %v8855_v21 = vld [vmem:[#allocation16 + $0x1940] sm:$0xff] }
 0x9f8   :  { %v8859_v43 = vld [vmem:[#allocation16 + $0x1960] sm:$0xff] }
 0x9f9   :  { %14471 = vmatpush1.bf16.msra.mxu1 %v17828_v38  ;;  %v8828_v38 = vld [vmem:[#allocation16 + $0x1868] sm:$0xff] }
 0x9fa   :  { %14815 = vmatpush1.bf16.msra.mxu0 %v17830_v39  ;;  %14472 = vmatprep.subr.bf16.mxu1 %v17837_v20  ;;  %v17870_v39 = vcombine.low %v8816_v25, %v8820_v7  ;;  %v17877_v20 = vcombine.high %v8823_v58, %v8827_v32  ;;  %v17879_v60 = vcombine.high %v8824_v59, %v8828_v38  ;;  %v8856_v25 = vld [vmem:[#allocation16 + $0x1948] sm:$0xff] }
 0x9fb   :  { %14816 = vmatprep.subr.bf16.mxu0 %v17839_v12  ;;  %v8831_v12 = vld [vmem:[#allocation16 + $0x1880] sm:$0xff]  ;;  %v8860_v7 = vld [vmem:[#allocation16 + $0x1968] sm:$0xff] }
 0x9fd   :  { %14473 = vmatpush1.bf16.msra.mxu1 %v17836_v6  ;;  %v17876_v6 = vcombine.low %v8823_v58, %v8827_v32  ;;  %v8863_v58 = vld [vmem:[#allocation16 + $0x1980] sm:$0xff] }
 0x9fe   :  { %14817 = vmatpush1.bf16.msra.mxu0 %v17838_v33  ;;  %14474 = vmatprep.subr.bf16.mxu1 %v17845_v36  ;;  %v17878_v33 = vcombine.low %v8824_v59, %v8828_v38  ;;  %v17885_v36 = vcombine.high %v8831_v12, %v8835_v0  ;;  %v8867_v32 = vld [vmem:[#allocation16 + $0x19a0] sm:$0xff]  ;;  %v8868_v59 = vld [vmem:[#allocation16 + $0x19a8] sm:$0xff]  ;;  %v17908_v38 = vcombine.low %v8855_v21, %v8859_v43 }
 0x9ff   :  { %14818 = vmatprep.subr.bf16.mxu0 %v17847_v8  ;;  %v17887_v8 = vcombine.high %v8832_v1, %v8836_v26 }
 0xa01   :  { %14475 = vmatpush1.bf16.msra.mxu1 %v17844_v23  ;;  %v17884_v23 = vcombine.low %v8831_v12, %v8835_v0  ;;  %v8871_v0 = vld [vmem:[#allocation16 + $0x19c0] sm:$0xff] }
 0xa02   :  { %14819 = vmatpush1.bf16.msra.mxu0 %v17846_v27  ;;  %14476 = vmatprep.subr.bf16.mxu1 %v17853_v11  ;;  %v17886_v27 = vcombine.low %v8832_v1, %v8836_v26  ;;  %v17893_v11 = vcombine.high %v8839_v41, %v8843_v53  ;;  %v8872_v1 = vld [vmem:[#allocation16 + $0x19c8] sm:$0xff] }
 0xa03   :  { %14820 = vmatprep.subr.bf16.mxu0 %v17855_v57  ;;  %v17895_v57 = vcombine.high %v8840_v54, %v8844_v56  ;;  %v8876_v26 = vld [vmem:[#allocation16 + $0x19e8] sm:$0xff] }
 0xa05   :  { %14477 = vmatpush1.bf16.msra.mxu1 %v17852_v46  ;;  %v17892_v46 = vcombine.low %v8839_v41, %v8843_v53  ;;  %v8879_v41 = vld [vmem:[#allocation16 + $0x1a00] sm:$0xff] }
 0xa06   :  { %14821 = vmatpush1.bf16.msra.mxu0 %v17854_v19  ;;  %14478 = vmatprep.subr.bf16.mxu1 %v17861_v13  ;;  %v17894_v19 = vcombine.low %v8840_v54, %v8844_v56  ;;  %v17901_v13 = vcombine.high %v8847_v4, %v8851_v15  ;;  %v8883_v53 = vld [vmem:[#allocation16 + $0x1a20] sm:$0xff]  ;;  %v8880_v54 = vld [vmem:[#allocation16 + $0x1a08] sm:$0xff] }
 0xa07   :  { %14822 = vmatprep.subr.bf16.mxu0 %v17863_v24  ;;  %v17903_v24 = vcombine.high %v8848_v45, %v8852_v5  ;;  %v8884_v56 = vld [vmem:[#allocation16 + $0x1a28] sm:$0xff] }
 0xa09   :  { %14479 = vmatpush1.bf16.msra.mxu1 %v17860_v42  ;;  %v17900_v42 = vcombine.low %v8847_v4, %v8851_v15  ;;  %v8887_v4 = vld [vmem:[#allocation16 + $0x1a40] sm:$0xff] }
 0xa0a   :  { %14823 = vmatpush1.bf16.msra.mxu0 %v17862_v30  ;;  %14491 = vmatprep.subr.bf16.mxu1 %v17869_v28  ;;  %v17902_v30 = vcombine.low %v8848_v45, %v8852_v5  ;;  %v17909_v28 = vcombine.high %v8855_v21, %v8859_v43  ;;  %v8891_v15 = vld [vmem:[#allocation16 + $0x1a60] sm:$0xff]  ;;  %v8888_v45 = vld [vmem:[#allocation16 + $0x1a48] sm:$0xff] }
 0xa0b   :  { %14835 = vmatprep.subr.bf16.mxu0 %v17871_v31  ;;  %v17911_v31 = vcombine.high %v8856_v25, %v8860_v7  ;;  %v8892_v5 = vld [vmem:[#allocation16 + $0x1a68] sm:$0xff]  ;;  %v8895_v21 = vld [vmem:[#allocation16 + $0x1a80] sm:$0xff] }
 0xa0c   :  { %14481 = vmatmul.mubr.bf16.vlgmr.msra.gmra.mrb[104].mxu1 %v21078_v18  ;;  %v8899_v43 = vld [vmem:[#allocation16 + $0x1aa0] sm:$0xff] }
 0xa0d   :  { %14825 = vmatmul.mubr.bf16.vlgmr.msra.gmra.mrb[104].mxu0 %v21078_v18  ;;  %14492 = vmatpush1.bf16.msra.mxu1 %v17868_v37  ;;  %v8864_v37 = vld [vmem:[#allocation16 + $0x1988] sm:$0xff] }
 0xa0e   :  { %14523 = vmatprep.mubr.bf16.mxu1 %v21149_v2  ;;  %14836 = vmatpush1.bf16.msra.mxu0 %v17870_v39  ;;  %v17910_v39 = vcombine.low %v8856_v25, %v8860_v7  ;;  %v17919_v12 = vcombine.high %v8864_v37, %v8868_v59  ;;  %v8896_v25 = vld [vmem:[#allocation16 + $0x1a88] sm:$0xff] }
 0xa0f   :  { %14867 = vmatprep.mubr.bf16.mxu0 %v21149_v2  ;;  %14493 = vmatprep.subr.bf16.mxu1 %v17877_v20  ;;  %v17917_v20 = vcombine.high %v8863_v58, %v8867_v32  ;;  %v8900_v7 = vld [vmem:[#allocation16 + $0x1aa8] sm:$0xff] }
 0xa10   :  { %14837 = vmatprep.subr.bf16.mxu0 %v17879_v60  ;;  %v8875_v60 = vld [vmem:[#allocation16 + $0x19e0] sm:$0xff] }
 0xa11   :  { %14494 = vmatpush1.bf16.msra.mxu1 %v17876_v6  ;;  %v17916_v6 = vcombine.low %v8863_v58, %v8867_v32  ;;  %v8903_v58 = vld [vmem:[#allocation16 + $0x1ac0] sm:$0xff] }
 0xa12   :  { %14838 = vmatpush1.bf16.msra.mxu0 %v17878_v33  ;;  %14495 = vmatprep.subr.bf16.mxu1 %v17885_v36  ;;  %v17918_v33 = vcombine.low %v8864_v37, %v8868_v59  ;;  %v17925_v36 = vcombine.high %v8871_v0, %v8875_v60  ;;  %v8907_v32 = vld [vmem:[#allocation16 + $0x1ae0] sm:$0xff]  ;;  %v8904_v37 = vld [vmem:[#allocation16 + $0x1ac8] sm:$0xff] }
 0xa13   :  { %14839 = vmatprep.subr.bf16.mxu0 %v17887_v8  ;;  %v17927_v8 = vcombine.high %v8872_v1, %v8876_v26  ;;  %v8908_v59 = vld [vmem:[#allocation16 + $0x1ae8] sm:$0xff] }
 0xa15   :  { %14496 = vmatpush1.bf16.msra.mxu1 %v17884_v23  ;;  %v17924_v23 = vcombine.low %v8871_v0, %v8875_v60  ;;  %v8911_v0 = vld [vmem:[#allocation16 + $0x1b00] sm:$0xff] }
 0xa16   :  { %14840 = vmatpush1.bf16.msra.mxu0 %v17886_v27  ;;  %14497 = vmatprep.subr.bf16.mxu1 %v17893_v11  ;;  %v17926_v27 = vcombine.low %v8872_v1, %v8876_v26  ;;  %v17933_v11 = vcombine.high %v8879_v41, %v8883_v53  ;;  %v8915_v60 = vld [vmem:[#allocation16 + $0x1b20] sm:$0xff]  ;;  %v8912_v1 = vld [vmem:[#allocation16 + $0x1b08] sm:$0xff] }
 0xa17   :  { %14841 = vmatprep.subr.bf16.mxu0 %v17895_v57  ;;  %v17935_v57 = vcombine.high %v8880_v54, %v8884_v56  ;;  %v8916_v26 = vld [vmem:[#allocation16 + $0x1b28] sm:$0xff] }
 0xa19   :  { %14498 = vmatpush1.bf16.msra.mxu1 %v17892_v46  ;;  %v17932_v46 = vcombine.low %v8879_v41, %v8883_v53  ;;  %v8919_v41 = vld [vmem:[#allocation16 + $0x1b40] sm:$0xff] }
 0xa1a   :  { %14842 = vmatpush1.bf16.msra.mxu0 %v17894_v19  ;;  %14499 = vmatprep.subr.bf16.mxu1 %v17901_v13  ;;  %v17934_v19 = vcombine.low %v8880_v54, %v8884_v56  ;;  %v17941_v13 = vcombine.high %v8887_v4, %v8891_v15  ;;  %v8923_v53 = vld [vmem:[#allocation16 + $0x1b60] sm:$0xff]  ;;  %v8920_v54 = vld [vmem:[#allocation16 + $0x1b48] sm:$0xff] }
 0xa1b   :  { %14843 = vmatprep.subr.bf16.mxu0 %v17903_v24  ;;  %v17943_v24 = vcombine.high %v8888_v45, %v8892_v5  ;;  %v8924_v56 = vld [vmem:[#allocation16 + $0x1b68] sm:$0xff] }
 0xa1d   :  { %14500 = vmatpush1.bf16.msra.mxu1 %v17900_v42  ;;  %v17940_v42 = vcombine.low %v8887_v4, %v8891_v15  ;;  %v8927_v4 = vld [vmem:[#allocation16 + $0x1b80] sm:$0xff] }
 0xa1e   :  { %14844 = vmatpush1.bf16.msra.mxu0 %v17902_v30  ;;  %14501 = vmatprep.subr.bf16.mxu1 %v17909_v28  ;;  %v17942_v30 = vcombine.low %v8888_v45, %v8892_v5  ;;  %v17949_v28 = vcombine.high %v8895_v21, %v8899_v43  ;;  %v8931_v15 = vld [vmem:[#allocation16 + $0x1ba0] sm:$0xff]  ;;  %v8928_v45 = vld [vmem:[#allocation16 + $0x1b88] sm:$0xff] }
 0xa1f   :  { %14845 = vmatprep.subr.bf16.mxu0 %v17911_v31  ;;  %v17951_v31 = vcombine.high %v8896_v25, %v8900_v7  ;;  %v8932_v5 = vld [vmem:[#allocation16 + $0x1ba8] sm:$0xff] }
 0xa21   :  { %14502 = vmatpush1.bf16.msra.mxu1 %v17908_v38  ;;  %v17948_v38 = vcombine.low %v8895_v21, %v8899_v43  ;;  %v8935_v21 = vld [vmem:[#allocation16 + $0x1bc0] sm:$0xff] }
 0xa22   :  { %14846 = vmatpush1.bf16.msra.mxu0 %v17910_v39  ;;  %14503 = vmatprep.subr.bf16.mxu1 %v17917_v20  ;;  %v17950_v39 = vcombine.low %v8896_v25, %v8900_v7  ;;  %v17957_v20 = vcombine.high %v8903_v58, %v8907_v32  ;;  %v8939_v43 = vld [vmem:[#allocation16 + $0x1be0] sm:$0xff]  ;;  %v8936_v25 = vld [vmem:[#allocation16 + $0x1bc8] sm:$0xff] }
 0xa23   :  { %14847 = vmatprep.subr.bf16.mxu0 %v17919_v12  ;;  %v17959_v12 = vcombine.high %v8904_v37, %v8908_v59  ;;  %v8940_v7 = vld [vmem:[#allocation16 + $0x1be8] sm:$0xff] }
 0xa25   :  { %14504 = vmatpush1.bf16.msra.mxu1 %v17916_v6  ;;  %v17956_v6 = vcombine.low %v8903_v58, %v8907_v32  ;;  %v8943_v58 = vld [vmem:[#allocation16 + $0x1c00] sm:$0xff] }
 0xa26   :  { %14848 = vmatpush1.bf16.msra.mxu0 %v17918_v33  ;;  %14505 = vmatprep.subr.bf16.mxu1 %v17925_v36  ;;  %v17958_v33 = vcombine.low %v8904_v37, %v8908_v59  ;;  %v17965_v36 = vcombine.high %v8911_v0, %v8915_v60  ;;  %v8947_v32 = vld [vmem:[#allocation16 + $0x1c20] sm:$0xff]  ;;  %v8944_v37 = vld [vmem:[#allocation16 + $0x1c08] sm:$0xff] }
 0xa27   :  { %14849 = vmatprep.subr.bf16.mxu0 %v17927_v8  ;;  %v17967_v8 = vcombine.high %v8912_v1, %v8916_v26  ;;  %v8948_v59 = vld [vmem:[#allocation16 + $0x1c28] sm:$0xff] }
 0xa29   :  { %14506 = vmatpush1.bf16.msra.mxu1 %v17924_v23  ;;  %v17964_v23 = vcombine.low %v8911_v0, %v8915_v60  ;;  %v8951_v0 = vld [vmem:[#allocation16 + $0x1c40] sm:$0xff] }
 0xa2a   :  { %14850 = vmatpush1.bf16.msra.mxu0 %v17926_v27  ;;  %14507 = vmatprep.subr.bf16.mxu1 %v17933_v11  ;;  %v17966_v27 = vcombine.low %v8912_v1, %v8916_v26  ;;  %v17973_v11 = vcombine.high %v8919_v41, %v8923_v53  ;;  %v8955_v60 = vld [vmem:[#allocation16 + $0x1c60] sm:$0xff]  ;;  %v17996_v1 = vcombine.low %v8943_v58, %v8947_v32  ;;  %v8952_v26 = vld [vmem:[#allocation16 + $0x1c48] sm:$0xff] }
 0xa2b   :  { %14851 = vmatprep.subr.bf16.mxu0 %v17935_v57  ;;  %v17975_v57 = vcombine.high %v8920_v54, %v8924_v56 }
 0xa2d   :  { %14508 = vmatpush1.bf16.msra.mxu1 %v17932_v46  ;;  %v17972_v46 = vcombine.low %v8919_v41, %v8923_v53  ;;  %v8963_v41 = vld [vmem:[#allocation16 + $0x1ca0] sm:$0xff] }
 0xa2e   :  { %14852 = vmatpush1.bf16.msra.mxu0 %v17934_v19  ;;  %14509 = vmatprep.subr.bf16.mxu1 %v17941_v13  ;;  %v17974_v19 = vcombine.low %v8920_v54, %v8924_v56  ;;  %v17981_v13 = vcombine.high %v8927_v4, %v8931_v15  ;;  %v8960_v54 = vld [vmem:[#allocation16 + $0x1c88] sm:$0xff] }
 0xa2f   :  { %14853 = vmatprep.subr.bf16.mxu0 %v17943_v24  ;;  %v17983_v24 = vcombine.high %v8928_v45, %v8932_v5  ;;  %v8964_v56 = vld [vmem:[#allocation16 + $0x1ca8] sm:$0xff] }
 0xa31   :  { %14510 = vmatpush1.bf16.msra.mxu1 %v17940_v42  ;;  %v17980_v42 = vcombine.low %v8927_v4, %v8931_v15  ;;  %v8967_v4 = vld [vmem:[#allocation16 + $0x1cc0] sm:$0xff] }
 0xa32   :  { %14854 = vmatpush1.bf16.msra.mxu0 %v17942_v30  ;;  %14511 = vmatprep.subr.bf16.mxu1 %v17949_v28  ;;  %v17982_v30 = vcombine.low %v8928_v45, %v8932_v5  ;;  %v17989_v28 = vcombine.high %v8935_v21, %v8939_v43  ;;  %v8971_v15 = vld [vmem:[#allocation16 + $0x1ce0] sm:$0xff]  ;;  %v8968_v45 = vld [vmem:[#allocation16 + $0x1cc8] sm:$0xff] }
 0xa33   :  { %14855 = vmatprep.subr.bf16.mxu0 %v17951_v31  ;;  %v17991_v31 = vcombine.high %v8936_v25, %v8940_v7  ;;  %v8972_v5 = vld [vmem:[#allocation16 + $0x1ce8] sm:$0xff] }
 0xa35   :  { %14512 = vmatpush1.bf16.msra.mxu1 %v17948_v38  ;;  %v17988_v38 = vcombine.low %v8935_v21, %v8939_v43  ;;  %v8975_v21 = vld [vmem:[#allocation16 + $0x1d00] sm:$0xff] }
 0xa36   :  { %14856 = vmatpush1.bf16.msra.mxu0 %v17950_v39  ;;  %14513 = vmatprep.subr.bf16.mxu1 %v17957_v20  ;;  %v17990_v39 = vcombine.low %v8936_v25, %v8940_v7  ;;  %v17997_v20 = vcombine.high %v8943_v58, %v8947_v32  ;;  %v8979_v43 = vld [vmem:[#allocation16 + $0x1d20] sm:$0xff]  ;;  %v8976_v25 = vld [vmem:[#allocation16 + $0x1d08] sm:$0xff] }
 0xa37   :  { %14857 = vmatprep.subr.bf16.mxu0 %v17959_v12  ;;  %v17999_v12 = vcombine.high %v8944_v37, %v8948_v59  ;;  %v8980_v7 = vld [vmem:[#allocation16 + $0x1d28] sm:$0xff]  ;;  %v8983_v58 = vld [vmem:[#allocation16 + $0x1d40] sm:$0xff] }
 0xa38   :  { %v8987_v32 = vld [vmem:[#allocation16 + $0x1d60] sm:$0xff] }
 0xa39   :  { %14514 = vmatpush1.bf16.msra.mxu1 %v17956_v6  ;;  %v8956_v6 = vld [vmem:[#allocation16 + $0x1c68] sm:$0xff] }
 0xa3a   :  { %14858 = vmatpush1.bf16.msra.mxu0 %v17958_v33  ;;  %14515 = vmatprep.subr.bf16.mxu1 %v17965_v36  ;;  %v17998_v33 = vcombine.low %v8944_v37, %v8948_v59  ;;  %v18005_v36 = vcombine.high %v8951_v0, %v8955_v60  ;;  %v18007_v53 = vcombine.high %v8952_v26, %v8956_v6  ;;  %v8984_v37 = vld [vmem:[#allocation16 + $0x1d48] sm:$0xff] }
 0xa3b   :  { %14859 = vmatprep.subr.bf16.mxu0 %v17967_v8  ;;  %v8959_v8 = vld [vmem:[#allocation16 + $0x1c80] sm:$0xff]  ;;  %v8988_v59 = vld [vmem:[#allocation16 + $0x1d68] sm:$0xff] }
 0xa3d   :  { %14516 = vmatpush1.bf16.msra.mxu1 %v17964_v23  ;;  %v18004_v23 = vcombine.low %v8951_v0, %v8955_v60  ;;  %v8991_v0 = vld [vmem:[#allocation16 + $0x1d80] sm:$0xff] }
 0xa3e   :  { %14860 = vmatpush1.bf16.msra.mxu0 %v17966_v27  ;;  %14517 = vmatprep.subr.bf16.mxu1 %v17973_v11  ;;  %v18006_v27 = vcombine.low %v8952_v26, %v8956_v6  ;;  %v18013_v11 = vcombine.high %v8959_v8, %v8963_v41  ;;  %v8995_v60 = vld [vmem:[#allocation16 + $0x1da0] sm:$0xff]  ;;  %v8996_v26 = vld [vmem:[#allocation16 + $0x1da8] sm:$0xff]  ;;  %v18036_v6 = vcombine.low %v8983_v58, %v8987_v32 }
 0xa3f   :  { %14861 = vmatprep.subr.bf16.mxu0 %v17975_v57  ;;  %v18015_v57 = vcombine.high %v8960_v54, %v8964_v56 }
 0xa41   :  { %14518 = vmatpush1.bf16.msra.mxu1 %v17972_v46  ;;  %v18012_v46 = vcombine.low %v8959_v8, %v8963_v41  ;;  %v8999_v41 = vld [vmem:[#allocation16 + $0x1dc0] sm:$0xff] }
 0xa42   :  { %14862 = vmatpush1.bf16.msra.mxu0 %v17974_v19  ;;  %14519 = vmatprep.subr.bf16.mxu1 %v17981_v13  ;;  %v18014_v19 = vcombine.low %v8960_v54, %v8964_v56  ;;  %v18021_v13 = vcombine.high %v8967_v4, %v8971_v15  ;;  %v9000_v54 = vld [vmem:[#allocation16 + $0x1dc8] sm:$0xff] }
 0xa43   :  { %14863 = vmatprep.subr.bf16.mxu0 %v17983_v24  ;;  %v18023_v24 = vcombine.high %v8968_v45, %v8972_v5  ;;  %v9004_v56 = vld [vmem:[#allocation16 + $0x1de8] sm:$0xff] }
 0xa45   :  { %14520 = vmatpush1.bf16.msra.mxu1 %v17980_v42  ;;  %v18020_v42 = vcombine.low %v8967_v4, %v8971_v15  ;;  %v9007_v4 = vld [vmem:[#allocation16 + $0x1e00] sm:$0xff] }
 0xa46   :  { %14864 = vmatpush1.bf16.msra.mxu0 %v17982_v30  ;;  %14521 = vmatprep.subr.bf16.mxu1 %v17989_v28  ;;  %v18022_v30 = vcombine.low %v8968_v45, %v8972_v5  ;;  %v18029_v28 = vcombine.high %v8975_v21, %v8979_v43  ;;  %v9011_v15 = vld [vmem:[#allocation16 + $0x1e20] sm:$0xff]  ;;  %v9008_v45 = vld [vmem:[#allocation16 + $0x1e08] sm:$0xff] }
 0xa47   :  { %14865 = vmatprep.subr.bf16.mxu0 %v17991_v31  ;;  %v18031_v31 = vcombine.high %v8976_v25, %v8980_v7  ;;  %v9012_v5 = vld [vmem:[#allocation16 + $0x1e28] sm:$0xff] }
 0xa49   :  { %14522 = vmatpush1.bf16.msra.mxu1 %v17988_v38  ;;  %v18028_v38 = vcombine.low %v8975_v21, %v8979_v43  ;;  %v9015_v21 = vld [vmem:[#allocation16 + $0x1e40] sm:$0xff] }
 0xa4a   :  { %14866 = vmatpush1.bf16.msra.mxu0 %v17990_v39  ;;  %14534 = vmatprep.subr.bf16.mxu1 %v17997_v20  ;;  %v18030_v39 = vcombine.low %v8976_v25, %v8980_v7  ;;  %v18037_v20 = vcombine.high %v8983_v58, %v8987_v32  ;;  %v9019_v43 = vld [vmem:[#allocation16 + $0x1e60] sm:$0xff]  ;;  %v9016_v25 = vld [vmem:[#allocation16 + $0x1e48] sm:$0xff] }
 0xa4b   :  { %14878 = vmatprep.subr.bf16.mxu0 %v17999_v12  ;;  %v18039_v12 = vcombine.high %v8984_v37, %v8988_v59  ;;  %v9020_v7 = vld [vmem:[#allocation16 + $0x1e68] sm:$0xff]  ;;  %v9023_v58 = vld [vmem:[#allocation16 + $0x1e80] sm:$0xff] }
 0xa4c   :  { %14524 = vmatmul.mubr.bf16.vlgmr.msra.gmra.mrb[104].mxu1 %v21147_v40  ;;  %v9027_v32 = vld [vmem:[#allocation16 + $0x1ea0] sm:$0xff] }
 0xa4d   :  { %14868 = vmatmul.mubr.bf16.vlgmr.msra.gmra.mrb[104].mxu0 %v21147_v40  ;;  %14535 = vmatpush1.bf16.msra.mxu1 %v17996_v1  ;;  %v8992_v1 = vld [vmem:[#allocation16 + $0x1d88] sm:$0xff] }
 0xa4e   :  { %14566 = vmatprep.mubr.bf16.mxu1 %v21137_v29  ;;  %14879 = vmatpush1.bf16.msra.mxu0 %v17998_v33  ;;  %v18038_v33 = vcombine.low %v8984_v37, %v8988_v59  ;;  %v18047_v8 = vcombine.high %v8992_v1, %v8996_v26  ;;  %v9024_v37 = vld [vmem:[#allocation16 + $0x1e88] sm:$0xff] }
 0xa4f   :  { %14910 = vmatprep.mubr.bf16.mxu0 %v21137_v29  ;;  %14536 = vmatprep.subr.bf16.mxu1 %v18005_v36  ;;  %v18045_v36 = vcombine.high %v8991_v0, %v8995_v60  ;;  %v9028_v59 = vld [vmem:[#allocation16 + $0x1ea8] sm:$0xff] }
 0xa50   :  { %14880 = vmatprep.subr.bf16.mxu0 %v18007_v53  ;;  %v9003_v53 = vld [vmem:[#allocation16 + $0x1de0] sm:$0xff] }
 0xa51   :  { %14537 = vmatpush1.bf16.msra.mxu1 %v18004_v23  ;;  %v18044_v23 = vcombine.low %v8991_v0, %v8995_v60  ;;  %v9031_v0 = vld [vmem:[#allocation16 + $0x1ec0] sm:$0xff] }
 0xa52   :  { %14881 = vmatpush1.bf16.msra.mxu0 %v18006_v27  ;;  %14538 = vmatprep.subr.bf16.mxu1 %v18013_v11  ;;  %v18046_v27 = vcombine.low %v8992_v1, %v8996_v26  ;;  %v18053_v11 = vcombine.high %v8999_v41, %v9003_v53  ;;  %v9035_v60 = vld [vmem:[#allocation16 + $0x1ee0] sm:$0xff]  ;;  %v9032_v1 = vld [vmem:[#allocation16 + $0x1ec8] sm:$0xff] }
 0xa53   :  { %14882 = vmatprep.subr.bf16.mxu0 %v18015_v57  ;;  %v18055_v57 = vcombine.high %v9000_v54, %v9004_v56  ;;  %v9036_v26 = vld [vmem:[#allocation16 + $0x1ee8] sm:$0xff] }
 0xa55   :  { %14539 = vmatpush1.bf16.msra.mxu1 %v18012_v46  ;;  %v18052_v46 = vcombine.low %v8999_v41, %v9003_v53  ;;  %v9039_v41 = vld [vmem:[#allocation16 + $0x1f00] sm:$0xff] }
 0xa56   :  { %14883 = vmatpush1.bf16.msra.mxu0 %v18014_v19  ;;  %14540 = vmatprep.subr.bf16.mxu1 %v18021_v13  ;;  %v18054_v19 = vcombine.low %v9000_v54, %v9004_v56  ;;  %v18061_v13 = vcombine.high %v9007_v4, %v9011_v15  ;;  %v9043_v53 = vld [vmem:[#allocation16 + $0x1f20] sm:$0xff]  ;;  %v9040_v54 = vld [vmem:[#allocation16 + $0x1f08] sm:$0xff] }
 0xa57   :  { %14884 = vmatprep.subr.bf16.mxu0 %v18023_v24  ;;  %v18063_v24 = vcombine.high %v9008_v45, %v9012_v5  ;;  %v9044_v56 = vld [vmem:[#allocation16 + $0x1f28] sm:$0xff] }
 0xa59   :  { %14541 = vmatpush1.bf16.msra.mxu1 %v18020_v42  ;;  %v18060_v42 = vcombine.low %v9007_v4, %v9011_v15  ;;  %v9047_v4 = vld [vmem:[#allocation16 + $0x1f40] sm:$0xff] }
 0xa5a   :  { %14885 = vmatpush1.bf16.msra.mxu0 %v18022_v30  ;;  %14542 = vmatprep.subr.bf16.mxu1 %v18029_v28  ;;  %v18062_v30 = vcombine.low %v9008_v45, %v9012_v5  ;;  %v18069_v28 = vcombine.high %v9015_v21, %v9019_v43  ;;  %v9051_v15 = vld [vmem:[#allocation16 + $0x1f60] sm:$0xff]  ;;  %v9048_v45 = vld [vmem:[#allocation16 + $0x1f48] sm:$0xff] }
 0xa5b   :  { %14886 = vmatprep.subr.bf16.mxu0 %v18031_v31  ;;  %v18071_v31 = vcombine.high %v9016_v25, %v9020_v7  ;;  %v9052_v5 = vld [vmem:[#allocation16 + $0x1f68] sm:$0xff] }
 0xa5d   :  { %14543 = vmatpush1.bf16.msra.mxu1 %v18028_v38  ;;  %v18068_v38 = vcombine.low %v9015_v21, %v9019_v43  ;;  %v9055_v21 = vld [vmem:[#allocation16 + $0x1f80] sm:$0xff] }
 0xa5e   :  { %14887 = vmatpush1.bf16.msra.mxu0 %v18030_v39  ;;  %14544 = vmatprep.subr.bf16.mxu1 %v18037_v20  ;;  %v18070_v39 = vcombine.low %v9016_v25, %v9020_v7  ;;  %v18077_v20 = vcombine.high %v9023_v58, %v9027_v32  ;;  %v9059_v43 = vld [vmem:[#allocation16 + $0x1fa0] sm:$0xff]  ;;  %v9056_v25 = vld [vmem:[#allocation16 + $0x1f88] sm:$0xff] }
 0xa5f   :  { %14888 = vmatprep.subr.bf16.mxu0 %v18039_v12  ;;  %v18079_v12 = vcombine.high %v9024_v37, %v9028_v59  ;;  %v9060_v7 = vld [vmem:[#allocation16 + $0x1fa8] sm:$0xff] }
 0xa61   :  { %14545 = vmatpush1.bf16.msra.mxu1 %v18036_v6  ;;  %v18076_v6 = vcombine.low %v9023_v58, %v9027_v32  ;;  %v9063_v58 = vld [vmem:[#allocation16 + $0x1fc0] sm:$0xff] }
 0xa62   :  { %14889 = vmatpush1.bf16.msra.mxu0 %v18038_v33  ;;  %14546 = vmatprep.subr.bf16.mxu1 %v18045_v36  ;;  %v18078_v33 = vcombine.low %v9024_v37, %v9028_v59  ;;  %v18085_v36 = vcombine.high %v9031_v0, %v9035_v60  ;;  %v9067_v32 = vld [vmem:[#allocation16 + $0x1fe0] sm:$0xff]  ;;  %v9064_v37 = vld [vmem:[#allocation16 + $0x1fc8] sm:$0xff] }
 0xa63   :  { %14890 = vmatprep.subr.bf16.mxu0 %v18047_v8  ;;  %v18087_v8 = vcombine.high %v9032_v1, %v9036_v26  ;;  %v9068_v59 = vld [vmem:[#allocation16 + $0x1fe8] sm:$0xff] }
 0xa65   :  { %14547 = vmatpush1.bf16.msra.mxu1 %v18044_v23  ;;  %v18084_v23 = vcombine.low %v9031_v0, %v9035_v60  ;;  %v8049_v0 = vld [vmem:[#allocation16 + $0x10] sm:$0xff] }
 0xa66   :  { %14891 = vmatpush1.bf16.msra.mxu0 %v18046_v27  ;;  %14548 = vmatprep.subr.bf16.mxu1 %v18053_v11  ;;  %v18086_v27 = vcombine.low %v9032_v1, %v9036_v26  ;;  %v18093_v11 = vcombine.high %v9039_v41, %v9043_v53  ;;  %v8053_v60 = vld [vmem:[#allocation16 + $0x30] sm:$0xff]  ;;  %v8050_v1 = vld [vmem:[#allocation16 + $0x18] sm:$0xff] }
 0xa67   :  { %14892 = vmatprep.subr.bf16.mxu0 %v18055_v57  ;;  %v18095_v57 = vcombine.high %v9040_v54, %v9044_v56  ;;  %v8054_v26 = vld [vmem:[#allocation16 + $0x38] sm:$0xff] }
 0xa69   :  { %14549 = vmatpush1.bf16.msra.mxu1 %v18052_v46  ;;  %v18092_v46 = vcombine.low %v9039_v41, %v9043_v53  ;;  %v8057_v41 = vld [vmem:[#allocation16 + $0x50] sm:$0xff] }
 0xa6a   :  { %14893 = vmatpush1.bf16.msra.mxu0 %v18054_v19  ;;  %14550 = vmatprep.subr.bf16.mxu1 %v18061_v13  ;;  %v18094_v19 = vcombine.low %v9040_v54, %v9044_v56  ;;  %v18101_v13 = vcombine.high %v9047_v4, %v9051_v15  ;;  %v8061_v53 = vld [vmem:[#allocation16 + $0x70] sm:$0xff]  ;;  %v17104_v54 = vcombine.low %v8049_v0, %v8053_v60  ;;  %v8058_v56 = vld [vmem:[#allocation16 + $0x58] sm:$0xff] }
 0xa6b   :  { %14894 = vmatprep.subr.bf16.mxu0 %v18063_v24  ;;  %v18103_v24 = vcombine.high %v9048_v45, %v9052_v5 }
 0xa6d   :  { %14551 = vmatpush1.bf16.msra.mxu1 %v18060_v42  ;;  %v18100_v42 = vcombine.low %v9047_v4, %v9051_v15  ;;  %v8069_v4 = vld [vmem:[#allocation16 + $0xb0] sm:$0xff] }
 0xa6e   :  { %14895 = vmatpush1.bf16.msra.mxu0 %v18062_v30  ;;  %14552 = vmatprep.subr.bf16.mxu1 %v18069_v28  ;;  %v18102_v30 = vcombine.low %v9048_v45, %v9052_v5  ;;  %v18109_v28 = vcombine.high %v9055_v21, %v9059_v43  ;;  %v8066_v45 = vld [vmem:[#allocation16 + $0x98] sm:$0xff] }
 0xa6f   :  { %14896 = vmatprep.subr.bf16.mxu0 %v18071_v31  ;;  %v18111_v31 = vcombine.high %v9056_v25, %v9060_v7  ;;  %v8070_v5 = vld [vmem:[#allocation16 + $0xb8] sm:$0xff] }
 0xa71   :  { %14553 = vmatpush1.bf16.msra.mxu1 %v18068_v38  ;;  %v18108_v38 = vcombine.low %v9055_v21, %v9059_v43  ;;  %v8073_v21 = vld [vmem:[#allocation16 + $0xd0] sm:$0xff] }
 0xa72   :  { %14897 = vmatpush1.bf16.msra.mxu0 %v18070_v39  ;;  %14554 = vmatprep.subr.bf16.mxu1 %v18077_v20  ;;  %v18110_v39 = vcombine.low %v9056_v25, %v9060_v7  ;;  %v18117_v20 = vcombine.high %v9063_v58, %v9067_v32  ;;  %v8077_v43 = vld [vmem:[#allocation16 + $0xf0] sm:$0xff]  ;;  %v8074_v25 = vld [vmem:[#allocation16 + $0xd8] sm:$0xff] }
 0xa73   :  { %14898 = vmatprep.subr.bf16.mxu0 %v18079_v12  ;;  %v18119_v12 = vcombine.high %v9064_v37, %v9068_v59  ;;  %v8078_v7 = vld [vmem:[#allocation16 + $0xf8] sm:$0xff] }
 0xa75   :  { %14555 = vmatpush1.bf16.msra.mxu1 %v18076_v6  ;;  %v18116_v6 = vcombine.low %v9063_v58, %v9067_v32  ;;  %v8081_v58 = vld [vmem:[#allocation16 + $0x110] sm:$0xff] }
 0xa76   :  { %14899 = vmatpush1.bf16.msra.mxu0 %v18078_v33  ;;  %14556 = vmatprep.subr.bf16.mxu1 %v18085_v36  ;;  %v18118_v33 = vcombine.low %v9064_v37, %v9068_v59  ;;  %v17105_v36 = vcombine.high %v8049_v0, %v8053_v60  ;;  %v8085_v32 = vld [vmem:[#allocation16 + $0x130] sm:$0xff]  ;;  %v8082_v37 = vld [vmem:[#allocation16 + $0x118] sm:$0xff] }
 0xa77   :  { %14900 = vmatprep.subr.bf16.mxu0 %v18087_v8  ;;  %v17107_v8 = vcombine.high %v8050_v1, %v8054_v26  ;;  %v8086_v59 = vld [vmem:[#allocation16 + $0x138] sm:$0xff]  ;;  %v8093_v0 = vld [vmem:[#allocation16 + $0x170] sm:$0xff] }
 0xa78   :  { %v8090_v60 = vld [vmem:[#allocation16 + $0x158] sm:$0xff] }
 0xa79   :  { %14557 = vmatpush1.bf16.msra.mxu1 %v18084_v23  ;;  %v8062_v23 = vld [vmem:[#allocation16 + $0x78] sm:$0xff] }
 0xa7a   :  { %14901 = vmatpush1.bf16.msra.mxu0 %v18086_v27  ;;  %14558 = vmatprep.subr.bf16.mxu1 %v18093_v11  ;;  %v17106_v27 = vcombine.low %v8050_v1, %v8054_v26  ;;  %v17113_v11 = vcombine.high %v8057_v41, %v8061_v53  ;;  %v17115_v15 = vcombine.high %v8058_v56, %v8062_v23  ;;  %v8094_v1 = vld [vmem:[#allocation16 + $0x178] sm:$0xff] }
 0xa7b   :  { %14902 = vmatprep.subr.bf16.mxu0 %v18095_v57  ;;  %v8065_v57 = vld [vmem:[#allocation16 + $0x90] sm:$0xff]  ;;  %v17136_v26 = vcombine.low %v8081_v58, %v8085_v32 }
 0xa7d   :  { %14559 = vmatpush1.bf16.msra.mxu1 %v18092_v46  ;;  %v17112_v46 = vcombine.low %v8057_v41, %v8061_v53  ;;  %v8101_v41 = vld [vmem:[#allocation16 + $0x1b0] sm:$0xff]  ;;  %v8098_v53 = vld [vmem:[#allocation16 + $0x198] sm:$0xff] }
 0xa7e   :  { %14903 = vmatpush1.bf16.msra.mxu0 %v18094_v19  ;;  %14560 = vmatprep.subr.bf16.mxu1 %v18101_v13  ;;  %v17114_v19 = vcombine.low %v8058_v56, %v8062_v23  ;;  %v17121_v13 = vcombine.high %v8065_v57, %v8069_v4  ;;  %v17146_v23 = vcombine.low %v8090_v60, %v8094_v1 }
 0xa7f   :  { %14904 = vmatprep.subr.bf16.mxu0 %v18103_v24  ;;  %v17123_v24 = vcombine.high %v8066_v45, %v8070_v5 }
 0xa81   :  { %14561 = vmatpush1.bf16.msra.mxu1 %v18100_v42  ;;  %v17120_v42 = vcombine.low %v8065_v57, %v8069_v4  ;;  %v8105_v57 = vld [vmem:[#allocation16 + $0x1d0] sm:$0xff] }
 0xa82   :  { %14905 = vmatpush1.bf16.msra.mxu0 %v18102_v30  ;;  %14562 = vmatprep.subr.bf16.mxu1 %v18109_v28  ;;  %v17122_v30 = vcombine.low %v8066_v45, %v8070_v5  ;;  %v17129_v28 = vcombine.high %v8073_v21, %v8077_v43  ;;  %v8109_v4 = vld [vmem:[#allocation16 + $0x1f0] sm:$0xff]  ;;  %v8110_v45 = vld [vmem:[#allocation16 + $0x1f8] sm:$0xff] }
 0xa83   :  { %14906 = vmatprep.subr.bf16.mxu0 %v18111_v31  ;;  %v17131_v31 = vcombine.high %v8074_v25, %v8078_v7 }
 0xa85   :  { %14563 = vmatpush1.bf16.msra.mxu1 %v18108_v38  ;;  %v17130_v38 = vcombine.low %v8074_v25, %v8078_v7  ;;  %v8118_v25 = vld [vmem:[#allocation16 + $0x238] sm:$0xff]  ;;  %v17160_v7 = vcombine.low %v8105_v57, %v8109_v4 }
 0xa86   :  { %14907 = vmatpush1.bf16.msra.mxu0 %v18110_v39  ;;  %14564 = vmatprep.subr.bf16.mxu1 %v18117_v20  ;;  %v17137_v39 = vcombine.high %v8081_v58, %v8085_v32  ;;  %v17139_v20 = vcombine.high %v8082_v37, %v8086_v59  ;;  %v8125_v58 = vld [vmem:[#allocation16 + $0x270] sm:$0xff]  ;;  %v8122_v32 = vld [vmem:[#allocation16 + $0x258] sm:$0xff] }
 0xa87   :  { %14908 = vmatprep.subr.bf16.mxu0 %v18119_v12  ;;  %v8089_v12 = vld [vmem:[#allocation16 + $0x150] sm:$0xff] }
 0xa88   :  { %v17144_v56 = vcombine.low %v8089_v12, %v8093_v0 }
 0xa89   :  { %14565 = vmatpush1.bf16.msra.mxu1 %v18116_v6  ;;  %v17138_v6 = vcombine.low %v8082_v37, %v8086_v59  ;;  %v8126_v37 = vld [vmem:[#allocation16 + $0x278] sm:$0xff] }
 0xa8a   :  { %14909 = vmatpush1.bf16.msra.mxu0 %v18118_v33  ;;  %14921 = vmatprep.subr.bf16.mxu1 %v17105_v36  ;;  %v17145_v33 = vcombine.high %v8089_v12, %v8093_v0  ;;  %v17147_v36 = vcombine.high %v8090_v60, %v8094_v1  ;;  %v8133_v12 = vld [vmem:[#allocation16 + $0x2b0] sm:$0xff]  ;;  %v8130_v0 = vld [vmem:[#allocation16 + $0x298] sm:$0xff] }
 0xa8b   :  { %15265 = vmatprep.subr.bf16.mxu0 %v17107_v8  ;;  %v8097_v8 = vld [vmem:[#allocation16 + $0x190] sm:$0xff]  ;;  %v8134_v60 = vld [vmem:[#allocation16 + $0x2b8] sm:$0xff] }
 0xa8c   :  { %14567 = vmatmul.mubr.bf16.vlgmr.msra.gmra.mrb[104].mxu1 %v21127_v17  ;;  %v17152_v5 = vcombine.low %v8097_v8, %v8101_v41 }
 0xa8d   :  { %14911 = vmatmul.mubr.bf16.vlgmr.msra.gmra.mrb[104].mxu0 %v21127_v17  ;;  %14922 = vmatpush1.bf16.msra.mxu1 %v17104_v54  ;;  %v8102_v54 = vld [vmem:[#allocation16 + $0x1b8] sm:$0xff] }
 0xa8e   :  { %14953 = vmatprep.mubr.bf16.mxu1 %v21031_v16  ;;  %15266 = vmatpush1.bf16.msra.mxu0 %v17106_v27  ;;  %v17153_v27 = vcombine.high %v8097_v8, %v8101_v41  ;;  %v8141_v8 = vld [vmem:[#allocation16 + $0x2f0] sm:$0xff]  ;;  %v8138_v41 = vld [vmem:[#allocation16 + $0x2d8] sm:$0xff] }
 0xa8f   :  { %15297 = vmatprep.mubr.bf16.mxu0 %v21031_v16  ;;  %14923 = vmatprep.subr.bf16.mxu1 %v17113_v11  ;;  %v17128_v16 = vcombine.low %v8073_v21, %v8077_v43  ;;  %v17155_v11 = vcombine.high %v8098_v53, %v8102_v54  ;;  %v8117_v21 = vld [vmem:[#allocation16 + $0x230] sm:$0xff]  ;;  %v8114_v43 = vld [vmem:[#allocation16 + $0x218] sm:$0xff] }
 0xa90   :  { %15267 = vmatprep.subr.bf16.mxu0 %v17115_v15  ;;  %v8106_v15 = vld [vmem:[#allocation16 + $0x1d8] sm:$0xff] }
 0xa91   :  { %14924 = vmatpush1.bf16.msra.mxu1 %v17112_v46  ;;  %v17154_v46 = vcombine.low %v8098_v53, %v8102_v54  ;;  %v8142_v53 = vld [vmem:[#allocation16 + $0x2f8] sm:$0xff] }
 0xa92   :  { %15268 = vmatpush1.bf16.msra.mxu0 %v17114_v19  ;;  %14925 = vmatprep.subr.bf16.mxu1 %v17121_v13  ;;  %v17161_v19 = vcombine.high %v8105_v57, %v8109_v4  ;;  %v17163_v13 = vcombine.high %v8106_v15, %v8110_v45  ;;  %v8149_v57 = vld [vmem:[#allocation16 + $0x330] sm:$0xff]  ;;  %v8146_v4 = vld [vmem:[#allocation16 + $0x318] sm:$0xff] }
 0xa93   :  { %15269 = vmatprep.subr.bf16.mxu0 %v17123_v24  ;;  %v8113_v24 = vld [vmem:[#allocation16 + $0x210] sm:$0xff] }
 0xa94   :  { %v17168_v59 = vcombine.low %v8113_v24, %v8117_v21 }
 0xa95   :  { %14926 = vmatpush1.bf16.msra.mxu1 %v17120_v42  ;;  %v17162_v42 = vcombine.low %v8106_v15, %v8110_v45  ;;  %v8150_v15 = vld [vmem:[#allocation16 + $0x338] sm:$0xff] }
 0xa96   :  { %15270 = vmatpush1.bf16.msra.mxu0 %v17122_v30  ;;  %14927 = vmatprep.subr.bf16.mxu1 %v17129_v28  ;;  %v17169_v30 = vcombine.high %v8113_v24, %v8117_v21  ;;  %v17171_v28 = vcombine.high %v8114_v43, %v8118_v25  ;;  %v8157_v24 = vld [vmem:[#allocation16 + $0x370] sm:$0xff]  ;;  %v8154_v21 = vld [vmem:[#allocation16 + $0x358] sm:$0xff] }
 0xa97   :  { %15271 = vmatprep.subr.bf16.mxu0 %v17131_v31  ;;  %v8121_v31 = vld [vmem:[#allocation16 + $0x250] sm:$0xff] }
 0xa98   :  { %v17176_v1 = vcombine.low %v8121_v31, %v8125_v58 }
 0xa99   :  { %14928 = vmatpush1.bf16.msra.mxu1 %v17128_v16  ;;  %v17170_v16 = vcombine.low %v8114_v43, %v8118_v25  ;;  %v8158_v43 = vld [vmem:[#allocation16 + $0x378] sm:$0xff] }
 0xa9a   :  { %15272 = vmatpush1.bf16.msra.mxu0 %v17130_v38  ;;  %14929 = vmatprep.subr.bf16.mxu1 %v17137_v39  ;;  %v17177_v38 = vcombine.high %v8121_v31, %v8125_v58  ;;  %v17179_v39 = vcombine.high %v8122_v32, %v8126_v37  ;;  %v8165_v31 = vld [vmem:[#allocation16 + $0x3b0] sm:$0xff]  ;;  %v8162_v58 = vld [vmem:[#allocation16 + $0x398] sm:$0xff] }
 0xa9b   :  { %15273 = vmatprep.subr.bf16.mxu0 %v17139_v20  ;;  %v8129_v20 = vld [vmem:[#allocation16 + $0x290] sm:$0xff] }
 0xa9c   :  { %v17184_v54 = vcombine.low %v8129_v20, %v8133_v12 }
 0xa9d   :  { %14930 = vmatpush1.bf16.msra.mxu1 %v17136_v26  ;;  %v17178_v26 = vcombine.low %v8122_v32, %v8126_v37  ;;  %v8166_v32 = vld [vmem:[#allocation16 + $0x3b8] sm:$0xff] }
 0xa9e   :  { %15274 = vmatpush1.bf16.msra.mxu0 %v17138_v6  ;;  %14931 = vmatprep.subr.bf16.mxu1 %v17145_v33  ;;  %v17185_v6 = vcombine.high %v8129_v20, %v8133_v12  ;;  %v17187_v33 = vcombine.high %v8130_v0, %v8134_v60  ;;  %v8173_v20 = vld [vmem:[#allocation16 + $0x3f0] sm:$0xff]  ;;  %v8170_v12 = vld [vmem:[#allocation16 + $0x3d8] sm:$0xff] }
 0xa9f   :  { %15275 = vmatprep.subr.bf16.mxu0 %v17147_v36  ;;  %v8137_v36 = vld [vmem:[#allocation16 + $0x2d0] sm:$0xff] }
 0xaa0   :  { %v17192_v45 = vcombine.low %v8137_v36, %v8141_v8 }
 0xaa1   :  { %14932 = vmatpush1.bf16.msra.mxu1 %v17144_v56  ;;  %v17186_v56 = vcombine.low %v8130_v0, %v8134_v60  ;;  %v8174_v0 = vld [vmem:[#allocation16 + $0x3f8] sm:$0xff] }
 0xaa2   :  { %15276 = vmatpush1.bf16.msra.mxu0 %v17146_v23  ;;  %14933 = vmatprep.subr.bf16.mxu1 %v17153_v27  ;;  %v17193_v23 = vcombine.high %v8137_v36, %v8141_v8  ;;  %v17195_v27 = vcombine.high %v8138_v41, %v8142_v53  ;;  %v8181_v36 = vld [vmem:[#allocation16 + $0x430] sm:$0xff]  ;;  %v8178_v8 = vld [vmem:[#allocation16 + $0x418] sm:$0xff] }
 0xaa3   :  { %15277 = vmatprep.subr.bf16.mxu0 %v17155_v11  ;;  %v8145_v11 = vld [vmem:[#allocation16 + $0x310] sm:$0xff] }
 0xaa4   :  { %v17200_v25 = vcombine.low %v8145_v11, %v8149_v57 }
 0xaa5   :  { %14934 = vmatpush1.bf16.msra.mxu1 %v17152_v5  ;;  %v17194_v5 = vcombine.low %v8138_v41, %v8142_v53  ;;  %v8182_v41 = vld [vmem:[#allocation16 + $0x438] sm:$0xff] }
 0xaa6   :  { %15278 = vmatpush1.bf16.msra.mxu0 %v17154_v46  ;;  %14935 = vmatprep.subr.bf16.mxu1 %v17161_v19  ;;  %v17201_v46 = vcombine.high %v8145_v11, %v8149_v57  ;;  %v17203_v19 = vcombine.high %v8146_v4, %v8150_v15  ;;  %v8189_v11 = vld [vmem:[#allocation16 + $0x470] sm:$0xff] }
 0xaa7   :  { %15279 = vmatprep.subr.bf16.mxu0 %v17163_v13  ;;  %v8153_v13 = vld [vmem:[#allocation16 + $0x350] sm:$0xff] }
 0xaa8   :  { %v17208_v37 = vcombine.low %v8153_v13, %v8157_v24 }
 0xaa9   :  { %14936 = vmatpush1.bf16.msra.mxu1 %v17160_v7  ;;  %v17202_v7 = vcombine.low %v8146_v4, %v8150_v15  ;;  %v8186_v4 = vld [vmem:[#allocation16 + $0x458] sm:$0xff] }
 0xaaa   :  { %15280 = vmatpush1.bf16.msra.mxu0 %v17162_v42  ;;  %14937 = vmatprep.subr.bf16.mxu1 %v17169_v30  ;;  %v17209_v42 = vcombine.high %v8153_v13, %v8157_v24  ;;  %v17211_v30 = vcombine.high %v8154_v21, %v8158_v43  ;;  %v8190_v15 = vld [vmem:[#allocation16 + $0x478] sm:$0xff] }
 0xaab   :  { %15281 = vmatprep.subr.bf16.mxu0 %v17171_v28  ;;  %v8161_v28 = vld [vmem:[#allocation16 + $0x390] sm:$0xff]  ;;  %v17243_v13 = vcombine.high %v8186_v4, %v8190_v15  ;;  %v8194_v24 = vld [vmem:[#allocation16 + $0x498] sm:$0xff] }
 0xaac   :  { %v17216_v60 = vcombine.low %v8161_v28, %v8165_v31 }
 0xaad   :  { %14938 = vmatpush1.bf16.msra.mxu1 %v17168_v59  ;;  %v17210_v59 = vcombine.low %v8154_v21, %v8158_v43  ;;  %v8198_v21 = vld [vmem:[#allocation16 + $0x4b8] sm:$0xff] }
 0xaae   :  { %15282 = vmatpush1.bf16.msra.mxu0 %v17170_v16  ;;  %14939 = vmatprep.subr.bf16.mxu1 %v17177_v38  ;;  %v17217_v16 = vcombine.high %v8161_v28, %v8165_v31  ;;  %v17219_v38 = vcombine.high %v8162_v58, %v8166_v32  ;;  %v8205_v28 = vld [vmem:[#allocation16 + $0x4f0] sm:$0xff]  ;;  %v8202_v31 = vld [vmem:[#allocation16 + $0x4d8] sm:$0xff] }
 0xaaf   :  { %15283 = vmatprep.subr.bf16.mxu0 %v17179_v39  ;;  %v8169_v39 = vld [vmem:[#allocation16 + $0x3d0] sm:$0xff] }
 0xab0   :  { %v17224_v53 = vcombine.low %v8169_v39, %v8173_v20 }
 0xab1   :  { %14940 = vmatpush1.bf16.msra.mxu1 %v17176_v1  ;;  %v17218_v1 = vcombine.low %v8162_v58, %v8166_v32  ;;  %v8206_v58 = vld [vmem:[#allocation16 + $0x4f8] sm:$0xff] }
 0xab2   :  { %15284 = vmatpush1.bf16.msra.mxu0 %v17178_v26  ;;  %14941 = vmatprep.subr.bf16.mxu1 %v17185_v6  ;;  %v17225_v26 = vcombine.high %v8169_v39, %v8173_v20  ;;  %v17227_v6 = vcombine.high %v8170_v12, %v8174_v0  ;;  %v8210_v39 = vld [vmem:[#allocation16 + $0x518] sm:$0xff] }
 0xab3   :  { %15285 = vmatprep.subr.bf16.mxu0 %v17187_v33  ;;  %v8177_v33 = vld [vmem:[#allocation16 + $0x410] sm:$0xff]  ;;  %v8214_v20 = vld [vmem:[#allocation16 + $0x538] sm:$0xff] }
 0xab4   :  { %v17232_v57 = vcombine.low %v8177_v33, %v8181_v36 }
 0xab5   :  { %14942 = vmatpush1.bf16.msra.mxu1 %v17184_v54  ;;  %v17226_v54 = vcombine.low %v8170_v12, %v8174_v0  ;;  %v17258_v12 = vcombine.low %v8202_v31, %v8206_v58 }
 0xab6   :  { %15286 = vmatpush1.bf16.msra.mxu0 %v17186_v56  ;;  %14943 = vmatprep.subr.bf16.mxu1 %v17193_v23  ;;  %v17233_v56 = vcombine.high %v8177_v33, %v8181_v36  ;;  %v17235_v23 = vcombine.high %v8178_v8, %v8182_v41  ;;  %v8222_v33 = vld [vmem:[#allocation16 + $0x578] sm:$0xff] }
 0xab7   :  { %15287 = vmatprep.subr.bf16.mxu0 %v17195_v27  ;;  %v8185_v27 = vld [vmem:[#allocation16 + $0x450] sm:$0xff] }
 0xab8   :  { %v17240_v43 = vcombine.low %v8185_v27, %v8189_v11 }
 0xab9   :  { %14944 = vmatpush1.bf16.msra.mxu1 %v17192_v45  ;;  %v17234_v45 = vcombine.low %v8178_v8, %v8182_v41  ;;  %v17266_v8 = vcombine.low %v8210_v39, %v8214_v20 }
 0xaba   :  { %15288 = vmatpush1.bf16.msra.mxu0 %v17194_v5  ;;  %14945 = vmatprep.subr.bf16.mxu1 %v17201_v46  ;;  %v17241_v5 = vcombine.high %v8185_v27, %v8189_v11  ;;  %v8193_v46 = vld [vmem:[#allocation16 + $0x490] sm:$0xff]  ;;  %v8230_v27 = vld [vmem:[#allocation16 + $0x5b8] sm:$0xff] }
 0xabb   :  { %15289 = vmatprep.subr.bf16.mxu0 %v17203_v19  ;;  %v8197_v19 = vld [vmem:[#allocation16 + $0x4b0] sm:$0xff] }
 0xabc   :  { %v17248_v32 = vcombine.low %v8193_v46, %v8197_v19 }
 0xabd   :  { %14946 = vmatpush1.bf16.msra.mxu1 %v17200_v25  ;;  %v17242_v25 = vcombine.low %v8186_v4, %v8190_v15 }
 0xabe   :  { %15290 = vmatpush1.bf16.msra.mxu0 %v17202_v7  ;;  %14947 = vmatprep.subr.bf16.mxu1 %v17209_v42  ;;  %v17249_v7 = vcombine.high %v8193_v46, %v8197_v19  ;;  %v17251_v42 = vcombine.high %v8194_v24, %v8198_v21  ;;  %v8234_v46 = vld [vmem:[#allocation16 + $0x5d8] sm:$0xff] }
 0xabf   :  { %15291 = vmatprep.subr.bf16.mxu0 %v17211_v30  ;;  %v8201_v30 = vld [vmem:[#allocation16 + $0x4d0] sm:$0xff]  ;;  %v8238_v19 = vld [vmem:[#allocation16 + $0x5f8] sm:$0xff] }
 0xac1   :  { %14948 = vmatpush1.bf16.msra.mxu1 %v17208_v37  ;;  %v17257_v37 = vcombine.high %v8201_v30, %v8205_v28 }
 0xac2   :  { %15292 = vmatpush1.bf16.msra.mxu0 %v17210_v59  ;;  %14949 = vmatprep.subr.bf16.mxu1 %v17217_v16  ;;  %v17259_v59 = vcombine.high %v8202_v31, %v8206_v58  ;;  %v8209_v16 = vld [vmem:[#allocation16 + $0x510] sm:$0xff]  ;;  %v17290_v31 = vcombine.low %v8234_v46, %v8238_v19 }
 0xac3   :  { %15293 = vmatprep.subr.bf16.mxu0 %v17219_v38  ;;  %v8213_v38 = vld [vmem:[#allocation16 + $0x530] sm:$0xff] }
 0xac4   :  { %v17265_v0 = vcombine.high %v8209_v16, %v8213_v38  ;;  %v17264_v36 = vcombine.low %v8209_v16, %v8213_v38  ;;  %v8254_v16 = vld [vmem:[#allocation16 + $0x678] sm:$0xff] }
 0xac5   :  { %14950 = vmatpush1.bf16.msra.mxu1 %v17216_v60  ;;  %v17267_v60 = vcombine.high %v8210_v39, %v8214_v20 }
 0xac6   :  { %15294 = vmatpush1.bf16.msra.mxu0 %v17218_v1  ;;  %14951 = vmatprep.subr.bf16.mxu1 %v17225_v26  ;;  %v8217_v1 = vld [vmem:[#allocation16 + $0x550] sm:$0xff] }
 0xac7   :  { %15295 = vmatprep.subr.bf16.mxu0 %v17227_v6  ;;  %v8221_v26 = vld [vmem:[#allocation16 + $0x570] sm:$0xff]  ;;  %v8218_v6 = vld [vmem:[#allocation16 + $0x558] sm:$0xff] }
 0xac8   :  { %v17273_v41 = vcombine.high %v8217_v1, %v8221_v26  ;;  %v17272_v11 = vcombine.low %v8217_v1, %v8221_v26  ;;  %v8262_v1 = vld [vmem:[#allocation16 + $0x6b8] sm:$0xff] }
 0xac9   :  { %14952 = vmatpush1.bf16.msra.mxu1 %v17224_v53  ;;  %v17275_v53 = vcombine.high %v8218_v6, %v8222_v33 }
 0xaca   :  { %15296 = vmatpush1.bf16.msra.mxu0 %v17226_v54  ;;  %14964 = vmatprep.subr.bf16.mxu1 %v17233_v56  ;;  %v8225_v54 = vld [vmem:[#allocation16 + $0x590] sm:$0xff] }
 0xacb   :  { %15308 = vmatprep.subr.bf16.mxu0 %v17235_v23  ;;  %v8229_v56 = vld [vmem:[#allocation16 + $0x5b0] sm:$0xff]  ;;  %v8226_v23 = vld [vmem:[#allocation16 + $0x598] sm:$0xff] }
 0xacc   :  { %14954 = vmatmul.mubr.bf16.vlgmr.msra.gmra.mrb[108].mxu1 %v21019_v3  ;;  %v17281_v4 = vcombine.high %v8225_v54, %v8229_v56  ;;  %v17283_v15 = vcombine.high %v8226_v23, %v8230_v27 }
 0xacd   :  { %15298 = vmatmul.mubr.bf16.vlgmr.msra.gmra.mrb[108].mxu0 %v21019_v3  ;;  %14965 = vmatpush1.bf16.msra.mxu1 %v17232_v57  ;;  %v17250_v3 = vcombine.low %v8194_v24, %v8198_v21  ;;  %v17274_v57 = vcombine.low %v8218_v6, %v8222_v33  ;;  %v17282_v24 = vcombine.low %v8226_v23, %v8230_v27 }
 0xace   :  { %14996 = vmatprep.mubr.bf16.mxu1 %v21097_v55  ;;  %15309 = vmatpush1.bf16.msra.mxu0 %v17234_v45  ;;  %v8233_v45 = vld [vmem:[#allocation16 + $0x5d0] sm:$0xff] }
 0xacf   :  { %15340 = vmatprep.mubr.bf16.mxu0 %v21097_v55  ;;  %14966 = vmatprep.subr.bf16.mxu1 %v17241_v5  ;;  %v17256_v55 = vcombine.low %v8201_v30, %v8205_v28  ;;  %v8237_v5 = vld [vmem:[#allocation16 + $0x5f0] sm:$0xff]  ;;  %v8246_v30 = vld [vmem:[#allocation16 + $0x638] sm:$0xff] }
 0xad0   :  { %15310 = vmatprep.subr.bf16.mxu0 %v17243_v13  ;;  %v17280_v13 = vcombine.low %v8225_v54, %v8229_v56  ;;  %v17289_v21 = vcombine.high %v8233_v45, %v8237_v5  ;;  %v17288_v28 = vcombine.low %v8233_v45, %v8237_v5  ;;  %v8270_v54 = vld [vmem:[#allocation16 + $0x6f8] sm:$0xff] }
 0xad1   :  { %14967 = vmatpush1.bf16.msra.mxu1 %v17240_v43  ;;  %v17291_v43 = vcombine.high %v8234_v46, %v8238_v19  ;;  %v8278_v45 = vld [vmem:[#allocation16 + $0x738] sm:$0xff] }
 0xad2   :  { %15311 = vmatpush1.bf16.msra.mxu0 %v17242_v25  ;;  %14968 = vmatprep.subr.bf16.mxu1 %v17249_v7  ;;  %v8241_v25 = vld [vmem:[#allocation16 + $0x610] sm:$0xff] }
 0xad3   :  { %15312 = vmatprep.subr.bf16.mxu0 %v17251_v42  ;;  %v8245_v7 = vld [vmem:[#allocation16 + $0x630] sm:$0xff]  ;;  %v8242_v42 = vld [vmem:[#allocation16 + $0x618] sm:$0xff] }
 0xad4   :  { %v17297_v58 = vcombine.high %v8241_v25, %v8245_v7  ;;  %v17296_v38 = vcombine.low %v8241_v25, %v8245_v7  ;;  %v17298_v39 = vcombine.low %v8242_v42, %v8246_v30  ;;  %v8286_v25 = vld [vmem:[#allocation16 + $0x778] sm:$0xff] }
 0xad5   :  { %14969 = vmatpush1.bf16.msra.mxu1 %v17248_v32  ;;  %v17299_v32 = vcombine.high %v8242_v42, %v8246_v30 }
 0xad6   :  { %15313 = vmatpush1.bf16.msra.mxu0 %v17250_v3  ;;  %14970 = vmatprep.subr.bf16.mxu1 %v17257_v37  ;;  %v8249_v3 = vld [vmem:[#allocation16 + $0x650] sm:$0xff] }
 0xad7   :  { %15314 = vmatprep.subr.bf16.mxu0 %v17259_v59  ;;  %v8253_v37 = vld [vmem:[#allocation16 + $0x670] sm:$0xff]  ;;  %v8250_v59 = vld [vmem:[#allocation16 + $0x658] sm:$0xff] }
 0xad8   :  { %v17305_v20 = vcombine.high %v8249_v3, %v8253_v37  ;;  %v17304_v26 = vcombine.low %v8249_v3, %v8253_v37  ;;  %v17306_v6 = vcombine.low %v8250_v59, %v8254_v16  ;;  %v8294_v3 = vld [vmem:[#allocation16 + $0x7b8] sm:$0xff] }
 0xad9   :  { %14971 = vmatpush1.bf16.msra.mxu1 %v17256_v55  ;;  %v17307_v55 = vcombine.high %v8250_v59, %v8254_v16 }
 0xada   :  { %15315 = vmatpush1.bf16.msra.mxu0 %v17258_v12  ;;  %14972 = vmatprep.subr.bf16.mxu1 %v17265_v0  ;;  %v8257_v12 = vld [vmem:[#allocation16 + $0x690] sm:$0xff] }
 0xadb   :  { %15316 = vmatprep.subr.bf16.mxu0 %v17267_v60  ;;  %v8261_v0 = vld [vmem:[#allocation16 + $0x6b0] sm:$0xff]  ;;  %v8258_v60 = vld [vmem:[#allocation16 + $0x698] sm:$0xff] }
 0xadc   :  { %v17313_v33 = vcombine.high %v8257_v12, %v8261_v0  ;;  %v17312_v56 = vcombine.low %v8257_v12, %v8261_v0  ;;  %v17314_v23 = vcombine.low %v8258_v60, %v8262_v1  ;;  %v8302_v12 = vld [vmem:[#allocation16 + $0x7f8] sm:$0xff] }
 0xadd   :  { %14973 = vmatpush1.bf16.msra.mxu1 %v17264_v36  ;;  %v17315_v36 = vcombine.high %v8258_v60, %v8262_v1 }
 0xade   :  { %15317 = vmatpush1.bf16.msra.mxu0 %v17266_v8  ;;  %14974 = vmatprep.subr.bf16.mxu1 %v17273_v41  ;;  %v8265_v8 = vld [vmem:[#allocation16 + $0x6d0] sm:$0xff] }
 0xadf   :  { %15318 = vmatprep.subr.bf16.mxu0 %v17275_v53  ;;  %v8269_v41 = vld [vmem:[#allocation16 + $0x6f0] sm:$0xff]  ;;  %v8266_v53 = vld [vmem:[#allocation16 + $0x6d8] sm:$0xff] }
 0xae0   :  { %v17321_v27 = vcombine.high %v8265_v8, %v8269_v41  ;;  %v17320_v5 = vcombine.low %v8265_v8, %v8269_v41  ;;  %v17322_v46 = vcombine.low %v8266_v53, %v8270_v54  ;;  %v8310_v8 = vld [vmem:[#allocation16 + $0x838] sm:$0xff] }
 0xae1   :  { %14975 = vmatpush1.bf16.msra.mxu1 %v17272_v11  ;;  %v17323_v11 = vcombine.high %v8266_v53, %v8270_v54 }
 0xae2   :  { %15319 = vmatpush1.bf16.msra.mxu0 %v17274_v57  ;;  %14976 = vmatprep.subr.bf16.mxu1 %v17281_v4  ;;  %v8273_v57 = vld [vmem:[#allocation16 + $0x710] sm:$0xff] }
 0xae3   :  { %15320 = vmatprep.subr.bf16.mxu0 %v17283_v15  ;;  %v8277_v4 = vld [vmem:[#allocation16 + $0x730] sm:$0xff]  ;;  %v8274_v15 = vld [vmem:[#allocation16 + $0x718] sm:$0xff] }
 0xae4   :  { %v17329_v19 = vcombine.high %v8273_v57, %v8277_v4  ;;  %v17328_v7 = vcombine.low %v8273_v57, %v8277_v4  ;;  %v17330_v42 = vcombine.low %v8274_v15, %v8278_v45  ;;  %v8314_v57 = vld [vmem:[#allocation16 + $0x858] sm:$0xff] }
 0xae5   :  { %14977 = vmatpush1.bf16.msra.mxu1 %v17280_v13  ;;  %v17331_v13 = vcombine.high %v8274_v15, %v8278_v45  ;;  %v8318_v4 = vld [vmem:[#allocation16 + $0x878] sm:$0xff] }
 0xae6   :  { %15321 = vmatpush1.bf16.msra.mxu0 %v17282_v24  ;;  %14978 = vmatprep.subr.bf16.mxu1 %v17289_v21  ;;  %v8281_v24 = vld [vmem:[#allocation16 + $0x750] sm:$0xff] }
 0xae7   :  { %15322 = vmatprep.subr.bf16.mxu0 %v17291_v43  ;;  %v8285_v21 = vld [vmem:[#allocation16 + $0x770] sm:$0xff]  ;;  %v8282_v43 = vld [vmem:[#allocation16 + $0x758] sm:$0xff] }
 0xae8   :  { %v17337_v30 = vcombine.high %v8281_v24, %v8285_v21  ;;  %v17336_v37 = vcombine.low %v8281_v24, %v8285_v21  ;;  %v17338_v59 = vcombine.low %v8282_v43, %v8286_v25  ;;  %v8326_v24 = vld [vmem:[#allocation16 + $0x8b8] sm:$0xff] }
 0xae9   :  { %14979 = vmatpush1.bf16.msra.mxu1 %v17288_v28  ;;  %v17339_v28 = vcombine.high %v8282_v43, %v8286_v25  ;;  %v17370_v43 = vcombine.low %v8314_v57, %v8318_v4 }
 0xaea   :  { %15323 = vmatpush1.bf16.msra.mxu0 %v17290_v31  ;;  %14980 = vmatprep.subr.bf16.mxu1 %v17297_v58  ;;  %v8289_v31 = vld [vmem:[#allocation16 + $0x790] sm:$0xff] }
 0xaeb   :  { %15324 = vmatprep.subr.bf16.mxu0 %v17299_v32  ;;  %v8293_v58 = vld [vmem:[#allocation16 + $0x7b0] sm:$0xff]  ;;  %v8290_v32 = vld [vmem:[#allocation16 + $0x798] sm:$0xff] }
 0xaec   :  { %v17345_v16 = vcombine.high %v8289_v31, %v8293_v58  ;;  %v17344_v0 = vcombine.low %v8289_v31, %v8293_v58  ;;  %v17346_v60 = vcombine.low %v8290_v32, %v8294_v3  ;;  %v8334_v31 = vld [vmem:[#allocation16 + $0x8f8] sm:$0xff] }
 0xaed   :  { %14981 = vmatpush1.bf16.msra.mxu1 %v17296_v38  ;;  %v17347_v38 = vcombine.high %v8290_v32, %v8294_v3 }
 0xaee   :  { %15325 = vmatpush1.bf16.msra.mxu0 %v17298_v39  ;;  %14982 = vmatprep.subr.bf16.mxu1 %v17305_v20  ;;  %v8297_v39 = vld [vmem:[#allocation16 + $0x7d0] sm:$0xff] }
 0xaef   :  { %15326 = vmatprep.subr.bf16.mxu0 %v17307_v55  ;;  %v8301_v20 = vld [vmem:[#allocation16 + $0x7f0] sm:$0xff]  ;;  %v8298_v55 = vld [vmem:[#allocation16 + $0x7d8] sm:$0xff] }
 0xaf0   :  { %v17353_v1 = vcombine.high %v8297_v39, %v8301_v20  ;;  %v17352_v41 = vcombine.low %v8297_v39, %v8301_v20  ;;  %v17354_v53 = vcombine.low %v8298_v55, %v8302_v12 }
 0xaf1   :  { %14983 = vmatpush1.bf16.msra.mxu1 %v17304_v26  ;;  %v17355_v26 = vcombine.high %v8298_v55, %v8302_v12  ;;  %v8345_v12 = vld [vmem:[#allocation16 + $0x950] sm:$0xff] }
 0xaf2   :  { %15327 = vmatpush1.bf16.msra.mxu0 %v17306_v6  ;;  %14984 = vmatprep.subr.bf16.mxu1 %v17313_v33  ;;  %v8305_v6 = vld [vmem:[#allocation16 + $0x810] sm:$0xff] }
 0xaf3   :  { %15328 = vmatprep.subr.bf16.mxu0 %v17315_v36  ;;  %v8309_v33 = vld [vmem:[#allocation16 + $0x830] sm:$0xff]  ;;  %v8306_v36 = vld [vmem:[#allocation16 + $0x818] sm:$0xff] }
 0xaf4   :  { %v17361_v54 = vcombine.high %v8305_v6, %v8309_v33  ;;  %v17362_v15 = vcombine.low %v8306_v36, %v8310_v8 }
 0xaf5   :  { %14985 = vmatpush1.bf16.msra.mxu1 %v17312_v56  ;;  %v17363_v56 = vcombine.high %v8306_v36, %v8310_v8  ;;  %v8353_v8 = vld [vmem:[#allocation16 + $0x990] sm:$0xff] }
 0xaf6   :  { %15329 = vmatpush1.bf16.msra.mxu0 %v17314_v23  ;;  %14986 = vmatprep.subr.bf16.mxu1 %v17321_v27  ;;  %v8313_v23 = vld [vmem:[#allocation16 + $0x850] sm:$0xff] }
 0xaf7   :  { %15330 = vmatprep.subr.bf16.mxu0 %v17323_v11  ;;  %v8317_v27 = vld [vmem:[#allocation16 + $0x870] sm:$0xff]  ;;  %v17360_v11 = vcombine.low %v8305_v6, %v8309_v33 }
 0xaf8   :  { %v17369_v45 = vcombine.high %v8313_v23, %v8317_v27  ;;  %v17368_v21 = vcombine.low %v8313_v23, %v8317_v27 }
 0xaf9   :  { %14987 = vmatpush1.bf16.msra.mxu1 %v17320_v5  ;;  %v8321_v5 = vld [vmem:[#allocation16 + $0x890] sm:$0xff] }
 0xafa   :  { %15331 = vmatpush1.bf16.msra.mxu0 %v17322_v46  ;;  %14988 = vmatprep.subr.bf16.mxu1 %v17329_v19  ;;  %v8325_v46 = vld [vmem:[#allocation16 + $0x8b0] sm:$0xff]  ;;  %v17371_v19 = vcombine.high %v8314_v57, %v8318_v4 }
 0xafb   :  { %15332 = vmatprep.subr.bf16.mxu0 %v17331_v13  ;;  %v8322_v13 = vld [vmem:[#allocation16 + $0x898] sm:$0xff]  ;;  %v17377_v25 = vcombine.high %v8321_v5, %v8325_v46  ;;  %v17376_v58 = vcombine.low %v8321_v5, %v8325_v46  ;;  %v8361_v57 = vld [vmem:[#allocation16 + $0x9d0] sm:$0xff] }
 0xafc   :  { %v8365_v4 = vld [vmem:[#allocation16 + $0x9f0] sm:$0xff] }
 0xafd   :  { %14989 = vmatpush1.bf16.msra.mxu1 %v17328_v7  ;;  %v17379_v7 = vcombine.high %v8322_v13, %v8326_v24 }
 0xafe   :  { %15333 = vmatpush1.bf16.msra.mxu0 %v17330_v42  ;;  %14990 = vmatprep.subr.bf16.mxu1 %v17337_v30  ;;  %v8329_v42 = vld [vmem:[#allocation16 + $0x8d0] sm:$0xff] }
 0xaff   :  { %15334 = vmatprep.subr.bf16.mxu0 %v17339_v28  ;;  %v8333_v30 = vld [vmem:[#allocation16 + $0x8f0] sm:$0xff]  ;;  %v8330_v28 = vld [vmem:[#allocation16 + $0x8d8] sm:$0xff] }
 0xb00   :  { %v17385_v32 = vcombine.high %v8329_v42, %v8333_v30  ;;  %v17387_v3 = vcombine.high %v8330_v28, %v8334_v31  ;;  %v17386_v39 = vcombine.low %v8330_v28, %v8334_v31  ;;  %v8377_v31 = vld [vmem:[#allocation16 + $0xa50] sm:$0xff] }
 0xb01   :  { %14991 = vmatpush1.bf16.msra.mxu1 %v17336_v37  ;;  %v8337_v37 = vld [vmem:[#allocation16 + $0x910] sm:$0xff] }
 0xb02   :  { %15335 = vmatpush1.bf16.msra.mxu0 %v17338_v59  ;;  %14992 = vmatprep.subr.bf16.mxu1 %v17345_v16  ;;  %v8341_v59 = vld [vmem:[#allocation16 + $0x930] sm:$0xff]  ;;  %v8338_v16 = vld [vmem:[#allocation16 + $0x918] sm:$0xff] }
 0xb03   :  { %15336 = vmatprep.subr.bf16.mxu0 %v17347_v38  ;;  %v8342_v38 = vld [vmem:[#allocation16 + $0x938] sm:$0xff]  ;;  %v17393_v20 = vcombine.high %v8337_v37, %v8341_v59 }
 0xb04   :  { %v17395_v55 = vcombine.high %v8338_v16, %v8342_v38  ;;  %v17394_v6 = vcombine.low %v8338_v16, %v8342_v38  ;;  %v8385_v38 = vld [vmem:[#allocation16 + $0xa90] sm:$0xff] }
 0xb05   :  { %14993 = vmatpush1.bf16.msra.mxu1 %v17344_v0  ;;  %v8349_v0 = vld [vmem:[#allocation16 + $0x970] sm:$0xff] }
 0xb06   :  { %15337 = vmatpush1.bf16.msra.mxu0 %v17346_v60  ;;  %14994 = vmatprep.subr.bf16.mxu1 %v17353_v1  ;;  %v8346_v60 = vld [vmem:[#allocation16 + $0x958] sm:$0xff]  ;;  %v17401_v33 = vcombine.high %v8345_v12, %v8349_v0 }
 0xb07   :  { %15338 = vmatprep.subr.bf16.mxu0 %v17355_v26  ;;  %v8350_v1 = vld [vmem:[#allocation16 + $0x978] sm:$0xff]  ;;  %v17392_v26 = vcombine.low %v8337_v37, %v8341_v59 }
 0xb08   :  { %v17403_v36 = vcombine.high %v8346_v60, %v8350_v1  ;;  %v17402_v23 = vcombine.low %v8346_v60, %v8350_v1  ;;  %v8393_v1 = vld [vmem:[#allocation16 + $0xad0] sm:$0xff] }
 0xb09   :  { %14995 = vmatpush1.bf16.msra.mxu1 %v17352_v41  ;;  %v8357_v41 = vld [vmem:[#allocation16 + $0x9b0] sm:$0xff] }
 0xb0a   :  { %15339 = vmatpush1.bf16.msra.mxu0 %v17354_v53  ;;  %15007 = vmatprep.subr.bf16.mxu1 %v17361_v54  ;;  %v8354_v53 = vld [vmem:[#allocation16 + $0x998] sm:$0xff]  ;;  %v17409_v27 = vcombine.high %v8353_v8, %v8357_v41  ;;  %v17408_v5 = vcombine.low %v8353_v8, %v8357_v41 }
 0xb0b   :  { %15351 = vmatprep.subr.bf16.mxu0 %v17363_v56  ;;  %v8358_v54 = vld [vmem:[#allocation16 + $0x9b8] sm:$0xff]  ;;  %v17400_v56 = vcombine.low %v8345_v12, %v8349_v0 }
 0xb0c   :  { %14997 = vmatmul.mubr.bf16.vlgmr.msra.gmra.mrb[108].mxu1 %v21092_v34  ;;  %v17410_v46 = vcombine.low %v8354_v53, %v8358_v54 }
 0xb0d   :  { %15341 = vmatmul.mubr.bf16.vlgmr.msra.gmra.mrb[108].mxu0 %v21092_v34  ;;  %15008 = vmatpush1.bf16.msra.mxu1 %v17360_v11  ;;  %v17378_v34 = vcombine.low %v8322_v13, %v8326_v24  ;;  %v17411_v11 = vcombine.high %v8354_v53, %v8358_v54  ;;  %v8369_v24 = vld [vmem:[#allocation16 + $0xa10] sm:$0xff] }
 0xb0e   :  { %15039 = vmatprep.mubr.bf16.mxu1 %v21129_v47  ;;  %15352 = vmatpush1.bf16.msra.mxu0 %v17362_v15  ;;  %v8362_v15 = vld [vmem:[#allocation16 + $0x9d8] sm:$0xff]  ;;  %v8401_v54 = vld [vmem:[#allocation16 + $0xb10] sm:$0xff] }
 0xb0f   :  { %15383 = vmatprep.mubr.bf16.mxu0 %v21129_v47  ;;  %15009 = vmatprep.subr.bf16.mxu1 %v17369_v45  ;;  %v17384_v47 = vcombine.low %v8329_v42, %v8333_v30  ;;  %v8366_v45 = vld [vmem:[#allocation16 + $0x9f8] sm:$0xff] }
 0xb10   :  { %15353 = vmatprep.subr.bf16.mxu0 %v17371_v19  ;;  %v17417_v19 = vcombine.high %v8361_v57, %v8365_v4  ;;  %v17419_v13 = vcombine.high %v8362_v15, %v8366_v45  ;;  %v17418_v42 = vcombine.low %v8362_v15, %v8366_v45  ;;  %v8409_v45 = vld [vmem:[#allocation16 + $0xb50] sm:$0xff] }
 0xb11   :  { %15010 = vmatpush1.bf16.msra.mxu1 %v17368_v21  ;;  %v8373_v21 = vld [vmem:[#allocation16 + $0xa30] sm:$0xff] }
 0xb12   :  { %15354 = vmatpush1.bf16.msra.mxu0 %v17370_v43  ;;  %15011 = vmatprep.subr.bf16.mxu1 %v17377_v25  ;;  %v8370_v43 = vld [vmem:[#allocation16 + $0xa18] sm:$0xff]  ;;  %v17425_v30 = vcombine.high %v8369_v24, %v8373_v21 }
 0xb13   :  { %15355 = vmatprep.subr.bf16.mxu0 %v17379_v7  ;;  %v8374_v25 = vld [vmem:[#allocation16 + $0xa38] sm:$0xff]  ;;  %v17416_v7 = vcombine.low %v8361_v57, %v8365_v4 }
 0xb14   :  { %v17427_v28 = vcombine.high %v8370_v43, %v8374_v25  ;;  %v17426_v37 = vcombine.low %v8370_v43, %v8374_v25  ;;  %v8417_v25 = vld [vmem:[#allocation16 + $0xb90] sm:$0xff] }
 0xb15   :  { %15012 = vmatpush1.bf16.msra.mxu1 %v17376_v58  ;;  %v8381_v58 = vld [vmem:[#allocation16 + $0xa70] sm:$0xff] }
 0xb16   :  { %15356 = vmatpush1.bf16.msra.mxu0 %v17378_v34  ;;  %15013 = vmatprep.subr.bf16.mxu1 %v17385_v32  ;;  %v8378_v34 = vld [vmem:[#allocation16 + $0xa58] sm:$0xff]  ;;  %v17433_v59 = vcombine.high %v8377_v31, %v8381_v58 }
 0xb17   :  { %15357 = vmatprep.subr.bf16.mxu0 %v17387_v3  ;;  %v8382_v32 = vld [vmem:[#allocation16 + $0xa78] sm:$0xff]  ;;  %v17424_v3 = vcombine.low %v8369_v24, %v8373_v21 }
 0xb18   :  { %v17435_v16 = vcombine.high %v8378_v34, %v8382_v32  ;;  %v17434_v12 = vcombine.low %v8378_v34, %v8382_v32  ;;  %v8425_v32 = vld [vmem:[#allocation16 + $0xbd0] sm:$0xff] }
 0xb19   :  { %15014 = vmatpush1.bf16.msra.mxu1 %v17384_v47  ;;  %v8389_v47 = vld [vmem:[#allocation16 + $0xab0] sm:$0xff] }
 0xb1a   :  { %15358 = vmatpush1.bf16.msra.mxu0 %v17386_v39  ;;  %15015 = vmatprep.subr.bf16.mxu1 %v17393_v20  ;;  %v8386_v39 = vld [vmem:[#allocation16 + $0xa98] sm:$0xff]  ;;  %v17441_v0 = vcombine.high %v8385_v38, %v8389_v47 }
 0xb1b   :  { %15359 = vmatprep.subr.bf16.mxu0 %v17395_v55  ;;  %v8390_v20 = vld [vmem:[#allocation16 + $0xab8] sm:$0xff]  ;;  %v17432_v55 = vcombine.low %v8377_v31, %v8381_v58 }
 0xb1c   :  { %v17443_v60 = vcombine.high %v8386_v39, %v8390_v20  ;;  %v17442_v8 = vcombine.low %v8386_v39, %v8390_v20  ;;  %v8433_v20 = vld [vmem:[#allocation16 + $0xc10] sm:$0xff] }
 0xb1d   :  { %15016 = vmatpush1.bf16.msra.mxu1 %v17392_v26  ;;  %v8397_v26 = vld [vmem:[#allocation16 + $0xaf0] sm:$0xff] }
 0xb1e   :  { %15360 = vmatpush1.bf16.msra.mxu0 %v17394_v6  ;;  %15017 = vmatprep.subr.bf16.mxu1 %v17401_v33  ;;  %v8394_v6 = vld [vmem:[#allocation16 + $0xad8] sm:$0xff]  ;;  %v17449_v41 = vcombine.high %v8393_v1, %v8397_v26 }
 0xb1f   :  { %15361 = vmatprep.subr.bf16.mxu0 %v17403_v36  ;;  %v8398_v33 = vld [vmem:[#allocation16 + $0xaf8] sm:$0xff]  ;;  %v17440_v36 = vcombine.low %v8385_v38, %v8389_v47 }
 0xb20   :  { %v17451_v53 = vcombine.high %v8394_v6, %v8398_v33  ;;  %v17450_v57 = vcombine.low %v8394_v6, %v8398_v33  ;;  %v8441_v33 = vld [vmem:[#allocation16 + $0xc50] sm:$0xff] }
 0xb21   :  { %15018 = vmatpush1.bf16.msra.mxu1 %v17400_v56  ;;  %v8405_v56 = vld [vmem:[#allocation16 + $0xb30] sm:$0xff] }
 0xb22   :  { %15362 = vmatpush1.bf16.msra.mxu0 %v17402_v23  ;;  %15019 = vmatprep.subr.bf16.mxu1 %v17409_v27  ;;  %v8402_v23 = vld [vmem:[#allocation16 + $0xb18] sm:$0xff]  ;;  %v17457_v4 = vcombine.high %v8401_v54, %v8405_v56 }
 0xb23   :  { %15363 = vmatprep.subr.bf16.mxu0 %v17411_v11  ;;  %v8406_v27 = vld [vmem:[#allocation16 + $0xb38] sm:$0xff]  ;;  %v17448_v11 = vcombine.low %v8393_v1, %v8397_v26 }
 0xb24   :  { %v17459_v15 = vcombine.high %v8402_v23, %v8406_v27  ;;  %v17458_v24 = vcombine.low %v8402_v23, %v8406_v27  ;;  %v8449_v23 = vld [vmem:[#allocation16 + $0xc90] sm:$0xff] }
 0xb25   :  { %15020 = vmatpush1.bf16.msra.mxu1 %v17408_v5  ;;  %v8413_v5 = vld [vmem:[#allocation16 + $0xb70] sm:$0xff] }
 0xb26   :  { %15364 = vmatpush1.bf16.msra.mxu0 %v17410_v46  ;;  %15021 = vmatprep.subr.bf16.mxu1 %v17417_v19  ;;  %v8410_v46 = vld [vmem:[#allocation16 + $0xb58] sm:$0xff]  ;;  %v17465_v21 = vcombine.high %v8409_v45, %v8413_v5  ;;  %v8453_v27 = vld [vmem:[#allocation16 + $0xcb0] sm:$0xff] }
 0xb27   :  { %15365 = vmatprep.subr.bf16.mxu0 %v17419_v13  ;;  %v8414_v19 = vld [vmem:[#allocation16 + $0xb78] sm:$0xff]  ;;  %v17456_v13 = vcombine.low %v8401_v54, %v8405_v56 }
 0xb28   :  { %v17467_v43 = vcombine.high %v8410_v46, %v8414_v19  ;;  %v17466_v31 = vcombine.low %v8410_v46, %v8414_v19  ;;  %v8457_v19 = vld [vmem:[#allocation16 + $0xcd0] sm:$0xff] }
 0xb29   :  { %15022 = vmatpush1.bf16.msra.mxu1 %v17416_v7  ;;  %v8421_v7 = vld [vmem:[#allocation16 + $0xbb0] sm:$0xff] }
 0xb2a   :  { %15366 = vmatpush1.bf16.msra.mxu0 %v17418_v42  ;;  %15023 = vmatprep.subr.bf16.mxu1 %v17425_v30  ;;  %v8418_v42 = vld [vmem:[#allocation16 + $0xb98] sm:$0xff]  ;;  %v17473_v58 = vcombine.high %v8417_v25, %v8421_v7 }
 0xb2b   :  { %15367 = vmatprep.subr.bf16.mxu0 %v17427_v28  ;;  %v8422_v30 = vld [vmem:[#allocation16 + $0xbb8] sm:$0xff]  ;;  %v17464_v28 = vcombine.low %v8409_v45, %v8413_v5  ;;  %v17505_v5 = vcombine.high %v8449_v23, %v8453_v27 }
 0xb2c   :  { %v17475_v34 = vcombine.high %v8418_v42, %v8422_v30  ;;  %v17474_v38 = vcombine.low %v8418_v42, %v8422_v30  ;;  %v8465_v42 = vld [vmem:[#allocation16 + $0xd10] sm:$0xff] }
 0xb2d   :  { %15024 = vmatpush1.bf16.msra.mxu1 %v17424_v3  ;;  %v8429_v3 = vld [vmem:[#allocation16 + $0xbf0] sm:$0xff] }
 0xb2e   :  { %15368 = vmatpush1.bf16.msra.mxu0 %v17426_v37  ;;  %15025 = vmatprep.subr.bf16.mxu1 %v17433_v59  ;;  %v8426_v37 = vld [vmem:[#allocation16 + $0xbd8] sm:$0xff]  ;;  %v17481_v47 = vcombine.high %v8425_v32, %v8429_v3  ;;  %v8469_v30 = vld [vmem:[#allocation16 + $0xd30] sm:$0xff] }
 0xb2f   :  { %15369 = vmatprep.subr.bf16.mxu0 %v17435_v16  ;;  %v8430_v59 = vld [vmem:[#allocation16 + $0xbf8] sm:$0xff]  ;;  %v17472_v16 = vcombine.low %v8417_v25, %v8421_v7 }
 0xb30   :  { %v17483_v39 = vcombine.high %v8426_v37, %v8430_v59  ;;  %v17482_v1 = vcombine.low %v8426_v37, %v8430_v59  ;;  %v8477_v37 = vld [vmem:[#allocation16 + $0xd70] sm:$0xff]  ;;  %v8474_v59 = vld [vmem:[#allocation16 + $0xd58] sm:$0xff] }
 0xb31   :  { %15026 = vmatpush1.bf16.msra.mxu1 %v17432_v55  ;;  %v8437_v55 = vld [vmem:[#allocation16 + $0xc30] sm:$0xff] }
 0xb32   :  { %15370 = vmatpush1.bf16.msra.mxu0 %v17434_v12  ;;  %15027 = vmatprep.subr.bf16.mxu1 %v17441_v0  ;;  %v8434_v12 = vld [vmem:[#allocation16 + $0xc18] sm:$0xff]  ;;  %v17489_v26 = vcombine.high %v8433_v20, %v8437_v55 }
 0xb33   :  { %15371 = vmatprep.subr.bf16.mxu0 %v17443_v60  ;;  %v8438_v0 = vld [vmem:[#allocation16 + $0xc38] sm:$0xff]  ;;  %v17480_v60 = vcombine.low %v8425_v32, %v8429_v3  ;;  %v8473_v3 = vld [vmem:[#allocation16 + $0xd50] sm:$0xff] }
 0xb34   :  { %v17491_v6 = vcombine.high %v8434_v12, %v8438_v0  ;;  %v17490_v54 = vcombine.low %v8434_v12, %v8438_v0  ;;  %v8481_v12 = vld [vmem:[#allocation16 + $0xd90] sm:$0xff] }
 0xb35   :  { %15028 = vmatpush1.bf16.msra.mxu1 %v17440_v36  ;;  %v8445_v36 = vld [vmem:[#allocation16 + $0xc70] sm:$0xff] }
 0xb36   :  { %15372 = vmatpush1.bf16.msra.mxu0 %v17442_v8  ;;  %15029 = vmatprep.subr.bf16.mxu1 %v17449_v41  ;;  %v17488_v8 = vcombine.low %v8433_v20, %v8437_v55  ;;  %v8442_v41 = vld [vmem:[#allocation16 + $0xc58] sm:$0xff]  ;;  %v17497_v56 = vcombine.high %v8441_v33, %v8445_v36  ;;  %v17529_v20 = vcombine.high %v8473_v3, %v8477_v37  ;;  %v8485_v0 = vld [vmem:[#allocation16 + $0xdb0] sm:$0xff] }
 0xb37   :  { %15373 = vmatprep.subr.bf16.mxu0 %v17451_v53  ;;  %v8446_v53 = vld [vmem:[#allocation16 + $0xc78] sm:$0xff] }
 0xb38   :  { %v17498_v45 = vcombine.low %v8442_v41, %v8446_v53 }
 0xb39   :  { %15030 = vmatpush1.bf16.msra.mxu1 %v17448_v11  ;;  %v17499_v11 = vcombine.high %v8442_v41, %v8446_v53  ;;  %v17537_v53 = vcombine.high %v8481_v12, %v8485_v0 }
 0xb3a   :  { %15374 = vmatpush1.bf16.msra.mxu0 %v17450_v57  ;;  %15031 = vmatprep.subr.bf16.mxu1 %v17457_v4  ;;  %v8450_v57 = vld [vmem:[#allocation16 + $0xc98] sm:$0xff] }
 0xb3b   :  { %15375 = vmatprep.subr.bf16.mxu0 %v17459_v15  ;;  %v8454_v4 = vld [vmem:[#allocation16 + $0xcb8] sm:$0xff]  ;;  %v17496_v15 = vcombine.low %v8441_v33, %v8445_v36  ;;  %v17528_v36 = vcombine.low %v8473_v3, %v8477_v37 }
 0xb3c   :  { %v17507_v46 = vcombine.high %v8450_v57, %v8454_v4  ;;  %v8498_v3 = vld [vmem:[#allocation16 + $0xe18] sm:$0xff] }
 0xb3d   :  { %15032 = vmatpush1.bf16.msra.mxu1 %v17456_v13  ;;  %v8461_v13 = vld [vmem:[#allocation16 + $0xcf0] sm:$0xff]  ;;  %v8502_v37 = vld [vmem:[#allocation16 + $0xe38] sm:$0xff] }
 0xb3e   :  { %15376 = vmatpush1.bf16.msra.mxu0 %v17458_v24  ;;  %15033 = vmatprep.subr.bf16.mxu1 %v17465_v21  ;;  %v8458_v24 = vld [vmem:[#allocation16 + $0xcd8] sm:$0xff]  ;;  %v17513_v25 = vcombine.high %v8457_v19, %v8461_v13 }
 0xb3f   :  { %15377 = vmatprep.subr.bf16.mxu0 %v17467_v43  ;;  %v8462_v21 = vld [vmem:[#allocation16 + $0xcf8] sm:$0xff]  ;;  %v17504_v43 = vcombine.low %v8449_v23, %v8453_v27  ;;  %v8489_v23 = vld [vmem:[#allocation16 + $0xdd0] sm:$0xff] }
 0xb40   :  { %v17515_v7 = vcombine.high %v8458_v24, %v8462_v21  ;;  %v8493_v27 = vld [vmem:[#allocation16 + $0xdf0] sm:$0xff] }
 0xb41   :  { %15034 = vmatpush1.bf16.msra.mxu1 %v17464_v28  ;;  %v8466_v28 = vld [vmem:[#allocation16 + $0xd18] sm:$0xff] }
 0xb42   :  { %15378 = vmatpush1.bf16.msra.mxu0 %v17466_v31  ;;  %15035 = vmatprep.subr.bf16.mxu1 %v17473_v58  ;;  %v8470_v31 = vld [vmem:[#allocation16 + $0xd38] sm:$0xff]  ;;  %v17514_v58 = vcombine.low %v8458_v24, %v8462_v21 }
 0xb43   :  { %15379 = vmatprep.subr.bf16.mxu0 %v17475_v34  ;;  %v17521_v34 = vcombine.high %v8465_v42, %v8469_v30  ;;  %v17523_v32 = vcombine.high %v8466_v28, %v8470_v31 }
 0xb45   :  { %15036 = vmatpush1.bf16.msra.mxu1 %v17472_v16  ;;  %v8478_v16 = vld [vmem:[#allocation16 + $0xd78] sm:$0xff] }
 0xb46   :  { %15380 = vmatpush1.bf16.msra.mxu0 %v17474_v38  ;;  %15037 = vmatprep.subr.bf16.mxu1 %v17481_v47  ;;  %v17520_v38 = vcombine.low %v8465_v42, %v8469_v30  ;;  %v9071_v47 = vld [vmem:[#allocation18] sm:$0xff]  ;;  %v17531_v55 = vcombine.high %v8474_v59, %v8478_v16  ;;  %v17530_v41 = vcombine.low %v8474_v59, %v8478_v16 }
 0xb47   :  { %15381 = vmatprep.subr.bf16.mxu0 %v17483_v39  ;;  %v17522_v39 = vcombine.low %v8466_v28, %v8470_v31  ;;  %v9080_v33 = vrot.slane %v9071_v47, %v20454_v51  ;;  %v17544_v42 = vcombine.low %v8489_v23, %v8493_v27  ;;  %v8497_v28 = vld [vmem:[#allocation16 + $0xe10] sm:$0xff] }
 0xb48   :  { %v8501_v31 = vld [vmem:[#allocation16 + $0xe30] sm:$0xff] }
 0xb49   :  { %15038 = vmatpush1.bf16.msra.mxu1 %v17480_v60  ;;  %v9076_v60 = vrot.slane %v9071_v47, %v20448_v48 }
 0xb4a   :  { %15382 = vmatpush1.bf16.msra.mxu0 %v17482_v1  ;;  %15050 = vmatprep.subr.bf16.mxu1 %v17489_v26  ;;  %v8482_v1 = vld [vmem:[#allocation16 + $0xd98] sm:$0xff] }
 0xb4b   :  { %15394 = vmatprep.subr.bf16.mxu0 %v17491_v6  ;;  %v8486_v26 = vld [vmem:[#allocation16 + $0xdb8] sm:$0xff]  ;;  %v9084_v6 = vrot.slane %v9071_v47, %v20451_v49 }
 0xb4c   :  { %15040 = vmatmul.mubr.bf16.vlgmr.msra.gmra.mrb[108].mxu1 %v21125_v61 }
 0xb4d   :  { %15384 = vmatmul.mubr.bf16.vlgmr.msra.gmra.mrb[108].mxu0 %v21125_v61  ;;  %15051 = vmatpush1.bf16.msra.mxu1 %v17488_v8  ;;  %v17506_v61 = vcombine.low %v8450_v57, %v8454_v4  ;;  %v9088_v8 = vrot.slane %v9071_v47, %v20457_v52  ;;  %v8490_v4 = vld [vmem:[#allocation16 + $0xdd8] sm:$0xff]  ;;  %v17538_v52 = vcombine.low %v8482_v1, %v8486_v26 }
 0xb4e   :  { %15082 = vmatprep.mubr.bf16.mxu1 %v21037_v22  ;;  %15395 = vmatpush1.bf16.msra.mxu0 %v17490_v54 }
 0xb4f   :  { %15426 = vmatprep.mubr.bf16.mxu0 %v21037_v22  ;;  %15052 = vmatprep.subr.bf16.mxu1 %v17497_v56  ;;  %v17512_v22 = vcombine.low %v8457_v19, %v8461_v13  ;;  %v17539_v56 = vcombine.high %v8482_v1, %v8486_v26  ;;  %v17555_v1 = vcombine.high %v8498_v3, %v8502_v37  ;;  %v8505_v26 = vld [vmem:[#allocation16 + $0xe50] sm:$0xff] }
 0xb50   :  { %15396 = vmatprep.subr.bf16.mxu0 %v17499_v11 }
 0xb51   :  { %15053 = vmatpush1.bf16.msra.mxu1 %v17496_v15  ;;  %v8494_v15 = vld [vmem:[#allocation16 + $0xdf8] sm:$0xff] }
 0xb52   :  { %15397 = vmatpush1.bf16.msra.mxu0 %v17498_v45  ;;  %15054 = vmatprep.subr.bf16.mxu1 %v17505_v5  ;;  %v17547_v30 = vcombine.high %v8490_v4, %v8494_v15 }
 0xb53   :  { %15398 = vmatprep.subr.bf16.mxu0 %v17507_v46  ;;  %v17536_v46 = vcombine.low %v8481_v12, %v8485_v0  ;;  %v17553_v12 = vcombine.high %v8497_v28, %v8501_v31 }
 0xb55   :  { %15055 = vmatpush1.bf16.msra.mxu1 %v17504_v43  ;;  %v17545_v43 = vcombine.high %v8489_v23, %v8493_v27  ;;  %v8513_v23 = vld [vmem:[#allocation16 + $0xe90] sm:$0xff] }
 0xb56   :  { %15399 = vmatpush1.bf16.msra.mxu0 %v17506_v61  ;;  %15056 = vmatprep.subr.bf16.mxu1 %v17513_v25  ;;  %v8517_v27 = vld [vmem:[#allocation16 + $0xeb0] sm:$0xff] }
 0xb57   :  { %15400 = vmatprep.subr.bf16.mxu0 %v17515_v7 }
 0xb59   :  { %15057 = vmatpush1.bf16.msra.mxu1 %v17512_v22 }
 0xb5a   :  { %15401 = vmatpush1.bf16.msra.mxu0 %v17514_v58  ;;  %15058 = vmatprep.subr.bf16.mxu1 %v17521_v34 }
 0xb5b   :  { %15402 = vmatprep.subr.bf16.mxu0 %v17523_v32  ;;  %v17546_v32 = vcombine.low %v8490_v4, %v8494_v15  ;;  %v17569_v15 = vcombine.high %v8513_v23, %v8517_v27 }
 0xb5d   :  { %15059 = vmatpush1.bf16.msra.mxu1 %v17520_v38 }
 0xb5e   :  { %15403 = vmatpush1.bf16.msra.mxu0 %v17522_v39  ;;  %15060 = vmatprep.subr.bf16.mxu1 %v17529_v20 }
 0xb5f   :  { %v14568_v54 = vpop.f32.mrb[104].mxu1  ;;  %15404 = vmatprep.subr.bf16.mxu0 %v17531_v55 }
 0xb60   :  { %v18583_v48 = vadd.f32 %v14568_v54, %v9076_v60  ;;  %v14912_v11 = vpop.f32.mrb[104].mxu0  ;;  %v14570_v57 = vpop.f32.mrb[105].mxu1 }
 0xb61   :  { %v18587_v49 = vadd.f32 %v14912_v11, %v9084_v6  ;;  %v18584_v45 = vadd.f32 %v14570_v57, %v9080_v33  ;;  %v14914_v51 = vpop.f32.mrb[105].mxu0  ;;  %v14572_v5 = vpop.f32.mrb[106].mxu1  ;;  %15061 = vmatpush1.bf16.msra.mxu1 %v17528_v36  ;;  %v8506_v36 = vld [vmem:[#allocation16 + $0xe58] sm:$0xff] }
 0xb62   :  { %v18588_v19 = vadd.f32 %v14914_v51, %v9088_v8  ;;  %v18585_v13 = vadd.f32 %v14572_v5, %v9076_v60  ;;  %v14916_v24 = vpop.f32.mrb[106].mxu0  ;;  %15405 = vmatpush1.bf16.msra.mxu0 %v17530_v41  ;;  %v14574_v21 = vpop.f32.mrb[107].mxu1  ;;  %15062 = vmatprep.subr.bf16.mxu1 %v17537_v53  ;;  %v15609_v22 = vmax.f32 %v18583_v48, 0.0  ;;  %v17552_v41 = vcombine.low %v8497_v28, %v8501_v31  ;;  %v8514_v48 = vld [vmem:[#allocation16 + $0xe98] sm:$0xff]  ;;  %v8525_v51 = vld [vmem:[#allocation16 + $0xef0] sm:$0xff] }
 0xb63   :  { %v18589_v61 = vadd.f32 %v14916_v24, %v9084_v6  ;;  %v18586_v25 = vadd.f32 %v14574_v21, %v9080_v33  ;;  %v14918_v7 = vpop.f32.mrb[107].mxu0  ;;  %15406 = vmatprep.subr.bf16.mxu0 %v17539_v56  ;;  %v15611_v59 = vmax.f32 %v18587_v49, 0.0  ;;  %v15610_v16 = vmax.f32 %v18584_v45, 0.0  ;;  %v8509_v6 = vld [vmem:[#allocation16 + $0xe70] sm:$0xff]  ;;  %v8518_v11 = vld [vmem:[#allocation16 + $0xeb8] sm:$0xff] }
 0xb64   :  { %v15617_v58 = vmax.f32 %v18585_v13, 0.0  ;;  %v18590_v34 = vadd.f32 %v14918_v7, %v9088_v8  ;;  %v15612_v39 = vmax.f32 %v18588_v19, 0.0  ;;  %v8510_v8 = vld [vmem:[#allocation16 + $0xe78] sm:$0xff]  ;;  %v17554_v53 = vcombine.low %v8498_v3, %v8502_v37  ;;  %v8521_v45 = vld [vmem:[#allocation16 + $0xed0] sm:$0xff] }
 0xb65   :  { %v15619_v38 = vmax.f32 %v18589_v61, 0.0  ;;  %v15618_v47 = vmax.f32 %v18586_v25, 0.0  ;;  %15063 = vmatpush1.bf16.msra.mxu1 %v17536_v46  ;;  %v17561_v54 = vcombine.high %v8505_v26, %v8509_v6  ;;  %v17563_v56 = vcombine.high %v8506_v36, %v8510_v8  ;;  %v8522_v5 = vld [vmem:[#allocation16 + $0xed8] sm:$0xff]  ;;  %v8529_v21 = vld [vmem:[#allocation16 + $0xf10] sm:$0xff] }
 0xb66   :  { %v21195_v20 = vpack.c.bf16 %v15617_v58, %v15609_v22  ;;  %v15620_v55 = vmax.f32 %v18590_v34, 0.0  ;;  %15407 = vmatpush1.bf16.msra.mxu0 %v17538_v52  ;;  %15064 = vmatprep.subr.bf16.mxu1 %v17545_v43  ;;  %v17560_v57 = vcombine.low %v8505_v26, %v8509_v6  ;;  %v17562_v4 = vcombine.low %v8506_v36, %v8510_v8  ;;  %v8526_v46 = vld [vmem:[#allocation16 + $0xef8] sm:$0xff]  ;;  %v8533_v43 = vld [vmem:[#allocation16 + $0xf30] sm:$0xff] }
 0xb67   :  { %v21197_v0 = vpack.c.bf16 %v15619_v38, %v15611_v59  ;;  %v21199_v60 = vpack.c.bf16 %v15618_v47, %v15610_v16  ;;  %15408 = vmatprep.subr.bf16.mxu0 %v17547_v30  ;;  %v17571_v49 = vcombine.high %v8514_v48, %v8518_v11  ;;  %v17568_v52 = vcombine.low %v8513_v23, %v8517_v27  ;;  %v8530_v61 = vld [vmem:[#allocation16 + $0xf18] sm:$0xff]  ;;  %v8537_v31 = vld [vmem:[#allocation16 + $0xf50] sm:$0xff] }
 0xb68   :  { %v21201_v33 = vpack.c.bf16 %v15620_v55, %v15612_v39  ;;  %v17570_v19 = vcombine.low %v8514_v48, %v8518_v11  ;;  %v17577_v13 = vcombine.high %v8521_v45, %v8525_v51  ;;  %v17579_v24 = vcombine.high %v8522_v5, %v8526_v46  ;;  %v8534_v25 = vld [vmem:[#allocation16 + $0xf38] sm:$0xff]  ;;  %v8541_v22 = vld [vmem:[#allocation16 + $0xf70] sm:$0xff] }
 0xb69   :  { %15065 = vmatpush1.bf16.msra.mxu1 %v17544_v42  ;;  %v17576_v7 = vcombine.low %v8521_v45, %v8525_v51  ;;  %v17578_v42 = vcombine.low %v8522_v5, %v8526_v46  ;;  %v17585_v30 = vcombine.high %v8529_v21, %v8533_v43  ;;  %v17587_v28 = vcombine.high %v8530_v61, %v8534_v25  ;;  %v8538_v58 = vld [vmem:[#allocation16 + $0xf58] sm:$0xff]  ;;  %v8545_v16 = vld [vmem:[#allocation16 + $0xf90] sm:$0xff] }
 0xb6a   :  { %15409 = vmatpush1.bf16.msra.mxu0 %v17546_v32  ;;  %15066 = vmatprep.subr.bf16.mxu1 %v17553_v12  ;;  %v8542_v34 = vld [vmem:[#allocation16 + $0xf78] sm:$0xff]  ;;  %v17584_v32 = vcombine.low %v8529_v21, %v8533_v43  ;;  %v17586_v3 = vcombine.low %v8530_v61, %v8534_v25  ;;  %v17593_v37 = vcombine.high %v8537_v31, %v8541_v22  ;;  %v8549_v38 = vld [vmem:[#allocation16 + $0xfb0] sm:$0xff] }
 0xb6b   :  { %15410 = vmatprep.subr.bf16.mxu0 %v17555_v1  ;;  %v17595_v59 = vcombine.high %v8538_v58, %v8542_v34  ;;  %v8546_v47 = vld [vmem:[#allocation16 + $0xf98] sm:$0xff]  ;;  %v17592_v55 = vcombine.low %v8537_v31, %v8541_v22  ;;  %v17594_v12 = vcombine.low %v8538_v58, %v8542_v34  ;;  %v17601_v1 = vcombine.high %v8545_v16, %v8549_v38  ;;  %v8553_v6 = vld [vmem:[#allocation16 + $0xfd0] sm:$0xff] }
 0xb6c   :  { %v8550_v39 = vld [vmem:[#allocation16 + $0xfb8] sm:$0xff]  ;;  %v8557_v36 = vld [vmem:[#allocation16 + $0xff0] sm:$0xff] }
 0xb6d   :  { %15067 = vmatpush1.bf16.msra.mxu1 %v17552_v41  ;;  %v17603_v26 = vcombine.high %v8546_v47, %v8550_v39  ;;  %v8554_v8 = vld [vmem:[#allocation16 + $0xfd8] sm:$0xff]  ;;  %v8561_v27 = vld [vmem:[#allocation16 + $0x1010] sm:$0xff] }
 0xb6e   :  { %15411 = vmatpush1.bf16.msra.mxu0 %v17554_v53  ;;  %15068 = vmatprep.subr.bf16.mxu1 %v17561_v54  ;;  %v8558_v41 = vld [vmem:[#allocation16 + $0xff8] sm:$0xff]  ;;  %v17600_v53 = vcombine.low %v8545_v16, %v8549_v38  ;;  %v17602_v54 = vcombine.low %v8546_v47, %v8550_v39  ;;  %v8565_v48 = vld [vmem:[#allocation16 + $0x1030] sm:$0xff] }
 0xb6f   :  { %15412 = vmatprep.subr.bf16.mxu0 %v17563_v56  ;;  %v17609_v56 = vcombine.high %v8553_v6, %v8557_v36  ;;  %v17611_v23 = vcombine.high %v8554_v8, %v8558_v41  ;;  %v8562_v11 = vld [vmem:[#allocation16 + $0x1018] sm:$0xff]  ;;  %v8569_v51 = vld [vmem:[#allocation16 + $0x1050] sm:$0xff]  ;;  %v17616_v46 = vcombine.low %v8561_v27, %v8565_v48 }
 0xb70   :  { %v8573_v5 = vld [vmem:[#allocation16 + $0x1070] sm:$0xff]  ;;  %v8578_v25 = vld [vmem:[#allocation16 + $0x1098] sm:$0xff] }
 0xb71   :  { %15069 = vmatpush1.bf16.msra.mxu1 %v17560_v57  ;;  %v8566_v57 = vld [vmem:[#allocation16 + $0x1038] sm:$0xff]  ;;  %v8577_v21 = vld [vmem:[#allocation16 + $0x1090] sm:$0xff] }
 0xb72   :  { %15413 = vmatpush1.bf16.msra.mxu0 %v17562_v4  ;;  %15070 = vmatprep.subr.bf16.mxu1 %v17569_v15  ;;  %v17608_v4 = vcombine.low %v8553_v6, %v8557_v36  ;;  %v17610_v15 = vcombine.low %v8554_v8, %v8558_v41  ;;  %v17619_v45 = vcombine.high %v8562_v11, %v8566_v57  ;;  %v8581_v43 = vld [vmem:[#allocation16 + $0x10b0] sm:$0xff]  ;;  %v8586_v34 = vld [vmem:[#allocation16 + $0x10d8] sm:$0xff] }
 0xb73   :  { %15414 = vmatprep.subr.bf16.mxu0 %v17571_v49  ;;  %v17617_v49 = vcombine.high %v8561_v27, %v8565_v48  ;;  %v8585_v22 = vld [vmem:[#allocation16 + $0x10d0] sm:$0xff]  ;;  %v8594_v47 = vld [vmem:[#allocation16 + $0x1118] sm:$0xff] }
 0xb74   :  { %v8589_v58 = vld [vmem:[#allocation16 + $0x10f0] sm:$0xff]  ;;  %v8598_v39 = vld [vmem:[#allocation16 + $0x1138] sm:$0xff] }
 0xb75   :  { %15071 = vmatpush1.bf16.msra.mxu1 %v17568_v52  ;;  %v8570_v52 = vld [vmem:[#allocation16 + $0x1058] sm:$0xff]  ;;  %v8593_v16 = vld [vmem:[#allocation16 + $0x1110] sm:$0xff] }
 0xb76   :  { %15415 = vmatpush1.bf16.msra.mxu0 %v17570_v19  ;;  %15072 = vmatprep.subr.bf16.mxu1 %v17577_v13  ;;  %v8574_v19 = vld [vmem:[#allocation16 + $0x1078] sm:$0xff]  ;;  %v17618_v13 = vcombine.low %v8562_v11, %v8566_v57  ;;  %v8597_v38 = vld [vmem:[#allocation16 + $0x1130] sm:$0xff] }
 0xb77   :  { %15416 = vmatprep.subr.bf16.mxu0 %v17579_v24  ;;  %v17625_v24 = vcombine.high %v8569_v51, %v8573_v5  ;;  %v17627_v61 = vcombine.high %v8570_v52, %v8574_v19  ;;  %v8605_v6 = vld [vmem:[#allocation16 + $0x1170] sm:$0xff]  ;;  %v8602_v36 = vld [vmem:[#allocation16 + $0x1158] sm:$0xff]  ;;  %v17648_v41 = vcombine.low %v8593_v16, %v8597_v38 }
 0xb78   :  { %v8606_v8 = vld [vmem:[#allocation16 + $0x1178] sm:$0xff]  ;;  %v8613_v27 = vld [vmem:[#allocation16 + $0x11b0] sm:$0xff] }
 0xb79   :  { %15073 = vmatpush1.bf16.msra.mxu1 %v17576_v7  ;;  %v8582_v7 = vld [vmem:[#allocation16 + $0x10b8] sm:$0xff] }
 0xb7a   :  { %15417 = vmatpush1.bf16.msra.mxu0 %v17578_v42  ;;  %15074 = vmatprep.subr.bf16.mxu1 %v17585_v30  ;;  %v17624_v42 = vcombine.low %v8569_v51, %v8573_v5  ;;  %v17626_v30 = vcombine.low %v8570_v52, %v8574_v19  ;;  %v17635_v31 = vcombine.high %v8578_v25, %v8582_v7  ;;  %v8610_v48 = vld [vmem:[#allocation16 + $0x1198] sm:$0xff]  ;;  %v8621_v51 = vld [vmem:[#allocation16 + $0x11f0] sm:$0xff] }
 0xb7b   :  { %15418 = vmatprep.subr.bf16.mxu0 %v17587_v28  ;;  %v17633_v28 = vcombine.high %v8577_v21, %v8581_v43  ;;  %v8614_v11 = vld [vmem:[#allocation16 + $0x11b8] sm:$0xff] }
 0xb7c   :  { %v8618_v5 = vld [vmem:[#allocation16 + $0x11d8] sm:$0xff]  ;;  %v17666_v19 = vcombine.low %v8610_v48, %v8614_v11 }
 0xb7d   :  { %15075 = vmatpush1.bf16.msra.mxu1 %v17584_v32  ;;  %v8590_v32 = vld [vmem:[#allocation16 + $0x10f8] sm:$0xff] }
 0xb7e   :  { %15419 = vmatpush1.bf16.msra.mxu0 %v17586_v3  ;;  %15076 = vmatprep.subr.bf16.mxu1 %v17593_v37  ;;  %v17632_v3 = vcombine.low %v8577_v21, %v8581_v43  ;;  %v17641_v37 = vcombine.high %v8585_v22, %v8589_v58  ;;  %v8625_v21 = vld [vmem:[#allocation16 + $0x1210] sm:$0xff] }
 0xb7f   :  { %15420 = vmatprep.subr.bf16.mxu0 %v17595_v59  ;;  %v17643_v59 = vcombine.high %v8586_v34, %v8590_v32  ;;  %v8629_v43 = vld [vmem:[#allocation16 + $0x1230] sm:$0xff] }
 0xb81   :  { %15077 = vmatpush1.bf16.msra.mxu1 %v17592_v55  ;;  %v17642_v55 = vcombine.low %v8586_v34, %v8590_v32  ;;  %v8638_v34 = vld [vmem:[#allocation16 + $0x1278] sm:$0xff]  ;;  %v17680_v32 = vcombine.low %v8625_v21, %v8629_v43 }
 0xb82   :  { %15421 = vmatpush1.bf16.msra.mxu0 %v17594_v12  ;;  %15078 = vmatprep.subr.bf16.mxu1 %v17601_v1  ;;  %v17649_v12 = vcombine.high %v8593_v16, %v8597_v38  ;;  %v17651_v1 = vcombine.high %v8594_v47, %v8598_v39  ;;  %v8645_v16 = vld [vmem:[#allocation16 + $0x12b0] sm:$0xff]  ;;  %v8642_v38 = vld [vmem:[#allocation16 + $0x1298] sm:$0xff] }
 0xb83   :  { %15422 = vmatprep.subr.bf16.mxu0 %v17603_v26  ;;  %v8601_v26 = vld [vmem:[#allocation16 + $0x1150] sm:$0xff] }
 0xb84   :  { %v17656_v57 = vcombine.low %v8601_v26, %v8605_v6 }
 0xb85   :  { %15079 = vmatpush1.bf16.msra.mxu1 %v17600_v53  ;;  %v17650_v53 = vcombine.low %v8594_v47, %v8598_v39  ;;  %v8646_v47 = vld [vmem:[#allocation16 + $0x12b8] sm:$0xff] }
 0xb86   :  { %15423 = vmatpush1.bf16.msra.mxu0 %v17602_v54  ;;  %15080 = vmatprep.subr.bf16.mxu1 %v17609_v56  ;;  %v17657_v54 = vcombine.high %v8601_v26, %v8605_v6  ;;  %v17659_v56 = vcombine.high %v8602_v36, %v8606_v8  ;;  %v8653_v26 = vld [vmem:[#allocation16 + $0x12f0] sm:$0xff]  ;;  %v8650_v6 = vld [vmem:[#allocation16 + $0x12d8] sm:$0xff] }
 0xb87   :  { %15424 = vmatprep.subr.bf16.mxu0 %v17611_v23  ;;  %v8609_v23 = vld [vmem:[#allocation16 + $0x1190] sm:$0xff] }
 0xb88   :  { %v17664_v52 = vcombine.low %v8609_v23, %v8613_v27 }
 0xb89   :  { %15081 = vmatpush1.bf16.msra.mxu1 %v17608_v4  ;;  %v17658_v4 = vcombine.low %v8602_v36, %v8606_v8  ;;  %v8654_v36 = vld [vmem:[#allocation16 + $0x12f8] sm:$0xff] }
 0xb8a   :  { %15425 = vmatpush1.bf16.msra.mxu0 %v17610_v15  ;;  %15093 = vmatprep.subr.bf16.mxu1 %v17617_v49  ;;  %v17665_v15 = vcombine.high %v8609_v23, %v8613_v27  ;;  %v17667_v49 = vcombine.high %v8610_v48, %v8614_v11  ;;  %v8661_v23 = vld [vmem:[#allocation16 + $0x1330] sm:$0xff]  ;;  %v8658_v27 = vld [vmem:[#allocation16 + $0x1318] sm:$0xff] }
 0xb8b   :  { %15437 = vmatprep.subr.bf16.mxu0 %v17619_v45  ;;  %v8617_v45 = vld [vmem:[#allocation16 + $0x11d0] sm:$0xff]  ;;  %v8662_v48 = vld [vmem:[#allocation16 + $0x1338] sm:$0xff] }
 0xb8c   :  { %15083 = vmatmul.mubr.bf16.vlgmr.msra.gmra.mrb[108].mxu1 %v21029_v9 }
 0xb8d   :  { %15427 = vmatmul.mubr.bf16.vlgmr.msra.gmra.mrb[108].mxu0 %v21029_v9  ;;  %15094 = vmatpush1.bf16.msra.mxu1 %v17616_v46  ;;  %v17634_v9 = vcombine.low %v8578_v25, %v8582_v7  ;;  %v8622_v46 = vld [vmem:[#allocation16 + $0x11f8] sm:$0xff]  ;;  %v17672_v7 = vcombine.low %v8617_v45, %v8621_v51 }
 0xb8e   :  { %15125 = vmatprep.mubr.bf16.mxu1 %v21145_v50  ;;  %15438 = vmatpush1.bf16.msra.mxu0 %v17618_v13  ;;  %v17673_v13 = vcombine.high %v8617_v45, %v8621_v51  ;;  %v8630_v25 = vld [vmem:[#allocation16 + $0x1238] sm:$0xff]  ;;  %v8669_v45 = vld [vmem:[#allocation16 + $0x1370] sm:$0xff] }
 0xb8f   :  { %15469 = vmatprep.mubr.bf16.mxu0 %v21145_v50  ;;  %15095 = vmatprep.subr.bf16.mxu1 %v17625_v24  ;;  %v17640_v50 = vcombine.low %v8585_v22, %v8589_v58  ;;  %v17675_v24 = vcombine.high %v8618_v5, %v8622_v46  ;;  %v8637_v22 = vld [vmem:[#allocation16 + $0x1270] sm:$0xff]  ;;  %v8634_v58 = vld [vmem:[#allocation16 + $0x1258] sm:$0xff] }
 0xb90   :  { %15439 = vmatprep.subr.bf16.mxu0 %v17627_v61  ;;  %v8626_v61 = vld [vmem:[#allocation16 + $0x1218] sm:$0xff] }
 0xb91   :  { %15096 = vmatpush1.bf16.msra.mxu1 %v17624_v42  ;;  %v17674_v42 = vcombine.low %v8618_v5, %v8622_v46  ;;  %v8666_v51 = vld [vmem:[#allocation16 + $0x1358] sm:$0xff] }
 0xb92   :  { %15440 = vmatpush1.bf16.msra.mxu0 %v17626_v30  ;;  %15097 = vmatprep.subr.bf16.mxu1 %v17633_v28  ;;  %v17681_v30 = vcombine.high %v8625_v21, %v8629_v43  ;;  %v17683_v28 = vcombine.high %v8626_v61, %v8630_v25  ;;  %v8670_v5 = vld [vmem:[#allocation16 + $0x1378] sm:$0xff]  ;;  %v8677_v21 = vld [vmem:[#allocation16 + $0x13b0] sm:$0xff] }
 0xb93   :  { %15441 = vmatprep.subr.bf16.mxu0 %v17635_v31  ;;  %v8633_v31 = vld [vmem:[#allocation16 + $0x1250] sm:$0xff]  ;;  %v8674_v43 = vld [vmem:[#allocation16 + $0x1398] sm:$0xff] }
 0xb94   :  { %v17688_v39 = vcombine.low %v8633_v31, %v8637_v22 }
 0xb95   :  { %15098 = vmatpush1.bf16.msra.mxu1 %v17632_v3  ;;  %v17682_v3 = vcombine.low %v8626_v61, %v8630_v25  ;;  %v8678_v61 = vld [vmem:[#allocation16 + $0x13b8] sm:$0xff] }
 0xb96   :  { %15442 = vmatpush1.bf16.msra.mxu0 %v17634_v9  ;;  %15099 = vmatprep.subr.bf16.mxu1 %v17641_v37  ;;  %v17689_v9 = vcombine.high %v8633_v31, %v8637_v22  ;;  %v17691_v37 = vcombine.high %v8634_v58, %v8638_v34  ;;  %v8685_v31 = vld [vmem:[#allocation16 + $0x13f0] sm:$0xff]  ;;  %v8682_v22 = vld [vmem:[#allocation16 + $0x13d8] sm:$0xff] }
 0xb97   :  { %15443 = vmatprep.subr.bf16.mxu0 %v17643_v59  ;;  %v8641_v59 = vld [vmem:[#allocation16 + $0x1290] sm:$0xff] }
 0xb98   :  { %v17696_v8 = vcombine.low %v8641_v59, %v8645_v16 }
 0xb99   :  { %15100 = vmatpush1.bf16.msra.mxu1 %v17640_v50  ;;  %v17690_v50 = vcombine.low %v8634_v58, %v8638_v34  ;;  %v8686_v58 = vld [vmem:[#allocation16 + $0x13f8] sm:$0xff] }
 0xb9a   :  { %15444 = vmatpush1.bf16.msra.mxu0 %v17642_v55  ;;  %15101 = vmatprep.subr.bf16.mxu1 %v17649_v12  ;;  %v17697_v55 = vcombine.high %v8641_v59, %v8645_v16  ;;  %v17699_v12 = vcombine.high %v8642_v38, %v8646_v47  ;;  %v8693_v59 = vld [vmem:[#allocation16 + $0x1430] sm:$0xff]  ;;  %v8690_v16 = vld [vmem:[#allocation16 + $0x1418] sm:$0xff] }
 0xb9b   :  { %15445 = vmatprep.subr.bf16.mxu0 %v17651_v1  ;;  %v8649_v1 = vld [vmem:[#allocation16 + $0x12d0] sm:$0xff] }
 0xb9c   :  { %v17704_v11 = vcombine.low %v8649_v1, %v8653_v26 }
 0xb9d   :  { %15102 = vmatpush1.bf16.msra.mxu1 %v17648_v41  ;;  %v17698_v41 = vcombine.low %v8642_v38, %v8646_v47  ;;  %v8694_v38 = vld [vmem:[#allocation16 + $0x1438] sm:$0xff] }
 0xb9e   :  { %15446 = vmatpush1.bf16.msra.mxu0 %v17650_v53  ;;  %15103 = vmatprep.subr.bf16.mxu1 %v17657_v54  ;;  %v17705_v53 = vcombine.high %v8649_v1, %v8653_v26  ;;  %v17707_v54 = vcombine.high %v8650_v6, %v8654_v36  ;;  %v8701_v1 = vld [vmem:[#allocation16 + $0x1470] sm:$0xff] }
 0xb9f   :  { %15447 = vmatprep.subr.bf16.mxu0 %v17659_v56  ;;  %v8657_v56 = vld [vmem:[#allocation16 + $0x1310] sm:$0xff] }
 0xba0   :  { %v17712_v46 = vcombine.low %v8657_v56, %v8661_v23 }
 0xba1   :  { %15104 = vmatpush1.bf16.msra.mxu1 %v17656_v57  ;;  %v17706_v57 = vcombine.low %v8650_v6, %v8654_v36  ;;  %v8698_v6 = vld [vmem:[#allocation16 + $0x1458] sm:$0xff] }
 0xba2   :  { %15448 = vmatpush1.bf16.msra.mxu0 %v17658_v4  ;;  %15105 = vmatprep.subr.bf16.mxu1 %v17665_v15  ;;  %v17713_v4 = vcombine.high %v8657_v56, %v8661_v23  ;;  %v17715_v15 = vcombine.high %v8658_v27, %v8662_v48  ;;  %v8702_v36 = vld [vmem:[#allocation16 + $0x1478] sm:$0xff] }
 0xba3   :  { %15449 = vmatprep.subr.bf16.mxu0 %v17667_v49  ;;  %v8665_v49 = vld [vmem:[#allocation16 + $0x1350] sm:$0xff]  ;;  %v17755_v56 = vcombine.high %v8698_v6, %v8702_v36  ;;  %v8706_v23 = vld [vmem:[#allocation16 + $0x1498] sm:$0xff] }
 0xba4   :  { %v17720_v25 = vcombine.low %v8665_v49, %v8669_v45 }
 0xba5   :  { %15106 = vmatpush1.bf16.msra.mxu1 %v17664_v52  ;;  %v17714_v52 = vcombine.low %v8658_v27, %v8662_v48  ;;  %v8710_v27 = vld [vmem:[#allocation16 + $0x14b8] sm:$0xff] }
 0xba6   :  { %15450 = vmatpush1.bf16.msra.mxu0 %v17666_v19  ;;  %15107 = vmatprep.subr.bf16.mxu1 %v17673_v13  ;;  %v17721_v19 = vcombine.high %v8665_v49, %v8669_v45  ;;  %v17723_v13 = vcombine.high %v8666_v51, %v8670_v5  ;;  %v8717_v49 = vld [vmem:[#allocation16 + $0x14f0] sm:$0xff]  ;;  %v8714_v45 = vld [vmem:[#allocation16 + $0x14d8] sm:$0xff] }
 0xba7   :  { %15451 = vmatprep.subr.bf16.mxu0 %v17675_v24  ;;  %v8673_v24 = vld [vmem:[#allocation16 + $0x1390] sm:$0xff] }
 0xba8   :  { %v17728_v34 = vcombine.low %v8673_v24, %v8677_v21 }
 0xba9   :  { %15108 = vmatpush1.bf16.msra.mxu1 %v17672_v7  ;;  %v17722_v7 = vcombine.low %v8666_v51, %v8670_v5  ;;  %v8718_v51 = vld [vmem:[#allocation16 + $0x14f8] sm:$0xff] }
 0xbaa   :  { %15452 = vmatpush1.bf16.msra.mxu0 %v17674_v42  ;;  %15109 = vmatprep.subr.bf16.mxu1 %v17681_v30  ;;  %v17729_v42 = vcombine.high %v8673_v24, %v8677_v21  ;;  %v17731_v30 = vcombine.high %v8674_v43, %v8678_v61  ;;  %v8722_v24 = vld [vmem:[#allocation16 + $0x1518] sm:$0xff] }
 0xbab   :  { %15453 = vmatprep.subr.bf16.mxu0 %v17683_v28  ;;  %v8681_v28 = vld [vmem:[#allocation16 + $0x13d0] sm:$0xff]  ;;  %v8726_v21 = vld [vmem:[#allocation16 + $0x1538] sm:$0xff] }
 0xbac   :  { %v17736_v47 = vcombine.low %v8681_v28, %v8685_v31 }
 0xbad   :  { %15110 = vmatpush1.bf16.msra.mxu1 %v17680_v32  ;;  %v17730_v32 = vcombine.low %v8674_v43, %v8678_v61  ;;  %v17770_v43 = vcombine.low %v8714_v45, %v8718_v51 }
 0xbae   :  { %15454 = vmatpush1.bf16.msra.mxu0 %v17682_v3  ;;  %15111 = vmatprep.subr.bf16.mxu1 %v17689_v9  ;;  %v17737_v3 = vcombine.high %v8681_v28, %v8685_v31  ;;  %v17739_v9 = vcombine.high %v8682_v22, %v8686_v58  ;;  %v8734_v28 = vld [vmem:[#allocation16 + $0x1578] sm:$0xff] }
 0xbaf   :  { %15455 = vmatprep.subr.bf16.mxu0 %v17691_v37  ;;  %v8689_v37 = vld [vmem:[#allocation16 + $0x1410] sm:$0xff] }
 0xbb0   :  { %v17744_v26 = vcombine.low %v8689_v37, %v8693_v59 }
 0xbb1   :  { %15112 = vmatpush1.bf16.msra.mxu1 %v17688_v39  ;;  %v17738_v39 = vcombine.low %v8682_v22, %v8686_v58  ;;  %v17778_v22 = vcombine.low %v8722_v24, %v8726_v21 }
 0xbb2   :  { %15456 = vmatpush1.bf16.msra.mxu0 %v17690_v50  ;;  %15113 = vmatprep.subr.bf16.mxu1 %v17697_v55  ;;  %v17745_v50 = vcombine.high %v8689_v37, %v8693_v59  ;;  %v17747_v55 = vcombine.high %v8690_v16, %v8694_v38  ;;  %v8742_v37 = vld [vmem:[#allocation16 + $0x15b8] sm:$0xff] }
 0xbb3   :  { %15457 = vmatprep.subr.bf16.mxu0 %v17699_v12  ;;  %v8697_v12 = vld [vmem:[#allocation16 + $0x1450] sm:$0xff] }
 0xbb4   :  { %v17752_v48 = vcombine.low %v8697_v12, %v8701_v1 }
 0xbb5   :  { %15114 = vmatpush1.bf16.msra.mxu1 %v17696_v8  ;;  %v17746_v8 = vcombine.low %v8690_v16, %v8694_v38 }
 0xbb6   :  { %15458 = vmatpush1.bf16.msra.mxu0 %v17698_v41  ;;  %15115 = vmatprep.subr.bf16.mxu1 %v17705_v53  ;;  %v17753_v41 = vcombine.high %v8697_v12, %v8701_v1  ;;  %v8705_v53 = vld [vmem:[#allocation16 + $0x1490] sm:$0xff]  ;;  %v8750_v12 = vld [vmem:[#allocation16 + $0x15f8] sm:$0xff] }
 0xbb7   :  { %15459 = vmatprep.subr.bf16.mxu0 %v17707_v54  ;;  %v8709_v54 = vld [vmem:[#allocation16 + $0x14b0] sm:$0xff] }
 0xbb8   :  { %v17760_v5 = vcombine.low %v8705_v53, %v8709_v54 }
 0xbb9   :  { %15116 = vmatpush1.bf16.msra.mxu1 %v17704_v11  ;;  %v17754_v11 = vcombine.low %v8698_v6, %v8702_v36 }
 0xbba   :  { %15460 = vmatpush1.bf16.msra.mxu0 %v17706_v57  ;;  %15117 = vmatprep.subr.bf16.mxu1 %v17713_v4  ;;  %v17761_v57 = vcombine.high %v8705_v53, %v8709_v54  ;;  %v17763_v4 = vcombine.high %v8706_v23, %v8710_v27  ;;  %v8754_v53 = vld [vmem:[#allocation16 + $0x1618] sm:$0xff] }
 0xbbb   :  { %15461 = vmatprep.subr.bf16.mxu0 %v17715_v15  ;;  %v8713_v15 = vld [vmem:[#allocation16 + $0x14d0] sm:$0xff]  ;;  %v8758_v54 = vld [vmem:[#allocation16 + $0x1638] sm:$0xff] }
 0xbbd   :  { %15118 = vmatpush1.bf16.msra.mxu1 %v17712_v46  ;;  %v17769_v46 = vcombine.high %v8713_v15, %v8717_v49 }
 0xbbe   :  { %15462 = vmatpush1.bf16.msra.mxu0 %v17714_v52  ;;  %15119 = vmatprep.subr.bf16.mxu1 %v17721_v19  ;;  %v17771_v52 = vcombine.high %v8714_v45, %v8718_v51  ;;  %v8721_v19 = vld [vmem:[#allocation16 + $0x1510] sm:$0xff]  ;;  %v17810_v45 = vcombine.low %v8754_v53, %v8758_v54 }
 0xbbf   :  { %15463 = vmatprep.subr.bf16.mxu0 %v17723_v13  ;;  %v8725_v13 = vld [vmem:[#allocation16 + $0x1530] sm:$0xff] }
 0xbc0   :  { %v17777_v61 = vcombine.high %v8721_v19, %v8725_v13  ;;  %v17776_v31 = vcombine.low %v8721_v19, %v8725_v13  ;;  %v8774_v19 = vld [vmem:[#allocation16 + $0x16b8] sm:$0xff] }
 0xbc1   :  { %15120 = vmatpush1.bf16.msra.mxu1 %v17720_v25  ;;  %v17779_v25 = vcombine.high %v8722_v24, %v8726_v21 }
 0xbc2   :  { %15464 = vmatpush1.bf16.msra.mxu0 %v17722_v7  ;;  %15121 = vmatprep.subr.bf16.mxu1 %v17729_v42  ;;  %v8729_v7 = vld [vmem:[#allocation16 + $0x1550] sm:$0xff] }
 0xbc3   :  { %15465 = vmatprep.subr.bf16.mxu0 %v17731_v30  ;;  %v8733_v42 = vld [vmem:[#allocation16 + $0x1570] sm:$0xff]  ;;  %v8730_v30 = vld [vmem:[#allocation16 + $0x1558] sm:$0xff] }
 0xbc4   :  { %v17785_v58 = vcombine.high %v8729_v7, %v8733_v42  ;;  %v17784_v59 = vcombine.low %v8729_v7, %v8733_v42  ;;  %v17786_v16 = vcombine.low %v8730_v30, %v8734_v28  ;;  %v8782_v7 = vld [vmem:[#allocation16 + $0x16f8] sm:$0xff] }
 0xbc5   :  { %15122 = vmatpush1.bf16.msra.mxu1 %v17728_v34  ;;  %v17787_v34 = vcombine.high %v8730_v30, %v8734_v28 }
 0xbc6   :  { %15466 = vmatpush1.bf16.msra.mxu0 %v17730_v32  ;;  %15123 = vmatprep.subr.bf16.mxu1 %v17737_v3  ;;  %v8737_v32 = vld [vmem:[#allocation16 + $0x1590] sm:$0xff] }
 0xbc7   :  { %15467 = vmatprep.subr.bf16.mxu0 %v17739_v9  ;;  %v8741_v3 = vld [vmem:[#allocation16 + $0x15b0] sm:$0xff]  ;;  %v8738_v9 = vld [vmem:[#allocation16 + $0x1598] sm:$0xff] }
 0xbc8   :  { %v17793_v38 = vcombine.high %v8737_v32, %v8741_v3  ;;  %v17792_v1 = vcombine.low %v8737_v32, %v8741_v3  ;;  %v8790_v32 = vld [vmem:[#allocation16 + $0x1738] sm:$0xff] }
 0xbc9   :  { %15124 = vmatpush1.bf16.msra.mxu1 %v17736_v47  ;;  %v17795_v47 = vcombine.high %v8738_v9, %v8742_v37 }
 0xbca   :  { %15468 = vmatpush1.bf16.msra.mxu0 %v17738_v39  ;;  %15136 = vmatprep.subr.bf16.mxu1 %v17745_v50  ;;  %v8745_v39 = vld [vmem:[#allocation16 + $0x15d0] sm:$0xff] }
 0xbcb   :  { %15480 = vmatprep.subr.bf16.mxu0 %v17747_v55  ;;  %v8749_v50 = vld [vmem:[#allocation16 + $0x15f0] sm:$0xff]  ;;  %v8746_v55 = vld [vmem:[#allocation16 + $0x15d8] sm:$0xff] }
 0xbcc   :  { %15126 = vmatmul.mubr.bf16.vlgmr.msra.gmra.mrb[108].mxu1 %v21143_v44  ;;  %v17801_v6 = vcombine.high %v8745_v39, %v8749_v50  ;;  %v17803_v36 = vcombine.high %v8746_v55, %v8750_v12 }
 0xbcd   :  { %15470 = vmatmul.mubr.bf16.vlgmr.msra.gmra.mrb[108].mxu0 %v21143_v44  ;;  %15137 = vmatpush1.bf16.msra.mxu1 %v17744_v26  ;;  %v17762_v44 = vcombine.low %v8706_v23, %v8710_v27  ;;  %v17794_v26 = vcombine.low %v8738_v9, %v8742_v37  ;;  %v17802_v23 = vcombine.low %v8746_v55, %v8750_v12 }
 0xbce   :  { %15168 = vmatprep.mubr.bf16.mxu1 %v21094_v35  ;;  %15481 = vmatpush1.bf16.msra.mxu0 %v17746_v8  ;;  %v8753_v8 = vld [vmem:[#allocation16 + $0x1610] sm:$0xff] }
 0xbcf   :  { %15512 = vmatprep.mubr.bf16.mxu0 %v21094_v35  ;;  %15138 = vmatprep.subr.bf16.mxu1 %v17753_v41  ;;  %v17768_v35 = vcombine.low %v8713_v15, %v8717_v49  ;;  %v8757_v41 = vld [vmem:[#allocation16 + $0x1630] sm:$0xff]  ;;  %v8766_v15 = vld [vmem:[#allocation16 + $0x1678] sm:$0xff] }
 0xbd0   :  { %15482 = vmatprep.subr.bf16.mxu0 %v17755_v56  ;;  %v17800_v56 = vcombine.low %v8745_v39, %v8749_v50  ;;  %v17809_v27 = vcombine.high %v8753_v8, %v8757_v41  ;;  %v17808_v49 = vcombine.low %v8753_v8, %v8757_v41  ;;  %v8798_v39 = vld [vmem:[#allocation16 + $0x1778] sm:$0xff] }
 0xbd1   :  { %15139 = vmatpush1.bf16.msra.mxu1 %v17752_v48  ;;  %v17811_v48 = vcombine.high %v8754_v53, %v8758_v54  ;;  %v8806_v8 = vld [vmem:[#allocation16 + $0x17b8] sm:$0xff] }
 0xbd2   :  { %15483 = vmatpush1.bf16.msra.mxu0 %v17754_v11  ;;  %15140 = vmatprep.subr.bf16.mxu1 %v17761_v57  ;;  %v8761_v11 = vld [vmem:[#allocation16 + $0x1650] sm:$0xff] }
 0xbd3   :  { %15484 = vmatprep.subr.bf16.mxu0 %v17763_v4  ;;  %v8765_v57 = vld [vmem:[#allocation16 + $0x1670] sm:$0xff]  ;;  %v8762_v4 = vld [vmem:[#allocation16 + $0x1658] sm:$0xff] }
 0xbd4   :  { %v17817_v51 = vcombine.high %v8761_v11, %v8765_v57  ;;  %v17816_v13 = vcombine.low %v8761_v11, %v8765_v57  ;;  %v17818_v24 = vcombine.low %v8762_v4, %v8766_v15  ;;  %v8814_v11 = vld [vmem:[#allocation16 + $0x17f8] sm:$0xff] }
 0xbd5   :  { %15141 = vmatpush1.bf16.msra.mxu1 %v17760_v5  ;;  %v17819_v5 = vcombine.high %v8762_v4, %v8766_v15 }
 0xbd6   :  { %15485 = vmatpush1.bf16.msra.mxu0 %v17762_v44  ;;  %15142 = vmatprep.subr.bf16.mxu1 %v17769_v46  ;;  %v8769_v44 = vld [vmem:[#allocation16 + $0x1690] sm:$0xff] }
 0xbd7   :  { %15486 = vmatprep.subr.bf16.mxu0 %v17771_v52  ;;  %v8773_v46 = vld [vmem:[#allocation16 + $0x16b0] sm:$0xff]  ;;  %v8770_v52 = vld [vmem:[#allocation16 + $0x1698] sm:$0xff] }
 0xbd8   :  { %v17825_v21 = vcombine.high %v8769_v44, %v8773_v46  ;;  %v17824_v42 = vcombine.low %v8769_v44, %v8773_v46  ;;  %v17826_v30 = vcombine.low %v8770_v52, %v8774_v19  ;;  %v8822_v44 = vld [vmem:[#allocation16 + $0x1838] sm:$0xff] }
 0xbd9   :  { %15143 = vmatpush1.bf16.msra.mxu1 %v17768_v35  ;;  %v17827_v35 = vcombine.high %v8770_v52, %v8774_v19 }
 0xbda   :  { %15487 = vmatpush1.bf16.msra.mxu0 %v17770_v43  ;;  %15144 = vmatprep.subr.bf16.mxu1 %v17777_v61  ;;  %v8777_v43 = vld [vmem:[#allocation16 + $0x16d0] sm:$0xff] }
 0xbdb   :  { %15488 = vmatprep.subr.bf16.mxu0 %v17779_v25  ;;  %v8781_v61 = vld [vmem:[#allocation16 + $0x16f0] sm:$0xff]  ;;  %v8778_v25 = vld [vmem:[#allocation16 + $0x16d8] sm:$0xff] }
 0xbdc   :  { %v17833_v28 = vcombine.high %v8777_v43, %v8781_v61  ;;  %v17832_v3 = vcombine.low %v8777_v43, %v8781_v61  ;;  %v17834_v9 = vcombine.low %v8778_v25, %v8782_v7  ;;  %v8826_v43 = vld [vmem:[#allocation16 + $0x1858] sm:$0xff] }
 0xbdd   :  { %15145 = vmatpush1.bf16.msra.mxu1 %v17776_v31  ;;  %v17835_v31 = vcombine.high %v8778_v25, %v8782_v7  ;;  %v8830_v61 = vld [vmem:[#allocation16 + $0x1878] sm:$0xff] }
 0xbde   :  { %15489 = vmatpush1.bf16.msra.mxu0 %v17778_v22  ;;  %15146 = vmatprep.subr.bf16.mxu1 %v17785_v58  ;;  %v8785_v22 = vld [vmem:[#allocation16 + $0x1710] sm:$0xff] }
 0xbdf   :  { %15490 = vmatprep.subr.bf16.mxu0 %v17787_v34  ;;  %v8789_v58 = vld [vmem:[#allocation16 + $0x1730] sm:$0xff]  ;;  %v8786_v34 = vld [vmem:[#allocation16 + $0x1718] sm:$0xff] }
 0xbe0   :  { %v17841_v37 = vcombine.high %v8785_v22, %v8789_v58  ;;  %v17840_v50 = vcombine.low %v8785_v22, %v8789_v58  ;;  %v17842_v55 = vcombine.low %v8786_v34, %v8790_v32  ;;  %v8838_v22 = vld [vmem:[#allocation16 + $0x18b8] sm:$0xff] }
 0xbe1   :  { %15147 = vmatpush1.bf16.msra.mxu1 %v17784_v59  ;;  %v17843_v59 = vcombine.high %v8786_v34, %v8790_v32  ;;  %v17882_v34 = vcombine.low %v8826_v43, %v8830_v61 }
 0xbe2   :  { %15491 = vmatpush1.bf16.msra.mxu0 %v17786_v16  ;;  %15148 = vmatprep.subr.bf16.mxu1 %v17793_v38  ;;  %v8793_v16 = vld [vmem:[#allocation16 + $0x1750] sm:$0xff] }
 0xbe3   :  { %15492 = vmatprep.subr.bf16.mxu0 %v17795_v47  ;;  %v8797_v38 = vld [vmem:[#allocation16 + $0x1770] sm:$0xff]  ;;  %v8794_v47 = vld [vmem:[#allocation16 + $0x1758] sm:$0xff] }
 0xbe4   :  { %v17849_v12 = vcombine.high %v8793_v16, %v8797_v38  ;;  %v17848_v41 = vcombine.low %v8793_v16, %v8797_v38  ;;  %v17850_v53 = vcombine.low %v8794_v47, %v8798_v39  ;;  %v8846_v16 = vld [vmem:[#allocation16 + $0x18f8] sm:$0xff] }
 0xbe5   :  { %15149 = vmatpush1.bf16.msra.mxu1 %v17792_v1  ;;  %v17851_v1 = vcombine.high %v8794_v47, %v8798_v39 }
 0xbe6   :  { %15493 = vmatpush1.bf16.msra.mxu0 %v17794_v26  ;;  %15150 = vmatprep.subr.bf16.mxu1 %v17801_v6  ;;  %v8801_v26 = vld [vmem:[#allocation16 + $0x1790] sm:$0xff] }
 0xbe7   :  { %15494 = vmatprep.subr.bf16.mxu0 %v17803_v36  ;;  %v8805_v6 = vld [vmem:[#allocation16 + $0x17b0] sm:$0xff]  ;;  %v8802_v36 = vld [vmem:[#allocation16 + $0x1798] sm:$0xff] }
 0xbe8   :  { %v17857_v54 = vcombine.high %v8801_v26, %v8805_v6  ;;  %v17856_v57 = vcombine.low %v8801_v26, %v8805_v6  ;;  %v17858_v4 = vcombine.low %v8802_v36, %v8806_v8 }
 0xbe9   :  { %15151 = vmatpush1.bf16.msra.mxu1 %v17800_v56  ;;  %v17859_v56 = vcombine.high %v8802_v36, %v8806_v8  ;;  %v8857_v8 = vld [vmem:[#allocation16 + $0x1950] sm:$0xff] }
 0xbea   :  { %15495 = vmatpush1.bf16.msra.mxu0 %v17802_v23  ;;  %15152 = vmatprep.subr.bf16.mxu1 %v17809_v27  ;;  %v8809_v23 = vld [vmem:[#allocation16 + $0x17d0] sm:$0xff] }
 0xbeb   :  { %15496 = vmatprep.subr.bf16.mxu0 %v17811_v48  ;;  %v8813_v27 = vld [vmem:[#allocation16 + $0x17f0] sm:$0xff]  ;;  %v8810_v48 = vld [vmem:[#allocation16 + $0x17d8] sm:$0xff] }
 0xbec   :  { %v17865_v15 = vcombine.high %v8809_v23, %v8813_v27  ;;  %v17864_v46 = vcombine.low %v8809_v23, %v8813_v27  ;;  %v17866_v52 = vcombine.low %v8810_v48, %v8814_v11 }
 0xbed   :  { %15153 = vmatpush1.bf16.msra.mxu1 %v17808_v49  ;;  %v17867_v49 = vcombine.high %v8810_v48, %v8814_v11  ;;  %v8865_v11 = vld [vmem:[#allocation16 + $0x1990] sm:$0xff] }
 0xbee   :  { %15497 = vmatpush1.bf16.msra.mxu0 %v17810_v45  ;;  %15154 = vmatprep.subr.bf16.mxu1 %v17817_v51  ;;  %v8817_v45 = vld [vmem:[#allocation16 + $0x1810] sm:$0xff] }
 0xbef   :  { %15498 = vmatprep.subr.bf16.mxu0 %v17819_v5  ;;  %v8821_v51 = vld [vmem:[#allocation16 + $0x1830] sm:$0xff]  ;;  %v8818_v5 = vld [vmem:[#allocation16 + $0x1818] sm:$0xff] }
 0xbf0   :  { %v17873_v19 = vcombine.high %v8817_v45, %v8821_v51  ;;  %v17874_v25 = vcombine.low %v8818_v5, %v8822_v44 }
 0xbf1   :  { %15155 = vmatpush1.bf16.msra.mxu1 %v17816_v13  ;;  %v17875_v13 = vcombine.high %v8818_v5, %v8822_v44  ;;  %v8873_v44 = vld [vmem:[#allocation16 + $0x19d0] sm:$0xff] }
 0xbf2   :  { %15499 = vmatpush1.bf16.msra.mxu0 %v17818_v24  ;;  %15156 = vmatprep.subr.bf16.mxu1 %v17825_v21  ;;  %v8825_v24 = vld [vmem:[#allocation16 + $0x1850] sm:$0xff] }
 0xbf3   :  { %15500 = vmatprep.subr.bf16.mxu0 %v17827_v35  ;;  %v8829_v21 = vld [vmem:[#allocation16 + $0x1870] sm:$0xff]  ;;  %v17872_v35 = vcombine.low %v8817_v45, %v8821_v51 }
 0xbf4   :  { %v17881_v7 = vcombine.high %v8825_v24, %v8829_v21  ;;  %v17880_v58 = vcombine.low %v8825_v24, %v8829_v21 }
 0xbf5   :  { %15157 = vmatpush1.bf16.msra.mxu1 %v17824_v42  ;;  %v8833_v42 = vld [vmem:[#allocation16 + $0x1890] sm:$0xff] }
 0xbf6   :  { %15501 = vmatpush1.bf16.msra.mxu0 %v17826_v30  ;;  %15158 = vmatprep.subr.bf16.mxu1 %v17833_v28  ;;  %v8837_v30 = vld [vmem:[#allocation16 + $0x18b0] sm:$0xff]  ;;  %v17883_v28 = vcombine.high %v8826_v43, %v8830_v61 }
 0xbf7   :  { %15502 = vmatprep.subr.bf16.mxu0 %v17835_v31  ;;  %v8834_v31 = vld [vmem:[#allocation16 + $0x1898] sm:$0xff]  ;;  %v17889_v32 = vcombine.high %v8833_v42, %v8837_v30  ;;  %v17888_v38 = vcombine.low %v8833_v42, %v8837_v30  ;;  %v8881_v43 = vld [vmem:[#allocation16 + $0x1a10] sm:$0xff] }
 0xbf8   :  { %v8885_v61 = vld [vmem:[#allocation16 + $0x1a30] sm:$0xff] }
 0xbf9   :  { %15159 = vmatpush1.bf16.msra.mxu1 %v17832_v3  ;;  %v17891_v3 = vcombine.high %v8834_v31, %v8838_v22 }
 0xbfa   :  { %15503 = vmatpush1.bf16.msra.mxu0 %v17834_v9  ;;  %15160 = vmatprep.subr.bf16.mxu1 %v17841_v37  ;;  %v8841_v9 = vld [vmem:[#allocation16 + $0x18d0] sm:$0xff] }
 0xbfb   :  { %15504 = vmatprep.subr.bf16.mxu0 %v17843_v59  ;;  %v8845_v37 = vld [vmem:[#allocation16 + $0x18f0] sm:$0xff]  ;;  %v8842_v59 = vld [vmem:[#allocation16 + $0x18d8] sm:$0xff] }
 0xbfc   :  { %v17897_v47 = vcombine.high %v8841_v9, %v8845_v37  ;;  %v17899_v39 = vcombine.high %v8842_v59, %v8846_v16  ;;  %v17898_v26 = vcombine.low %v8842_v59, %v8846_v16  ;;  %v8897_v16 = vld [vmem:[#allocation16 + $0x1a90] sm:$0xff] }
 0xbfd   :  { %15161 = vmatpush1.bf16.msra.mxu1 %v17840_v50  ;;  %v8849_v50 = vld [vmem:[#allocation16 + $0x1910] sm:$0xff] }
 0xbfe   :  { %15505 = vmatpush1.bf16.msra.mxu0 %v17842_v55  ;;  %15162 = vmatprep.subr.bf16.mxu1 %v17849_v12  ;;  %v8853_v55 = vld [vmem:[#allocation16 + $0x1930] sm:$0xff]  ;;  %v8850_v12 = vld [vmem:[#allocation16 + $0x1918] sm:$0xff] }
 0xbff   :  { %15506 = vmatprep.subr.bf16.mxu0 %v17851_v1  ;;  %v8854_v1 = vld [vmem:[#allocation16 + $0x1938] sm:$0xff]  ;;  %v17905_v6 = vcombine.high %v8849_v50, %v8853_v55 }
 0xc00   :  { %v17907_v36 = vcombine.high %v8850_v12, %v8854_v1  ;;  %v17906_v23 = vcombine.low %v8850_v12, %v8854_v1  ;;  %v8905_v1 = vld [vmem:[#allocation16 + $0x1ad0] sm:$0xff] }
 0xc01   :  { %15163 = vmatpush1.bf16.msra.mxu1 %v17848_v41  ;;  %v8861_v41 = vld [vmem:[#allocation16 + $0x1970] sm:$0xff] }
 0xc02   :  { %15507 = vmatpush1.bf16.msra.mxu0 %v17850_v53  ;;  %15164 = vmatprep.subr.bf16.mxu1 %v17857_v54  ;;  %v8858_v53 = vld [vmem:[#allocation16 + $0x1958] sm:$0xff]  ;;  %v17913_v27 = vcombine.high %v8857_v8, %v8861_v41 }
 0xc03   :  { %15508 = vmatprep.subr.bf16.mxu0 %v17859_v56  ;;  %v8862_v54 = vld [vmem:[#allocation16 + $0x1978] sm:$0xff]  ;;  %v17904_v56 = vcombine.low %v8849_v50, %v8853_v55 }
 0xc04   :  { %v17915_v48 = vcombine.high %v8858_v53, %v8862_v54  ;;  %v17914_v45 = vcombine.low %v8858_v53, %v8862_v54  ;;  %v8913_v54 = vld [vmem:[#allocation16 + $0x1b10] sm:$0xff] }
 0xc05   :  { %15165 = vmatpush1.bf16.msra.mxu1 %v17856_v57  ;;  %v8869_v57 = vld [vmem:[#allocation16 + $0x19b0] sm:$0xff] }
 0xc06   :  { %15509 = vmatpush1.bf16.msra.mxu0 %v17858_v4  ;;  %15166 = vmatprep.subr.bf16.mxu1 %v17865_v15  ;;  %v8866_v4 = vld [vmem:[#allocation16 + $0x1998] sm:$0xff]  ;;  %v17921_v51 = vcombine.high %v8865_v11, %v8869_v57 }
 0xc07   :  { %15510 = vmatprep.subr.bf16.mxu0 %v17867_v49  ;;  %v8870_v15 = vld [vmem:[#allocation16 + $0x19b8] sm:$0xff]  ;;  %v17912_v49 = vcombine.low %v8857_v8, %v8861_v41 }
 0xc08   :  { %v17923_v5 = vcombine.high %v8866_v4, %v8870_v15  ;;  %v17922_v24 = vcombine.low %v8866_v4, %v8870_v15  ;;  %v8921_v15 = vld [vmem:[#allocation16 + $0x1b50] sm:$0xff] }
 0xc09   :  { %15167 = vmatpush1.bf16.msra.mxu1 %v17864_v46  ;;  %v8877_v46 = vld [vmem:[#allocation16 + $0x19f0] sm:$0xff] }
 0xc0a   :  { %15511 = vmatpush1.bf16.msra.mxu0 %v17866_v52  ;;  %15179 = vmatprep.subr.bf16.mxu1 %v17873_v19  ;;  %v8874_v52 = vld [vmem:[#allocation16 + $0x19d8] sm:$0xff]  ;;  %v17929_v21 = vcombine.high %v8873_v44, %v8877_v46  ;;  %v17928_v42 = vcombine.low %v8873_v44, %v8877_v46 }
 0xc0b   :  { %15523 = vmatprep.subr.bf16.mxu0 %v17875_v13  ;;  %v8878_v19 = vld [vmem:[#allocation16 + $0x19f8] sm:$0xff]  ;;  %v17920_v13 = vcombine.low %v8865_v11, %v8869_v57 }
 0xc0c   :  { %15169 = vmatmul.mubr.bf16.vlgmr.msra.gmra.mrb[108].mxu1 %v21078_v18  ;;  %v17930_v30 = vcombine.low %v8874_v52, %v8878_v19 }
 0xc0d   :  { %15513 = vmatmul.mubr.bf16.vlgmr.msra.gmra.mrb[108].mxu0 %v21078_v18  ;;  %15180 = vmatpush1.bf16.msra.mxu1 %v17872_v35  ;;  %v17890_v18 = vcombine.low %v8834_v31, %v8838_v22  ;;  %v17931_v35 = vcombine.high %v8874_v52, %v8878_v19  ;;  %v8889_v22 = vld [vmem:[#allocation16 + $0x1a50] sm:$0xff] }
 0xc0e   :  { %15211 = vmatprep.mubr.bf16.mxu1 %v21149_v2  ;;  %15524 = vmatpush1.bf16.msra.mxu0 %v17874_v25  ;;  %v8882_v25 = vld [vmem:[#allocation16 + $0x1a18] sm:$0xff]  ;;  %v8929_v19 = vld [vmem:[#allocation16 + $0x1b90] sm:$0xff] }
 0xc0f   :  { %15555 = vmatprep.mubr.bf16.mxu0 %v21149_v2  ;;  %15181 = vmatprep.subr.bf16.mxu1 %v17881_v7  ;;  %v17896_v2 = vcombine.low %v8841_v9, %v8845_v37  ;;  %v8886_v7 = vld [vmem:[#allocation16 + $0x1a38] sm:$0xff] }
 0xc10   :  { %15525 = vmatprep.subr.bf16.mxu0 %v17883_v28  ;;  %v17937_v28 = vcombine.high %v8881_v43, %v8885_v61  ;;  %v17939_v31 = vcombine.high %v8882_v25, %v8886_v7  ;;  %v17938_v9 = vcombine.low %v8882_v25, %v8886_v7  ;;  %v8937_v7 = vld [vmem:[#allocation16 + $0x1bd0] sm:$0xff] }
 0xc11   :  { %15182 = vmatpush1.bf16.msra.mxu1 %v17880_v58  ;;  %v8893_v58 = vld [vmem:[#allocation16 + $0x1a70] sm:$0xff] }
 0xc12   :  { %15526 = vmatpush1.bf16.msra.mxu0 %v17882_v34  ;;  %15183 = vmatprep.subr.bf16.mxu1 %v17889_v32  ;;  %v8890_v34 = vld [vmem:[#allocation16 + $0x1a58] sm:$0xff]  ;;  %v17945_v37 = vcombine.high %v8889_v22, %v8893_v58 }
 0xc13   :  { %15527 = vmatprep.subr.bf16.mxu0 %v17891_v3  ;;  %v8894_v32 = vld [vmem:[#allocation16 + $0x1a78] sm:$0xff]  ;;  %v17936_v3 = vcombine.low %v8881_v43, %v8885_v61 }
 0xc14   :  { %v17947_v59 = vcombine.high %v8890_v34, %v8894_v32  ;;  %v17946_v50 = vcombine.low %v8890_v34, %v8894_v32  ;;  %v8945_v32 = vld [vmem:[#allocation16 + $0x1c10] sm:$0xff] }
 0xc15   :  { %15184 = vmatpush1.bf16.msra.mxu1 %v17888_v38  ;;  %v8901_v38 = vld [vmem:[#allocation16 + $0x1ab0] sm:$0xff] }
 0xc16   :  { %15528 = vmatpush1.bf16.msra.mxu0 %v17890_v18  ;;  %15185 = vmatprep.subr.bf16.mxu1 %v17897_v47  ;;  %v8898_v18 = vld [vmem:[#allocation16 + $0x1a98] sm:$0xff]  ;;  %v17953_v55 = vcombine.high %v8897_v16, %v8901_v38 }
 0xc17   :  { %15529 = vmatprep.subr.bf16.mxu0 %v17899_v39  ;;  %v8902_v47 = vld [vmem:[#allocation16 + $0x1ab8] sm:$0xff]  ;;  %v17944_v39 = vcombine.low %v8889_v22, %v8893_v58 }
 0xc18   :  { %v17955_v12 = vcombine.high %v8898_v18, %v8902_v47  ;;  %v17954_v8 = vcombine.low %v8898_v18, %v8902_v47  ;;  %v8953_v47 = vld [vmem:[#allocation16 + $0x1c50] sm:$0xff] }
 0xc19   :  { %15186 = vmatpush1.bf16.msra.mxu1 %v17896_v2  ;;  %v8909_v2 = vld [vmem:[#allocation16 + $0x1af0] sm:$0xff] }
 0xc1a   :  { %15530 = vmatpush1.bf16.msra.mxu0 %v17898_v26  ;;  %15187 = vmatprep.subr.bf16.mxu1 %v17905_v6  ;;  %v8906_v26 = vld [vmem:[#allocation16 + $0x1ad8] sm:$0xff]  ;;  %v17961_v41 = vcombine.high %v8905_v1, %v8909_v2 }
 0xc1b   :  { %15531 = vmatprep.subr.bf16.mxu0 %v17907_v36  ;;  %v8910_v6 = vld [vmem:[#allocation16 + $0x1af8] sm:$0xff]  ;;  %v17952_v36 = vcombine.low %v8897_v16, %v8901_v38 }
 0xc1c   :  { %v17963_v53 = vcombine.high %v8906_v26, %v8910_v6  ;;  %v17962_v11 = vcombine.low %v8906_v26, %v8910_v6  ;;  %v8961_v26 = vld [vmem:[#allocation16 + $0x1c90] sm:$0xff] }
 0xc1d   :  { %15188 = vmatpush1.bf16.msra.mxu1 %v17904_v56  ;;  %v8917_v56 = vld [vmem:[#allocation16 + $0x1b30] sm:$0xff] }
 0xc1e   :  { %15532 = vmatpush1.bf16.msra.mxu0 %v17906_v23  ;;  %15189 = vmatprep.subr.bf16.mxu1 %v17913_v27  ;;  %v8914_v23 = vld [vmem:[#allocation16 + $0x1b18] sm:$0xff]  ;;  %v17969_v57 = vcombine.high %v8913_v54, %v8917_v56  ;;  %v8965_v6 = vld [vmem:[#allocation16 + $0x1cb0] sm:$0xff] }
 0xc1f   :  { %15533 = vmatprep.subr.bf16.mxu0 %v17915_v48  ;;  %v8918_v27 = vld [vmem:[#allocation16 + $0x1b38] sm:$0xff]  ;;  %v17960_v48 = vcombine.low %v8905_v1, %v8909_v2 }
 0xc20   :  { %v17971_v4 = vcombine.high %v8914_v23, %v8918_v27  ;;  %v17970_v44 = vcombine.low %v8914_v23, %v8918_v27  ;;  %v8969_v27 = vld [vmem:[#allocation16 + $0x1cd0] sm:$0xff] }
 0xc21   :  { %15190 = vmatpush1.bf16.msra.mxu1 %v17912_v49  ;;  %v8925_v49 = vld [vmem:[#allocation16 + $0x1b70] sm:$0xff] }
 0xc22   :  { %15534 = vmatpush1.bf16.msra.mxu0 %v17914_v45  ;;  %15191 = vmatprep.subr.bf16.mxu1 %v17921_v51  ;;  %v8922_v45 = vld [vmem:[#allocation16 + $0x1b58] sm:$0xff]  ;;  %v17977_v46 = vcombine.high %v8921_v15, %v8925_v49 }
 0xc23   :  { %15535 = vmatprep.subr.bf16.mxu0 %v17923_v5  ;;  %v8926_v51 = vld [vmem:[#allocation16 + $0x1b78] sm:$0xff]  ;;  %v17968_v5 = vcombine.low %v8913_v54, %v8917_v56  ;;  %v18017_v56 = vcombine.high %v8961_v26, %v8965_v6 }
 0xc24   :  { %v17979_v52 = vcombine.high %v8922_v45, %v8926_v51  ;;  %v17978_v43 = vcombine.low %v8922_v45, %v8926_v51  ;;  %v8977_v45 = vld [vmem:[#allocation16 + $0x1d10] sm:$0xff] }
 0xc25   :  { %15192 = vmatpush1.bf16.msra.mxu1 %v17920_v13  ;;  %v8933_v13 = vld [vmem:[#allocation16 + $0x1bb0] sm:$0xff] }
 0xc26   :  { %15536 = vmatpush1.bf16.msra.mxu0 %v17922_v24  ;;  %15193 = vmatprep.subr.bf16.mxu1 %v17929_v21  ;;  %v8930_v24 = vld [vmem:[#allocation16 + $0x1b98] sm:$0xff]  ;;  %v17985_v61 = vcombine.high %v8929_v19, %v8933_v13  ;;  %v8981_v51 = vld [vmem:[#allocation16 + $0x1d30] sm:$0xff] }
 0xc27   :  { %15537 = vmatprep.subr.bf16.mxu0 %v17931_v35  ;;  %v8934_v21 = vld [vmem:[#allocation16 + $0x1bb8] sm:$0xff]  ;;  %v17976_v35 = vcombine.low %v8921_v15, %v8925_v49 }
 0xc28   :  { %v17987_v25 = vcombine.high %v8930_v24, %v8934_v21  ;;  %v17986_v22 = vcombine.low %v8930_v24, %v8934_v21  ;;  %v8989_v24 = vld [vmem:[#allocation16 + $0x1d70] sm:$0xff]  ;;  %v8986_v21 = vld [vmem:[#allocation16 + $0x1d58] sm:$0xff] }
 0xc29   :  { %15194 = vmatpush1.bf16.msra.mxu1 %v17928_v42  ;;  %v8941_v42 = vld [vmem:[#allocation16 + $0x1bf0] sm:$0xff] }
 0xc2a   :  { %15538 = vmatpush1.bf16.msra.mxu0 %v17930_v30  ;;  %15195 = vmatprep.subr.bf16.mxu1 %v17937_v28  ;;  %v8938_v30 = vld [vmem:[#allocation16 + $0x1bd8] sm:$0xff]  ;;  %v17993_v58 = vcombine.high %v8937_v7, %v8941_v42 }
 0xc2b   :  { %15539 = vmatprep.subr.bf16.mxu0 %v17939_v31  ;;  %v8942_v28 = vld [vmem:[#allocation16 + $0x1bf8] sm:$0xff]  ;;  %v17984_v31 = vcombine.low %v8929_v19, %v8933_v13  ;;  %v8985_v13 = vld [vmem:[#allocation16 + $0x1d50] sm:$0xff] }
 0xc2c   :  { %v17995_v34 = vcombine.high %v8938_v30, %v8942_v28  ;;  %v17994_v16 = vcombine.low %v8938_v30, %v8942_v28  ;;  %v8997_v30 = vld [vmem:[#allocation16 + $0x1db0] sm:$0xff]  ;;  %v8994_v28 = vld [vmem:[#allocation16 + $0x1d98] sm:$0xff] }
 0xc2d   :  { %15196 = vmatpush1.bf16.msra.mxu1 %v17936_v3  ;;  %v8949_v3 = vld [vmem:[#allocation16 + $0x1c30] sm:$0xff] }
 0xc2e   :  { %15540 = vmatpush1.bf16.msra.mxu0 %v17938_v9  ;;  %15197 = vmatprep.subr.bf16.mxu1 %v17945_v37  ;;  %v8946_v9 = vld [vmem:[#allocation16 + $0x1c18] sm:$0xff]  ;;  %v18001_v38 = vcombine.high %v8945_v32, %v8949_v3 }
 0xc2f   :  { %15541 = vmatprep.subr.bf16.mxu0 %v17947_v59  ;;  %v8950_v37 = vld [vmem:[#allocation16 + $0x1c38] sm:$0xff]  ;;  %v17992_v59 = vcombine.low %v8937_v7, %v8941_v42  ;;  %v8993_v42 = vld [vmem:[#allocation16 + $0x1d90] sm:$0xff] }
 0xc30   :  { %v18003_v18 = vcombine.high %v8946_v9, %v8950_v37  ;;  %v18002_v1 = vcombine.low %v8946_v9, %v8950_v37  ;;  %v9005_v9 = vld [vmem:[#allocation16 + $0x1df0] sm:$0xff]  ;;  %v9002_v37 = vld [vmem:[#allocation16 + $0x1dd8] sm:$0xff] }
 0xc31   :  { %15198 = vmatpush1.bf16.msra.mxu1 %v17944_v39  ;;  %v8957_v39 = vld [vmem:[#allocation16 + $0x1c70] sm:$0xff] }
 0xc32   :  { %15542 = vmatpush1.bf16.msra.mxu0 %v17946_v50  ;;  %15199 = vmatprep.subr.bf16.mxu1 %v17953_v55  ;;  %v18000_v50 = vcombine.low %v8945_v32, %v8949_v3  ;;  %v8954_v55 = vld [vmem:[#allocation16 + $0x1c58] sm:$0xff]  ;;  %v18009_v2 = vcombine.high %v8953_v47, %v8957_v39  ;;  %v9001_v3 = vld [vmem:[#allocation16 + $0x1dd0] sm:$0xff] }
 0xc33   :  { %15543 = vmatprep.subr.bf16.mxu0 %v17955_v12  ;;  %v8958_v12 = vld [vmem:[#allocation16 + $0x1c78] sm:$0xff] }
 0xc34   :  { %v18010_v54 = vcombine.low %v8954_v55, %v8958_v12 }
 0xc35   :  { %15200 = vmatpush1.bf16.msra.mxu1 %v17952_v36  ;;  %v18011_v36 = vcombine.high %v8954_v55, %v8958_v12  ;;  %v9010_v55 = vld [vmem:[#allocation16 + $0x1e18] sm:$0xff] }
 0xc36   :  { %15544 = vmatpush1.bf16.msra.mxu0 %v17954_v8  ;;  %15201 = vmatprep.subr.bf16.mxu1 %v17961_v41  ;;  %v8962_v8 = vld [vmem:[#allocation16 + $0x1c98] sm:$0xff] }
 0xc37   :  { %15545 = vmatprep.subr.bf16.mxu0 %v17963_v53  ;;  %v8966_v41 = vld [vmem:[#allocation16 + $0x1cb8] sm:$0xff]  ;;  %v18008_v53 = vcombine.low %v8953_v47, %v8957_v39  ;;  %v9009_v39 = vld [vmem:[#allocation16 + $0x1e10] sm:$0xff] }
 0xc38   :  { %v18019_v23 = vcombine.high %v8962_v8, %v8966_v41  ;;  %v9014_v12 = vld [vmem:[#allocation16 + $0x1e38] sm:$0xff] }
 0xc39   :  { %15202 = vmatpush1.bf16.msra.mxu1 %v17960_v48  ;;  %v8973_v48 = vld [vmem:[#allocation16 + $0x1cf0] sm:$0xff] }
 0xc3a   :  { %15546 = vmatpush1.bf16.msra.mxu0 %v17962_v11  ;;  %15203 = vmatprep.subr.bf16.mxu1 %v17969_v57  ;;  %v8970_v11 = vld [vmem:[#allocation16 + $0x1cd8] sm:$0xff]  ;;  %v18025_v15 = vcombine.high %v8969_v27, %v8973_v48 }
 0xc3b   :  { %15547 = vmatprep.subr.bf16.mxu0 %v17971_v4  ;;  %v8974_v57 = vld [vmem:[#allocation16 + $0x1cf8] sm:$0xff]  ;;  %v18016_v4 = vcombine.low %v8961_v26, %v8965_v6  ;;  %v18067_v6 = vcombine.high %v9010_v55, %v9014_v12 }
 0xc3c   :  { %v18027_v49 = vcombine.high %v8970_v11, %v8974_v57 }
 0xc3d   :  { %15204 = vmatpush1.bf16.msra.mxu1 %v17968_v5  ;;  %v8978_v5 = vld [vmem:[#allocation16 + $0x1d18] sm:$0xff] }
 0xc3e   :  { %15548 = vmatpush1.bf16.msra.mxu0 %v17970_v44  ;;  %15205 = vmatprep.subr.bf16.mxu1 %v17977_v46  ;;  %v8982_v44 = vld [vmem:[#allocation16 + $0x1d38] sm:$0xff]  ;;  %v18026_v46 = vcombine.low %v8970_v11, %v8974_v57  ;;  %v9029_v11 = vld [vmem:[#allocation16 + $0x1eb0] sm:$0xff] }
 0xc3f   :  { %15549 = vmatprep.subr.bf16.mxu0 %v17979_v52  ;;  %v18033_v52 = vcombine.high %v8977_v45, %v8981_v51  ;;  %v18035_v19 = vcombine.high %v8978_v5, %v8982_v44  ;;  %v9026_v57 = vld [vmem:[#allocation16 + $0x1e98] sm:$0xff] }
 0xc41   :  { %15206 = vmatpush1.bf16.msra.mxu1 %v17976_v35  ;;  %v8990_v35 = vld [vmem:[#allocation16 + $0x1d78] sm:$0xff] }
 0xc42   :  { %15550 = vmatpush1.bf16.msra.mxu0 %v17978_v43  ;;  %15207 = vmatprep.subr.bf16.mxu1 %v17985_v61  ;;  %v18032_v43 = vcombine.low %v8977_v45, %v8981_v51  ;;  %v18034_v61 = vcombine.low %v8978_v5, %v8982_v44  ;;  %v18043_v7 = vcombine.high %v8986_v21, %v8990_v35  ;;  %v9033_v51 = vld [vmem:[#allocation16 + $0x1ed0] sm:$0xff]  ;;  %v9034_v44 = vld [vmem:[#allocation16 + $0x1ed8] sm:$0xff] }
 0xc43   :  { %15551 = vmatprep.subr.bf16.mxu0 %v17987_v25  ;;  %v18041_v25 = vcombine.high %v8985_v13, %v8989_v24  ;;  %v9037_v5 = vld [vmem:[#allocation16 + $0x1ef0] sm:$0xff] }
 0xc45   :  { %15208 = vmatpush1.bf16.msra.mxu1 %v17984_v31  ;;  %v8998_v31 = vld [vmem:[#allocation16 + $0x1db8] sm:$0xff] }
 0xc46   :  { %15552 = vmatpush1.bf16.msra.mxu0 %v17986_v22  ;;  %15209 = vmatprep.subr.bf16.mxu1 %v17993_v58  ;;  %v18040_v22 = vcombine.low %v8985_v13, %v8989_v24  ;;  %v18042_v58 = vcombine.low %v8986_v21, %v8990_v35  ;;  %v18051_v32 = vcombine.high %v8994_v28, %v8998_v31  ;;  %v9041_v24 = vld [vmem:[#allocation16 + $0x1f10] sm:$0xff]  ;;  %v9042_v35 = vld [vmem:[#allocation16 + $0x1f18] sm:$0xff] }
 0xc47   :  { %15553 = vmatprep.subr.bf16.mxu0 %v17995_v34  ;;  %v18049_v34 = vcombine.high %v8993_v42, %v8997_v30  ;;  %v9045_v21 = vld [vmem:[#allocation16 + $0x1f30] sm:$0xff] }
 0xc49   :  { %15210 = vmatpush1.bf16.msra.mxu1 %v17992_v59  ;;  %v9006_v59 = vld [vmem:[#allocation16 + $0x1df8] sm:$0xff] }
 0xc4a   :  { %15554 = vmatpush1.bf16.msra.mxu0 %v17994_v16  ;;  %15222 = vmatprep.subr.bf16.mxu1 %v18001_v38  ;;  %v18048_v16 = vcombine.low %v8993_v42, %v8997_v30  ;;  %v18050_v38 = vcombine.low %v8994_v28, %v8998_v31  ;;  %v18059_v47 = vcombine.high %v9002_v37, %v9006_v59  ;;  %v9049_v30 = vld [vmem:[#allocation16 + $0x1f50] sm:$0xff]  ;;  %v9050_v31 = vld [vmem:[#allocation16 + $0x1f58] sm:$0xff] }
 0xc4b   :  { %15566 = vmatprep.subr.bf16.mxu0 %v18003_v18  ;;  %v18057_v18 = vcombine.high %v9001_v3, %v9005_v9  ;;  %v9053_v28 = vld [vmem:[#allocation16 + $0x1f70] sm:$0xff] }
 0xc4c   :  { %15212 = vmatmul.mubr.bf16.vlgmr.msra.gmra.mrb[108].mxu1 %v21147_v40 }
 0xc4d   :  { %15556 = vmatmul.mubr.bf16.vlgmr.msra.gmra.mrb[108].mxu0 %v21147_v40  ;;  %15223 = vmatpush1.bf16.msra.mxu1 %v18000_v50  ;;  %v18018_v40 = vcombine.low %v8962_v8, %v8966_v41  ;;  %v9013_v50 = vld [vmem:[#allocation16 + $0x1e30] sm:$0xff]  ;;  %v9018_v41 = vld [vmem:[#allocation16 + $0x1e58] sm:$0xff] }
 0xc4e   :  { %15254 = vmatprep.mubr.bf16.mxu1 %v21137_v29  ;;  %15567 = vmatpush1.bf16.msra.mxu0 %v18002_v1  ;;  %v18056_v1 = vcombine.low %v9001_v3, %v9005_v9  ;;  %v18065_v26 = vcombine.high %v9009_v39, %v9013_v50  ;;  %v9021_v8 = vld [vmem:[#allocation16 + $0x1e70] sm:$0xff] }
 0xc4f   :  { %15598 = vmatprep.mubr.bf16.mxu0 %v21137_v29  ;;  %15224 = vmatprep.subr.bf16.mxu1 %v18009_v2  ;;  %v18024_v29 = vcombine.low %v8969_v27, %v8973_v48  ;;  %v18058_v2 = vcombine.low %v9002_v37, %v9006_v59  ;;  %v9025_v48 = vld [vmem:[#allocation16 + $0x1e90] sm:$0xff]  ;;  %v9058_v59 = vld [vmem:[#allocation16 + $0x1f98] sm:$0xff] }
 0xc50   :  { %15568 = vmatprep.subr.bf16.mxu0 %v18011_v36  ;;  %v9017_v36 = vld [vmem:[#allocation16 + $0x1e50] sm:$0xff] }
 0xc51   :  { %15225 = vmatpush1.bf16.msra.mxu1 %v18008_v53  ;;  %v9022_v53 = vld [vmem:[#allocation16 + $0x1e78] sm:$0xff]  ;;  %v9057_v9 = vld [vmem:[#allocation16 + $0x1f90] sm:$0xff] }
 0xc52   :  { %15569 = vmatpush1.bf16.msra.mxu0 %v18010_v54  ;;  %15226 = vmatprep.subr.bf16.mxu1 %v18017_v56  ;;  %v18064_v54 = vcombine.low %v9009_v39, %v9013_v50  ;;  %v18066_v56 = vcombine.low %v9010_v55, %v9014_v12  ;;  %v18075_v27 = vcombine.high %v9018_v41, %v9022_v53  ;;  %v9061_v37 = vld [vmem:[#allocation16 + $0x1fb0] sm:$0xff]  ;;  %v9066_v12 = vld [vmem:[#allocation16 + $0x1fd8] sm:$0xff] }
 0xc53   :  { %15570 = vmatprep.subr.bf16.mxu0 %v18019_v23  ;;  %v18073_v23 = vcombine.high %v9017_v36, %v9021_v8  ;;  %v9065_v50 = vld [vmem:[#allocation16 + $0x1fd0] sm:$0xff] }
 0xc54   :  { %v9069_v55 = vld [vmem:[#allocation16 + $0x1ff0] sm:$0xff] }
 0xc55   :  { %15227 = vmatpush1.bf16.msra.mxu1 %v18016_v4  ;;  %v9030_v4 = vld [vmem:[#allocation16 + $0x1eb8] sm:$0xff] }
 0xc56   :  { %15571 = vmatpush1.bf16.msra.mxu0 %v18018_v40  ;;  %15228 = vmatprep.subr.bf16.mxu1 %v18025_v15  ;;  %v18072_v40 = vcombine.low %v9017_v36, %v9021_v8  ;;  %v18074_v15 = vcombine.low %v9018_v41, %v9022_v53  ;;  %v18083_v45 = vcombine.high %v9026_v57, %v9030_v4  ;;  %v19226_v53 = vld [vmem:[#allocation19 + $0x40] sm:$0xff]  }
 0xc57   :  { %15572 = vmatprep.subr.bf16.mxu0 %v18027_v49  ;;  %v18081_v49 = vcombine.high %v9025_v48, %v9029_v11  ;;  %v18120_v8 = vcombine.low %v9065_v50, %v9069_v55 }
 0xc59   :  { %15229 = vmatpush1.bf16.msra.mxu1 %v18024_v29  ;;  %v9038_v29 = vld [vmem:[#allocation16 + $0x1ef8] sm:$0xff] }
 0xc5a   :  { %15573 = vmatpush1.bf16.msra.mxu0 %v18026_v46  ;;  %15230 = vmatprep.subr.bf16.mxu1 %v18033_v52  ;;  %v18080_v46 = vcombine.low %v9025_v48, %v9029_v11  ;;  %v18082_v52 = vcombine.low %v9026_v57, %v9030_v4  ;;  %v18091_v13 = vcombine.high %v9034_v44, %v9038_v29  ;;  %v19231_v48 = vld [vmem:[#allocation19 + $0xc8] sm:$0xff]   ;;  %v19234_v4 = vld [vmem:[#allocation19 + $0x50] sm:$0xff]  }
 0xc5b   :  { %15574 = vmatprep.subr.bf16.mxu0 %v18035_v19  ;;  %v18089_v19 = vcombine.high %v9033_v51, %v9037_v5  ;;  %v19232_v11 = vld [vmem:[#allocation19 + $0x8] sm:$0xff]  }
 0xc5c   :  { %v19233_v57 = vld [vmem:[#allocation19 + $0x88] sm:$0xff]  }
 0xc5d   :  { %15231 = vmatpush1.bf16.msra.mxu1 %v18032_v43  ;;  %v9046_v43 = vld [vmem:[#allocation16 + $0x1f38] sm:$0xff] }
 0xc5e   :  { %15575 = vmatpush1.bf16.msra.mxu0 %v18034_v61  ;;  %15232 = vmatprep.subr.bf16.mxu1 %v18041_v25  ;;  %v18088_v61 = vcombine.low %v9033_v51, %v9037_v5  ;;  %v18090_v25 = vcombine.low %v9034_v44, %v9038_v29  ;;  %v18099_v42 = vcombine.high %v9042_v35, %v9046_v43  ;;  %v19240_v51 = vld [vmem:[#allocation19 + $0x18] sm:$0xff]   ;;  %v19242_v5 = vld [vmem:[#allocation19 + $0x60] sm:$0xff]  }
 0xc5f   :  { %15576 = vmatprep.subr.bf16.mxu0 %v18043_v7  ;;  %v18097_v7 = vcombine.high %v9041_v24, %v9045_v21  ;;  %v19243_v44 = vld [vmem:[#allocation19 + $0xe0] sm:$0xff]  }
 0xc60   :  { %v19245_v29 = vld [vmem:[#allocation19 + $0xa0] sm:$0xff]  }
 0xc61   :  { %15233 = vmatpush1.bf16.msra.mxu1 %v18040_v22  ;;  %v9054_v22 = vld [vmem:[#allocation16 + $0x1f78] sm:$0xff] }
 0xc62   :  { %15577 = vmatpush1.bf16.msra.mxu0 %v18042_v58  ;;  %15234 = vmatprep.subr.bf16.mxu1 %v18049_v34  ;;  %v18096_v58 = vcombine.low %v9041_v24, %v9045_v21  ;;  %v18098_v34 = vcombine.low %v9042_v35, %v9046_v43  ;;  %v18107_v3 = vcombine.high %v9050_v31, %v9054_v22  ;;  %v19250_v24 = vld [vmem:[#allocation19 + $0x70] sm:$0xff]  }
 0xc63   :  { %15578 = vmatprep.subr.bf16.mxu0 %v18051_v32  ;;  %v18105_v32 = vcombine.high %v9049_v30, %v9053_v28  ;;  %v19251_v21 = vld [vmem:[#allocation19 + $0xf0] sm:$0xff]  }
 0xc64   :  { %v19252_v35 = vld [vmem:[#allocation19 + $0x30] sm:$0xff]  }
 0xc65   :  { %15235 = vmatpush1.bf16.msra.mxu1 %v18048_v16  ;;  %v9062_v16 = vld [vmem:[#allocation16 + $0x1fb8] sm:$0xff] }
 0xc66   :  { %15579 = vmatpush1.bf16.msra.mxu0 %v18050_v38  ;;  %15236 = vmatprep.subr.bf16.mxu1 %v18057_v18  ;;  %v18104_v38 = vcombine.low %v9049_v30, %v9053_v28  ;;  %v18106_v18 = vcombine.low %v9050_v31, %v9054_v22  ;;  %v18115_v39 = vcombine.high %v9058_v59, %v9062_v16  ;;  %v19253_v43 = vld [vmem:[#allocation19 + $0xb0] sm:$0xff]   ;;  %v19258_v30 = vld [vmem:[#allocation19 + $0x140] sm:$0xff]  }
 0xc67   :  { %15580 = vmatprep.subr.bf16.mxu0 %v18059_v47  ;;  %v18113_v47 = vcombine.high %v9057_v9, %v9061_v37  ;;  %v19259_v28 = vld [vmem:[#allocation19 + $0x1c0] sm:$0xff]  }
 0xc68   :  { %v19260_v31 = vld [vmem:[#allocation19 + $0x100] sm:$0xff]  }
 0xc69   :  { %15237 = vmatpush1.bf16.msra.mxu1 %v18056_v1  ;;  %v9070_v1 = vld [vmem:[#allocation16 + $0x1ff8] sm:$0xff]  ;;  %v19261_v22 = vld [vmem:[#allocation19 + $0x180] sm:$0xff]  }
 0xc6a   :  { %15581 = vmatpush1.bf16.msra.mxu0 %v18058_v2  ;;  %15238 = vmatprep.subr.bf16.mxu1 %v18065_v26  ;;  %v18112_v2 = vcombine.low %v9057_v9, %v9061_v37  ;;  %v18114_v26 = vcombine.low %v9058_v59, %v9062_v16  ;;  %v18123_v36 = vcombine.high %v9066_v12, %v9070_v1  ;;  %v19266_v9 = vld [vmem:[#allocation19 + $0x150] sm:$0xff]  }
 0xc6b   :  { %15582 = vmatprep.subr.bf16.mxu0 %v18067_v6  ;;  %v18121_v6 = vcombine.high %v9065_v50, %v9069_v55  ;;  %v18122_v41 = vcombine.low %v9066_v12, %v9070_v1  ;;  %v19267_v37 = vld [vmem:[#allocation19 + $0x1d0] sm:$0xff]   ;;  %v19276_v50 = vld [vmem:[#allocation19 + $0x120] sm:$0xff]   ;;  %v19278_v12 = vld [vmem:[#allocation19 + $0x168] sm:$0xff]  }
 0xc6c   :  { %v19268_v59 = vld [vmem:[#allocation19 + $0x110] sm:$0xff]   ;;  %v19277_v55 = vld [vmem:[#allocation19 + $0x1a0] sm:$0xff]   ;;  %v19279_v1 = vld [vmem:[#allocation19 + $0x1e8] sm:$0xff]  }
 0xc6d   :  { %15239 = vmatpush1.bf16.msra.mxu1 %v18064_v54  ;;  %v19227_v54 = vld [vmem:[#allocation19 + $0xc0] sm:$0xff]   ;;  %v19269_v16 = vld [vmem:[#allocation19 + $0x190] sm:$0xff]  }
 0xc6e   :  { %15583 = vmatpush1.bf16.msra.mxu0 %v18066_v56  ;;  %15240 = vmatprep.subr.bf16.mxu1 %v18073_v23  ;;  %v19228_v56 = vld [vmem:[#allocation19] sm:$0xff]  }
 0xc6f   :  { %15584 = vmatprep.subr.bf16.mxu0 %v18075_v27  ;;  %v19229_v23 = vld [vmem:[#allocation19 + $0x80] sm:$0xff]   ;;  %v19230_v27 = vld [vmem:[#allocation19 + $0x48] sm:$0xff]  }
 0xc71   :  { %15241 = vmatpush1.bf16.msra.mxu1 %v18072_v40  ;;  %v19235_v40 = vld [vmem:[#allocation19 + $0xd0] sm:$0xff]  }
 0xc72   :  { %15585 = vmatpush1.bf16.msra.mxu0 %v18074_v15  ;;  %15242 = vmatprep.subr.bf16.mxu1 %v18081_v49  ;;  %v19236_v15 = vld [vmem:[#allocation19 + $0x10] sm:$0xff]  }
 0xc73   :  { %15586 = vmatprep.subr.bf16.mxu0 %v18083_v45  ;;  %v19237_v49 = vld [vmem:[#allocation19 + $0x90] sm:$0xff]   ;;  %v19238_v45 = vld [vmem:[#allocation19 + $0x58] sm:$0xff]  }
 0xc75   :  { %15243 = vmatpush1.bf16.msra.mxu1 %v18080_v46  ;;  %v19246_v46 = vld [vmem:[#allocation19 + $0x68] sm:$0xff]  }
 0xc76   :  { %15587 = vmatpush1.bf16.msra.mxu0 %v18082_v52  ;;  %15244 = vmatprep.subr.bf16.mxu1 %v18089_v19  ;;  %v19247_v52 = vld [vmem:[#allocation19 + $0xe8] sm:$0xff]  }
 0xc77   :  { %15588 = vmatprep.subr.bf16.mxu0 %v18091_v13  ;;  %v19248_v19 = vld [vmem:[#allocation19 + $0x28] sm:$0xff]  }
 0xc78   :  { %v19249_v13 = vld [vmem:[#allocation19 + $0xa8] sm:$0xff]  }
 0xc79   :  { %15245 = vmatpush1.bf16.msra.mxu1 %v18088_v61  ;;  %v19254_v61 = vld [vmem:[#allocation19 + $0x78] sm:$0xff]  }
 0xc7a   :  { %15589 = vmatpush1.bf16.msra.mxu0 %v18090_v25  ;;  %15246 = vmatprep.subr.bf16.mxu1 %v18097_v7  ;;  %v19255_v25 = vld [vmem:[#allocation19 + $0xf8] sm:$0xff]  }
 0xc7b   :  { %15590 = vmatprep.subr.bf16.mxu0 %v18099_v42  ;;  %v19256_v7 = vld [vmem:[#allocation19 + $0x38] sm:$0xff]  }
 0xc7c   :  { %v19257_v42 = vld [vmem:[#allocation19 + $0xb8] sm:$0xff]  }
 0xc7d   :  { %15247 = vmatpush1.bf16.msra.mxu1 %v18096_v58  ;;  %v19262_v58 = vld [vmem:[#allocation19 + $0x148] sm:$0xff]  }
 0xc7e   :  { %15591 = vmatpush1.bf16.msra.mxu0 %v18098_v34  ;;  %15248 = vmatprep.subr.bf16.mxu1 %v18105_v32  ;;  %v19263_v34 = vld [vmem:[#allocation19 + $0x1c8] sm:$0xff]  }
 0xc7f   :  { %15592 = vmatprep.subr.bf16.mxu0 %v18107_v3  ;;  %v19264_v32 = vld [vmem:[#allocation19 + $0x108] sm:$0xff]  }
 0xc80   :  { %v19265_v3 = vld [vmem:[#allocation19 + $0x188] sm:$0xff]  }
 0xc81   :  { %15249 = vmatpush1.bf16.msra.mxu1 %v18104_v38  ;;  %v19270_v38 = vld [vmem:[#allocation19 + $0x158] sm:$0xff]  }
 0xc82   :  { %15593 = vmatpush1.bf16.msra.mxu0 %v18106_v18  ;;  %15250 = vmatprep.subr.bf16.mxu1 %v18113_v47  ;;  %v19271_v18 = vld [vmem:[#allocation19 + $0x1d8] sm:$0xff]   ;;  %v19274_v47 = vld [vmem:[#allocation19 + $0x160] sm:$0xff]  }
 0xc83   :  { %15594 = vmatprep.subr.bf16.mxu0 %v18115_v39  ;;  %v19275_v39 = vld [vmem:[#allocation19 + $0x1e0] sm:$0xff]  }
 0xc85   :  { %15251 = vmatpush1.bf16.msra.mxu1 %v18112_v2  ;;  %v19280_v2 = vld [vmem:[#allocation19 + $0x128] sm:$0xff]  }
 0xc86   :  { %15595 = vmatpush1.bf16.msra.mxu0 %v18114_v26  ;;  %15252 = vmatprep.subr.bf16.mxu1 %v18121_v6  ;;  %v19281_v26 = vld [vmem:[#allocation19 + $0x1a8] sm:$0xff]   ;;  %v19282_v6 = vld [vmem:[#allocation19 + $0x170] sm:$0xff]  }
 0xc87   :  { %15596 = vmatprep.subr.bf16.mxu0 %v18123_v36  ;;  %v19283_v36 = vld [vmem:[#allocation19 + $0x1f0] sm:$0xff]  }
 0xc89   :  { %15253 = vmatpush1.bf16.msra.mxu1 %v18120_v8  ;;  %v19284_v8 = vld [vmem:[#allocation19 + $0x130] sm:$0xff]  }
 0xc8a   :  { %15597 = vmatpush1.bf16.msra.mxu0 %v18122_v41  ;;  %18269 = vmatprep.subr.bf16.mxu1 %v19226_v53  ;;  %v19285_v41 = vld [vmem:[#allocation19 + $0x1b0] sm:$0xff]   ;;  %v19286_v53 = vld [vmem:[#allocation19 + $0x178] sm:$0xff]  }
 0xc8b   :  { %18291 = vmatprep.subr.bf16.mxu0 %v19227_v54  ;;  %v19287_v54 = vld [vmem:[#allocation19 + $0x1f8] sm:$0xff]  }
 0xc8c   :  { %15255 = vmatmul.mubr.bf16.vlgmr.msra.gmra.mrb[108].mxu1 %v21127_v17 }
 0xc8d   :  { %15599 = vmatmul.mubr.bf16.vlgmr.msra.gmra.mrb[108].mxu0 %v21127_v17  ;;  %18270 = vmatpush3.bf16.msra.mxu1 %v19228_v56  ;;  %v19239_v17 = vld [vmem:[#allocation19 + $0xd8] sm:$0xff]  }
 0xc8e   :  { %16184 = vmatprep.mubr.bf16.mxu1 %v21199_v60  ;;  %18292 = vmatpush3.bf16.msra.mxu0 %v19229_v23  ;;  %v19241_v60 = vld [vmem:[#allocation19 + $0x98] sm:$0xff]  }
 0xc8f   :  { %16225 = vmatprep.mubr.bf16.mxu0 %v21201_v33  ;;  %18271 = vmatprep.subr.bf16.mxu1 %v19230_v27  ;;  %v19244_v33 = vld [vmem:[#allocation19 + $0x20] sm:$0xff]   ;;  %v19288_v56 = vld [vmem:[#allocation19 + $0x138] sm:$0xff]  }
 0xc90   :  { %18293 = vmatprep.subr.bf16.mxu0 %v19231_v48  ;;  %v19289_v23 = vld [vmem:[#allocation19 + $0x1b8] sm:$0xff]  }
 0xc91   :  { %18272 = vmatpush3.bf16.msra.mxu1 %v19232_v11  ;;  %v19290_v27 = vld [vmem:[#allocation18] sm:$0xff] }
 0xc92   :  { %18294 = vmatpush3.bf16.msra.mxu0 %v19233_v57  ;;  %18273 = vmatprep.subr.bf16.mxu1 %v19234_v4  ;;  %v9092_v48 = vrot.slane %v19290_v27, %v20981_v14  ;;  %v9100_v11 = vrot.slane %v19290_v27, %v20954_v62  ;;  %v9096_v57 = vrot.slane %v19290_v27, %v20991_v10 }
 0xc93   :  { %18295 = vmatprep.subr.bf16.mxu0 %v19235_v40  ;;  %v9104_v4 = vrot.slane %v19290_v27, %v20957_v63 }
 0xc95   :  { %18274 = vmatpush3.bf16.msra.mxu1 %v19236_v15 }
 0xc96   :  { %18296 = vmatpush3.bf16.msra.mxu0 %v19237_v49  ;;  %18275 = vmatprep.subr.bf16.mxu1 %v19238_v45 }
 0xc97   :  { %18297 = vmatprep.subr.bf16.mxu0 %v19239_v17 }
 0xc99   :  { %18276 = vmatpush3.bf16.msra.mxu1 %v19240_v51 }
 0xc9a   :  { %18298 = vmatpush3.bf16.msra.mxu0 %v19241_v60  ;;  %18277 = vmatprep.subr.bf16.mxu1 %v19242_v5 }
 0xc9b   :  { %18299 = vmatprep.subr.bf16.mxu0 %v19243_v44 }
 0xc9d   :  { %18278 = vmatpush3.bf16.msra.mxu1 %v19244_v33 }
 0xc9e   :  { %18300 = vmatpush3.bf16.msra.mxu0 %v19245_v29  ;;  %18279 = vmatprep.subr.bf16.mxu1 %v19246_v46 }
 0xc9f   :  { %18301 = vmatprep.subr.bf16.mxu0 %v19247_v52 }
 0xca1   :  { %18280 = vmatpush3.bf16.msra.mxu1 %v19248_v19 }
 0xca2   :  { %18302 = vmatpush3.bf16.msra.mxu0 %v19249_v13  ;;  %18281 = vmatprep.subr.bf16.mxu1 %v19250_v24 }
 0xca3   :  { %18303 = vmatprep.subr.bf16.mxu0 %v19251_v21 }
 0xca5   :  { %18282 = vmatpush3.bf16.msra.mxu1 %v19252_v35 }
 0xca6   :  { %18304 = vmatpush3.bf16.msra.mxu0 %v19253_v43  ;;  %18283 = vmatprep.subr.bf16.mxu1 %v19254_v61 }
 0xca7   :  { %18305 = vmatprep.subr.bf16.mxu0 %v19255_v25 }
 0xca9   :  { %18284 = vmatpush3.bf16.msra.mxu1 %v19256_v7 }
 0xcaa   :  { %18306 = vmatpush3.bf16.msra.mxu0 %v19257_v42  ;;  %18313 = vmatprep.subr.bf16.mxu1 %v19258_v30 }
 0xcab   :  { %18335 = vmatprep.subr.bf16.mxu0 %v19259_v28 }
 0xcac   :  { %16185 = vmatmul.mubr.bf16.vlgmr.msra.gmra.mrb[112].mxu1 %v21195_v20  ;;  %v19272_v20 = vld [vmem:[#allocation19 + $0x118] sm:$0xff]  }
 0xcad   :  { %16226 = vmatmul.mubr.bf16.vlgmr.msra.gmra.mrb[112].mxu0 %v21197_v0  ;;  %18314 = vmatpush3.bf16.msra.mxu1 %v19260_v31  ;;  %v19273_v0 = vld [vmem:[#allocation19 + $0x198] sm:$0xff]  }
 0xcae   :  { %18336 = vmatpush3.bf16.msra.mxu0 %v19261_v22  ;;  %18315 = vmatprep.subr.bf16.mxu1 %v19262_v58  ;;  %v18124_v22 = vld [vmem:[#allocation21] ss:$0 sm:$0xff] }
 0xcaf   :  { %18337 = vmatprep.subr.bf16.mxu0 %v19263_v34 }
 0xcb1   :  { %18316 = vmatpush3.bf16.msra.mxu1 %v19264_v32 }
 0xcb2   :  { %18338 = vmatpush3.bf16.msra.mxu0 %v19265_v3  ;;  %18317 = vmatprep.subr.bf16.mxu1 %v19266_v9 }
 0xcb3   :  { %18339 = vmatprep.subr.bf16.mxu0 %v19267_v37 }
 0xcb5   :  { %18318 = vmatpush3.bf16.msra.mxu1 %v19268_v59 }
 0xcb6   :  { %18340 = vmatpush3.bf16.msra.mxu0 %v19269_v16  ;;  %18319 = vmatprep.subr.bf16.mxu1 %v19270_v38 }
 0xcb7   :  { %18341 = vmatprep.subr.bf16.mxu0 %v19271_v18 }
 0xcb9   :  { %18320 = vmatpush3.bf16.msra.mxu1 %v19272_v20 }
 0xcba   :  { %18342 = vmatpush3.bf16.msra.mxu0 %v19273_v0  ;;  %18321 = vmatprep.subr.bf16.mxu1 %v19274_v47 }
 0xcbb   :  { %18343 = vmatprep.subr.bf16.mxu0 %v19275_v39 }
 0xcbd   :  { %18322 = vmatpush3.bf16.msra.mxu1 %v19276_v50 }
 0xcbe   :  { %18344 = vmatpush3.bf16.msra.mxu0 %v19277_v55  ;;  %18323 = vmatprep.subr.bf16.mxu1 %v19278_v12 }
 0xcbf   :  { %18345 = vmatprep.subr.bf16.mxu0 %v19279_v1 }
 0xcc1   :  { %18324 = vmatpush3.bf16.msra.mxu1 %v19280_v2 }
 0xcc2   :  { %18346 = vmatpush3.bf16.msra.mxu0 %v19281_v26  ;;  %18325 = vmatprep.subr.bf16.mxu1 %v19282_v6 }
 0xcc3   :  { %18347 = vmatprep.subr.bf16.mxu0 %v19283_v36 }
 0xcc5   :  { %18326 = vmatpush3.bf16.msra.mxu1 %v19284_v8 }
 0xcc6   :  { %18348 = vmatpush3.bf16.msra.mxu0 %v19285_v41  ;;  %18327 = vmatprep.subr.bf16.mxu1 %v19286_v53 }
 0xcc7   :  { %18349 = vmatprep.subr.bf16.mxu0 %v19287_v54 }
 0xcc9   :  { %18328 = vmatpush3.bf16.msra.mxu1 %v19288_v56 }
 0xcca   :  { %18350 = vmatpush3.bf16.msra.mxu0 %v19289_v23 }
 0xd5f   :  { %v15256_v40 = vpop.f32.mrb[108].mxu1 }
 0xd60   :  { %v18591_v15 = vadd.f32 %v15256_v40, %v9092_v48  ;;  %v15600_v49 = vpop.f32.mrb[108].mxu0  ;;  %v15258_v45 = vpop.f32.mrb[109].mxu1 }
 0xd61   :  { %v18595_v17 = vadd.f32 %v15600_v49, %v9100_v11  ;;  %v18592_v51 = vadd.f32 %v15258_v45, %v9096_v57  ;;  %v15602_v60 = vpop.f32.mrb[109].mxu0  ;;  %v15260_v5 = vpop.f32.mrb[110].mxu1 }
 0xd62   :  { %v18596_v44 = vadd.f32 %v15602_v60, %v9104_v4  ;;  %v18593_v33 = vadd.f32 %v15260_v5, %v9092_v48  ;;  %v15604_v29 = vpop.f32.mrb[110].mxu0  ;;  %v15262_v46 = vpop.f32.mrb[111].mxu1  ;;  %v15613_v62 = vmax.f32 %v18591_v15, 0.0 }
 0xd63   :  { %v18597_v52 = vadd.f32 %v15604_v29, %v9100_v11  ;;  %v18594_v14 = vadd.f32 %v15262_v46, %v9096_v57  ;;  %v15606_v19 = vpop.f32.mrb[111].mxu0  ;;  %v15615_v24 = vmax.f32 %v18595_v17, 0.0  ;;  %v15614_v63 = vmax.f32 %v18592_v51, 0.0 }
 0xd64   :  { %v15621_v13 = vmax.f32 %v18593_v33, 0.0  ;;  %v18598_v10 = vadd.f32 %v15606_v19, %v9104_v4  ;;  %v15616_v43 = vmax.f32 %v18596_v44, 0.0 }
 0xd65   :  { %v15623_v21 = vmax.f32 %v18597_v52, 0.0  ;;  %v15622_v35 = vmax.f32 %v18594_v14, 0.0 }
 0xd66   :  { %v15629_v61 = vpack.c.bf16 %v15621_v13, %v15613_v62  ;;  %v15624_v25 = vmax.f32 %v18598_v10, 0.0 }
 0xd67   :  { %v15631_v7 = vpack.c.bf16 %v15623_v21, %v15615_v24  ;;  %v15630_v42 = vpack.c.bf16 %v15622_v35, %v15614_v63 }
 0xd68   :  { %v15632_v30 = vpack.c.bf16 %v15624_v25, %v15616_v43 }
 0xd69   :  { %16266 = vmatprep.mubr.bf16.mxu1 %v15630_v42 }
 0xd6a   :  { %16307 = vmatprep.mubr.bf16.mxu0 %v15632_v30  ;;  %16267 = vmatmul.mubr.bf16.vlgmr.msra.gmra.mrb[116].mxu1 %v15629_v61 }
 0xd6b   :  { %16308 = vmatmul.mubr.bf16.vlgmr.msra.gmra.mrb[116].mxu0 %v15631_v7 }
 0xd7f   :  { %v18285_v28 = vpop.f32.mrb[112].mxu1 }
 0xd80   :  { %v18307_v31 = vpop.f32.mrb[112].mxu0  ;;  %v18286_v58 = vpop.f32.mrb[113].mxu1 }
 0xd81   :  { %v18287_v34 = vadd.f32 %v18286_v58, %v18285_v28  ;;  %v18308_v32 = vpop.f32.mrb[113].mxu0  ;;  %v18288_v3 = vpop.f32.mrb[114].mxu1 }
 0xd82   :  { %v18309_v9 = vadd.f32 %v18308_v32, %v18307_v31  ;;  %v18310_v37 = vpop.f32.mrb[114].mxu0  ;;  %v18289_v59 = vpop.f32.mrb[115].mxu1 }
 0xd83   :  { %v16187_v16 = vadd.f32 %v18287_v34, %v18124_v22  ;;  %v18290_v38 = vadd.f32 %v18289_v59, %v18288_v3  ;;  %v18311_v18 = vpop.f32.mrb[115].mxu0 }
 0xd84   :  { %v18312_v20 = vadd.f32 %v18311_v18, %v18310_v37 }
 0xd85   :  { %v16228_v0 = vadd.f32 %v18309_v9, %v16187_v16  ;;  %v16190_v47 = vadd.f32 %v18290_v38, %v18124_v22 }
 0xd87   :  { %v16231_v39 = vadd.f32 %v18312_v20, %v16190_v47 }
 0xe3d   :  { %v18329_v50 = vpop.f32.mrb[116].mxu1 }
 0xe3e   :  { %v18351_v55 = vpop.f32.mrb[116].mxu0  ;;  %v18330_v12 = vpop.f32.mrb[117].mxu1 }
 0xe3f   :  { %v18331_v1 = vadd.f32 %v18330_v12, %v18329_v50  ;;  %v18352_v2 = vpop.f32.mrb[117].mxu0  ;;  %v18332_v26 = vpop.f32.mrb[118].mxu1 }
 0xe40   :  { %v18353_v6 = vadd.f32 %v18352_v2, %v18351_v55  ;;  %v18354_v36 = vpop.f32.mrb[118].mxu0  ;;  %v18333_v8 = vpop.f32.mrb[119].mxu1 }
 0xe41   :  { %v16269_v41 = vadd.f32 %v18331_v1, %v16228_v0  ;;  %v18334_v53 = vadd.f32 %v18333_v8, %v18332_v26  ;;  %v18355_v54 = vpop.f32.mrb[119].mxu0 }
 0xe42   :  { %v18356_v56 = vadd.f32 %v18355_v54, %v18354_v36 }
 0xe43   :  { %v16310_v23 = vadd.f32 %v18353_v6, %v16269_v41  ;;  %v16272_v27 = vadd.f32 %v18334_v53, %v16231_v39 }
 0xe45   :  { %16316 = vst [vmem:[%s21252_s17] sm:$0xff] %v16310_v23  ;;  %v16313_v48 = vadd.f32 %v18356_v56, %v16272_v27 }
 0xe47   :  { %16317 = vst [vmem:[%s21252_s17 + $0x8] sm:$0xff] %v16313_v48 }
 0xe48   :  { %16322 = vsyncpa [#allocation3], 1 }
 0xe49   :  { %16323 = vsyncpa [#allocation5], 1 }
 0xe4a   :  { %16324 = vsyncpa [#allocation8], 1 }
 0xe4b   :  { %16325 = vsyncpa [#allocation11], 1 }
 0xe4c   :  { %16326 = vsyncpa [#allocation14], 1 }
 0xe4d   :  { %16327 = vsyncpa [#allocation17], 1 }
 0xe4e   :  { %16328 = vsyncpa [#allocation20], 1 }

</bundles_post_ra>
